<compile_context>
chip_gen: v7x
topology: tpu7x:2x2x1
jax: 0.10.0
libtpu: 0.0.40
codegen_flags: <defaults>
</compile_context>

<pallas_src>
import functools

import jax
import jax.numpy as jnp
from jax.experimental import pallas as pl
from jax.experimental.pallas import tpu as pltpu


# ----------------------------- helpers -------------------------------------

def _rup(x, m):
    return -(-x // m) * m


def _pick_tile(dim, cands):
    r = _rup(dim, 128)
    for t in cands:
        if t <= r and r % t == 0:
            return t
    return 128


def _row_align(m):
    r = _rup(m, 8)
    return r if r <= 256 else _rup(m, 256)


_VMEM = pl.BlockSpec(memory_space=pltpu.MemorySpace.VMEM)


# ------------------- fused (BN/ReLU) matmul kernel --------------------------

def _fmm_kernel(pre_bn_relu, post_mode, a_ref, b_ref, sa_ref, ba_ref,
                so_ref, bo_ref, o_ref, acc_ref):
    k = pl.program_id(2)

    @pl.when(k == 0)
    def _init():
        acc_ref[...] = jnp.zeros_like(acc_ref)

    a = a_ref[...]
    if pre_bn_relu:  # BN -> ReLU on the input (A) side, per K column
        a = jnp.maximum(a.astype(jnp.float32) * sa_ref[...] + ba_ref[...], 0.0)
    acc_ref[...] += jnp.dot(a.astype(jnp.bfloat16), b_ref[...],
                            preferred_element_type=jnp.float32)

    @pl.when(k == pl.num_programs(2) - 1)
    def _finalize():
        acc = acc_ref[...]
        if post_mode == "bn_relu":          # BN -> ReLU epilogue, per N column
            acc = jnp.maximum(acc * so_ref[...] + bo_ref[...], 0.0)
        elif post_mode == "bias_sigmoid":   # classifier: bias + sigmoid
            z = acc + bo_ref[...]
            acc = 1.0 / (1.0 + jnp.exp(-z))
        o_ref[...] = acc.astype(o_ref.dtype)


def fused_matmul(a, b, *, pre_scale=None, pre_bias=None,
                 post_scale=None, post_bias=None, post_mode="none",
                 k_valid=None, out_dtype=jnp.bfloat16):
    """out = post( pre(a[:, :K]) @ b ).

    a: (Ma, Ka), b: (K, N) with K = k_valid or Ka.  When k_valid is given, `a`
    may be wider than K (dense-block slab); only the first K columns are read
    by the K-grid.  Returns (Ma, N) in out_dtype.
    """
    Ma, Ka = a.shape
    K = Ka if k_valid is None else k_valid
    Kb, N = b.shape
    assert Kb == K

    tm = min(256, _rup(Ma, 8))
    tn = _pick_tile(N, (256, 128))
    tk = _pick_tile(K, (512, 256, 128))
    Mp, Np, Kp = _rup(Ma, tm), _rup(N, tn), _rup(K, tk)
    assert k_valid is None or Kp <= Ka

    a_bf = a.astype(jnp.bfloat16)
    pad_k_a = 0 if k_valid is not None else max(0, Kp - Ka)
    if Mp > Ma or pad_k_a:
        a_bf = jnp.pad(a_bf, ((0, Mp - Ma), (0, pad_k_a)))
    b_bf = b.astype(jnp.bfloat16)
    if Kp > Kb or Np > N:
        b_bf = jnp.pad(b_bf, ((0, Kp - Kb), (0, Np - N)))

    def _vec(v, n, npad):
        if v is None:
            return jnp.zeros((1, npad), jnp.float32)
        v = v.astype(jnp.float32).reshape(1, n)
        return jnp.pad(v, ((0, 0), (0, npad - n))) if npad > n else v

    sa, ba = _vec(pre_scale, K, Kp), _vec(pre_bias, K, Kp)
    so, bo = _vec(post_scale, N, Np), _vec(post_bias, N, Np)

    kernel = functools.partial(_fmm_kernel, pre_scale is not None, post_mode)
    out = pl.pallas_call(
        kernel,
        out_shape=jax.ShapeDtypeStruct((Mp, Np), out_dtype),
        grid_spec=pltpu.PrefetchScalarGridSpec(
            num_scalar_prefetch=0,
            grid=(Mp // tm, Np // tn, Kp // tk),
            in_specs=[
                pl.BlockSpec((tm, tk), lambda i, j, k: (i, k)),
                pl.BlockSpec((tk, tn), lambda i, j, k: (k, j)),
                pl.BlockSpec((1, tk), lambda i, j, k: (0, k)),
                pl.BlockSpec((1, tk), lambda i, j, k: (0, k)),
                pl.BlockSpec((1, tn), lambda i, j, k: (0, j)),
                pl.BlockSpec((1, tn), lambda i, j, k: (0, j)),
            ],
            out_specs=pl.BlockSpec((tm, tn), lambda i, j, k: (i, j)),
            scratch_shapes=[pltpu.VMEM((tm, tn), jnp.float32)],
        ),
        compiler_params=pltpu.CompilerParams(
            dimension_semantics=("parallel", "parallel", "arbitrary"),
            vmem_limit_bytes=32 * 1024 * 1024,
        ),
    )(a_bf, b_bf, sa, ba, so, bo)
    return out[:Ma, :N]


# ------------------------- pooling reductions -------------------------------

def _stack_reduce_kernel(op, x_ref, o_ref):
    x = x_ref[...]
    if op == "max":
        o_ref[...] = jnp.max(x, axis=0)
    else:
        s = jnp.sum(x.astype(jnp.float32), axis=0)
        o_ref[...] = (s * (1.0 / x.shape[0])).astype(o_ref.dtype)


def stack_reduce(stacked, op):
    S, M, C = stacked.shape
    tm = min(512, _rup(M, 8))
    Mp, Cp = _rup(M, tm), _rup(C, 128)
    if Mp > M or Cp > C:
        stacked = jnp.pad(stacked, ((0, 0), (0, Mp - M), (0, Cp - C)))
    out = pl.pallas_call(
        functools.partial(_stack_reduce_kernel, op),
        out_shape=jax.ShapeDtypeStruct((Mp, Cp), stacked.dtype),
        grid_spec=pltpu.PrefetchScalarGridSpec(
            num_scalar_prefetch=0,
            grid=(Mp // tm,),
            in_specs=[pl.BlockSpec((S, tm, Cp), lambda i: (0, i, 0))],
            out_specs=pl.BlockSpec((tm, Cp), lambda i: (i, 0)),
        ),
        compiler_params=pltpu.CompilerParams(dimension_semantics=("parallel",)),
    )(stacked)
    return out[:M, :C]


def _gap_bn_relu_kernel(x_ref, s_ref, b_ref, o_ref):
    x = x_ref[...].astype(jnp.float32)                 # (HW, Nb, C)
    y = jnp.maximum(x * s_ref[...] + b_ref[...], 0.0)  # fused norm5 + relu
    o_ref[...] = jnp.mean(y, axis=0)                   # adaptive_avg_pool2d((1,1))


def global_pool_bn_relu(x, scale, bias):
    N, H, W, C = x.shape
    Np, Cp = _rup(N, 8), _rup(C, 128)
    xt = jnp.transpose(x.reshape(N, H * W, C), (1, 0, 2))
    xt = jnp.pad(xt, ((0, 0), (0, Np - N), (0, Cp - C)))
    sp = jnp.pad(scale.astype(jnp.float32).reshape(1, 1, C),
                 ((0, 0), (0, 0), (0, Cp - C)))
    bp = jnp.pad(bias.astype(jnp.float32).reshape(1, 1, C),
                 ((0, 0), (0, 0), (0, Cp - C)))
    out = pl.pallas_call(
        _gap_bn_relu_kernel,
        out_shape=jax.ShapeDtypeStruct((Np, Cp), jnp.float32),
        in_specs=[_VMEM, _VMEM, _VMEM],
        out_specs=_VMEM,
    )(xt, sp, bp)
    return out[:N, :C]


def maxpool_3x3_s2_p1(x):
    N, H, W, C = x.shape
    Ho, Wo = (H + 2 - 3) // 2 + 1, (W + 2 - 3) // 2 + 1
    # TODO(synk): direct windowed pooling kernel would avoid the 9x tap stack.
    neg = jnp.finfo(x.dtype).min
    xp = jnp.pad(x, ((0, 0), (1, 1), (1, 1), (0, 0)), constant_values=neg)
    taps = [xp[:, i:i + 2 * Ho:2, j:j + 2 * Wo:2, :].reshape(N * Ho * Wo, C)
            for i in range(3) for j in range(3)]
    y = stack_reduce(jnp.stack(taps, axis=0), "max")
    return y.reshape(N, Ho, Wo, C)


def avgpool_2x2_s2(x):
    N, H, W, C = x.shape
    Ho, Wo = H // 2, W // 2  # matches nn.AvgPool2d(2,2) flooring
    taps = [x[:, i:2 * Ho:2, j:2 * Wo:2, :].reshape(N * Ho * Wo, C)
            for i in range(2) for j in range(2)]
    y = stack_reduce(jnp.stack(taps, axis=0), "mean")
    return y.reshape(N, Ho, Wo, C)


# ------------------------------ conv layers ---------------------------------

def conv_im2col(x, w, stride, padding, post_scale=None, post_bias=None,
                post_mode="none"):
    """General conv via im2col + fused matmul (used only for the 7x7 stem)."""
    N, H, W, Cin = x.shape
    kh, kw, _, Cout = w.shape
    Ho = (H + 2 * padding - kh) // stride + 1
    Wo = (W + 2 * padding - kw) // stride + 1
    xp = jnp.pad(x, ((0, 0), (padding, padding), (padding, padding), (0, 0)))
    taps = [xp[:, i:i + stride * (Ho - 1) + 1:stride,
               j:j + stride * (Wo - 1) + 1:stride, :]
            for i in range(kh) for j in range(kw)]
    a = jnp.concatenate(taps, axis=-1).reshape(N * Ho * Wo, kh * kw * Cin)
    y = fused_matmul(a, w.reshape(kh * kw * Cin, Cout),
                     post_scale=post_scale, post_bias=post_bias,
                     post_mode=post_mode)
    return y.reshape(N, Ho, Wo, Cout)


def conv3x3_p1(x, w):
    """3x3 stride-1 pad-1 conv: one MXU matmul over all 9 taps (Cin -> 9*Cout)
    followed by a spatial shift-add.  Avoids materializing the 9x im2col."""
    N, H, W, Cin = x.shape
    Cout = w.shape[-1]
    wf = jnp.transpose(w, (2, 0, 1, 3)).reshape(Cin, 9 * Cout)
    y = fused_matmul(x.reshape(N * H * W, Cin), wf)          # (N*H*W, 9*Cout)
    y = y.reshape(N, H, W, 3, 3, Cout)
    yp = jnp.pad(y, ((0, 0), (1, 1), (1, 1), (0, 0), (0, 0), (0, 0)))
    o = jnp.zeros((N, H, W, Cout), jnp.float32)
    for di in range(3):
        for dj in range(3):
            o = o + yp[:, di:di + H, dj:dj + W, di, dj, :].astype(jnp.float32)
    return o.astype(jnp.bfloat16)


def bn_fold(bn, eps=1e-5):
    # TODO(synk): eval-mode BatchNorm only (running statistics); training-mode
    # batch statistics of nn.BatchNorm2d are not implemented.
    scale = bn['gamma'] * jax.lax.rsqrt(bn['var'] + eps)
    return scale, bn['beta'] - bn['mean'] * scale


# --------------------------- DenseNet121 model ------------------------------

GROWTH = 32
BLOCK_CONFIG = (6, 12, 24, 16)
NUM_INIT_FEATURES = 64
BN_SIZE = 4


def init_params(key, out_size):
    counter = [0]

    def nxt():
        counter[0] += 1
        return jax.random.fold_in(key, counter[0])

    def conv_w(kh, kw, cin, cout):
        fan_in = kh * kw * cin
        return (jax.random.normal(nxt(), (kh, kw, cin, cout), jnp.float32)
                * jnp.sqrt(2.0 / fan_in))

    def bn_p(c):
        return {
            'gamma': 1.0 + 0.05 * jax.random.normal(nxt(), (c,), jnp.float32),
            'beta': 0.05 * jax.random.normal(nxt(), (c,), jnp.float32),
            'mean': 0.05 * jax.random.normal(nxt(), (c,), jnp.float32),
            'var': jnp.ones((c,), jnp.float32),
        }

    params = {
        'conv0': conv_w(7, 7, 3, NUM_INIT_FEATURES),
        'norm0': bn_p(NUM_INIT_FEATURES),
        'blocks': [],
        'transitions': [],
    }
    c = NUM_INIT_FEATURES
    for bi, nlayers in enumerate(BLOCK_CONFIG):
        block = []
        for li in range(nlayers):
            cin = c + li * GROWTH
            block.append({
                'norm1': bn_p(cin),
                'conv1': conv_w(1, 1, cin, BN_SIZE * GROWTH),
                'norm2': bn_p(BN_SIZE * GROWTH),
                'conv2': conv_w(3, 3, BN_SIZE * GROWTH, GROWTH),
            })
        params['blocks'].append(block)
        c = c + nlayers * GROWTH
        if bi != len(BLOCK_CONFIG) - 1:
            params['transitions'].append({
                'norm': bn_p(c),
                'conv': conv_w(1, 1, c, c // 2),
            })
            c = c // 2
    params['norm5'] = bn_p(c)  # c == 1024 == num_ftrs for DenseNet121
    params['classifier'] = {
        'w': jax.random.normal(nxt(), (c, out_size), jnp.float32) * jnp.sqrt(1.0 / c),
        'b': jnp.zeros((out_size,), jnp.float32),
    }
    return params


@jax.jit
def densenet121_forward(params, x_nchw):
    x = jnp.transpose(x_nchw, (0, 2, 3, 1)).astype(jnp.bfloat16)  # NCHW -> NHWC
    Nb = x_nchw.shape[0]

    # Stem: conv0 (7x7/2) with norm0+relu fused as the epilogue, then maxpool.
    s0, b0 = bn_fold(params['norm0'])
    x = conv_im2col(x, params['conv0'], stride=2, padding=3,
                    post_scale=s0, post_bias=b0, post_mode="bn_relu")
    x = maxpool_3x3_s2_p1(x)

    c = NUM_INIT_FEATURES
    slab = None
    M = H = W = 0
    for bi, nlayers in enumerate(BLOCK_CONFIG):
        _, H, W, _ = x.shape
        M = Nb * H * W
        Mp = _row_align(M)
        c_out = c + nlayers * GROWTH
        # Resident per-block feature slab: concat(features) kept in place; each
        # layer appends its 32 growth channels instead of re-concatenating.
        slab = jnp.zeros((Mp, c_out), jnp.bfloat16)
        slab = slab.at[:M, :c].set(x.reshape(M, c))
        for li in range(nlayers):
            lp = params['blocks'][bi][li]
            cin = c + li * GROWTH
            s1, b1 = bn_fold(lp['norm1'])
            s2, b2 = bn_fold(lp['norm2'])
            # 1x1 bottleneck: norm1+relu fused on the A side (only the first
            # `cin` slab channels are read), norm2+relu fused as the epilogue.
            bott = fused_matmul(slab, lp['conv1'].reshape(cin, BN_SIZE * GROWTH),
                                pre_scale=s1, pre_bias=b1,
                                post_scale=s2, post_bias=b2, post_mode="bn_relu",
                                k_valid=cin)
            h = bott[:M].reshape(Nb, H, W, BN_SIZE * GROWTH)
            new = conv3x3_p1(h, lp['conv2'])                      # (Nb,H,W,32)
            slab = slab.at[:M, cin:cin + GROWTH].set(new.reshape(M, GROWTH))
        c = c_out
        if bi != len(BLOCK_CONFIG) - 1:
            tp = params['transitions'][bi]
            st, bt = bn_fold(tp['norm'])
            # transition: norm+relu fused on A, 1x1 conv, then 2x2 avg pool.
            t = fused_matmul(slab, tp['conv'].reshape(c, c // 2),
                             pre_scale=st, pre_bias=bt, k_valid=c)
            x = avgpool_2x2_s2(t[:M].reshape(Nb, H, W, c // 2))
            c = c // 2

    # norm5 -> relu -> adaptive_avg_pool2d((1,1)) fused, then Linear + Sigmoid.
    s5, b5 = bn_fold(params['norm5'])
    pooled = global_pool_bn_relu(slab[:M].reshape(Nb, H, W, c), s5, b5)
    out = fused_matmul(pooled, params['classifier']['w'],
                       post_bias=params['classifier']['b'],
                       post_mode="bias_sigmoid", out_dtype=jnp.float32)
    return out


if __name__ == "__main__":
    key = jax.random.PRNGKey(0)
    out_size = 14  # CheXNet: 14 disease labels
    params = init_params(jax.random.fold_in(key, 1), out_size)
    # 32x32 is the smallest spatial size compatible with DenseNet121's five
    # spatial downsamplings (final feature map is 1x1).
    x = jax.random.normal(jax.random.fold_in(key, 2), (2, 3, 32, 32), jnp.float32)
    y = jax.block_until_ready(densenet121_forward(params, x))
    assert y.shape == (2, out_size), y.shape
    assert bool(jnp.all(jnp.isfinite(y)))
    assert bool(jnp.all((y >= 0.0) & (y <= 1.0)))  # sigmoid output range
    print("KERNEL_OK")
</pallas_src>

<mosaic_0001>
module attributes {stable_mosaic.version = 11 : i64} {
  func.func @_fmm_kernel(%arg0: i32, %arg1: i32, %arg2: i32, %arg3: memref<256x256xbf16, #tpu.memory_space<vmem>>, %arg4: memref<256x128xbf16, #tpu.memory_space<vmem>>, %arg5: memref<1x256xf32, #tpu.memory_space<vmem>>, %arg6: memref<1x256xf32, #tpu.memory_space<vmem>>, %arg7: memref<1x128xf32, #tpu.memory_space<vmem>>, %arg8: memref<1x128xf32, #tpu.memory_space<vmem>>, %arg9: memref<256x128xbf16, #tpu.memory_space<vmem>>, %arg10: memref<256x128xf32, #tpu.memory_space<vmem>>) attributes {dimension_semantics = [#tpu.dimension_semantics<parallel>, #tpu.dimension_semantics<parallel>, #tpu.dimension_semantics<arbitrary>], iteration_bounds = array<i64: 2, 1, 1>, scalar_prefetch = 0 : i64, scratch_operands = 1 : i64, tpu.core_type = #tpu.core_type<tc>, window_params = [{transform_indices = @transform_0, window_bounds = array<i64: 256, 256>}, {transform_indices = @transform_1, window_bounds = array<i64: 256, 128>}, {transform_indices = @transform_2, window_bounds = array<i64: 1, 256>}, {transform_indices = @transform_3, window_bounds = array<i64: 1, 256>}, {transform_indices = @transform_4, window_bounds = array<i64: 1, 128>}, {transform_indices = @transform_5, window_bounds = array<i64: 1, 128>}, {transform_indices = @transform_6, window_bounds = array<i64: 256, 128>}]} {
    %c0_i32 = arith.constant 0 : i32
    %0 = arith.cmpi eq, %arg2, %c0_i32 : i32
    %1 = arith.extui %0 : i1 to i32
    %c0_i32_0 = arith.constant 0 : i32
    %2 = arith.cmpi ne, %1, %c0_i32_0 : i32
    scf.if %2 {
      %cst_10 = arith.constant 0.000000e+00 : f32
      %12 = vector.broadcast %cst_10 : f32 to vector<256x128xf32>
      %c0_11 = arith.constant 0 : index
      %c0_12 = arith.constant 0 : index
      %13 = vector.load %arg10[%c0_11, %c0_12] : memref<256x128xf32, #tpu.memory_space<vmem>>, vector<256x128xf32>
      tpu.vector_store %arg10[%c0_11, %c0_12], %12 {strides = array<i32>} : memref<256x128xf32, #tpu.memory_space<vmem>>, vector<256x128xf32>,
    } else {
    }
    %c0 = arith.constant 0 : index
    %c0_1 = arith.constant 0 : index
    %3 = vector.load %arg3[%c0, %c0_1] : memref<256x256xbf16, #tpu.memory_space<vmem>>, vector<256x256xbf16>
    %c0_2 = arith.constant 0 : index
    %c0_3 = arith.constant 0 : index
    %4 = vector.load %arg10[%c0_2, %c0_3] : memref<256x128xf32, #tpu.memory_space<vmem>>, vector<256x128xf32>
    %c0_4 = arith.constant 0 : index
    %c0_5 = arith.constant 0 : index
    %5 = vector.load %arg4[%c0_4, %c0_5] : memref<256x128xbf16, #tpu.memory_space<vmem>>, vector<256x128xbf16>
    %cst = arith.constant dense<0.000000e+00> : vector<256x128xf32>
    %6 = tpu.matmul %3, %5, %cst {dimension_numbers = #tpu.dot_dimension_numbers<[1], [0], [0], [1], [0, 0, 1, 1], [], []>} : vector<256x256xbf16>, vector<256x128xbf16>, vector<256x128xf32> -> vector<256x128xf32>
    %7 = arith.addf %4, %6 : vector<256x128xf32>
    %c0_6 = arith.constant 0 : index
    %c0_7 = arith.constant 0 : index
    %8 = vector.load %arg10[%c0_6, %c0_7] : memref<256x128xf32, #tpu.memory_space<vmem>>, vector<256x128xf32>
    tpu.vector_store %arg10[%c0_6, %c0_7], %7 {strides = array<i32>} : memref<256x128xf32, #tpu.memory_space<vmem>>, vector<256x128xf32>,
    %c0_i32_8 = arith.constant 0 : i32
    %9 = arith.cmpi eq, %arg2, %c0_i32_8 : i32
    %10 = arith.extui %9 : i1 to i32
    %c0_i32_9 = arith.constant 0 : i32
    %11 = arith.cmpi ne, %10, %c0_i32_9 : i32
    scf.if %11 {
      %c0_10 = arith.constant 0 : index
      %c0_11 = arith.constant 0 : index
      %12 = vector.load %arg10[%c0_10, %c0_11] : memref<256x128xf32, #tpu.memory_space<vmem>>, vector<256x128xf32>
      %c0_12 = arith.constant 0 : index
      %c0_13 = arith.constant 0 : index
      %13 = vector.load %arg7[%c0_12, %c0_13] : memref<1x128xf32, #tpu.memory_space<vmem>>, vector<1x128xf32>
      %14 = vector.broadcast %13 : vector<1x128xf32> to vector<256x128xf32>
      %15 = arith.mulf %12, %14 : vector<256x128xf32>
      %c0_14 = arith.constant 0 : index
      %c0_15 = arith.constant 0 : index
      %16 = vector.load %arg8[%c0_14, %c0_15] : memref<1x128xf32, #tpu.memory_space<vmem>>, vector<1x128xf32>
      %17 = vector.broadcast %16 : vector<1x128xf32> to vector<256x128xf32>
      %18 = arith.addf %15, %17 : vector<256x128xf32>
      %cst_16 = arith.constant 0.000000e+00 : f32
      %19 = vector.broadcast %cst_16 : f32 to vector<256x128xf32>
      %20 = arith.maximumf %18, %19 : vector<256x128xf32>
      %21 = arith.truncf %20 : vector<256x128xf32> to vector<256x128xbf16>
      %c0_17 = arith.constant 0 : index
      %c0_18 = arith.constant 0 : index
      %22 = vector.load %arg9[%c0_17, %c0_18] : memref<256x128xbf16, #tpu.memory_space<vmem>>, vector<256x128xbf16>
      tpu.vector_store %arg9[%c0_17, %c0_18], %21 {strides = array<i32>} : memref<256x128xbf16, #tpu.memory_space<vmem>>, vector<256x128xbf16>,
    } else {
    }
    return
  }
  func.func @transform_0(%arg0: i32, %arg1: i32, %arg2: i32) -> (i32, i32) {
    %c0_i32 = arith.constant 0 : i32
    return %arg0, %arg2 : i32, i32
  }
  func.func @transform_1(%arg0: i32, %arg1: i32, %arg2: i32) -> (i32, i32) {
    %c0_i32 = arith.constant 0 : i32
    return %arg2, %arg1 : i32, i32
  }
  func.func @transform_2(%arg0: i32, %arg1: i32, %arg2: i32) -> (i32, i32) {
    %c0_i32 = arith.constant 0 : i32
    %c0_i32_0 = arith.constant 0 : i32
    return %c0_i32, %arg2 : i32, i32
  }
  func.func @transform_3(%arg0: i32, %arg1: i32, %arg2: i32) -> (i32, i32) {
    %c0_i32 = arith.constant 0 : i32
    %c0_i32_0 = arith.constant 0 : i32
    return %c0_i32, %arg2 : i32, i32
  }
  func.func @transform_4(%arg0: i32, %arg1: i32, %arg2: i32) -> (i32, i32) {
    %c0_i32 = arith.constant 0 : i32
    %c0_i32_0 = arith.constant 0 : i32
    return %c0_i32, %arg1 : i32, i32
  }
  func.func @transform_5(%arg0: i32, %arg1: i32, %arg2: i32) -> (i32, i32) {
    %c0_i32 = arith.constant 0 : i32
    %c0_i32_0 = arith.constant 0 : i32
    return %c0_i32, %arg1 : i32, i32
  }
  func.func @transform_6(%arg0: i32, %arg1: i32, %arg2: i32) -> (i32, i32) {
    %c0_i32 = arith.constant 0 : i32
    return %arg0, %arg1 : i32, i32
  }
}

module attributes {stable_mosaic.version = 11 : i64} {
  func.func @_stack_reduce_kernel(%arg0: i32, %arg1: memref<9x128x128xbf16, #tpu.memory_space<vmem>>, %arg2: memref<128x128xbf16, #tpu.memory_space<vmem>>) attributes {dimension_semantics = [#tpu.dimension_semantics<parallel>], iteration_bounds = array<i64: 1>, scalar_prefetch = 0 : i64, scratch_operands = 0 : i64, tpu.core_type = #tpu.core_type<tc>, window_params = [{transform_indices = @transform_0, window_bounds = array<i64: 9, 128, 128>}, {transform_indices = @transform_1, window_bounds = array<i64: 128, 128>}]} {
    %c0 = arith.constant 0 : index
    %c0_0 = arith.constant 0 : index
    %c0_1 = arith.constant 0 : index
    %0 = vector.load %arg1[%c0, %c0_0, %c0_1] : memref<9x128x128xbf16, #tpu.memory_space<vmem>>, vector<9x128x128xbf16>
    %cst = arith.constant dense<0xFF80> : vector<128x128xbf16>
    %1 = vector.multi_reduction <maximumf>, %0, %cst [0] : vector<9x128x128xbf16> to vector<128x128xbf16>
    %c0_2 = arith.constant 0 : index
    %c0_3 = arith.constant 0 : index
    %2 = vector.load %arg2[%c0_2, %c0_3] : memref<128x128xbf16, #tpu.memory_space<vmem>>, vector<128x128xbf16>
    tpu.vector_store %arg2[%c0_2, %c0_3], %1 {strides = array<i32>} : memref<128x128xbf16, #tpu.memory_space<vmem>>, vector<128x128xbf16>,
    return
  }
  func.func @transform_0(%arg0: i32) -> (i32, i32, i32) {
    %c0_i32 = arith.constant 0 : i32
    %c0_i32_0 = arith.constant 0 : i32
    %c0_i32_1 = arith.constant 0 : i32
    return %c0_i32, %arg0, %c0_i32_0 : i32, i32, i32
  }
  func.func @transform_1(%arg0: i32) -> (i32, i32) {
    %c0_i32 = arith.constant 0 : i32
    %c0_i32_0 = arith.constant 0 : i32
    return %arg0, %c0_i32 : i32, i32
  }
}

module attributes {stable_mosaic.version = 11 : i64} {
  func.func @_fmm_kernel(%arg0: i32, %arg1: i32, %arg2: i32, %arg3: memref<128x128xbf16, #tpu.memory_space<vmem>>, %arg4: memref<128x128xbf16, #tpu.memory_space<vmem>>, %arg5: memref<1x128xf32, #tpu.memory_space<vmem>>, %arg6: memref<1x128xf32, #tpu.memory_space<vmem>>, %arg7: memref<1x128xf32, #tpu.memory_space<vmem>>, %arg8: memref<1x128xf32, #tpu.memory_space<vmem>>, %arg9: memref<128x128xbf16, #tpu.memory_space<vmem>>, %arg10: memref<128x128xf32, #tpu.memory_space<vmem>>) attributes {dimension_semantics = [#tpu.dimension_semantics<parallel>, #tpu.dimension_semantics<parallel>, #tpu.dimension_semantics<arbitrary>], iteration_bounds = array<i64: 1, 1, 1>, scalar_prefetch = 0 : i64, scratch_operands = 1 : i64, tpu.core_type = #tpu.core_type<tc>, window_params = [{transform_indices = @transform_0, window_bounds = array<i64: 128, 128>}, {transform_indices = @transform_1, window_bounds = array<i64: 128, 128>}, {transform_indices = @transform_2, window_bounds = array<i64: 1, 128>}, {transform_indices = @transform_3, window_bounds = array<i64: 1, 128>}, {transform_indices = @transform_4, window_bounds = array<i64: 1, 128>}, {transform_indices = @transform_5, window_bounds = array<i64: 1, 128>}, {transform_indices = @transform_6, window_bounds = array<i64: 128, 128>}]} {
    %c0_i32 = arith.constant 0 : i32
    %0 = arith.cmpi eq, %arg2, %c0_i32 : i32
    %1 = arith.extui %0 : i1 to i32
    %c0_i32_0 = arith.constant 0 : i32
    %2 = arith.cmpi ne, %1, %c0_i32_0 : i32
    scf.if %2 {
      %cst_15 = arith.constant 0.000000e+00 : f32
      %22 = vector.broadcast %cst_15 : f32 to vector<128x128xf32>
      %c0_16 = arith.constant 0 : index
      %c0_17 = arith.constant 0 : index
      %23 = vector.load %arg10[%c0_16, %c0_17] : memref<128x128xf32, #tpu.memory_space<vmem>>, vector<128x128xf32>
      tpu.vector_store %arg10[%c0_16, %c0_17], %22 {strides = array<i32>} : memref<128x128xf32, #tpu.memory_space<vmem>>, vector<128x128xf32>,
    } else {
    }
    %c0 = arith.constant 0 : index
    %c0_1 = arith.constant 0 : index
    %3 = vector.load %arg3[%c0, %c0_1] : memref<128x128xbf16, #tpu.memory_space<vmem>>, vector<128x128xbf16>
    %4 = arith.extf %3 : vector<128x128xbf16> to vector<128x128xf32>
    %c0_2 = arith.constant 0 : index
    %c0_3 = arith.constant 0 : index
    %5 = vector.load %arg5[%c0_2, %c0_3] : memref<1x128xf32, #tpu.memory_space<vmem>>, vector<1x128xf32>
    %6 = vector.broadcast %5 : vector<1x128xf32> to vector<128x128xf32>
    %7 = arith.mulf %4, %6 : vector<128x128xf32>
    %c0_4 = arith.constant 0 : index
    %c0_5 = arith.constant 0 : index
    %8 = vector.load %arg6[%c0_4, %c0_5] : memref<1x128xf32, #tpu.memory_space<vmem>>, vector<1x128xf32>
    %9 = vector.broadcast %8 : vector<1x128xf32> to vector<128x128xf32>
    %10 = arith.addf %7, %9 : vector<128x128xf32>
    %cst = arith.constant 0.000000e+00 : f32
    %11 = vector.broadcast %cst : f32 to vector<128x128xf32>
    %12 = arith.maximumf %10, %11 : vector<128x128xf32>
    %c0_6 = arith.constant 0 : index
    %c0_7 = arith.constant 0 : index
    %13 = vector.load %arg10[%c0_6, %c0_7] : memref<128x128xf32, #tpu.memory_space<vmem>>, vector<128x128xf32>
    %14 = arith.truncf %12 : vector<128x128xf32> to vector<128x128xbf16>
    %c0_8 = arith.constant 0 : index
    %c0_9 = arith.constant 0 : index
    %15 = vector.load %arg4[%c0_8, %c0_9] : memref<128x128xbf16, #tpu.memory_space<vmem>>, vector<128x128xbf16>
    %cst_10 = arith.constant dense<0.000000e+00> : vector<128x128xf32>
    %16 = tpu.matmul %14, %15, %cst_10 {dimension_numbers = #tpu.dot_dimension_numbers<[1], [0], [0], [1], [0, 0, 1, 1], [], []>} : vector<128x128xbf16>, vector<128x128xbf16>, vector<128x128xf32> -> vector<128x128xf32>
    %17 = arith.addf %13, %16 : vector<128x128xf32>
    %c0_11 = arith.constant 0 : index
    %c0_12 = arith.constant 0 : index
    %18 = vector.load %arg10[%c0_11, %c0_12] : memref<128x128xf32, #tpu.memory_space<vmem>>, vector<128x128xf32>
    tpu.vector_store %arg10[%c0_11, %c0_12], %17 {strides = array<i32>} : memref<128x128xf32, #tpu.memory_space<vmem>>, vector<128x128xf32>,
    %c0_i32_13 = arith.constant 0 : i32
    %19 = arith.cmpi eq, %arg2, %c0_i32_13 : i32
    %20 = arith.extui %19 : i1 to i32
    %c0_i32_14 = arith.constant 0 : i32
    %21 = arith.cmpi ne, %20, %c0_i32_14 : i32
    scf.if %21 {
      %c0_15 = arith.constant 0 : index
      %c0_16 = arith.constant 0 : index
      %22 = vector.load %arg10[%c0_15, %c0_16] : memref<128x128xf32, #tpu.memory_space<vmem>>, vector<128x128xf32>
      %c0_17 = arith.constant 0 : index
      %c0_18 = arith.constant 0 : index
      %23 = vector.load %arg7[%c0_17, %c0_18] : memref<1x128xf32, #tpu.memory_space<vmem>>, vector<1x128xf32>
      %24 = vector.broadcast %23 : vector<1x128xf32> to vector<128x128xf32>
      %25 = arith.mulf %22, %24 : vector<128x128xf32>
      %c0_19 = arith.constant 0 : index
      %c0_20 = arith.constant 0 : index
      %26 = vector.load %arg8[%c0_19, %c0_20] : memref<1x128xf32, #tpu.memory_space<vmem>>, vector<1x128xf32>
      %27 = vector.broadcast %26 : vector<1x128xf32> to vector<128x128xf32>
      %28 = arith.addf %25, %27 : vector<128x128xf32>
      %cst_21 = arith.constant 0.000000e+00 : f32
      %29 = vector.broadcast %cst_21 : f32 to vector<128x128xf32>
      %30 = arith.maximumf %28, %29 : vector<128x128xf32>
      %31 = arith.truncf %30 : vector<128x128xf32> to vector<128x128xbf16>
      %c0_22 = arith.constant 0 : index
      %c0_23 = arith.constant 0 : index
      %32 = vector.load %arg9[%c0_22, %c0_23] : memref<128x128xbf16, #tpu.memory_space<vmem>>, vector<128x128xbf16>
      tpu.vector_store %arg9[%c0_22, %c0_23], %31 {strides = array<i32>} : memref<128x128xbf16, #tpu.memory_space<vmem>>, vector<128x128xbf16>,
    } else {
    }
    return
  }
  func.func @transform_0(%arg0: i32, %arg1: i32, %arg2: i32) -> (i32, i32) {
    %c0_i32 = arith.constant 0 : i32
    return %arg0, %arg2 : i32, i32
  }
  func.func @transform_1(%arg0: i32, %arg1: i32, %arg2: i32) -> (i32, i32) {
    %c0_i32 = arith.constant 0 : i32
    return %arg2, %arg1 : i32, i32
  }
  func.func @transform_2(%arg0: i32, %arg1: i32, %arg2: i32) -> (i32, i32) {
    %c0_i32 = arith.constant 0 : i32
    %c0_i32_0 = arith.constant 0 : i32
    return %c0_i32, %arg2 : i32, i32
  }
  func.func @transform_3(%arg0: i32, %arg1: i32, %arg2: i32) -> (i32, i32) {
    %c0_i32 = arith.constant 0 : i32
    %c0_i32_0 = arith.constant 0 : i32
    return %c0_i32, %arg2 : i32, i32
  }
  func.func @transform_4(%arg0: i32, %arg1: i32, %arg2: i32) -> (i32, i32) {
    %c0_i32 = arith.constant 0 : i32
    %c0_i32_0 = arith.constant 0 : i32
    return %c0_i32, %arg1 : i32, i32
  }
  func.func @transform_5(%arg0: i32, %arg1: i32, %arg2: i32) -> (i32, i32) {
    %c0_i32 = arith.constant 0 : i32
    %c0_i32_0 = arith.constant 0 : i32
    return %c0_i32, %arg1 : i32, i32
  }
  func.func @transform_6(%arg0: i32, %arg1: i32, %arg2: i32) -> (i32, i32) {
    %c0_i32 = arith.constant 0 : i32
    return %arg0, %arg1 : i32, i32
  }
}

module attributes {stable_mosaic.version = 11 : i64} {
  func.func @_fmm_kernel(%arg0: i32, %arg1: i32, %arg2: i32, %arg3: memref<128x128xbf16, #tpu.memory_space<vmem>>, %arg4: memref<128x128xbf16, #tpu.memory_space<vmem>>, %arg5: memref<1x128xf32, #tpu.memory_space<vmem>>, %arg6: memref<1x128xf32, #tpu.memory_space<vmem>>, %arg7: memref<1x128xf32, #tpu.memory_space<vmem>>, %arg8: memref<1x128xf32, #tpu.memory_space<vmem>>, %arg9: memref<128x128xbf16, #tpu.memory_space<vmem>>, %arg10: memref<128x128xf32, #tpu.memory_space<vmem>>) attributes {dimension_semantics = [#tpu.dimension_semantics<parallel>, #tpu.dimension_semantics<parallel>, #tpu.dimension_semantics<arbitrary>], iteration_bounds = array<i64: 1, 3, 1>, scalar_prefetch = 0 : i64, scratch_operands = 1 : i64, tpu.core_type = #tpu.core_type<tc>, window_params = [{transform_indices = @transform_0, window_bounds = array<i64: 128, 128>}, {transform_indices = @transform_1, window_bounds = array<i64: 128, 128>}, {transform_indices = @transform_2, window_bounds = array<i64: 1, 128>}, {transform_indices = @transform_3, window_bounds = array<i64: 1, 128>}, {transform_indices = @transform_4, window_bounds = array<i64: 1, 128>}, {transform_indices = @transform_5, window_bounds = array<i64: 1, 128>}, {transform_indices = @transform_6, window_bounds = array<i64: 128, 128>}]} {
    %c0_i32 = arith.constant 0 : i32
    %0 = arith.cmpi eq, %arg2, %c0_i32 : i32
    %1 = arith.extui %0 : i1 to i32
    %c0_i32_0 = arith.constant 0 : i32
    %2 = arith.cmpi ne, %1, %c0_i32_0 : i32
    scf.if %2 {
      %cst_10 = arith.constant 0.000000e+00 : f32
      %12 = vector.broadcast %cst_10 : f32 to vector<128x128xf32>
      %c0_11 = arith.constant 0 : index
      %c0_12 = arith.constant 0 : index
      %13 = vector.load %arg10[%c0_11, %c0_12] : memref<128x128xf32, #tpu.memory_space<vmem>>, vector<128x128xf32>
      tpu.vector_store %arg10[%c0_11, %c0_12], %12 {strides = array<i32>} : memref<128x128xf32, #tpu.memory_space<vmem>>, vector<128x128xf32>,
    } else {
    }
    %c0 = arith.constant 0 : index
    %c0_1 = arith.constant 0 : index
    %3 = vector.load %arg3[%c0, %c0_1] : memref<128x128xbf16, #tpu.memory_space<vmem>>, vector<128x128xbf16>
    %c0_2 = arith.constant 0 : index
    %c0_3 = arith.constant 0 : index
    %4 = vector.load %arg10[%c0_2, %c0_3] : memref<128x128xf32, #tpu.memory_space<vmem>>, vector<128x128xf32>
    %c0_4 = arith.constant 0 : index
    %c0_5 = arith.constant 0 : index
    %5 = vector.load %arg4[%c0_4, %c0_5] : memref<128x128xbf16, #tpu.memory_space<vmem>>, vector<128x128xbf16>
    %cst = arith.constant dense<0.000000e+00> : vector<128x128xf32>
    %6 = tpu.matmul %3, %5, %cst {dimension_numbers = #tpu.dot_dimension_numbers<[1], [0], [0], [1], [0, 0, 1, 1], [], []>} : vector<128x128xbf16>, vector<128x128xbf16>, vector<128x128xf32> -> vector<128x128xf32>
    %7 = arith.addf %4, %6 : vector<128x128xf32>
    %c0_6 = arith.constant 0 : index
    %c0_7 = arith.constant 0 : index
    %8 = vector.load %arg10[%c0_6, %c0_7] : memref<128x128xf32, #tpu.memory_space<vmem>>, vector<128x128xf32>
    tpu.vector_store %arg10[%c0_6, %c0_7], %7 {strides = array<i32>} : memref<128x128xf32, #tpu.memory_space<vmem>>, vector<128x128xf32>,
    %c0_i32_8 = arith.constant 0 : i32
    %9 = arith.cmpi eq, %arg2, %c0_i32_8 : i32
    %10 = arith.extui %9 : i1 to i32
    %c0_i32_9 = arith.constant 0 : i32
    %11 = arith.cmpi ne, %10, %c0_i32_9 : i32
    scf.if %11 {
      %c0_10 = arith.constant 0 : index
      %c0_11 = arith.constant 0 : index
      %12 = vector.load %arg10[%c0_10, %c0_11] : memref<128x128xf32, #tpu.memory_space<vmem>>, vector<128x128xf32>
      %13 = arith.truncf %12 : vector<128x128xf32> to vector<128x128xbf16>
      %c0_12 = arith.constant 0 : index
      %c0_13 = arith.constant 0 : index
      %14 = vector.load %arg9[%c0_12, %c0_13] : memref<128x128xbf16, #tpu.memory_space<vmem>>, vector<128x128xbf16>
      tpu.vector_store %arg9[%c0_12, %c0_13], %13 {strides = array<i32>} : memref<128x128xbf16, #tpu.memory_space<vmem>>, vector<128x128xbf16>,
    } else {
    }
    return
  }
  func.func @transform_0(%arg0: i32, %arg1: i32, %arg2: i32) -> (i32, i32) {
    %c0_i32 = arith.constant 0 : i32
    return %arg0, %arg2 : i32, i32
  }
  func.func @transform_1(%arg0: i32, %arg1: i32, %arg2: i32) -> (i32, i32) {
    %c0_i32 = arith.constant 0 : i32
    return %arg2, %arg1 : i32, i32
  }
  func.func @transform_2(%arg0: i32, %arg1: i32, %arg2: i32) -> (i32, i32) {
    %c0_i32 = arith.constant 0 : i32
    %c0_i32_0 = arith.constant 0 : i32
    return %c0_i32, %arg2 : i32, i32
  }
  func.func @transform_3(%arg0: i32, %arg1: i32, %arg2: i32) -> (i32, i32) {
    %c0_i32 = arith.constant 0 : i32
    %c0_i32_0 = arith.constant 0 : i32
    return %c0_i32, %arg2 : i32, i32
  }
  func.func @transform_4(%arg0: i32, %arg1: i32, %arg2: i32) -> (i32, i32) {
    %c0_i32 = arith.constant 0 : i32
    %c0_i32_0 = arith.constant 0 : i32
    return %c0_i32, %arg1 : i32, i32
  }
  func.func @transform_5(%arg0: i32, %arg1: i32, %arg2: i32) -> (i32, i32) {
    %c0_i32 = arith.constant 0 : i32
    %c0_i32_0 = arith.constant 0 : i32
    return %c0_i32, %arg1 : i32, i32
  }
  func.func @transform_6(%arg0: i32, %arg1: i32, %arg2: i32) -> (i32, i32) {
    %c0_i32 = arith.constant 0 : i32
    return %arg0, %arg1 : i32, i32
  }
}

module attributes {stable_mosaic.version = 11 : i64} {
  func.func @_fmm_kernel(%arg0: i32, %arg1: i32, %arg2: i32, %arg3: memref<128x256xbf16, #tpu.memory_space<vmem>>, %arg4: memref<256x128xbf16, #tpu.memory_space<vmem>>, %arg5: memref<1x256xf32, #tpu.memory_space<vmem>>, %arg6: memref<1x256xf32, #tpu.memory_space<vmem>>, %arg7: memref<1x128xf32, #tpu.memory_space<vmem>>, %arg8: memref<1x128xf32, #tpu.memory_space<vmem>>, %arg9: memref<128x128xbf16, #tpu.memory_space<vmem>>, %arg10: memref<128x128xf32, #tpu.memory_space<vmem>>) attributes {dimension_semantics = [#tpu.dimension_semantics<parallel>, #tpu.dimension_semantics<parallel>, #tpu.dimension_semantics<arbitrary>], iteration_bounds = array<i64: 1, 1, 1>, scalar_prefetch = 0 : i64, scratch_operands = 1 : i64, tpu.core_type = #tpu.core_type<tc>, window_params = [{transform_indices = @transform_0, window_bounds = array<i64: 128, 256>}, {transform_indices = @transform_1, window_bounds = array<i64: 256, 128>}, {transform_indices = @transform_2, window_bounds = array<i64: 1, 256>}, {transform_indices = @transform_3, window_bounds = array<i64: 1, 256>}, {transform_indices = @transform_4, window_bounds = array<i64: 1, 128>}, {transform_indices = @transform_5, window_bounds = array<i64: 1, 128>}, {transform_indices = @transform_6, window_bounds = array<i64: 128, 128>}]} {
    %c0_i32 = arith.constant 0 : i32
    %0 = arith.cmpi eq, %arg2, %c0_i32 : i32
    %1 = arith.extui %0 : i1 to i32
    %c0_i32_0 = arith.constant 0 : i32
    %2 = arith.cmpi ne, %1, %c0_i32_0 : i32
    scf.if %2 {
      %cst_15 = arith.constant 0.000000e+00 : f32
      %22 = vector.broadcast %cst_15 : f32 to vector<128x128xf32>
      %c0_16 = arith.constant 0 : index
      %c0_17 = arith.constant 0 : index
      %23 = vector.load %arg10[%c0_16, %c0_17] : memref<128x128xf32, #tpu.memory_space<vmem>>, vector<128x128xf32>
      tpu.vector_store %arg10[%c0_16, %c0_17], %22 {strides = array<i32>} : memref<128x128xf32, #tpu.memory_space<vmem>>, vector<128x128xf32>,
    } else {
    }
    %c0 = arith.constant 0 : index
    %c0_1 = arith.constant 0 : index
    %3 = vector.load %arg3[%c0, %c0_1] : memref<128x256xbf16, #tpu.memory_space<vmem>>, vector<128x256xbf16>
    %4 = arith.extf %3 : vector<128x256xbf16> to vector<128x256xf32>
    %c0_2 = arith.constant 0 : index
    %c0_3 = arith.constant 0 : index
    %5 = vector.load %arg5[%c0_2, %c0_3] : memref<1x256xf32, #tpu.memory_space<vmem>>, vector<1x256xf32>
    %6 = vector.broadcast %5 : vector<1x256xf32> to vector<128x256xf32>
    %7 = arith.mulf %4, %6 : vector<128x256xf32>
    %c0_4 = arith.constant 0 : index
    %c0_5 = arith.constant 0 : index
    %8 = vector.load %arg6[%c0_4, %c0_5] : memref<1x256xf32, #tpu.memory_space<vmem>>, vector<1x256xf32>
    %9 = vector.broadcast %8 : vector<1x256xf32> to vector<128x256xf32>
    %10 = arith.addf %7, %9 : vector<128x256xf32>
    %cst = arith.constant 0.000000e+00 : f32
    %11 = vector.broadcast %cst : f32 to vector<128x256xf32>
    %12 = arith.maximumf %10, %11 : vector<128x256xf32>
    %c0_6 = arith.constant 0 : index
    %c0_7 = arith.constant 0 : index
    %13 = vector.load %arg10[%c0_6, %c0_7] : memref<128x128xf32, #tpu.memory_space<vmem>>, vector<128x128xf32>
    %14 = arith.truncf %12 : vector<128x256xf32> to vector<128x256xbf16>
    %c0_8 = arith.constant 0 : index
    %c0_9 = arith.constant 0 : index
    %15 = vector.load %arg4[%c0_8, %c0_9] : memref<256x128xbf16, #tpu.memory_space<vmem>>, vector<256x128xbf16>
    %cst_10 = arith.constant dense<0.000000e+00> : vector<128x128xf32>
    %16 = tpu.matmul %14, %15, %cst_10 {dimension_numbers = #tpu.dot_dimension_numbers<[1], [0], [0], [1], [0, 0, 1, 1], [], []>} : vector<128x256xbf16>, vector<256x128xbf16>, vector<128x128xf32> -> vector<128x128xf32>
    %17 = arith.addf %13, %16 : vector<128x128xf32>
    %c0_11 = arith.constant 0 : index
    %c0_12 = arith.constant 0 : index
    %18 = vector.load %arg10[%c0_11, %c0_12] : memref<128x128xf32, #tpu.memory_space<vmem>>, vector<128x128xf32>
    tpu.vector_store %arg10[%c0_11, %c0_12], %17 {strides = array<i32>} : memref<128x128xf32, #tpu.memory_space<vmem>>, vector<128x128xf32>,
    %c0_i32_13 = arith.constant 0 : i32
    %19 = arith.cmpi eq, %arg2, %c0_i32_13 : i32
    %20 = arith.extui %19 : i1 to i32
    %c0_i32_14 = arith.constant 0 : i32
    %21 = arith.cmpi ne, %20, %c0_i32_14 : i32
    scf.if %21 {
      %c0_15 = arith.constant 0 : index
      %c0_16 = arith.constant 0 : index
      %22 = vector.load %arg10[%c0_15, %c0_16] : memref<128x128xf32, #tpu.memory_space<vmem>>, vector<128x128xf32>
      %c0_17 = arith.constant 0 : index
      %c0_18 = arith.constant 0 : index
      %23 = vector.load %arg7[%c0_17, %c0_18] : memref<1x128xf32, #tpu.memory_space<vmem>>, vector<1x128xf32>
      %24 = vector.broadcast %23 : vector<1x128xf32> to vector<128x128xf32>
      %25 = arith.mulf %22, %24 : vector<128x128xf32>
      %c0_19 = arith.constant 0 : index
      %c0_20 = arith.constant 0 : index
      %26 = vector.load %arg8[%c0_19, %c0_20] : memref<1x128xf32, #tpu.memory_space<vmem>>, vector<1x128xf32>
      %27 = vector.broadcast %26 : vector<1x128xf32> to vector<128x128xf32>
      %28 = arith.addf %25, %27 : vector<128x128xf32>
      %cst_21 = arith.constant 0.000000e+00 : f32
      %29 = vector.broadcast %cst_21 : f32 to vector<128x128xf32>
      %30 = arith.maximumf %28, %29 : vector<128x128xf32>
      %31 = arith.truncf %30 : vector<128x128xf32> to vector<128x128xbf16>
      %c0_22 = arith.constant 0 : index
      %c0_23 = arith.constant 0 : index
      %32 = vector.load %arg9[%c0_22, %c0_23] : memref<128x128xbf16, #tpu.memory_space<vmem>>, vector<128x128xbf16>
      tpu.vector_store %arg9[%c0_22, %c0_23], %31 {strides = array<i32>} : memref<128x128xbf16, #tpu.memory_space<vmem>>, vector<128x128xbf16>,
    } else {
    }
    return
  }
  func.func @transform_0(%arg0: i32, %arg1: i32, %arg2: i32) -> (i32, i32) {
    %c0_i32 = arith.constant 0 : i32
    return %arg0, %arg2 : i32, i32
  }
  func.func @transform_1(%arg0: i32, %arg1: i32, %arg2: i32) -> (i32, i32) {
    %c0_i32 = arith.constant 0 : i32
    return %arg2, %arg1 : i32, i32
  }
  func.func @transform_2(%arg0: i32, %arg1: i32, %arg2: i32) -> (i32, i32) {
    %c0_i32 = arith.constant 0 : i32
    %c0_i32_0 = arith.constant 0 : i32
    return %c0_i32, %arg2 : i32, i32
  }
  func.func @transform_3(%arg0: i32, %arg1: i32, %arg2: i32) -> (i32, i32) {
    %c0_i32 = arith.constant 0 : i32
    %c0_i32_0 = arith.constant 0 : i32
    return %c0_i32, %arg2 : i32, i32
  }
  func.func @transform_4(%arg0: i32, %arg1: i32, %arg2: i32) -> (i32, i32) {
    %c0_i32 = arith.constant 0 : i32
    %c0_i32_0 = arith.constant 0 : i32
    return %c0_i32, %arg1 : i32, i32
  }
  func.func @transform_5(%arg0: i32, %arg1: i32, %arg2: i32) -> (i32, i32) {
    %c0_i32 = arith.constant 0 : i32
    %c0_i32_0 = arith.constant 0 : i32
    return %c0_i32, %arg1 : i32, i32
  }
  func.func @transform_6(%arg0: i32, %arg1: i32, %arg2: i32) -> (i32, i32) {
    %c0_i32 = arith.constant 0 : i32
    return %arg0, %arg1 : i32, i32
  }
}

module attributes {stable_mosaic.version = 11 : i64} {
  func.func @_fmm_kernel(%arg0: i32, %arg1: i32, %arg2: i32, %arg3: memref<128x256xbf16, #tpu.memory_space<vmem>>, %arg4: memref<256x128xbf16, #tpu.memory_space<vmem>>, %arg5: memref<1x256xf32, #tpu.memory_space<vmem>>, %arg6: memref<1x256xf32, #tpu.memory_space<vmem>>, %arg7: memref<1x128xf32, #tpu.memory_space<vmem>>, %arg8: memref<1x128xf32, #tpu.memory_space<vmem>>, %arg9: memref<128x128xbf16, #tpu.memory_space<vmem>>, %arg10: memref<128x128xf32, #tpu.memory_space<vmem>>) attributes {dimension_semantics = [#tpu.dimension_semantics<parallel>, #tpu.dimension_semantics<parallel>, #tpu.dimension_semantics<arbitrary>], iteration_bounds = array<i64: 1, 1, 1>, scalar_prefetch = 0 : i64, scratch_operands = 1 : i64, tpu.core_type = #tpu.core_type<tc>, window_params = [{transform_indices = @transform_0, window_bounds = array<i64: 128, 256>}, {transform_indices = @transform_1, window_bounds = array<i64: 256, 128>}, {transform_indices = @transform_2, window_bounds = array<i64: 1, 256>}, {transform_indices = @transform_3, window_bounds = array<i64: 1, 256>}, {transform_indices = @transform_4, window_bounds = array<i64: 1, 128>}, {transform_indices = @transform_5, window_bounds = array<i64: 1, 128>}, {transform_indices = @transform_6, window_bounds = array<i64: 128, 128>}]} {
    %c0_i32 = arith.constant 0 : i32
    %0 = arith.cmpi eq, %arg2, %c0_i32 : i32
    %1 = arith.extui %0 : i1 to i32
    %c0_i32_0 = arith.constant 0 : i32
    %2 = arith.cmpi ne, %1, %c0_i32_0 : i32
    scf.if %2 {
      %cst_15 = arith.constant 0.000000e+00 : f32
      %22 = vector.broadcast %cst_15 : f32 to vector<128x128xf32>
      %c0_16 = arith.constant 0 : index
      %c0_17 = arith.constant 0 : index
      %23 = vector.load %arg10[%c0_16, %c0_17] : memref<128x128xf32, #tpu.memory_space<vmem>>, vector<128x128xf32>
      tpu.vector_store %arg10[%c0_16, %c0_17], %22 {strides = array<i32>} : memref<128x128xf32, #tpu.memory_space<vmem>>, vector<128x128xf32>,
    } else {
    }
    %c0 = arith.constant 0 : index
    %c0_1 = arith.constant 0 : index
    %3 = vector.load %arg3[%c0, %c0_1] : memref<128x256xbf16, #tpu.memory_space<vmem>>, vector<128x256xbf16>
    %4 = arith.extf %3 : vector<128x256xbf16> to vector<128x256xf32>
    %c0_2 = arith.constant 0 : index
    %c0_3 = arith.constant 0 : index
    %5 = vector.load %arg5[%c0_2, %c0_3] : memref<1x256xf32, #tpu.memory_space<vmem>>, vector<1x256xf32>
    %6 = vector.broadcast %5 : vector<1x256xf32> to vector<128x256xf32>
    %7 = arith.mulf %4, %6 : vector<128x256xf32>
    %c0_4 = arith.constant 0 : index
    %c0_5 = arith.constant 0 : index
    %8 = vector.load %arg6[%c0_4, %c0_5] : memref<1x256xf32, #tpu.memory_space<vmem>>, vector<1x256xf32>
    %9 = vector.broadcast %8 : vector<1x256xf32> to vector<128x256xf32>
    %10 = arith.addf %7, %9 : vector<128x256xf32>
    %cst = arith.constant 0.000000e+00 : f32
    %11 = vector.broadcast %cst : f32 to vector<128x256xf32>
    %12 = arith.maximumf %10, %11 : vector<128x256xf32>
    %c0_6 = arith.constant 0 : index
    %c0_7 = arith.constant 0 : index
    %13 = vector.load %arg10[%c0_6, %c0_7] : memref<128x128xf32, #tpu.memory_space<vmem>>, vector<128x128xf32>
    %14 = arith.truncf %12 : vector<128x256xf32> to vector<128x256xbf16>
    %c0_8 = arith.constant 0 : index
    %c0_9 = arith.constant 0 : index
    %15 = vector.load %arg4[%c0_8, %c0_9] : memref<256x128xbf16, #tpu.memory_space<vmem>>, vector<256x128xbf16>
    %cst_10 = arith.constant dense<0.000000e+00> : vector<128x128xf32>
    %16 = tpu.matmul %14, %15, %cst_10 {dimension_numbers = #tpu.dot_dimension_numbers<[1], [0], [0], [1], [0, 0, 1, 1], [], []>} : vector<128x256xbf16>, vector<256x128xbf16>, vector<128x128xf32> -> vector<128x128xf32>
    %17 = arith.addf %13, %16 : vector<128x128xf32>
    %c0_11 = arith.constant 0 : index
    %c0_12 = arith.constant 0 : index
    %18 = vector.load %arg10[%c0_11, %c0_12] : memref<128x128xf32, #tpu.memory_space<vmem>>, vector<128x128xf32>
    tpu.vector_store %arg10[%c0_11, %c0_12], %17 {strides = array<i32>} : memref<128x128xf32, #tpu.memory_space<vmem>>, vector<128x128xf32>,
    %c0_i32_13 = arith.constant 0 : i32
    %19 = arith.cmpi eq, %arg2, %c0_i32_13 : i32
    %20 = arith.extui %19 : i1 to i32
    %c0_i32_14 = arith.constant 0 : i32
    %21 = arith.cmpi ne, %20, %c0_i32_14 : i32
    scf.if %21 {
      %c0_15 = arith.constant 0 : index
      %c0_16 = arith.constant 0 : index
      %22 = vector.load %arg10[%c0_15, %c0_16] : memref<128x128xf32, #tpu.memory_space<vmem>>, vector<128x128xf32>
      %23 = arith.truncf %22 : vector<128x128xf32> to vector<128x128xbf16>
      %c0_17 = arith.constant 0 : index
      %c0_18 = arith.constant 0 : index
      %24 = vector.load %arg9[%c0_17, %c0_18] : memref<128x128xbf16, #tpu.memory_space<vmem>>, vector<128x128xbf16>
      tpu.vector_store %arg9[%c0_17, %c0_18], %23 {strides = array<i32>} : memref<128x128xbf16, #tpu.memory_space<vmem>>, vector<128x128xbf16>,
    } else {
    }
    return
  }
  func.func @transform_0(%arg0: i32, %arg1: i32, %arg2: i32) -> (i32, i32) {
    %c0_i32 = arith.constant 0 : i32
    return %arg0, %arg2 : i32, i32
  }
  func.func @transform_1(%arg0: i32, %arg1: i32, %arg2: i32) -> (i32, i32) {
    %c0_i32 = arith.constant 0 : i32
    return %arg2, %arg1 : i32, i32
  }
  func.func @transform_2(%arg0: i32, %arg1: i32, %arg2: i32) -> (i32, i32) {
    %c0_i32 = arith.constant 0 : i32
    %c0_i32_0 = arith.constant 0 : i32
    return %c0_i32, %arg2 : i32, i32
  }
  func.func @transform_3(%arg0: i32, %arg1: i32, %arg2: i32) -> (i32, i32) {
    %c0_i32 = arith.constant 0 : i32
    %c0_i32_0 = arith.constant 0 : i32
    return %c0_i32, %arg2 : i32, i32
  }
  func.func @transform_4(%arg0: i32, %arg1: i32, %arg2: i32) -> (i32, i32) {
    %c0_i32 = arith.constant 0 : i32
    %c0_i32_0 = arith.constant 0 : i32
    return %c0_i32, %arg1 : i32, i32
  }
  func.func @transform_5(%arg0: i32, %arg1: i32, %arg2: i32) -> (i32, i32) {
    %c0_i32 = arith.constant 0 : i32
    %c0_i32_0 = arith.constant 0 : i32
    return %c0_i32, %arg1 : i32, i32
  }
  func.func @transform_6(%arg0: i32, %arg1: i32, %arg2: i32) -> (i32, i32) {
    %c0_i32 = arith.constant 0 : i32
    return %arg0, %arg1 : i32, i32
  }
}

module attributes {stable_mosaic.version = 11 : i64} {
  func.func @_stack_reduce_kernel(%arg0: i32, %arg1: memref<4x32x128xbf16, #tpu.memory_space<vmem>>, %arg2: memref<32x128xbf16, #tpu.memory_space<vmem>>) attributes {dimension_semantics = [#tpu.dimension_semantics<parallel>], iteration_bounds = array<i64: 1>, scalar_prefetch = 0 : i64, scratch_operands = 0 : i64, tpu.core_type = #tpu.core_type<tc>, window_params = [{transform_indices = @transform_0, window_bounds = array<i64: 4, 32, 128>}, {transform_indices = @transform_1, window_bounds = array<i64: 32, 128>}]} {
    %c0 = arith.constant 0 : index
    %c0_0 = arith.constant 0 : index
    %c0_1 = arith.constant 0 : index
    %0 = vector.load %arg1[%c0, %c0_0, %c0_1] : memref<4x32x128xbf16, #tpu.memory_space<vmem>>, vector<4x32x128xbf16>
    %1 = arith.extf %0 : vector<4x32x128xbf16> to vector<4x32x128xf32>
    %cst = arith.constant dense<0.000000e+00> : vector<32x128xf32>
    %2 = vector.multi_reduction <add>, %1, %cst [0] : vector<4x32x128xf32> to vector<32x128xf32>
    %cst_2 = arith.constant 2.500000e-01 : f32
    %3 = vector.broadcast %cst_2 : f32 to vector<32x128xf32>
    %4 = arith.mulf %2, %3 : vector<32x128xf32>
    %5 = arith.truncf %4 : vector<32x128xf32> to vector<32x128xbf16>
    %c0_3 = arith.constant 0 : index
    %c0_4 = arith.constant 0 : index
    %6 = vector.load %arg2[%c0_3, %c0_4] : memref<32x128xbf16, #tpu.memory_space<vmem>>, vector<32x128xbf16>
    tpu.vector_store %arg2[%c0_3, %c0_4], %5 {strides = array<i32>} : memref<32x128xbf16, #tpu.memory_space<vmem>>, vector<32x128xbf16>,
    return
  }
  func.func @transform_0(%arg0: i32) -> (i32, i32, i32) {
    %c0_i32 = arith.constant 0 : i32
    %c0_i32_0 = arith.constant 0 : i32
    %c0_i32_1 = arith.constant 0 : i32
    return %c0_i32, %arg0, %c0_i32_0 : i32, i32, i32
  }
  func.func @transform_1(%arg0: i32) -> (i32, i32) {
    %c0_i32 = arith.constant 0 : i32
    %c0_i32_0 = arith.constant 0 : i32
    return %arg0, %c0_i32 : i32, i32
  }
}

module attributes {stable_mosaic.version = 11 : i64} {
  func.func @_fmm_kernel(%arg0: i32, %arg1: i32, %arg2: i32, %arg3: memref<32x128xbf16, #tpu.memory_space<vmem>>, %arg4: memref<128x128xbf16, #tpu.memory_space<vmem>>, %arg5: memref<1x128xf32, #tpu.memory_space<vmem>>, %arg6: memref<1x128xf32, #tpu.memory_space<vmem>>, %arg7: memref<1x128xf32, #tpu.memory_space<vmem>>, %arg8: memref<1x128xf32, #tpu.memory_space<vmem>>, %arg9: memref<32x128xbf16, #tpu.memory_space<vmem>>, %arg10: memref<32x128xf32, #tpu.memory_space<vmem>>) attributes {dimension_semantics = [#tpu.dimension_semantics<parallel>, #tpu.dimension_semantics<parallel>, #tpu.dimension_semantics<arbitrary>], iteration_bounds = array<i64: 1, 1, 1>, scalar_prefetch = 0 : i64, scratch_operands = 1 : i64, tpu.core_type = #tpu.core_type<tc>, window_params = [{transform_indices = @transform_0, window_bounds = array<i64: 32, 128>}, {transform_indices = @transform_1, window_bounds = array<i64: 128, 128>}, {transform_indices = @transform_2, window_bounds = array<i64: 1, 128>}, {transform_indices = @transform_3, window_bounds = array<i64: 1, 128>}, {transform_indices = @transform_4, window_bounds = array<i64: 1, 128>}, {transform_indices = @transform_5, window_bounds = array<i64: 1, 128>}, {transform_indices = @transform_6, window_bounds = array<i64: 32, 128>}]} {
    %c0_i32 = arith.constant 0 : i32
    %0 = arith.cmpi eq, %arg2, %c0_i32 : i32
    %1 = arith.extui %0 : i1 to i32
    %c0_i32_0 = arith.constant 0 : i32
    %2 = arith.cmpi ne, %1, %c0_i32_0 : i32
    scf.if %2 {
      %cst_15 = arith.constant 0.000000e+00 : f32
      %22 = vector.broadcast %cst_15 : f32 to vector<32x128xf32>
      %c0_16 = arith.constant 0 : index
      %c0_17 = arith.constant 0 : index
      %23 = vector.load %arg10[%c0_16, %c0_17] : memref<32x128xf32, #tpu.memory_space<vmem>>, vector<32x128xf32>
      tpu.vector_store %arg10[%c0_16, %c0_17], %22 {strides = array<i32>} : memref<32x128xf32, #tpu.memory_space<vmem>>, vector<32x128xf32>,
    } else {
    }
    %c0 = arith.constant 0 : index
    %c0_1 = arith.constant 0 : index
    %3 = vector.load %arg3[%c0, %c0_1] : memref<32x128xbf16, #tpu.memory_space<vmem>>, vector<32x128xbf16>
    %4 = arith.extf %3 : vector<32x128xbf16> to vector<32x128xf32>
    %c0_2 = arith.constant 0 : index
    %c0_3 = arith.constant 0 : index
    %5 = vector.load %arg5[%c0_2, %c0_3] : memref<1x128xf32, #tpu.memory_space<vmem>>, vector<1x128xf32>
    %6 = vector.broadcast %5 : vector<1x128xf32> to vector<32x128xf32>
    %7 = arith.mulf %4, %6 : vector<32x128xf32>
    %c0_4 = arith.constant 0 : index
    %c0_5 = arith.constant 0 : index
    %8 = vector.load %arg6[%c0_4, %c0_5] : memref<1x128xf32, #tpu.memory_space<vmem>>, vector<1x128xf32>
    %9 = vector.broadcast %8 : vector<1x128xf32> to vector<32x128xf32>
    %10 = arith.addf %7, %9 : vector<32x128xf32>
    %cst = arith.constant 0.000000e+00 : f32
    %11 = vector.broadcast %cst : f32 to vector<32x128xf32>
    %12 = arith.maximumf %10, %11 : vector<32x128xf32>
    %c0_6 = arith.constant 0 : index
    %c0_7 = arith.constant 0 : index
    %13 = vector.load %arg10[%c0_6, %c0_7] : memref<32x128xf32, #tpu.memory_space<vmem>>, vector<32x128xf32>
    %14 = arith.truncf %12 : vector<32x128xf32> to vector<32x128xbf16>
    %c0_8 = arith.constant 0 : index
    %c0_9 = arith.constant 0 : index
    %15 = vector.load %arg4[%c0_8, %c0_9] : memref<128x128xbf16, #tpu.memory_space<vmem>>, vector<128x128xbf16>
    %cst_10 = arith.constant dense<0.000000e+00> : vector<32x128xf32>
    %16 = tpu.matmul %14, %15, %cst_10 {dimension_numbers = #tpu.dot_dimension_numbers<[1], [0], [0], [1], [0, 0, 1, 1], [], []>} : vector<32x128xbf16>, vector<128x128xbf16>, vector<32x128xf32> -> vector<32x128xf32>
    %17 = arith.addf %13, %16 : vector<32x128xf32>
    %c0_11 = arith.constant 0 : index
    %c0_12 = arith.constant 0 : index
    %18 = vector.load %arg10[%c0_11, %c0_12] : memref<32x128xf32, #tpu.memory_space<vmem>>, vector<32x128xf32>
    tpu.vector_store %arg10[%c0_11, %c0_12], %17 {strides = array<i32>} : memref<32x128xf32, #tpu.memory_space<vmem>>, vector<32x128xf32>,
    %c0_i32_13 = arith.constant 0 : i32
    %19 = arith.cmpi eq, %arg2, %c0_i32_13 : i32
    %20 = arith.extui %19 : i1 to i32
    %c0_i32_14 = arith.constant 0 : i32
    %21 = arith.cmpi ne, %20, %c0_i32_14 : i32
    scf.if %21 {
      %c0_15 = arith.constant 0 : index
      %c0_16 = arith.constant 0 : index
      %22 = vector.load %arg10[%c0_15, %c0_16] : memref<32x128xf32, #tpu.memory_space<vmem>>, vector<32x128xf32>
      %c0_17 = arith.constant 0 : index
      %c0_18 = arith.constant 0 : index
      %23 = vector.load %arg7[%c0_17, %c0_18] : memref<1x128xf32, #tpu.memory_space<vmem>>, vector<1x128xf32>
      %24 = vector.broadcast %23 : vector<1x128xf32> to vector<32x128xf32>
      %25 = arith.mulf %22, %24 : vector<32x128xf32>
      %c0_19 = arith.constant 0 : index
      %c0_20 = arith.constant 0 : index
      %26 = vector.load %arg8[%c0_19, %c0_20] : memref<1x128xf32, #tpu.memory_space<vmem>>, vector<1x128xf32>
      %27 = vector.broadcast %26 : vector<1x128xf32> to vector<32x128xf32>
      %28 = arith.addf %25, %27 : vector<32x128xf32>
      %cst_21 = arith.constant 0.000000e+00 : f32
      %29 = vector.broadcast %cst_21 : f32 to vector<32x128xf32>
      %30 = arith.maximumf %28, %29 : vector<32x128xf32>
      %31 = arith.truncf %30 : vector<32x128xf32> to vector<32x128xbf16>
      %c0_22 = arith.constant 0 : index
      %c0_23 = arith.constant 0 : index
      %32 = vector.load %arg9[%c0_22, %c0_23] : memref<32x128xbf16, #tpu.memory_space<vmem>>, vector<32x128xbf16>
      tpu.vector_store %arg9[%c0_22, %c0_23], %31 {strides = array<i32>} : memref<32x128xbf16, #tpu.memory_space<vmem>>, vector<32x128xbf16>,
    } else {
    }
    return
  }
  func.func @transform_0(%arg0: i32, %arg1: i32, %arg2: i32) -> (i32, i32) {
    %c0_i32 = arith.constant 0 : i32
    return %arg0, %arg2 : i32, i32
  }
  func.func @transform_1(%arg0: i32, %arg1: i32, %arg2: i32) -> (i32, i32) {
    %c0_i32 = arith.constant 0 : i32
    return %arg2, %arg1 : i32, i32
  }
  func.func @transform_2(%arg0: i32, %arg1: i32, %arg2: i32) -> (i32, i32) {
    %c0_i32 = arith.constant 0 : i32
    %c0_i32_0 = arith.constant 0 : i32
    return %c0_i32, %arg2 : i32, i32
  }
  func.func @transform_3(%arg0: i32, %arg1: i32, %arg2: i32) -> (i32, i32) {
    %c0_i32 = arith.constant 0 : i32
    %c0_i32_0 = arith.constant 0 : i32
    return %c0_i32, %arg2 : i32, i32
  }
  func.func @transform_4(%arg0: i32, %arg1: i32, %arg2: i32) -> (i32, i32) {
    %c0_i32 = arith.constant 0 : i32
    %c0_i32_0 = arith.constant 0 : i32
    return %c0_i32, %arg1 : i32, i32
  }
  func.func @transform_5(%arg0: i32, %arg1: i32, %arg2: i32) -> (i32, i32) {
    %c0_i32 = arith.constant 0 : i32
    %c0_i32_0 = arith.constant 0 : i32
    return %c0_i32, %arg1 : i32, i32
  }
  func.func @transform_6(%arg0: i32, %arg1: i32, %arg2: i32) -> (i32, i32) {
    %c0_i32 = arith.constant 0 : i32
    return %arg0, %arg1 : i32, i32
  }
}

module attributes {stable_mosaic.version = 11 : i64} {
  func.func @_fmm_kernel(%arg0: i32, %arg1: i32, %arg2: i32, %arg3: memref<32x128xbf16, #tpu.memory_space<vmem>>, %arg4: memref<128x128xbf16, #tpu.memory_space<vmem>>, %arg5: memref<1x128xf32, #tpu.memory_space<vmem>>, %arg6: memref<1x128xf32, #tpu.memory_space<vmem>>, %arg7: memref<1x128xf32, #tpu.memory_space<vmem>>, %arg8: memref<1x128xf32, #tpu.memory_space<vmem>>, %arg9: memref<32x128xbf16, #tpu.memory_space<vmem>>, %arg10: memref<32x128xf32, #tpu.memory_space<vmem>>) attributes {dimension_semantics = [#tpu.dimension_semantics<parallel>, #tpu.dimension_semantics<parallel>, #tpu.dimension_semantics<arbitrary>], iteration_bounds = array<i64: 1, 3, 1>, scalar_prefetch = 0 : i64, scratch_operands = 1 : i64, tpu.core_type = #tpu.core_type<tc>, window_params = [{transform_indices = @transform_0, window_bounds = array<i64: 32, 128>}, {transform_indices = @transform_1, window_bounds = array<i64: 128, 128>}, {transform_indices = @transform_2, window_bounds = array<i64: 1, 128>}, {transform_indices = @transform_3, window_bounds = array<i64: 1, 128>}, {transform_indices = @transform_4, window_bounds = array<i64: 1, 128>}, {transform_indices = @transform_5, window_bounds = array<i64: 1, 128>}, {transform_indices = @transform_6, window_bounds = array<i64: 32, 128>}]} {
    %c0_i32 = arith.constant 0 : i32
    %0 = arith.cmpi eq, %arg2, %c0_i32 : i32
    %1 = arith.extui %0 : i1 to i32
    %c0_i32_0 = arith.constant 0 : i32
    %2 = arith.cmpi ne, %1, %c0_i32_0 : i32
    scf.if %2 {
      %cst_10 = arith.constant 0.000000e+00 : f32
      %12 = vector.broadcast %cst_10 : f32 to vector<32x128xf32>
      %c0_11 = arith.constant 0 : index
      %c0_12 = arith.constant 0 : index
      %13 = vector.load %arg10[%c0_11, %c0_12] : memref<32x128xf32, #tpu.memory_space<vmem>>, vector<32x128xf32>
      tpu.vector_store %arg10[%c0_11, %c0_12], %12 {strides = array<i32>} : memref<32x128xf32, #tpu.memory_space<vmem>>, vector<32x128xf32>,
    } else {
    }
    %c0 = arith.constant 0 : index
    %c0_1 = arith.constant 0 : index
    %3 = vector.load %arg3[%c0, %c0_1] : memref<32x128xbf16, #tpu.memory_space<vmem>>, vector<32x128xbf16>
    %c0_2 = arith.constant 0 : index
    %c0_3 = arith.constant 0 : index
    %4 = vector.load %arg10[%c0_2, %c0_3] : memref<32x128xf32, #tpu.memory_space<vmem>>, vector<32x128xf32>
    %c0_4 = arith.constant 0 : index
    %c0_5 = arith.constant 0 : index
    %5 = vector.load %arg4[%c0_4, %c0_5] : memref<128x128xbf16, #tpu.memory_space<vmem>>, vector<128x128xbf16>
    %cst = arith.constant dense<0.000000e+00> : vector<32x128xf32>
    %6 = tpu.matmul %3, %5, %cst {dimension_numbers = #tpu.dot_dimension_numbers<[1], [0], [0], [1], [0, 0, 1, 1], [], []>} : vector<32x128xbf16>, vector<128x128xbf16>, vector<32x128xf32> -> vector<32x128xf32>
    %7 = arith.addf %4, %6 : vector<32x128xf32>
    %c0_6 = arith.constant 0 : index
    %c0_7 = arith.constant 0 : index
    %8 = vector.load %arg10[%c0_6, %c0_7] : memref<32x128xf32, #tpu.memory_space<vmem>>, vector<32x128xf32>
    tpu.vector_store %arg10[%c0_6, %c0_7], %7 {strides = array<i32>} : memref<32x128xf32, #tpu.memory_space<vmem>>, vector<32x128xf32>,
    %c0_i32_8 = arith.constant 0 : i32
    %9 = arith.cmpi eq, %arg2, %c0_i32_8 : i32
    %10 = arith.extui %9 : i1 to i32
    %c0_i32_9 = arith.constant 0 : i32
    %11 = arith.cmpi ne, %10, %c0_i32_9 : i32
    scf.if %11 {
      %c0_10 = arith.constant 0 : index
      %c0_11 = arith.constant 0 : index
      %12 = vector.load %arg10[%c0_10, %c0_11] : memref<32x128xf32, #tpu.memory_space<vmem>>, vector<32x128xf32>
      %13 = arith.truncf %12 : vector<32x128xf32> to vector<32x128xbf16>
      %c0_12 = arith.constant 0 : index
      %c0_13 = arith.constant 0 : index
      %14 = vector.load %arg9[%c0_12, %c0_13] : memref<32x128xbf16, #tpu.memory_space<vmem>>, vector<32x128xbf16>
      tpu.vector_store %arg9[%c0_12, %c0_13], %13 {strides = array<i32>} : memref<32x128xbf16, #tpu.memory_space<vmem>>, vector<32x128xbf16>,
    } else {
    }
    return
  }
  func.func @transform_0(%arg0: i32, %arg1: i32, %arg2: i32) -> (i32, i32) {
    %c0_i32 = arith.constant 0 : i32
    return %arg0, %arg2 : i32, i32
  }
  func.func @transform_1(%arg0: i32, %arg1: i32, %arg2: i32) -> (i32, i32) {
    %c0_i32 = arith.constant 0 : i32
    return %arg2, %arg1 : i32, i32
  }
  func.func @transform_2(%arg0: i32, %arg1: i32, %arg2: i32) -> (i32, i32) {
    %c0_i32 = arith.constant 0 : i32
    %c0_i32_0 = arith.constant 0 : i32
    return %c0_i32, %arg2 : i32, i32
  }
  func.func @transform_3(%arg0: i32, %arg1: i32, %arg2: i32) -> (i32, i32) {
    %c0_i32 = arith.constant 0 : i32
    %c0_i32_0 = arith.constant 0 : i32
    return %c0_i32, %arg2 : i32, i32
  }
  func.func @transform_4(%arg0: i32, %arg1: i32, %arg2: i32) -> (i32, i32) {
    %c0_i32 = arith.constant 0 : i32
    %c0_i32_0 = arith.constant 0 : i32
    return %c0_i32, %arg1 : i32, i32
  }
  func.func @transform_5(%arg0: i32, %arg1: i32, %arg2: i32) -> (i32, i32) {
    %c0_i32 = arith.constant 0 : i32
    %c0_i32_0 = arith.constant 0 : i32
    return %c0_i32, %arg1 : i32, i32
  }
  func.func @transform_6(%arg0: i32, %arg1: i32, %arg2: i32) -> (i32, i32) {
    %c0_i32 = arith.constant 0 : i32
    return %arg0, %arg1 : i32, i32
  }
}

module attributes {stable_mosaic.version = 11 : i64} {
  func.func @_fmm_kernel(%arg0: i32, %arg1: i32, %arg2: i32, %arg3: memref<32x256xbf16, #tpu.memory_space<vmem>>, %arg4: memref<256x128xbf16, #tpu.memory_space<vmem>>, %arg5: memref<1x256xf32, #tpu.memory_space<vmem>>, %arg6: memref<1x256xf32, #tpu.memory_space<vmem>>, %arg7: memref<1x128xf32, #tpu.memory_space<vmem>>, %arg8: memref<1x128xf32, #tpu.memory_space<vmem>>, %arg9: memref<32x128xbf16, #tpu.memory_space<vmem>>, %arg10: memref<32x128xf32, #tpu.memory_space<vmem>>) attributes {dimension_semantics = [#tpu.dimension_semantics<parallel>, #tpu.dimension_semantics<parallel>, #tpu.dimension_semantics<arbitrary>], iteration_bounds = array<i64: 1, 1, 1>, scalar_prefetch = 0 : i64, scratch_operands = 1 : i64, tpu.core_type = #tpu.core_type<tc>, window_params = [{transform_indices = @transform_0, window_bounds = array<i64: 32, 256>}, {transform_indices = @transform_1, window_bounds = array<i64: 256, 128>}, {transform_indices = @transform_2, window_bounds = array<i64: 1, 256>}, {transform_indices = @transform_3, window_bounds = array<i64: 1, 256>}, {transform_indices = @transform_4, window_bounds = array<i64: 1, 128>}, {transform_indices = @transform_5, window_bounds = array<i64: 1, 128>}, {transform_indices = @transform_6, window_bounds = array<i64: 32, 128>}]} {
    %c0_i32 = arith.constant 0 : i32
    %0 = arith.cmpi eq, %arg2, %c0_i32 : i32
    %1 = arith.extui %0 : i1 to i32
    %c0_i32_0 = arith.constant 0 : i32
    %2 = arith.cmpi ne, %1, %c0_i32_0 : i32
    scf.if %2 {
      %cst_15 = arith.constant 0.000000e+00 : f32
      %22 = vector.broadcast %cst_15 : f32 to vector<32x128xf32>
      %c0_16 = arith.constant 0 : index
      %c0_17 = arith.constant 0 : index
      %23 = vector.load %arg10[%c0_16, %c0_17] : memref<32x128xf32, #tpu.memory_space<vmem>>, vector<32x128xf32>
      tpu.vector_store %arg10[%c0_16, %c0_17], %22 {strides = array<i32>} : memref<32x128xf32, #tpu.memory_space<vmem>>, vector<32x128xf32>,
    } else {
    }
    %c0 = arith.constant 0 : index
    %c0_1 = arith.constant 0 : index
    %3 = vector.load %arg3[%c0, %c0_1] : memref<32x256xbf16, #tpu.memory_space<vmem>>, vector<32x256xbf16>
    %4 = arith.extf %3 : vector<32x256xbf16> to vector<32x256xf32>
    %c0_2 = arith.constant 0 : index
    %c0_3 = arith.constant 0 : index
    %5 = vector.load %arg5[%c0_2, %c0_3] : memref<1x256xf32, #tpu.memory_space<vmem>>, vector<1x256xf32>
    %6 = vector.broadcast %5 : vector<1x256xf32> to vector<32x256xf32>
    %7 = arith.mulf %4, %6 : vector<32x256xf32>
    %c0_4 = arith.constant 0 : index
    %c0_5 = arith.constant 0 : index
    %8 = vector.load %arg6[%c0_4, %c0_5] : memref<1x256xf32, #tpu.memory_space<vmem>>, vector<1x256xf32>
    %9 = vector.broadcast %8 : vector<1x256xf32> to vector<32x256xf32>
    %10 = arith.addf %7, %9 : vector<32x256xf32>
    %cst = arith.constant 0.000000e+00 : f32
    %11 = vector.broadcast %cst : f32 to vector<32x256xf32>
    %12 = arith.maximumf %10, %11 : vector<32x256xf32>
    %c0_6 = arith.constant 0 : index
    %c0_7 = arith.constant 0 : index
    %13 = vector.load %arg10[%c0_6, %c0_7] : memref<32x128xf32, #tpu.memory_space<vmem>>, vector<32x128xf32>
    %14 = arith.truncf %12 : vector<32x256xf32> to vector<32x256xbf16>
    %c0_8 = arith.constant 0 : index
    %c0_9 = arith.constant 0 : index
    %15 = vector.load %arg4[%c0_8, %c0_9] : memref<256x128xbf16, #tpu.memory_space<vmem>>, vector<256x128xbf16>
    %cst_10 = arith.constant dense<0.000000e+00> : vector<32x128xf32>
    %16 = tpu.matmul %14, %15, %cst_10 {dimension_numbers = #tpu.dot_dimension_numbers<[1], [0], [0], [1], [0, 0, 1, 1], [], []>} : vector<32x256xbf16>, vector<256x128xbf16>, vector<32x128xf32> -> vector<32x128xf32>
    %17 = arith.addf %13, %16 : vector<32x128xf32>
    %c0_11 = arith.constant 0 : index
    %c0_12 = arith.constant 0 : index
    %18 = vector.load %arg10[%c0_11, %c0_12] : memref<32x128xf32, #tpu.memory_space<vmem>>, vector<32x128xf32>
    tpu.vector_store %arg10[%c0_11, %c0_12], %17 {strides = array<i32>} : memref<32x128xf32, #tpu.memory_space<vmem>>, vector<32x128xf32>,
    %c0_i32_13 = arith.constant 0 : i32
    %19 = arith.cmpi eq, %arg2, %c0_i32_13 : i32
    %20 = arith.extui %19 : i1 to i32
    %c0_i32_14 = arith.constant 0 : i32
    %21 = arith.cmpi ne, %20, %c0_i32_14 : i32
    scf.if %21 {
      %c0_15 = arith.constant 0 : index
      %c0_16 = arith.constant 0 : index
      %22 = vector.load %arg10[%c0_15, %c0_16] : memref<32x128xf32, #tpu.memory_space<vmem>>, vector<32x128xf32>
      %c0_17 = arith.constant 0 : index
      %c0_18 = arith.constant 0 : index
      %23 = vector.load %arg7[%c0_17, %c0_18] : memref<1x128xf32, #tpu.memory_space<vmem>>, vector<1x128xf32>
      %24 = vector.broadcast %23 : vector<1x128xf32> to vector<32x128xf32>
      %25 = arith.mulf %22, %24 : vector<32x128xf32>
      %c0_19 = arith.constant 0 : index
      %c0_20 = arith.constant 0 : index
      %26 = vector.load %arg8[%c0_19, %c0_20] : memref<1x128xf32, #tpu.memory_space<vmem>>, vector<1x128xf32>
      %27 = vector.broadcast %26 : vector<1x128xf32> to vector<32x128xf32>
      %28 = arith.addf %25, %27 : vector<32x128xf32>
      %cst_21 = arith.constant 0.000000e+00 : f32
      %29 = vector.broadcast %cst_21 : f32 to vector<32x128xf32>
      %30 = arith.maximumf %28, %29 : vector<32x128xf32>
      %31 = arith.truncf %30 : vector<32x128xf32> to vector<32x128xbf16>
      %c0_22 = arith.constant 0 : index
      %c0_23 = arith.constant 0 : index
      %32 = vector.load %arg9[%c0_22, %c0_23] : memref<32x128xbf16, #tpu.memory_space<vmem>>, vector<32x128xbf16>
      tpu.vector_store %arg9[%c0_22, %c0_23], %31 {strides = array<i32>} : memref<32x128xbf16, #tpu.memory_space<vmem>>, vector<32x128xbf16>,
    } else {
    }
    return
  }
  func.func @transform_0(%arg0: i32, %arg1: i32, %arg2: i32) -> (i32, i32) {
    %c0_i32 = arith.constant 0 : i32
    return %arg0, %arg2 : i32, i32
  }
  func.func @transform_1(%arg0: i32, %arg1: i32, %arg2: i32) -> (i32, i32) {
    %c0_i32 = arith.constant 0 : i32
    return %arg2, %arg1 : i32, i32
  }
  func.func @transform_2(%arg0: i32, %arg1: i32, %arg2: i32) -> (i32, i32) {
    %c0_i32 = arith.constant 0 : i32
    %c0_i32_0 = arith.constant 0 : i32
    return %c0_i32, %arg2 : i32, i32
  }
  func.func @transform_3(%arg0: i32, %arg1: i32, %arg2: i32) -> (i32, i32) {
    %c0_i32 = arith.constant 0 : i32
    %c0_i32_0 = arith.constant 0 : i32
    return %c0_i32, %arg2 : i32, i32
  }
  func.func @transform_4(%arg0: i32, %arg1: i32, %arg2: i32) -> (i32, i32) {
    %c0_i32 = arith.constant 0 : i32
    %c0_i32_0 = arith.constant 0 : i32
    return %c0_i32, %arg1 : i32, i32
  }
  func.func @transform_5(%arg0: i32, %arg1: i32, %arg2: i32) -> (i32, i32) {
    %c0_i32 = arith.constant 0 : i32
    %c0_i32_0 = arith.constant 0 : i32
    return %c0_i32, %arg1 : i32, i32
  }
  func.func @transform_6(%arg0: i32, %arg1: i32, %arg2: i32) -> (i32, i32) {
    %c0_i32 = arith.constant 0 : i32
    return %arg0, %arg1 : i32, i32
  }
}

module attributes {stable_mosaic.version = 11 : i64} {
  func.func @_fmm_kernel(%arg0: i32, %arg1: i32, %arg2: i32, %arg3: memref<32x128xbf16, #tpu.memory_space<vmem>>, %arg4: memref<128x128xbf16, #tpu.memory_space<vmem>>, %arg5: memref<1x128xf32, #tpu.memory_space<vmem>>, %arg6: memref<1x128xf32, #tpu.memory_space<vmem>>, %arg7: memref<1x128xf32, #tpu.memory_space<vmem>>, %arg8: memref<1x128xf32, #tpu.memory_space<vmem>>, %arg9: memref<32x128xbf16, #tpu.memory_space<vmem>>, %arg10: memref<32x128xf32, #tpu.memory_space<vmem>>) attributes {dimension_semantics = [#tpu.dimension_semantics<parallel>, #tpu.dimension_semantics<parallel>, #tpu.dimension_semantics<arbitrary>], iteration_bounds = array<i64: 1, 1, 3>, scalar_prefetch = 0 : i64, scratch_operands = 1 : i64, tpu.core_type = #tpu.core_type<tc>, window_params = [{transform_indices = @transform_0, window_bounds = array<i64: 32, 128>}, {transform_indices = @transform_1, window_bounds = array<i64: 128, 128>}, {transform_indices = @transform_2, window_bounds = array<i64: 1, 128>}, {transform_indices = @transform_3, window_bounds = array<i64: 1, 128>}, {transform_indices = @transform_4, window_bounds = array<i64: 1, 128>}, {transform_indices = @transform_5, window_bounds = array<i64: 1, 128>}, {transform_indices = @transform_6, window_bounds = array<i64: 32, 128>}]} {
    %c0_i32 = arith.constant 0 : i32
    %0 = arith.cmpi eq, %arg2, %c0_i32 : i32
    %1 = arith.extui %0 : i1 to i32
    %c0_i32_0 = arith.constant 0 : i32
    %2 = arith.cmpi ne, %1, %c0_i32_0 : i32
    scf.if %2 {
      %cst_14 = arith.constant 0.000000e+00 : f32
      %22 = vector.broadcast %cst_14 : f32 to vector<32x128xf32>
      %c0_15 = arith.constant 0 : index
      %c0_16 = arith.constant 0 : index
      %23 = vector.load %arg10[%c0_15, %c0_16] : memref<32x128xf32, #tpu.memory_space<vmem>>, vector<32x128xf32>
      tpu.vector_store %arg10[%c0_15, %c0_16], %22 {strides = array<i32>} : memref<32x128xf32, #tpu.memory_space<vmem>>, vector<32x128xf32>,
    } else {
    }
    %c0 = arith.constant 0 : index
    %c0_1 = arith.constant 0 : index
    %3 = vector.load %arg3[%c0, %c0_1] : memref<32x128xbf16, #tpu.memory_space<vmem>>, vector<32x128xbf16>
    %4 = arith.extf %3 : vector<32x128xbf16> to vector<32x128xf32>
    %c0_2 = arith.constant 0 : index
    %c0_3 = arith.constant 0 : index
    %5 = vector.load %arg5[%c0_2, %c0_3] : memref<1x128xf32, #tpu.memory_space<vmem>>, vector<1x128xf32>
    %6 = vector.broadcast %5 : vector<1x128xf32> to vector<32x128xf32>
    %7 = arith.mulf %4, %6 : vector<32x128xf32>
    %c0_4 = arith.constant 0 : index
    %c0_5 = arith.constant 0 : index
    %8 = vector.load %arg6[%c0_4, %c0_5] : memref<1x128xf32, #tpu.memory_space<vmem>>, vector<1x128xf32>
    %9 = vector.broadcast %8 : vector<1x128xf32> to vector<32x128xf32>
    %10 = arith.addf %7, %9 : vector<32x128xf32>
    %cst = arith.constant 0.000000e+00 : f32
    %11 = vector.broadcast %cst : f32 to vector<32x128xf32>
    %12 = arith.maximumf %10, %11 : vector<32x128xf32>
    %c0_6 = arith.constant 0 : index
    %c0_7 = arith.constant 0 : index
    %13 = vector.load %arg10[%c0_6, %c0_7] : memref<32x128xf32, #tpu.memory_space<vmem>>, vector<32x128xf32>
    %14 = arith.truncf %12 : vector<32x128xf32> to vector<32x128xbf16>
    %c0_8 = arith.constant 0 : index
    %c0_9 = arith.constant 0 : index
    %15 = vector.load %arg4[%c0_8, %c0_9] : memref<128x128xbf16, #tpu.memory_space<vmem>>, vector<128x128xbf16>
    %cst_10 = arith.constant dense<0.000000e+00> : vector<32x128xf32>
    %16 = tpu.matmul %14, %15, %cst_10 {dimension_numbers = #tpu.dot_dimension_numbers<[1], [0], [0], [1], [0, 0, 1, 1], [], []>} : vector<32x128xbf16>, vector<128x128xbf16>, vector<32x128xf32> -> vector<32x128xf32>
    %17 = arith.addf %13, %16 : vector<32x128xf32>
    %c0_11 = arith.constant 0 : index
    %c0_12 = arith.constant 0 : index
    %18 = vector.load %arg10[%c0_11, %c0_12] : memref<32x128xf32, #tpu.memory_space<vmem>>, vector<32x128xf32>
    tpu.vector_store %arg10[%c0_11, %c0_12], %17 {strides = array<i32>} : memref<32x128xf32, #tpu.memory_space<vmem>>, vector<32x128xf32>,
    %c2_i32 = arith.constant 2 : i32
    %19 = arith.cmpi eq, %arg2, %c2_i32 : i32
    %20 = arith.extui %19 : i1 to i32
    %c0_i32_13 = arith.constant 0 : i32
    %21 = arith.cmpi ne, %20, %c0_i32_13 : i32
    scf.if %21 {
      %c0_14 = arith.constant 0 : index
      %c0_15 = arith.constant 0 : index
      %22 = vector.load %arg10[%c0_14, %c0_15] : memref<32x128xf32, #tpu.memory_space<vmem>>, vector<32x128xf32>
      %c0_16 = arith.constant 0 : index
      %c0_17 = arith.constant 0 : index
      %23 = vector.load %arg7[%c0_16, %c0_17] : memref<1x128xf32, #tpu.memory_space<vmem>>, vector<1x128xf32>
      %24 = vector.broadcast %23 : vector<1x128xf32> to vector<32x128xf32>
      %25 = arith.mulf %22, %24 : vector<32x128xf32>
      %c0_18 = arith.constant 0 : index
      %c0_19 = arith.constant 0 : index
      %26 = vector.load %arg8[%c0_18, %c0_19] : memref<1x128xf32, #tpu.memory_space<vmem>>, vector<1x128xf32>
      %27 = vector.broadcast %26 : vector<1x128xf32> to vector<32x128xf32>
      %28 = arith.addf %25, %27 : vector<32x128xf32>
      %cst_20 = arith.constant 0.000000e+00 : f32
      %29 = vector.broadcast %cst_20 : f32 to vector<32x128xf32>
      %30 = arith.maximumf %28, %29 : vector<32x128xf32>
      %31 = arith.truncf %30 : vector<32x128xf32> to vector<32x128xbf16>
      %c0_21 = arith.constant 0 : index
      %c0_22 = arith.constant 0 : index
      %32 = vector.load %arg9[%c0_21, %c0_22] : memref<32x128xbf16, #tpu.memory_space<vmem>>, vector<32x128xbf16>
      tpu.vector_store %arg9[%c0_21, %c0_22], %31 {strides = array<i32>} : memref<32x128xbf16, #tpu.memory_space<vmem>>, vector<32x128xbf16>,
    } else {
    }
    return
  }
  func.func @transform_0(%arg0: i32, %arg1: i32, %arg2: i32) -> (i32, i32) {
    %c0_i32 = arith.constant 0 : i32
    return %arg0, %arg2 : i32, i32
  }
  func.func @transform_1(%arg0: i32, %arg1: i32, %arg2: i32) -> (i32, i32) {
    %c0_i32 = arith.constant 0 : i32
    return %arg2, %arg1 : i32, i32
  }
  func.func @transform_2(%arg0: i32, %arg1: i32, %arg2: i32) -> (i32, i32) {
    %c0_i32 = arith.constant 0 : i32
    %c0_i32_0 = arith.constant 0 : i32
    return %c0_i32, %arg2 : i32, i32
  }
  func.func @transform_3(%arg0: i32, %arg1: i32, %arg2: i32) -> (i32, i32) {
    %c0_i32 = arith.constant 0 : i32
    %c0_i32_0 = arith.constant 0 : i32
    return %c0_i32, %arg2 : i32, i32
  }
  func.func @transform_4(%arg0: i32, %arg1: i32, %arg2: i32) -> (i32, i32) {
    %c0_i32 = arith.constant 0 : i32
    %c0_i32_0 = arith.constant 0 : i32
    return %c0_i32, %arg1 : i32, i32
  }
  func.func @transform_5(%arg0: i32, %arg1: i32, %arg2: i32) -> (i32, i32) {
    %c0_i32 = arith.constant 0 : i32
    %c0_i32_0 = arith.constant 0 : i32
    return %c0_i32, %arg1 : i32, i32
  }
  func.func @transform_6(%arg0: i32, %arg1: i32, %arg2: i32) -> (i32, i32) {
    %c0_i32 = arith.constant 0 : i32
    return %arg0, %arg1 : i32, i32
  }
}

module attributes {stable_mosaic.version = 11 : i64} {
  func.func @_fmm_kernel(%arg0: i32, %arg1: i32, %arg2: i32, %arg3: memref<32x512xbf16, #tpu.memory_space<vmem>>, %arg4: memref<512x128xbf16, #tpu.memory_space<vmem>>, %arg5: memref<1x512xf32, #tpu.memory_space<vmem>>, %arg6: memref<1x512xf32, #tpu.memory_space<vmem>>, %arg7: memref<1x128xf32, #tpu.memory_space<vmem>>, %arg8: memref<1x128xf32, #tpu.memory_space<vmem>>, %arg9: memref<32x128xbf16, #tpu.memory_space<vmem>>, %arg10: memref<32x128xf32, #tpu.memory_space<vmem>>) attributes {dimension_semantics = [#tpu.dimension_semantics<parallel>, #tpu.dimension_semantics<parallel>, #tpu.dimension_semantics<arbitrary>], iteration_bounds = array<i64: 1, 1, 1>, scalar_prefetch = 0 : i64, scratch_operands = 1 : i64, tpu.core_type = #tpu.core_type<tc>, window_params = [{transform_indices = @transform_0, window_bounds = array<i64: 32, 512>}, {transform_indices = @transform_1, window_bounds = array<i64: 512, 128>}, {transform_indices = @transform_2, window_bounds = array<i64: 1, 512>}, {transform_indices = @transform_3, window_bounds = array<i64: 1, 512>}, {transform_indices = @transform_4, window_bounds = array<i64: 1, 128>}, {transform_indices = @transform_5, window_bounds = array<i64: 1, 128>}, {transform_indices = @transform_6, window_bounds = array<i64: 32, 128>}]} {
    %c0_i32 = arith.constant 0 : i32
    %0 = arith.cmpi eq, %arg2, %c0_i32 : i32
    %1 = arith.extui %0 : i1 to i32
    %c0_i32_0 = arith.constant 0 : i32
    %2 = arith.cmpi ne, %1, %c0_i32_0 : i32
    scf.if %2 {
      %cst_15 = arith.constant 0.000000e+00 : f32
      %22 = vector.broadcast %cst_15 : f32 to vector<32x128xf32>
      %c0_16 = arith.constant 0 : index
      %c0_17 = arith.constant 0 : index
      %23 = vector.load %arg10[%c0_16, %c0_17] : memref<32x128xf32, #tpu.memory_space<vmem>>, vector<32x128xf32>
      tpu.vector_store %arg10[%c0_16, %c0_17], %22 {strides = array<i32>} : memref<32x128xf32, #tpu.memory_space<vmem>>, vector<32x128xf32>,
    } else {
    }
    %c0 = arith.constant 0 : index
    %c0_1 = arith.constant 0 : index
    %3 = vector.load %arg3[%c0, %c0_1] : memref<32x512xbf16, #tpu.memory_space<vmem>>, vector<32x512xbf16>
    %4 = arith.extf %3 : vector<32x512xbf16> to vector<32x512xf32>
    %c0_2 = arith.constant 0 : index
    %c0_3 = arith.constant 0 : index
    %5 = vector.load %arg5[%c0_2, %c0_3] : memref<1x512xf32, #tpu.memory_space<vmem>>, vector<1x512xf32>
    %6 = vector.broadcast %5 : vector<1x512xf32> to vector<32x512xf32>
    %7 = arith.mulf %4, %6 : vector<32x512xf32>
    %c0_4 = arith.constant 0 : index
    %c0_5 = arith.constant 0 : index
    %8 = vector.load %arg6[%c0_4, %c0_5] : memref<1x512xf32, #tpu.memory_space<vmem>>, vector<1x512xf32>
    %9 = vector.broadcast %8 : vector<1x512xf32> to vector<32x512xf32>
    %10 = arith.addf %7, %9 : vector<32x512xf32>
    %cst = arith.constant 0.000000e+00 : f32
    %11 = vector.broadcast %cst : f32 to vector<32x512xf32>
    %12 = arith.maximumf %10, %11 : vector<32x512xf32>
    %c0_6 = arith.constant 0 : index
    %c0_7 = arith.constant 0 : index
    %13 = vector.load %arg10[%c0_6, %c0_7] : memref<32x128xf32, #tpu.memory_space<vmem>>, vector<32x128xf32>
    %14 = arith.truncf %12 : vector<32x512xf32> to vector<32x512xbf16>
    %c0_8 = arith.constant 0 : index
    %c0_9 = arith.constant 0 : index
    %15 = vector.load %arg4[%c0_8, %c0_9] : memref<512x128xbf16, #tpu.memory_space<vmem>>, vector<512x128xbf16>
    %cst_10 = arith.constant dense<0.000000e+00> : vector<32x128xf32>
    %16 = tpu.matmul %14, %15, %cst_10 {dimension_numbers = #tpu.dot_dimension_numbers<[1], [0], [0], [1], [0, 0, 1, 1], [], []>} : vector<32x512xbf16>, vector<512x128xbf16>, vector<32x128xf32> -> vector<32x128xf32>
    %17 = arith.addf %13, %16 : vector<32x128xf32>
    %c0_11 = arith.constant 0 : index
    %c0_12 = arith.constant 0 : index
    %18 = vector.load %arg10[%c0_11, %c0_12] : memref<32x128xf32, #tpu.memory_space<vmem>>, vector<32x128xf32>
    tpu.vector_store %arg10[%c0_11, %c0_12], %17 {strides = array<i32>} : memref<32x128xf32, #tpu.memory_space<vmem>>, vector<32x128xf32>,
    %c0_i32_13 = arith.constant 0 : i32
    %19 = arith.cmpi eq, %arg2, %c0_i32_13 : i32
    %20 = arith.extui %19 : i1 to i32
    %c0_i32_14 = arith.constant 0 : i32
    %21 = arith.cmpi ne, %20, %c0_i32_14 : i32
    scf.if %21 {
      %c0_15 = arith.constant 0 : index
      %c0_16 = arith.constant 0 : index
      %22 = vector.load %arg10[%c0_15, %c0_16] : memref<32x128xf32, #tpu.memory_space<vmem>>, vector<32x128xf32>
      %c0_17 = arith.constant 0 : index
      %c0_18 = arith.constant 0 : index
      %23 = vector.load %arg7[%c0_17, %c0_18] : memref<1x128xf32, #tpu.memory_space<vmem>>, vector<1x128xf32>
      %24 = vector.broadcast %23 : vector<1x128xf32> to vector<32x128xf32>
      %25 = arith.mulf %22, %24 : vector<32x128xf32>
      %c0_19 = arith.constant 0 : index
      %c0_20 = arith.constant 0 : index
      %26 = vector.load %arg8[%c0_19, %c0_20] : memref<1x128xf32, #tpu.memory_space<vmem>>, vector<1x128xf32>
      %27 = vector.broadcast %26 : vector<1x128xf32> to vector<32x128xf32>
      %28 = arith.addf %25, %27 : vector<32x128xf32>
      %cst_21 = arith.constant 0.000000e+00 : f32
      %29 = vector.broadcast %cst_21 : f32 to vector<32x128xf32>
      %30 = arith.maximumf %28, %29 : vector<32x128xf32>
      %31 = arith.truncf %30 : vector<32x128xf32> to vector<32x128xbf16>
      %c0_22 = arith.constant 0 : index
      %c0_23 = arith.constant 0 : index
      %32 = vector.load %arg9[%c0_22, %c0_23] : memref<32x128xbf16, #tpu.memory_space<vmem>>, vector<32x128xbf16>
      tpu.vector_store %arg9[%c0_22, %c0_23], %31 {strides = array<i32>} : memref<32x128xbf16, #tpu.memory_space<vmem>>, vector<32x128xbf16>,
    } else {
    }
    return
  }
  func.func @transform_0(%arg0: i32, %arg1: i32, %arg2: i32) -> (i32, i32) {
    %c0_i32 = arith.constant 0 : i32
    return %arg0, %arg2 : i32, i32
  }
  func.func @transform_1(%arg0: i32, %arg1: i32, %arg2: i32) -> (i32, i32) {
    %c0_i32 = arith.constant 0 : i32
    return %arg2, %arg1 : i32, i32
  }
  func.func @transform_2(%arg0: i32, %arg1: i32, %arg2: i32) -> (i32, i32) {
    %c0_i32 = arith.constant 0 : i32
    %c0_i32_0 = arith.constant 0 : i32
    return %c0_i32, %arg2 : i32, i32
  }
  func.func @transform_3(%arg0: i32, %arg1: i32, %arg2: i32) -> (i32, i32) {
    %c0_i32 = arith.constant 0 : i32
    %c0_i32_0 = arith.constant 0 : i32
    return %c0_i32, %arg2 : i32, i32
  }
  func.func @transform_4(%arg0: i32, %arg1: i32, %arg2: i32) -> (i32, i32) {
    %c0_i32 = arith.constant 0 : i32
    %c0_i32_0 = arith.constant 0 : i32
    return %c0_i32, %arg1 : i32, i32
  }
  func.func @transform_5(%arg0: i32, %arg1: i32, %arg2: i32) -> (i32, i32) {
    %c0_i32 = arith.constant 0 : i32
    %c0_i32_0 = arith.constant 0 : i32
    return %c0_i32, %arg1 : i32, i32
  }
  func.func @transform_6(%arg0: i32, %arg1: i32, %arg2: i32) -> (i32, i32) {
    %c0_i32 = arith.constant 0 : i32
    return %arg0, %arg1 : i32, i32
  }
}

module attributes {stable_mosaic.version = 11 : i64} {
  func.func @_fmm_kernel(%arg0: i32, %arg1: i32, %arg2: i32, %arg3: memref<32x512xbf16, #tpu.memory_space<vmem>>, %arg4: memref<512x256xbf16, #tpu.memory_space<vmem>>, %arg5: memref<1x512xf32, #tpu.memory_space<vmem>>, %arg6: memref<1x512xf32, #tpu.memory_space<vmem>>, %arg7: memref<1x256xf32, #tpu.memory_space<vmem>>, %arg8: memref<1x256xf32, #tpu.memory_space<vmem>>, %arg9: memref<32x256xbf16, #tpu.memory_space<vmem>>, %arg10: memref<32x256xf32, #tpu.memory_space<vmem>>) attributes {dimension_semantics = [#tpu.dimension_semantics<parallel>, #tpu.dimension_semantics<parallel>, #tpu.dimension_semantics<arbitrary>], iteration_bounds = array<i64: 1, 1, 1>, scalar_prefetch = 0 : i64, scratch_operands = 1 : i64, tpu.core_type = #tpu.core_type<tc>, window_params = [{transform_indices = @transform_0, window_bounds = array<i64: 32, 512>}, {transform_indices = @transform_1, window_bounds = array<i64: 512, 256>}, {transform_indices = @transform_2, window_bounds = array<i64: 1, 512>}, {transform_indices = @transform_3, window_bounds = array<i64: 1, 512>}, {transform_indices = @transform_4, window_bounds = array<i64: 1, 256>}, {transform_indices = @transform_5, window_bounds = array<i64: 1, 256>}, {transform_indices = @transform_6, window_bounds = array<i64: 32, 256>}]} {
    %c0_i32 = arith.constant 0 : i32
    %0 = arith.cmpi eq, %arg2, %c0_i32 : i32
    %1 = arith.extui %0 : i1 to i32
    %c0_i32_0 = arith.constant 0 : i32
    %2 = arith.cmpi ne, %1, %c0_i32_0 : i32
    scf.if %2 {
      %cst_15 = arith.constant 0.000000e+00 : f32
      %22 = vector.broadcast %cst_15 : f32 to vector<32x256xf32>
      %c0_16 = arith.constant 0 : index
      %c0_17 = arith.constant 0 : index
      %23 = vector.load %arg10[%c0_16, %c0_17] : memref<32x256xf32, #tpu.memory_space<vmem>>, vector<32x256xf32>
      tpu.vector_store %arg10[%c0_16, %c0_17], %22 {strides = array<i32>} : memref<32x256xf32, #tpu.memory_space<vmem>>, vector<32x256xf32>,
    } else {
    }
    %c0 = arith.constant 0 : index
    %c0_1 = arith.constant 0 : index
    %3 = vector.load %arg3[%c0, %c0_1] : memref<32x512xbf16, #tpu.memory_space<vmem>>, vector<32x512xbf16>
    %4 = arith.extf %3 : vector<32x512xbf16> to vector<32x512xf32>
    %c0_2 = arith.constant 0 : index
    %c0_3 = arith.constant 0 : index
    %5 = vector.load %arg5[%c0_2, %c0_3] : memref<1x512xf32, #tpu.memory_space<vmem>>, vector<1x512xf32>
    %6 = vector.broadcast %5 : vector<1x512xf32> to vector<32x512xf32>
    %7 = arith.mulf %4, %6 : vector<32x512xf32>
    %c0_4 = arith.constant 0 : index
    %c0_5 = arith.constant 0 : index
    %8 = vector.load %arg6[%c0_4, %c0_5] : memref<1x512xf32, #tpu.memory_space<vmem>>, vector<1x512xf32>
    %9 = vector.broadcast %8 : vector<1x512xf32> to vector<32x512xf32>
    %10 = arith.addf %7, %9 : vector<32x512xf32>
    %cst = arith.constant 0.000000e+00 : f32
    %11 = vector.broadcast %cst : f32 to vector<32x512xf32>
    %12 = arith.maximumf %10, %11 : vector<32x512xf32>
    %c0_6 = arith.constant 0 : index
    %c0_7 = arith.constant 0 : index
    %13 = vector.load %arg10[%c0_6, %c0_7] : memref<32x256xf32, #tpu.memory_space<vmem>>, vector<32x256xf32>
    %14 = arith.truncf %12 : vector<32x512xf32> to vector<32x512xbf16>
    %c0_8 = arith.constant 0 : index
    %c0_9 = arith.constant 0 : index
    %15 = vector.load %arg4[%c0_8, %c0_9] : memref<512x256xbf16, #tpu.memory_space<vmem>>, vector<512x256xbf16>
    %cst_10 = arith.constant dense<0.000000e+00> : vector<32x256xf32>
    %16 = tpu.matmul %14, %15, %cst_10 {dimension_numbers = #tpu.dot_dimension_numbers<[1], [0], [0], [1], [0, 0, 1, 1], [], []>} : vector<32x512xbf16>, vector<512x256xbf16>, vector<32x256xf32> -> vector<32x256xf32>
    %17 = arith.addf %13, %16 : vector<32x256xf32>
    %c0_11 = arith.constant 0 : index
    %c0_12 = arith.constant 0 : index
    %18 = vector.load %arg10[%c0_11, %c0_12] : memref<32x256xf32, #tpu.memory_space<vmem>>, vector<32x256xf32>
    tpu.vector_store %arg10[%c0_11, %c0_12], %17 {strides = array<i32>} : memref<32x256xf32, #tpu.memory_space<vmem>>, vector<32x256xf32>,
    %c0_i32_13 = arith.constant 0 : i32
    %19 = arith.cmpi eq, %arg2, %c0_i32_13 : i32
    %20 = arith.extui %19 : i1 to i32
    %c0_i32_14 = arith.constant 0 : i32
    %21 = arith.cmpi ne, %20, %c0_i32_14 : i32
    scf.if %21 {
      %c0_15 = arith.constant 0 : index
      %c0_16 = arith.constant 0 : index
      %22 = vector.load %arg10[%c0_15, %c0_16] : memref<32x256xf32, #tpu.memory_space<vmem>>, vector<32x256xf32>
      %23 = arith.truncf %22 : vector<32x256xf32> to vector<32x256xbf16>
      %c0_17 = arith.constant 0 : index
      %c0_18 = arith.constant 0 : index
      %24 = vector.load %arg9[%c0_17, %c0_18] : memref<32x256xbf16, #tpu.memory_space<vmem>>, vector<32x256xbf16>
      tpu.vector_store %arg9[%c0_17, %c0_18], %23 {strides = array<i32>} : memref<32x256xbf16, #tpu.memory_space<vmem>>, vector<32x256xbf16>,
    } else {
    }
    return
  }
  func.func @transform_0(%arg0: i32, %arg1: i32, %arg2: i32) -> (i32, i32) {
    %c0_i32 = arith.constant 0 : i32
    return %arg0, %arg2 : i32, i32
  }
  func.func @transform_1(%arg0: i32, %arg1: i32, %arg2: i32) -> (i32, i32) {
    %c0_i32 = arith.constant 0 : i32
    return %arg2, %arg1 : i32, i32
  }
  func.func @transform_2(%arg0: i32, %arg1: i32, %arg2: i32) -> (i32, i32) {
    %c0_i32 = arith.constant 0 : i32
    %c0_i32_0 = arith.constant 0 : i32
    return %c0_i32, %arg2 : i32, i32
  }
  func.func @transform_3(%arg0: i32, %arg1: i32, %arg2: i32) -> (i32, i32) {
    %c0_i32 = arith.constant 0 : i32
    %c0_i32_0 = arith.constant 0 : i32
    return %c0_i32, %arg2 : i32, i32
  }
  func.func @transform_4(%arg0: i32, %arg1: i32, %arg2: i32) -> (i32, i32) {
    %c0_i32 = arith.constant 0 : i32
    %c0_i32_0 = arith.constant 0 : i32
    return %c0_i32, %arg1 : i32, i32
  }
  func.func @transform_5(%arg0: i32, %arg1: i32, %arg2: i32) -> (i32, i32) {
    %c0_i32 = arith.constant 0 : i32
    %c0_i32_0 = arith.constant 0 : i32
    return %c0_i32, %arg1 : i32, i32
  }
  func.func @transform_6(%arg0: i32, %arg1: i32, %arg2: i32) -> (i32, i32) {
    %c0_i32 = arith.constant 0 : i32
    return %arg0, %arg1 : i32, i32
  }
}

module attributes {stable_mosaic.version = 11 : i64} {
  func.func @_stack_reduce_kernel(%arg0: i32, %arg1: memref<4x8x256xbf16, #tpu.memory_space<vmem>>, %arg2: memref<8x256xbf16, #tpu.memory_space<vmem>>) attributes {dimension_semantics = [#tpu.dimension_semantics<parallel>], iteration_bounds = array<i64: 1>, scalar_prefetch = 0 : i64, scratch_operands = 0 : i64, tpu.core_type = #tpu.core_type<tc>, window_params = [{transform_indices = @transform_0, window_bounds = array<i64: 4, 8, 256>}, {transform_indices = @transform_1, window_bounds = array<i64: 8, 256>}]} {
    %c0 = arith.constant 0 : index
    %c0_0 = arith.constant 0 : index
    %c0_1 = arith.constant 0 : index
    %0 = vector.load %arg1[%c0, %c0_0, %c0_1] : memref<4x8x256xbf16, #tpu.memory_space<vmem>>, vector<4x8x256xbf16>
    %1 = arith.extf %0 : vector<4x8x256xbf16> to vector<4x8x256xf32>
    %cst = arith.constant dense<0.000000e+00> : vector<8x256xf32>
    %2 = vector.multi_reduction <add>, %1, %cst [0] : vector<4x8x256xf32> to vector<8x256xf32>
    %cst_2 = arith.constant 2.500000e-01 : f32
    %3 = vector.broadcast %cst_2 : f32 to vector<8x256xf32>
    %4 = arith.mulf %2, %3 : vector<8x256xf32>
    %5 = arith.truncf %4 : vector<8x256xf32> to vector<8x256xbf16>
    %c0_3 = arith.constant 0 : index
    %c0_4 = arith.constant 0 : index
    %6 = vector.load %arg2[%c0_3, %c0_4] : memref<8x256xbf16, #tpu.memory_space<vmem>>, vector<8x256xbf16>
    tpu.vector_store %arg2[%c0_3, %c0_4], %5 {strides = array<i32>} : memref<8x256xbf16, #tpu.memory_space<vmem>>, vector<8x256xbf16>,
    return
  }
  func.func @transform_0(%arg0: i32) -> (i32, i32, i32) {
    %c0_i32 = arith.constant 0 : i32
    %c0_i32_0 = arith.constant 0 : i32
    %c0_i32_1 = arith.constant 0 : i32
    return %c0_i32, %arg0, %c0_i32_0 : i32, i32, i32
  }
  func.func @transform_1(%arg0: i32) -> (i32, i32) {
    %c0_i32 = arith.constant 0 : i32
    %c0_i32_0 = arith.constant 0 : i32
    return %arg0, %c0_i32 : i32, i32
  }
}

module attributes {stable_mosaic.version = 11 : i64} {
  func.func @_fmm_kernel(%arg0: i32, %arg1: i32, %arg2: i32, %arg3: memref<8x128xbf16, #tpu.memory_space<vmem>>, %arg4: memref<128x128xbf16, #tpu.memory_space<vmem>>, %arg5: memref<1x128xf32, #tpu.memory_space<vmem>>, %arg6: memref<1x128xf32, #tpu.memory_space<vmem>>, %arg7: memref<1x128xf32, #tpu.memory_space<vmem>>, %arg8: memref<1x128xf32, #tpu.memory_space<vmem>>, %arg9: memref<8x128xbf16, #tpu.memory_space<vmem>>, %arg10: memref<8x128xf32, #tpu.memory_space<vmem>>) attributes {dimension_semantics = [#tpu.dimension_semantics<parallel>, #tpu.dimension_semantics<parallel>, #tpu.dimension_semantics<arbitrary>], iteration_bounds = array<i64: 1, 3, 1>, scalar_prefetch = 0 : i64, scratch_operands = 1 : i64, tpu.core_type = #tpu.core_type<tc>, window_params = [{transform_indices = @transform_0, window_bounds = array<i64: 8, 128>}, {transform_indices = @transform_1, window_bounds = array<i64: 128, 128>}, {transform_indices = @transform_2, window_bounds = array<i64: 1, 128>}, {transform_indices = @transform_3, window_bounds = array<i64: 1, 128>}, {transform_indices = @transform_4, window_bounds = array<i64: 1, 128>}, {transform_indices = @transform_5, window_bounds = array<i64: 1, 128>}, {transform_indices = @transform_6, window_bounds = array<i64: 8, 128>}]} {
    %c0_i32 = arith.constant 0 : i32
    %0 = arith.cmpi eq, %arg2, %c0_i32 : i32
    %1 = arith.extui %0 : i1 to i32
    %c0_i32_0 = arith.constant 0 : i32
    %2 = arith.cmpi ne, %1, %c0_i32_0 : i32
    scf.if %2 {
      %cst_10 = arith.constant 0.000000e+00 : f32
      %12 = vector.broadcast %cst_10 : f32 to vector<8x128xf32>
      %c0_11 = arith.constant 0 : index
      %c0_12 = arith.constant 0 : index
      %13 = vector.load %arg10[%c0_11, %c0_12] : memref<8x128xf32, #tpu.memory_space<vmem>>, vector<8x128xf32>
      tpu.vector_store %arg10[%c0_11, %c0_12], %12 {strides = array<i32>} : memref<8x128xf32, #tpu.memory_space<vmem>>, vector<8x128xf32>,
    } else {
    }
    %c0 = arith.constant 0 : index
    %c0_1 = arith.constant 0 : index
    %3 = vector.load %arg3[%c0, %c0_1] : memref<8x128xbf16, #tpu.memory_space<vmem>>, vector<8x128xbf16>
    %c0_2 = arith.constant 0 : index
    %c0_3 = arith.constant 0 : index
    %4 = vector.load %arg10[%c0_2, %c0_3] : memref<8x128xf32, #tpu.memory_space<vmem>>, vector<8x128xf32>
    %c0_4 = arith.constant 0 : index
    %c0_5 = arith.constant 0 : index
    %5 = vector.load %arg4[%c0_4, %c0_5] : memref<128x128xbf16, #tpu.memory_space<vmem>>, vector<128x128xbf16>
    %cst = arith.constant dense<0.000000e+00> : vector<8x128xf32>
    %6 = tpu.matmul %3, %5, %cst {dimension_numbers = #tpu.dot_dimension_numbers<[1], [0], [0], [1], [0, 0, 1, 1], [], []>} : vector<8x128xbf16>, vector<128x128xbf16>, vector<8x128xf32> -> vector<8x128xf32>
    %7 = arith.addf %4, %6 : vector<8x128xf32>
    %c0_6 = arith.constant 0 : index
    %c0_7 = arith.constant 0 : index
    %8 = vector.load %arg10[%c0_6, %c0_7] : memref<8x128xf32, #tpu.memory_space<vmem>>, vector<8x128xf32>
    tpu.vector_store %arg10[%c0_6, %c0_7], %7 {strides = array<i32>} : memref<8x128xf32, #tpu.memory_space<vmem>>, vector<8x128xf32>,
    %c0_i32_8 = arith.constant 0 : i32
    %9 = arith.cmpi eq, %arg2, %c0_i32_8 : i32
    %10 = arith.extui %9 : i1 to i32
    %c0_i32_9 = arith.constant 0 : i32
    %11 = arith.cmpi ne, %10, %c0_i32_9 : i32
    scf.if %11 {
      %c0_10 = arith.constant 0 : index
      %c0_11 = arith.constant 0 : index
      %12 = vector.load %arg10[%c0_10, %c0_11] : memref<8x128xf32, #tpu.memory_space<vmem>>, vector<8x128xf32>
      %13 = arith.truncf %12 : vector<8x128xf32> to vector<8x128xbf16>
      %c0_12 = arith.constant 0 : index
      %c0_13 = arith.constant 0 : index
      %14 = vector.load %arg9[%c0_12, %c0_13] : memref<8x128xbf16, #tpu.memory_space<vmem>>, vector<8x128xbf16>
      tpu.vector_store %arg9[%c0_12, %c0_13], %13 {strides = array<i32>} : memref<8x128xbf16, #tpu.memory_space<vmem>>, vector<8x128xbf16>,
    } else {
    }
    return
  }
  func.func @transform_0(%arg0: i32, %arg1: i32, %arg2: i32) -> (i32, i32) {
    %c0_i32 = arith.constant 0 : i32
    return %arg0, %arg2 : i32, i32
  }
  func.func @transform_1(%arg0: i32, %arg1: i32, %arg2: i32) -> (i32, i32) {
    %c0_i32 = arith.constant 0 : i32
    return %arg2, %arg1 : i32, i32
  }
  func.func @transform_2(%arg0: i32, %arg1: i32, %arg2: i32) -> (i32, i32) {
    %c0_i32 = arith.constant 0 : i32
    %c0_i32_0 = arith.constant 0 : i32
    return %c0_i32, %arg2 : i32, i32
  }
  func.func @transform_3(%arg0: i32, %arg1: i32, %arg2: i32) -> (i32, i32) {
    %c0_i32 = arith.constant 0 : i32
    %c0_i32_0 = arith.constant 0 : i32
    return %c0_i32, %arg2 : i32, i32
  }
  func.func @transform_4(%arg0: i32, %arg1: i32, %arg2: i32) -> (i32, i32) {
    %c0_i32 = arith.constant 0 : i32
    %c0_i32_0 = arith.constant 0 : i32
    return %c0_i32, %arg1 : i32, i32
  }
  func.func @transform_5(%arg0: i32, %arg1: i32, %arg2: i32) -> (i32, i32) {
    %c0_i32 = arith.constant 0 : i32
    %c0_i32_0 = arith.constant 0 : i32
    return %c0_i32, %arg1 : i32, i32
  }
  func.func @transform_6(%arg0: i32, %arg1: i32, %arg2: i32) -> (i32, i32) {
    %c0_i32 = arith.constant 0 : i32
    return %arg0, %arg1 : i32, i32
  }
}

module attributes {stable_mosaic.version = 11 : i64} {
  func.func @_fmm_kernel(%arg0: i32, %arg1: i32, %arg2: i32, %arg3: memref<8x256xbf16, #tpu.memory_space<vmem>>, %arg4: memref<256x128xbf16, #tpu.memory_space<vmem>>, %arg5: memref<1x256xf32, #tpu.memory_space<vmem>>, %arg6: memref<1x256xf32, #tpu.memory_space<vmem>>, %arg7: memref<1x128xf32, #tpu.memory_space<vmem>>, %arg8: memref<1x128xf32, #tpu.memory_space<vmem>>, %arg9: memref<8x128xbf16, #tpu.memory_space<vmem>>, %arg10: memref<8x128xf32, #tpu.memory_space<vmem>>) attributes {dimension_semantics = [#tpu.dimension_semantics<parallel>, #tpu.dimension_semantics<parallel>, #tpu.dimension_semantics<arbitrary>], iteration_bounds = array<i64: 1, 1, 1>, scalar_prefetch = 0 : i64, scratch_operands = 1 : i64, tpu.core_type = #tpu.core_type<tc>, window_params = [{transform_indices = @transform_0, window_bounds = array<i64: 8, 256>}, {transform_indices = @transform_1, window_bounds = array<i64: 256, 128>}, {transform_indices = @transform_2, window_bounds = array<i64: 1, 256>}, {transform_indices = @transform_3, window_bounds = array<i64: 1, 256>}, {transform_indices = @transform_4, window_bounds = array<i64: 1, 128>}, {transform_indices = @transform_5, window_bounds = array<i64: 1, 128>}, {transform_indices = @transform_6, window_bounds = array<i64: 8, 128>}]} {
    %c0_i32 = arith.constant 0 : i32
    %0 = arith.cmpi eq, %arg2, %c0_i32 : i32
    %1 = arith.extui %0 : i1 to i32
    %c0_i32_0 = arith.constant 0 : i32
    %2 = arith.cmpi ne, %1, %c0_i32_0 : i32
    scf.if %2 {
      %cst_15 = arith.constant 0.000000e+00 : f32
      %22 = vector.broadcast %cst_15 : f32 to vector<8x128xf32>
      %c0_16 = arith.constant 0 : index
      %c0_17 = arith.constant 0 : index
      %23 = vector.load %arg10[%c0_16, %c0_17] : memref<8x128xf32, #tpu.memory_space<vmem>>, vector<8x128xf32>
      tpu.vector_store %arg10[%c0_16, %c0_17], %22 {strides = array<i32>} : memref<8x128xf32, #tpu.memory_space<vmem>>, vector<8x128xf32>,
    } else {
    }
    %c0 = arith.constant 0 : index
    %c0_1 = arith.constant 0 : index
    %3 = vector.load %arg3[%c0, %c0_1] : memref<8x256xbf16, #tpu.memory_space<vmem>>, vector<8x256xbf16>
    %4 = arith.extf %3 : vector<8x256xbf16> to vector<8x256xf32>
    %c0_2 = arith.constant 0 : index
    %c0_3 = arith.constant 0 : index
    %5 = vector.load %arg5[%c0_2, %c0_3] : memref<1x256xf32, #tpu.memory_space<vmem>>, vector<1x256xf32>
    %6 = vector.broadcast %5 : vector<1x256xf32> to vector<8x256xf32>
    %7 = arith.mulf %4, %6 : vector<8x256xf32>
    %c0_4 = arith.constant 0 : index
    %c0_5 = arith.constant 0 : index
    %8 = vector.load %arg6[%c0_4, %c0_5] : memref<1x256xf32, #tpu.memory_space<vmem>>, vector<1x256xf32>
    %9 = vector.broadcast %8 : vector<1x256xf32> to vector<8x256xf32>
    %10 = arith.addf %7, %9 : vector<8x256xf32>
    %cst = arith.constant 0.000000e+00 : f32
    %11 = vector.broadcast %cst : f32 to vector<8x256xf32>
    %12 = arith.maximumf %10, %11 : vector<8x256xf32>
    %c0_6 = arith.constant 0 : index
    %c0_7 = arith.constant 0 : index
    %13 = vector.load %arg10[%c0_6, %c0_7] : memref<8x128xf32, #tpu.memory_space<vmem>>, vector<8x128xf32>
    %14 = arith.truncf %12 : vector<8x256xf32> to vector<8x256xbf16>
    %c0_8 = arith.constant 0 : index
    %c0_9 = arith.constant 0 : index
    %15 = vector.load %arg4[%c0_8, %c0_9] : memref<256x128xbf16, #tpu.memory_space<vmem>>, vector<256x128xbf16>
    %cst_10 = arith.constant dense<0.000000e+00> : vector<8x128xf32>
    %16 = tpu.matmul %14, %15, %cst_10 {dimension_numbers = #tpu.dot_dimension_numbers<[1], [0], [0], [1], [0, 0, 1, 1], [], []>} : vector<8x256xbf16>, vector<256x128xbf16>, vector<8x128xf32> -> vector<8x128xf32>
    %17 = arith.addf %13, %16 : vector<8x128xf32>
    %c0_11 = arith.constant 0 : index
    %c0_12 = arith.constant 0 : index
    %18 = vector.load %arg10[%c0_11, %c0_12] : memref<8x128xf32, #tpu.memory_space<vmem>>, vector<8x128xf32>
    tpu.vector_store %arg10[%c0_11, %c0_12], %17 {strides = array<i32>} : memref<8x128xf32, #tpu.memory_space<vmem>>, vector<8x128xf32>,
    %c0_i32_13 = arith.constant 0 : i32
    %19 = arith.cmpi eq, %arg2, %c0_i32_13 : i32
    %20 = arith.extui %19 : i1 to i32
    %c0_i32_14 = arith.constant 0 : i32
    %21 = arith.cmpi ne, %20, %c0_i32_14 : i32
    scf.if %21 {
      %c0_15 = arith.constant 0 : index
      %c0_16 = arith.constant 0 : index
      %22 = vector.load %arg10[%c0_15, %c0_16] : memref<8x128xf32, #tpu.memory_space<vmem>>, vector<8x128xf32>
      %c0_17 = arith.constant 0 : index
      %c0_18 = arith.constant 0 : index
      %23 = vector.load %arg7[%c0_17, %c0_18] : memref<1x128xf32, #tpu.memory_space<vmem>>, vector<1x128xf32>
      %24 = vector.broadcast %23 : vector<1x128xf32> to vector<8x128xf32>
      %25 = arith.mulf %22, %24 : vector<8x128xf32>
      %c0_19 = arith.constant 0 : index
      %c0_20 = arith.constant 0 : index
      %26 = vector.load %arg8[%c0_19, %c0_20] : memref<1x128xf32, #tpu.memory_space<vmem>>, vector<1x128xf32>
      %27 = vector.broadcast %26 : vector<1x128xf32> to vector<8x128xf32>
      %28 = arith.addf %25, %27 : vector<8x128xf32>
      %cst_21 = arith.constant 0.000000e+00 : f32
      %29 = vector.broadcast %cst_21 : f32 to vector<8x128xf32>
      %30 = arith.maximumf %28, %29 : vector<8x128xf32>
      %31 = arith.truncf %30 : vector<8x128xf32> to vector<8x128xbf16>
      %c0_22 = arith.constant 0 : index
      %c0_23 = arith.constant 0 : index
      %32 = vector.load %arg9[%c0_22, %c0_23] : memref<8x128xbf16, #tpu.memory_space<vmem>>, vector<8x128xbf16>
      tpu.vector_store %arg9[%c0_22, %c0_23], %31 {strides = array<i32>} : memref<8x128xbf16, #tpu.memory_space<vmem>>, vector<8x128xbf16>,
    } else {
    }
    return
  }
  func.func @transform_0(%arg0: i32, %arg1: i32, %arg2: i32) -> (i32, i32) {
    %c0_i32 = arith.constant 0 : i32
    return %arg0, %arg2 : i32, i32
  }
  func.func @transform_1(%arg0: i32, %arg1: i32, %arg2: i32) -> (i32, i32) {
    %c0_i32 = arith.constant 0 : i32
    return %arg2, %arg1 : i32, i32
  }
  func.func @transform_2(%arg0: i32, %arg1: i32, %arg2: i32) -> (i32, i32) {
    %c0_i32 = arith.constant 0 : i32
    %c0_i32_0 = arith.constant 0 : i32
    return %c0_i32, %arg2 : i32, i32
  }
  func.func @transform_3(%arg0: i32, %arg1: i32, %arg2: i32) -> (i32, i32) {
    %c0_i32 = arith.constant 0 : i32
    %c0_i32_0 = arith.constant 0 : i32
    return %c0_i32, %arg2 : i32, i32
  }
  func.func @transform_4(%arg0: i32, %arg1: i32, %arg2: i32) -> (i32, i32) {
    %c0_i32 = arith.constant 0 : i32
    %c0_i32_0 = arith.constant 0 : i32
    return %c0_i32, %arg1 : i32, i32
  }
  func.func @transform_5(%arg0: i32, %arg1: i32, %arg2: i32) -> (i32, i32) {
    %c0_i32 = arith.constant 0 : i32
    %c0_i32_0 = arith.constant 0 : i32
    return %c0_i32, %arg1 : i32, i32
  }
  func.func @transform_6(%arg0: i32, %arg1: i32, %arg2: i32) -> (i32, i32) {
    %c0_i32 = arith.constant 0 : i32
    return %arg0, %arg1 : i32, i32
  }
}

module attributes {stable_mosaic.version = 11 : i64} {
  func.func @_fmm_kernel(%arg0: i32, %arg1: i32, %arg2: i32, %arg3: memref<8x128xbf16, #tpu.memory_space<vmem>>, %arg4: memref<128x128xbf16, #tpu.memory_space<vmem>>, %arg5: memref<1x128xf32, #tpu.memory_space<vmem>>, %arg6: memref<1x128xf32, #tpu.memory_space<vmem>>, %arg7: memref<1x128xf32, #tpu.memory_space<vmem>>, %arg8: memref<1x128xf32, #tpu.memory_space<vmem>>, %arg9: memref<8x128xbf16, #tpu.memory_space<vmem>>, %arg10: memref<8x128xf32, #tpu.memory_space<vmem>>) attributes {dimension_semantics = [#tpu.dimension_semantics<parallel>, #tpu.dimension_semantics<parallel>, #tpu.dimension_semantics<arbitrary>], iteration_bounds = array<i64: 1, 1, 3>, scalar_prefetch = 0 : i64, scratch_operands = 1 : i64, tpu.core_type = #tpu.core_type<tc>, window_params = [{transform_indices = @transform_0, window_bounds = array<i64: 8, 128>}, {transform_indices = @transform_1, window_bounds = array<i64: 128, 128>}, {transform_indices = @transform_2, window_bounds = array<i64: 1, 128>}, {transform_indices = @transform_3, window_bounds = array<i64: 1, 128>}, {transform_indices = @transform_4, window_bounds = array<i64: 1, 128>}, {transform_indices = @transform_5, window_bounds = array<i64: 1, 128>}, {transform_indices = @transform_6, window_bounds = array<i64: 8, 128>}]} {
    %c0_i32 = arith.constant 0 : i32
    %0 = arith.cmpi eq, %arg2, %c0_i32 : i32
    %1 = arith.extui %0 : i1 to i32
    %c0_i32_0 = arith.constant 0 : i32
    %2 = arith.cmpi ne, %1, %c0_i32_0 : i32
    scf.if %2 {
      %cst_14 = arith.constant 0.000000e+00 : f32
      %22 = vector.broadcast %cst_14 : f32 to vector<8x128xf32>
      %c0_15 = arith.constant 0 : index
      %c0_16 = arith.constant 0 : index
      %23 = vector.load %arg10[%c0_15, %c0_16] : memref<8x128xf32, #tpu.memory_space<vmem>>, vector<8x128xf32>
      tpu.vector_store %arg10[%c0_15, %c0_16], %22 {strides = array<i32>} : memref<8x128xf32, #tpu.memory_space<vmem>>, vector<8x128xf32>,
    } else {
    }
    %c0 = arith.constant 0 : index
    %c0_1 = arith.constant 0 : index
    %3 = vector.load %arg3[%c0, %c0_1] : memref<8x128xbf16, #tpu.memory_space<vmem>>, vector<8x128xbf16>
    %4 = arith.extf %3 : vector<8x128xbf16> to vector<8x128xf32>
    %c0_2 = arith.constant 0 : index
    %c0_3 = arith.constant 0 : index
    %5 = vector.load %arg5[%c0_2, %c0_3] : memref<1x128xf32, #tpu.memory_space<vmem>>, vector<1x128xf32>
    %6 = vector.broadcast %5 : vector<1x128xf32> to vector<8x128xf32>
    %7 = arith.mulf %4, %6 : vector<8x128xf32>
    %c0_4 = arith.constant 0 : index
    %c0_5 = arith.constant 0 : index
    %8 = vector.load %arg6[%c0_4, %c0_5] : memref<1x128xf32, #tpu.memory_space<vmem>>, vector<1x128xf32>
    %9 = vector.broadcast %8 : vector<1x128xf32> to vector<8x128xf32>
    %10 = arith.addf %7, %9 : vector<8x128xf32>
    %cst = arith.constant 0.000000e+00 : f32
    %11 = vector.broadcast %cst : f32 to vector<8x128xf32>
    %12 = arith.maximumf %10, %11 : vector<8x128xf32>
    %c0_6 = arith.constant 0 : index
    %c0_7 = arith.constant 0 : index
    %13 = vector.load %arg10[%c0_6, %c0_7] : memref<8x128xf32, #tpu.memory_space<vmem>>, vector<8x128xf32>
    %14 = arith.truncf %12 : vector<8x128xf32> to vector<8x128xbf16>
    %c0_8 = arith.constant 0 : index
    %c0_9 = arith.constant 0 : index
    %15 = vector.load %arg4[%c0_8, %c0_9] : memref<128x128xbf16, #tpu.memory_space<vmem>>, vector<128x128xbf16>
    %cst_10 = arith.constant dense<0.000000e+00> : vector<8x128xf32>
    %16 = tpu.matmul %14, %15, %cst_10 {dimension_numbers = #tpu.dot_dimension_numbers<[1], [0], [0], [1], [0, 0, 1, 1], [], []>} : vector<8x128xbf16>, vector<128x128xbf16>, vector<8x128xf32> -> vector<8x128xf32>
    %17 = arith.addf %13, %16 : vector<8x128xf32>
    %c0_11 = arith.constant 0 : index
    %c0_12 = arith.constant 0 : index
    %18 = vector.load %arg10[%c0_11, %c0_12] : memref<8x128xf32, #tpu.memory_space<vmem>>, vector<8x128xf32>
    tpu.vector_store %arg10[%c0_11, %c0_12], %17 {strides = array<i32>} : memref<8x128xf32, #tpu.memory_space<vmem>>, vector<8x128xf32>,
    %c2_i32 = arith.constant 2 : i32
    %19 = arith.cmpi eq, %arg2, %c2_i32 : i32
    %20 = arith.extui %19 : i1 to i32
    %c0_i32_13 = arith.constant 0 : i32
    %21 = arith.cmpi ne, %20, %c0_i32_13 : i32
    scf.if %21 {
      %c0_14 = arith.constant 0 : index
      %c0_15 = arith.constant 0 : index
      %22 = vector.load %arg10[%c0_14, %c0_15] : memref<8x128xf32, #tpu.memory_space<vmem>>, vector<8x128xf32>
      %c0_16 = arith.constant 0 : index
      %c0_17 = arith.constant 0 : index
      %23 = vector.load %arg7[%c0_16, %c0_17] : memref<1x128xf32, #tpu.memory_space<vmem>>, vector<1x128xf32>
      %24 = vector.broadcast %23 : vector<1x128xf32> to vector<8x128xf32>
      %25 = arith.mulf %22, %24 : vector<8x128xf32>
      %c0_18 = arith.constant 0 : index
      %c0_19 = arith.constant 0 : index
      %26 = vector.load %arg8[%c0_18, %c0_19] : memref<1x128xf32, #tpu.memory_space<vmem>>, vector<1x128xf32>
      %27 = vector.broadcast %26 : vector<1x128xf32> to vector<8x128xf32>
      %28 = arith.addf %25, %27 : vector<8x128xf32>
      %cst_20 = arith.constant 0.000000e+00 : f32
      %29 = vector.broadcast %cst_20 : f32 to vector<8x128xf32>
      %30 = arith.maximumf %28, %29 : vector<8x128xf32>
      %31 = arith.truncf %30 : vector<8x128xf32> to vector<8x128xbf16>
      %c0_21 = arith.constant 0 : index
      %c0_22 = arith.constant 0 : index
      %32 = vector.load %arg9[%c0_21, %c0_22] : memref<8x128xbf16, #tpu.memory_space<vmem>>, vector<8x128xbf16>
      tpu.vector_store %arg9[%c0_21, %c0_22], %31 {strides = array<i32>} : memref<8x128xbf16, #tpu.memory_space<vmem>>, vector<8x128xbf16>,
    } else {
    }
    return
  }
  func.func @transform_0(%arg0: i32, %arg1: i32, %arg2: i32) -> (i32, i32) {
    %c0_i32 = arith.constant 0 : i32
    return %arg0, %arg2 : i32, i32
  }
  func.func @transform_1(%arg0: i32, %arg1: i32, %arg2: i32) -> (i32, i32) {
    %c0_i32 = arith.constant 0 : i32
    return %arg2, %arg1 : i32, i32
  }
  func.func @transform_2(%arg0: i32, %arg1: i32, %arg2: i32) -> (i32, i32) {
    %c0_i32 = arith.constant 0 : i32
    %c0_i32_0 = arith.constant 0 : i32
    return %c0_i32, %arg2 : i32, i32
  }
  func.func @transform_3(%arg0: i32, %arg1: i32, %arg2: i32) -> (i32, i32) {
    %c0_i32 = arith.constant 0 : i32
    %c0_i32_0 = arith.constant 0 : i32
    return %c0_i32, %arg2 : i32, i32
  }
  func.func @transform_4(%arg0: i32, %arg1: i32, %arg2: i32) -> (i32, i32) {
    %c0_i32 = arith.constant 0 : i32
    %c0_i32_0 = arith.constant 0 : i32
    return %c0_i32, %arg1 : i32, i32
  }
  func.func @transform_5(%arg0: i32, %arg1: i32, %arg2: i32) -> (i32, i32) {
    %c0_i32 = arith.constant 0 : i32
    %c0_i32_0 = arith.constant 0 : i32
    return %c0_i32, %arg1 : i32, i32
  }
  func.func @transform_6(%arg0: i32, %arg1: i32, %arg2: i32) -> (i32, i32) {
    %c0_i32 = arith.constant 0 : i32
    return %arg0, %arg1 : i32, i32
  }
}

module attributes {stable_mosaic.version = 11 : i64} {
  func.func @_fmm_kernel(%arg0: i32, %arg1: i32, %arg2: i32, %arg3: memref<8x512xbf16, #tpu.memory_space<vmem>>, %arg4: memref<512x128xbf16, #tpu.memory_space<vmem>>, %arg5: memref<1x512xf32, #tpu.memory_space<vmem>>, %arg6: memref<1x512xf32, #tpu.memory_space<vmem>>, %arg7: memref<1x128xf32, #tpu.memory_space<vmem>>, %arg8: memref<1x128xf32, #tpu.memory_space<vmem>>, %arg9: memref<8x128xbf16, #tpu.memory_space<vmem>>, %arg10: memref<8x128xf32, #tpu.memory_space<vmem>>) attributes {dimension_semantics = [#tpu.dimension_semantics<parallel>, #tpu.dimension_semantics<parallel>, #tpu.dimension_semantics<arbitrary>], iteration_bounds = array<i64: 1, 1, 1>, scalar_prefetch = 0 : i64, scratch_operands = 1 : i64, tpu.core_type = #tpu.core_type<tc>, window_params = [{transform_indices = @transform_0, window_bounds = array<i64: 8, 512>}, {transform_indices = @transform_1, window_bounds = array<i64: 512, 128>}, {transform_indices = @transform_2, window_bounds = array<i64: 1, 512>}, {transform_indices = @transform_3, window_bounds = array<i64: 1, 512>}, {transform_indices = @transform_4, window_bounds = array<i64: 1, 128>}, {transform_indices = @transform_5, window_bounds = array<i64: 1, 128>}, {transform_indices = @transform_6, window_bounds = array<i64: 8, 128>}]} {
    %c0_i32 = arith.constant 0 : i32
    %0 = arith.cmpi eq, %arg2, %c0_i32 : i32
    %1 = arith.extui %0 : i1 to i32
    %c0_i32_0 = arith.constant 0 : i32
    %2 = arith.cmpi ne, %1, %c0_i32_0 : i32
    scf.if %2 {
      %cst_15 = arith.constant 0.000000e+00 : f32
      %22 = vector.broadcast %cst_15 : f32 to vector<8x128xf32>
      %c0_16 = arith.constant 0 : index
      %c0_17 = arith.constant 0 : index
      %23 = vector.load %arg10[%c0_16, %c0_17] : memref<8x128xf32, #tpu.memory_space<vmem>>, vector<8x128xf32>
      tpu.vector_store %arg10[%c0_16, %c0_17], %22 {strides = array<i32>} : memref<8x128xf32, #tpu.memory_space<vmem>>, vector<8x128xf32>,
    } else {
    }
    %c0 = arith.constant 0 : index
    %c0_1 = arith.constant 0 : index
    %3 = vector.load %arg3[%c0, %c0_1] : memref<8x512xbf16, #tpu.memory_space<vmem>>, vector<8x512xbf16>
    %4 = arith.extf %3 : vector<8x512xbf16> to vector<8x512xf32>
    %c0_2 = arith.constant 0 : index
    %c0_3 = arith.constant 0 : index
    %5 = vector.load %arg5[%c0_2, %c0_3] : memref<1x512xf32, #tpu.memory_space<vmem>>, vector<1x512xf32>
    %6 = vector.broadcast %5 : vector<1x512xf32> to vector<8x512xf32>
    %7 = arith.mulf %4, %6 : vector<8x512xf32>
    %c0_4 = arith.constant 0 : index
    %c0_5 = arith.constant 0 : index
    %8 = vector.load %arg6[%c0_4, %c0_5] : memref<1x512xf32, #tpu.memory_space<vmem>>, vector<1x512xf32>
    %9 = vector.broadcast %8 : vector<1x512xf32> to vector<8x512xf32>
    %10 = arith.addf %7, %9 : vector<8x512xf32>
    %cst = arith.constant 0.000000e+00 : f32
    %11 = vector.broadcast %cst : f32 to vector<8x512xf32>
    %12 = arith.maximumf %10, %11 : vector<8x512xf32>
    %c0_6 = arith.constant 0 : index
    %c0_7 = arith.constant 0 : index
    %13 = vector.load %arg10[%c0_6, %c0_7] : memref<8x128xf32, #tpu.memory_space<vmem>>, vector<8x128xf32>
    %14 = arith.truncf %12 : vector<8x512xf32> to vector<8x512xbf16>
    %c0_8 = arith.constant 0 : index
    %c0_9 = arith.constant 0 : index
    %15 = vector.load %arg4[%c0_8, %c0_9] : memref<512x128xbf16, #tpu.memory_space<vmem>>, vector<512x128xbf16>
    %cst_10 = arith.constant dense<0.000000e+00> : vector<8x128xf32>
    %16 = tpu.matmul %14, %15, %cst_10 {dimension_numbers = #tpu.dot_dimension_numbers<[1], [0], [0], [1], [0, 0, 1, 1], [], []>} : vector<8x512xbf16>, vector<512x128xbf16>, vector<8x128xf32> -> vector<8x128xf32>
    %17 = arith.addf %13, %16 : vector<8x128xf32>
    %c0_11 = arith.constant 0 : index
    %c0_12 = arith.constant 0 : index
    %18 = vector.load %arg10[%c0_11, %c0_12] : memref<8x128xf32, #tpu.memory_space<vmem>>, vector<8x128xf32>
    tpu.vector_store %arg10[%c0_11, %c0_12], %17 {strides = array<i32>} : memref<8x128xf32, #tpu.memory_space<vmem>>, vector<8x128xf32>,
    %c0_i32_13 = arith.constant 0 : i32
    %19 = arith.cmpi eq, %arg2, %c0_i32_13 : i32
    %20 = arith.extui %19 : i1 to i32
    %c0_i32_14 = arith.constant 0 : i32
    %21 = arith.cmpi ne, %20, %c0_i32_14 : i32
    scf.if %21 {
      %c0_15 = arith.constant 0 : index
      %c0_16 = arith.constant 0 : index
      %22 = vector.load %arg10[%c0_15, %c0_16] : memref<8x128xf32, #tpu.memory_space<vmem>>, vector<8x128xf32>
      %c0_17 = arith.constant 0 : index
      %c0_18 = arith.constant 0 : index
      %23 = vector.load %arg7[%c0_17, %c0_18] : memref<1x128xf32, #tpu.memory_space<vmem>>, vector<1x128xf32>
      %24 = vector.broadcast %23 : vector<1x128xf32> to vector<8x128xf32>
      %25 = arith.mulf %22, %24 : vector<8x128xf32>
      %c0_19 = arith.constant 0 : index
      %c0_20 = arith.constant 0 : index
      %26 = vector.load %arg8[%c0_19, %c0_20] : memref<1x128xf32, #tpu.memory_space<vmem>>, vector<1x128xf32>
      %27 = vector.broadcast %26 : vector<1x128xf32> to vector<8x128xf32>
      %28 = arith.addf %25, %27 : vector<8x128xf32>
      %cst_21 = arith.constant 0.000000e+00 : f32
      %29 = vector.broadcast %cst_21 : f32 to vector<8x128xf32>
      %30 = arith.maximumf %28, %29 : vector<8x128xf32>
      %31 = arith.truncf %30 : vector<8x128xf32> to vector<8x128xbf16>
      %c0_22 = arith.constant 0 : index
      %c0_23 = arith.constant 0 : index
      %32 = vector.load %arg9[%c0_22, %c0_23] : memref<8x128xbf16, #tpu.memory_space<vmem>>, vector<8x128xbf16>
      tpu.vector_store %arg9[%c0_22, %c0_23], %31 {strides = array<i32>} : memref<8x128xbf16, #tpu.memory_space<vmem>>, vector<8x128xbf16>,
    } else {
    }
    return
  }
  func.func @transform_0(%arg0: i32, %arg1: i32, %arg2: i32) -> (i32, i32) {
    %c0_i32 = arith.constant 0 : i32
    return %arg0, %arg2 : i32, i32
  }
  func.func @transform_1(%arg0: i32, %arg1: i32, %arg2: i32) -> (i32, i32) {
    %c0_i32 = arith.constant 0 : i32
    return %arg2, %arg1 : i32, i32
  }
  func.func @transform_2(%arg0: i32, %arg1: i32, %arg2: i32) -> (i32, i32) {
    %c0_i32 = arith.constant 0 : i32
    %c0_i32_0 = arith.constant 0 : i32
    return %c0_i32, %arg2 : i32, i32
  }
  func.func @transform_3(%arg0: i32, %arg1: i32, %arg2: i32) -> (i32, i32) {
    %c0_i32 = arith.constant 0 : i32
    %c0_i32_0 = arith.constant 0 : i32
    return %c0_i32, %arg2 : i32, i32
  }
  func.func @transform_4(%arg0: i32, %arg1: i32, %arg2: i32) -> (i32, i32) {
    %c0_i32 = arith.constant 0 : i32
    %c0_i32_0 = arith.constant 0 : i32
    return %c0_i32, %arg1 : i32, i32
  }
  func.func @transform_5(%arg0: i32, %arg1: i32, %arg2: i32) -> (i32, i32) {
    %c0_i32 = arith.constant 0 : i32
    %c0_i32_0 = arith.constant 0 : i32
    return %c0_i32, %arg1 : i32, i32
  }
  func.func @transform_6(%arg0: i32, %arg1: i32, %arg2: i32) -> (i32, i32) {
    %c0_i32 = arith.constant 0 : i32
    return %arg0, %arg1 : i32, i32
  }
}

module attributes {stable_mosaic.version = 11 : i64} {
  func.func @_fmm_kernel(%arg0: i32, %arg1: i32, %arg2: i32, %arg3: memref<8x128xbf16, #tpu.memory_space<vmem>>, %arg4: memref<128x128xbf16, #tpu.memory_space<vmem>>, %arg5: memref<1x128xf32, #tpu.memory_space<vmem>>, %arg6: memref<1x128xf32, #tpu.memory_space<vmem>>, %arg7: memref<1x128xf32, #tpu.memory_space<vmem>>, %arg8: memref<1x128xf32, #tpu.memory_space<vmem>>, %arg9: memref<8x128xbf16, #tpu.memory_space<vmem>>, %arg10: memref<8x128xf32, #tpu.memory_space<vmem>>) attributes {dimension_semantics = [#tpu.dimension_semantics<parallel>, #tpu.dimension_semantics<parallel>, #tpu.dimension_semantics<arbitrary>], iteration_bounds = array<i64: 1, 1, 5>, scalar_prefetch = 0 : i64, scratch_operands = 1 : i64, tpu.core_type = #tpu.core_type<tc>, window_params = [{transform_indices = @transform_0, window_bounds = array<i64: 8, 128>}, {transform_indices = @transform_1, window_bounds = array<i64: 128, 128>}, {transform_indices = @transform_2, window_bounds = array<i64: 1, 128>}, {transform_indices = @transform_3, window_bounds = array<i64: 1, 128>}, {transform_indices = @transform_4, window_bounds = array<i64: 1, 128>}, {transform_indices = @transform_5, window_bounds = array<i64: 1, 128>}, {transform_indices = @transform_6, window_bounds = array<i64: 8, 128>}]} {
    %c0_i32 = arith.constant 0 : i32
    %0 = arith.cmpi eq, %arg2, %c0_i32 : i32
    %1 = arith.extui %0 : i1 to i32
    %c0_i32_0 = arith.constant 0 : i32
    %2 = arith.cmpi ne, %1, %c0_i32_0 : i32
    scf.if %2 {
      %cst_14 = arith.constant 0.000000e+00 : f32
      %22 = vector.broadcast %cst_14 : f32 to vector<8x128xf32>
      %c0_15 = arith.constant 0 : index
      %c0_16 = arith.constant 0 : index
      %23 = vector.load %arg10[%c0_15, %c0_16] : memref<8x128xf32, #tpu.memory_space<vmem>>, vector<8x128xf32>
      tpu.vector_store %arg10[%c0_15, %c0_16], %22 {strides = array<i32>} : memref<8x128xf32, #tpu.memory_space<vmem>>, vector<8x128xf32>,
    } else {
    }
    %c0 = arith.constant 0 : index
    %c0_1 = arith.constant 0 : index
    %3 = vector.load %arg3[%c0, %c0_1] : memref<8x128xbf16, #tpu.memory_space<vmem>>, vector<8x128xbf16>
    %4 = arith.extf %3 : vector<8x128xbf16> to vector<8x128xf32>
    %c0_2 = arith.constant 0 : index
    %c0_3 = arith.constant 0 : index
    %5 = vector.load %arg5[%c0_2, %c0_3] : memref<1x128xf32, #tpu.memory_space<vmem>>, vector<1x128xf32>
    %6 = vector.broadcast %5 : vector<1x128xf32> to vector<8x128xf32>
    %7 = arith.mulf %4, %6 : vector<8x128xf32>
    %c0_4 = arith.constant 0 : index
    %c0_5 = arith.constant 0 : index
    %8 = vector.load %arg6[%c0_4, %c0_5] : memref<1x128xf32, #tpu.memory_space<vmem>>, vector<1x128xf32>
    %9 = vector.broadcast %8 : vector<1x128xf32> to vector<8x128xf32>
    %10 = arith.addf %7, %9 : vector<8x128xf32>
    %cst = arith.constant 0.000000e+00 : f32
    %11 = vector.broadcast %cst : f32 to vector<8x128xf32>
    %12 = arith.maximumf %10, %11 : vector<8x128xf32>
    %c0_6 = arith.constant 0 : index
    %c0_7 = arith.constant 0 : index
    %13 = vector.load %arg10[%c0_6, %c0_7] : memref<8x128xf32, #tpu.memory_space<vmem>>, vector<8x128xf32>
    %14 = arith.truncf %12 : vector<8x128xf32> to vector<8x128xbf16>
    %c0_8 = arith.constant 0 : index
    %c0_9 = arith.constant 0 : index
    %15 = vector.load %arg4[%c0_8, %c0_9] : memref<128x128xbf16, #tpu.memory_space<vmem>>, vector<128x128xbf16>
    %cst_10 = arith.constant dense<0.000000e+00> : vector<8x128xf32>
    %16 = tpu.matmul %14, %15, %cst_10 {dimension_numbers = #tpu.dot_dimension_numbers<[1], [0], [0], [1], [0, 0, 1, 1], [], []>} : vector<8x128xbf16>, vector<128x128xbf16>, vector<8x128xf32> -> vector<8x128xf32>
    %17 = arith.addf %13, %16 : vector<8x128xf32>
    %c0_11 = arith.constant 0 : index
    %c0_12 = arith.constant 0 : index
    %18 = vector.load %arg10[%c0_11, %c0_12] : memref<8x128xf32, #tpu.memory_space<vmem>>, vector<8x128xf32>
    tpu.vector_store %arg10[%c0_11, %c0_12], %17 {strides = array<i32>} : memref<8x128xf32, #tpu.memory_space<vmem>>, vector<8x128xf32>,
    %c4_i32 = arith.constant 4 : i32
    %19 = arith.cmpi eq, %arg2, %c4_i32 : i32
    %20 = arith.extui %19 : i1 to i32
    %c0_i32_13 = arith.constant 0 : i32
    %21 = arith.cmpi ne, %20, %c0_i32_13 : i32
    scf.if %21 {
      %c0_14 = arith.constant 0 : index
      %c0_15 = arith.constant 0 : index
      %22 = vector.load %arg10[%c0_14, %c0_15] : memref<8x128xf32, #tpu.memory_space<vmem>>, vector<8x128xf32>
      %c0_16 = arith.constant 0 : index
      %c0_17 = arith.constant 0 : index
      %23 = vector.load %arg7[%c0_16, %c0_17] : memref<1x128xf32, #tpu.memory_space<vmem>>, vector<1x128xf32>
      %24 = vector.broadcast %23 : vector<1x128xf32> to vector<8x128xf32>
      %25 = arith.mulf %22, %24 : vector<8x128xf32>
      %c0_18 = arith.constant 0 : index
      %c0_19 = arith.constant 0 : index
      %26 = vector.load %arg8[%c0_18, %c0_19] : memref<1x128xf32, #tpu.memory_space<vmem>>, vector<1x128xf32>
      %27 = vector.broadcast %26 : vector<1x128xf32> to vector<8x128xf32>
      %28 = arith.addf %25, %27 : vector<8x128xf32>
      %cst_20 = arith.constant 0.000000e+00 : f32
      %29 = vector.broadcast %cst_20 : f32 to vector<8x128xf32>
      %30 = arith.maximumf %28, %29 : vector<8x128xf32>
      %31 = arith.truncf %30 : vector<8x128xf32> to vector<8x128xbf16>
      %c0_21 = arith.constant 0 : index
      %c0_22 = arith.constant 0 : index
      %32 = vector.load %arg9[%c0_21, %c0_22] : memref<8x128xbf16, #tpu.memory_space<vmem>>, vector<8x128xbf16>
      tpu.vector_store %arg9[%c0_21, %c0_22], %31 {strides = array<i32>} : memref<8x128xbf16, #tpu.memory_space<vmem>>, vector<8x128xbf16>,
    } else {
    }
    return
  }
  func.func @transform_0(%arg0: i32, %arg1: i32, %arg2: i32) -> (i32, i32) {
    %c0_i32 = arith.constant 0 : i32
    return %arg0, %arg2 : i32, i32
  }
  func.func @transform_1(%arg0: i32, %arg1: i32, %arg2: i32) -> (i32, i32) {
    %c0_i32 = arith.constant 0 : i32
    return %arg2, %arg1 : i32, i32
  }
  func.func @transform_2(%arg0: i32, %arg1: i32, %arg2: i32) -> (i32, i32) {
    %c0_i32 = arith.constant 0 : i32
    %c0_i32_0 = arith.constant 0 : i32
    return %c0_i32, %arg2 : i32, i32
  }
  func.func @transform_3(%arg0: i32, %arg1: i32, %arg2: i32) -> (i32, i32) {
    %c0_i32 = arith.constant 0 : i32
    %c0_i32_0 = arith.constant 0 : i32
    return %c0_i32, %arg2 : i32, i32
  }
  func.func @transform_4(%arg0: i32, %arg1: i32, %arg2: i32) -> (i32, i32) {
    %c0_i32 = arith.constant 0 : i32
    %c0_i32_0 = arith.constant 0 : i32
    return %c0_i32, %arg1 : i32, i32
  }
  func.func @transform_5(%arg0: i32, %arg1: i32, %arg2: i32) -> (i32, i32) {
    %c0_i32 = arith.constant 0 : i32
    %c0_i32_0 = arith.constant 0 : i32
    return %c0_i32, %arg1 : i32, i32
  }
  func.func @transform_6(%arg0: i32, %arg1: i32, %arg2: i32) -> (i32, i32) {
    %c0_i32 = arith.constant 0 : i32
    return %arg0, %arg1 : i32, i32
  }
}

module attributes {stable_mosaic.version = 11 : i64} {
  func.func @_fmm_kernel(%arg0: i32, %arg1: i32, %arg2: i32, %arg3: memref<8x256xbf16, #tpu.memory_space<vmem>>, %arg4: memref<256x128xbf16, #tpu.memory_space<vmem>>, %arg5: memref<1x256xf32, #tpu.memory_space<vmem>>, %arg6: memref<1x256xf32, #tpu.memory_space<vmem>>, %arg7: memref<1x128xf32, #tpu.memory_space<vmem>>, %arg8: memref<1x128xf32, #tpu.memory_space<vmem>>, %arg9: memref<8x128xbf16, #tpu.memory_space<vmem>>, %arg10: memref<8x128xf32, #tpu.memory_space<vmem>>) attributes {dimension_semantics = [#tpu.dimension_semantics<parallel>, #tpu.dimension_semantics<parallel>, #tpu.dimension_semantics<arbitrary>], iteration_bounds = array<i64: 1, 1, 3>, scalar_prefetch = 0 : i64, scratch_operands = 1 : i64, tpu.core_type = #tpu.core_type<tc>, window_params = [{transform_indices = @transform_0, window_bounds = array<i64: 8, 256>}, {transform_indices = @transform_1, window_bounds = array<i64: 256, 128>}, {transform_indices = @transform_2, window_bounds = array<i64: 1, 256>}, {transform_indices = @transform_3, window_bounds = array<i64: 1, 256>}, {transform_indices = @transform_4, window_bounds = array<i64: 1, 128>}, {transform_indices = @transform_5, window_bounds = array<i64: 1, 128>}, {transform_indices = @transform_6, window_bounds = array<i64: 8, 128>}]} {
    %c0_i32 = arith.constant 0 : i32
    %0 = arith.cmpi eq, %arg2, %c0_i32 : i32
    %1 = arith.extui %0 : i1 to i32
    %c0_i32_0 = arith.constant 0 : i32
    %2 = arith.cmpi ne, %1, %c0_i32_0 : i32
    scf.if %2 {
      %cst_14 = arith.constant 0.000000e+00 : f32
      %22 = vector.broadcast %cst_14 : f32 to vector<8x128xf32>
      %c0_15 = arith.constant 0 : index
      %c0_16 = arith.constant 0 : index
      %23 = vector.load %arg10[%c0_15, %c0_16] : memref<8x128xf32, #tpu.memory_space<vmem>>, vector<8x128xf32>
      tpu.vector_store %arg10[%c0_15, %c0_16], %22 {strides = array<i32>} : memref<8x128xf32, #tpu.memory_space<vmem>>, vector<8x128xf32>,
    } else {
    }
    %c0 = arith.constant 0 : index
    %c0_1 = arith.constant 0 : index
    %3 = vector.load %arg3[%c0, %c0_1] : memref<8x256xbf16, #tpu.memory_space<vmem>>, vector<8x256xbf16>
    %4 = arith.extf %3 : vector<8x256xbf16> to vector<8x256xf32>
    %c0_2 = arith.constant 0 : index
    %c0_3 = arith.constant 0 : index
    %5 = vector.load %arg5[%c0_2, %c0_3] : memref<1x256xf32, #tpu.memory_space<vmem>>, vector<1x256xf32>
    %6 = vector.broadcast %5 : vector<1x256xf32> to vector<8x256xf32>
    %7 = arith.mulf %4, %6 : vector<8x256xf32>
    %c0_4 = arith.constant 0 : index
    %c0_5 = arith.constant 0 : index
    %8 = vector.load %arg6[%c0_4, %c0_5] : memref<1x256xf32, #tpu.memory_space<vmem>>, vector<1x256xf32>
    %9 = vector.broadcast %8 : vector<1x256xf32> to vector<8x256xf32>
    %10 = arith.addf %7, %9 : vector<8x256xf32>
    %cst = arith.constant 0.000000e+00 : f32
    %11 = vector.broadcast %cst : f32 to vector<8x256xf32>
    %12 = arith.maximumf %10, %11 : vector<8x256xf32>
    %c0_6 = arith.constant 0 : index
    %c0_7 = arith.constant 0 : index
    %13 = vector.load %arg10[%c0_6, %c0_7] : memref<8x128xf32, #tpu.memory_space<vmem>>, vector<8x128xf32>
    %14 = arith.truncf %12 : vector<8x256xf32> to vector<8x256xbf16>
    %c0_8 = arith.constant 0 : index
    %c0_9 = arith.constant 0 : index
    %15 = vector.load %arg4[%c0_8, %c0_9] : memref<256x128xbf16, #tpu.memory_space<vmem>>, vector<256x128xbf16>
    %cst_10 = arith.constant dense<0.000000e+00> : vector<8x128xf32>
    %16 = tpu.matmul %14, %15, %cst_10 {dimension_numbers = #tpu.dot_dimension_numbers<[1], [0], [0], [1], [0, 0, 1, 1], [], []>} : vector<8x256xbf16>, vector<256x128xbf16>, vector<8x128xf32> -> vector<8x128xf32>
    %17 = arith.addf %13, %16 : vector<8x128xf32>
    %c0_11 = arith.constant 0 : index
    %c0_12 = arith.constant 0 : index
    %18 = vector.load %arg10[%c0_11, %c0_12] : memref<8x128xf32, #tpu.memory_space<vmem>>, vector<8x128xf32>
    tpu.vector_store %arg10[%c0_11, %c0_12], %17 {strides = array<i32>} : memref<8x128xf32, #tpu.memory_space<vmem>>, vector<8x128xf32>,
    %c2_i32 = arith.constant 2 : i32
    %19 = arith.cmpi eq, %arg2, %c2_i32 : i32
    %20 = arith.extui %19 : i1 to i32
    %c0_i32_13 = arith.constant 0 : i32
    %21 = arith.cmpi ne, %20, %c0_i32_13 : i32
    scf.if %21 {
      %c0_14 = arith.constant 0 : index
      %c0_15 = arith.constant 0 : index
      %22 = vector.load %arg10[%c0_14, %c0_15] : memref<8x128xf32, #tpu.memory_space<vmem>>, vector<8x128xf32>
      %c0_16 = arith.constant 0 : index
      %c0_17 = arith.constant 0 : index
      %23 = vector.load %arg7[%c0_16, %c0_17] : memref<1x128xf32, #tpu.memory_space<vmem>>, vector<1x128xf32>
      %24 = vector.broadcast %23 : vector<1x128xf32> to vector<8x128xf32>
      %25 = arith.mulf %22, %24 : vector<8x128xf32>
      %c0_18 = arith.constant 0 : index
      %c0_19 = arith.constant 0 : index
      %26 = vector.load %arg8[%c0_18, %c0_19] : memref<1x128xf32, #tpu.memory_space<vmem>>, vector<1x128xf32>
      %27 = vector.broadcast %26 : vector<1x128xf32> to vector<8x128xf32>
      %28 = arith.addf %25, %27 : vector<8x128xf32>
      %cst_20 = arith.constant 0.000000e+00 : f32
      %29 = vector.broadcast %cst_20 : f32 to vector<8x128xf32>
      %30 = arith.maximumf %28, %29 : vector<8x128xf32>
      %31 = arith.truncf %30 : vector<8x128xf32> to vector<8x128xbf16>
      %c0_21 = arith.constant 0 : index
      %c0_22 = arith.constant 0 : index
      %32 = vector.load %arg9[%c0_21, %c0_22] : memref<8x128xbf16, #tpu.memory_space<vmem>>, vector<8x128xbf16>
      tpu.vector_store %arg9[%c0_21, %c0_22], %31 {strides = array<i32>} : memref<8x128xbf16, #tpu.memory_space<vmem>>, vector<8x128xbf16>,
    } else {
    }
    return
  }
  func.func @transform_0(%arg0: i32, %arg1: i32, %arg2: i32) -> (i32, i32) {
    %c0_i32 = arith.constant 0 : i32
    return %arg0, %arg2 : i32, i32
  }
  func.func @transform_1(%arg0: i32, %arg1: i32, %arg2: i32) -> (i32, i32) {
    %c0_i32 = arith.constant 0 : i32
    return %arg2, %arg1 : i32, i32
  }
  func.func @transform_2(%arg0: i32, %arg1: i32, %arg2: i32) -> (i32, i32) {
    %c0_i32 = arith.constant 0 : i32
    %c0_i32_0 = arith.constant 0 : i32
    return %c0_i32, %arg2 : i32, i32
  }
  func.func @transform_3(%arg0: i32, %arg1: i32, %arg2: i32) -> (i32, i32) {
    %c0_i32 = arith.constant 0 : i32
    %c0_i32_0 = arith.constant 0 : i32
    return %c0_i32, %arg2 : i32, i32
  }
  func.func @transform_4(%arg0: i32, %arg1: i32, %arg2: i32) -> (i32, i32) {
    %c0_i32 = arith.constant 0 : i32
    %c0_i32_0 = arith.constant 0 : i32
    return %c0_i32, %arg1 : i32, i32
  }
  func.func @transform_5(%arg0: i32, %arg1: i32, %arg2: i32) -> (i32, i32) {
    %c0_i32 = arith.constant 0 : i32
    %c0_i32_0 = arith.constant 0 : i32
    return %c0_i32, %arg1 : i32, i32
  }
  func.func @transform_6(%arg0: i32, %arg1: i32, %arg2: i32) -> (i32, i32) {
    %c0_i32 = arith.constant 0 : i32
    return %arg0, %arg1 : i32, i32
  }
}

module attributes {stable_mosaic.version = 11 : i64} {
  func.func @_fmm_kernel(%arg0: i32, %arg1: i32, %arg2: i32, %arg3: memref<8x128xbf16, #tpu.memory_space<vmem>>, %arg4: memref<128x128xbf16, #tpu.memory_space<vmem>>, %arg5: memref<1x128xf32, #tpu.memory_space<vmem>>, %arg6: memref<1x128xf32, #tpu.memory_space<vmem>>, %arg7: memref<1x128xf32, #tpu.memory_space<vmem>>, %arg8: memref<1x128xf32, #tpu.memory_space<vmem>>, %arg9: memref<8x128xbf16, #tpu.memory_space<vmem>>, %arg10: memref<8x128xf32, #tpu.memory_space<vmem>>) attributes {dimension_semantics = [#tpu.dimension_semantics<parallel>, #tpu.dimension_semantics<parallel>, #tpu.dimension_semantics<arbitrary>], iteration_bounds = array<i64: 1, 1, 7>, scalar_prefetch = 0 : i64, scratch_operands = 1 : i64, tpu.core_type = #tpu.core_type<tc>, window_params = [{transform_indices = @transform_0, window_bounds = array<i64: 8, 128>}, {transform_indices = @transform_1, window_bounds = array<i64: 128, 128>}, {transform_indices = @transform_2, window_bounds = array<i64: 1, 128>}, {transform_indices = @transform_3, window_bounds = array<i64: 1, 128>}, {transform_indices = @transform_4, window_bounds = array<i64: 1, 128>}, {transform_indices = @transform_5, window_bounds = array<i64: 1, 128>}, {transform_indices = @transform_6, window_bounds = array<i64: 8, 128>}]} {
    %c0_i32 = arith.constant 0 : i32
    %0 = arith.cmpi eq, %arg2, %c0_i32 : i32
    %1 = arith.extui %0 : i1 to i32
    %c0_i32_0 = arith.constant 0 : i32
    %2 = arith.cmpi ne, %1, %c0_i32_0 : i32
    scf.if %2 {
      %cst_14 = arith.constant 0.000000e+00 : f32
      %22 = vector.broadcast %cst_14 : f32 to vector<8x128xf32>
      %c0_15 = arith.constant 0 : index
      %c0_16 = arith.constant 0 : index
      %23 = vector.load %arg10[%c0_15, %c0_16] : memref<8x128xf32, #tpu.memory_space<vmem>>, vector<8x128xf32>
      tpu.vector_store %arg10[%c0_15, %c0_16], %22 {strides = array<i32>} : memref<8x128xf32, #tpu.memory_space<vmem>>, vector<8x128xf32>,
    } else {
    }
    %c0 = arith.constant 0 : index
    %c0_1 = arith.constant 0 : index
    %3 = vector.load %arg3[%c0, %c0_1] : memref<8x128xbf16, #tpu.memory_space<vmem>>, vector<8x128xbf16>
    %4 = arith.extf %3 : vector<8x128xbf16> to vector<8x128xf32>
    %c0_2 = arith.constant 0 : index
    %c0_3 = arith.constant 0 : index
    %5 = vector.load %arg5[%c0_2, %c0_3] : memref<1x128xf32, #tpu.memory_space<vmem>>, vector<1x128xf32>
    %6 = vector.broadcast %5 : vector<1x128xf32> to vector<8x128xf32>
    %7 = arith.mulf %4, %6 : vector<8x128xf32>
    %c0_4 = arith.constant 0 : index
    %c0_5 = arith.constant 0 : index
    %8 = vector.load %arg6[%c0_4, %c0_5] : memref<1x128xf32, #tpu.memory_space<vmem>>, vector<1x128xf32>
    %9 = vector.broadcast %8 : vector<1x128xf32> to vector<8x128xf32>
    %10 = arith.addf %7, %9 : vector<8x128xf32>
    %cst = arith.constant 0.000000e+00 : f32
    %11 = vector.broadcast %cst : f32 to vector<8x128xf32>
    %12 = arith.maximumf %10, %11 : vector<8x128xf32>
    %c0_6 = arith.constant 0 : index
    %c0_7 = arith.constant 0 : index
    %13 = vector.load %arg10[%c0_6, %c0_7] : memref<8x128xf32, #tpu.memory_space<vmem>>, vector<8x128xf32>
    %14 = arith.truncf %12 : vector<8x128xf32> to vector<8x128xbf16>
    %c0_8 = arith.constant 0 : index
    %c0_9 = arith.constant 0 : index
    %15 = vector.load %arg4[%c0_8, %c0_9] : memref<128x128xbf16, #tpu.memory_space<vmem>>, vector<128x128xbf16>
    %cst_10 = arith.constant dense<0.000000e+00> : vector<8x128xf32>
    %16 = tpu.matmul %14, %15, %cst_10 {dimension_numbers = #tpu.dot_dimension_numbers<[1], [0], [0], [1], [0, 0, 1, 1], [], []>} : vector<8x128xbf16>, vector<128x128xbf16>, vector<8x128xf32> -> vector<8x128xf32>
    %17 = arith.addf %13, %16 : vector<8x128xf32>
    %c0_11 = arith.constant 0 : index
    %c0_12 = arith.constant 0 : index
    %18 = vector.load %arg10[%c0_11, %c0_12] : memref<8x128xf32, #tpu.memory_space<vmem>>, vector<8x128xf32>
    tpu.vector_store %arg10[%c0_11, %c0_12], %17 {strides = array<i32>} : memref<8x128xf32, #tpu.memory_space<vmem>>, vector<8x128xf32>,
    %c6_i32 = arith.constant 6 : i32
    %19 = arith.cmpi eq, %arg2, %c6_i32 : i32
    %20 = arith.extui %19 : i1 to i32
    %c0_i32_13 = arith.constant 0 : i32
    %21 = arith.cmpi ne, %20, %c0_i32_13 : i32
    scf.if %21 {
      %c0_14 = arith.constant 0 : index
      %c0_15 = arith.constant 0 : index
      %22 = vector.load %arg10[%c0_14, %c0_15] : memref<8x128xf32, #tpu.memory_space<vmem>>, vector<8x128xf32>
      %c0_16 = arith.constant 0 : index
      %c0_17 = arith.constant 0 : index
      %23 = vector.load %arg7[%c0_16, %c0_17] : memref<1x128xf32, #tpu.memory_space<vmem>>, vector<1x128xf32>
      %24 = vector.broadcast %23 : vector<1x128xf32> to vector<8x128xf32>
      %25 = arith.mulf %22, %24 : vector<8x128xf32>
      %c0_18 = arith.constant 0 : index
      %c0_19 = arith.constant 0 : index
      %26 = vector.load %arg8[%c0_18, %c0_19] : memref<1x128xf32, #tpu.memory_space<vmem>>, vector<1x128xf32>
      %27 = vector.broadcast %26 : vector<1x128xf32> to vector<8x128xf32>
      %28 = arith.addf %25, %27 : vector<8x128xf32>
      %cst_20 = arith.constant 0.000000e+00 : f32
      %29 = vector.broadcast %cst_20 : f32 to vector<8x128xf32>
      %30 = arith.maximumf %28, %29 : vector<8x128xf32>
      %31 = arith.truncf %30 : vector<8x128xf32> to vector<8x128xbf16>
      %c0_21 = arith.constant 0 : index
      %c0_22 = arith.constant 0 : index
      %32 = vector.load %arg9[%c0_21, %c0_22] : memref<8x128xbf16, #tpu.memory_space<vmem>>, vector<8x128xbf16>
      tpu.vector_store %arg9[%c0_21, %c0_22], %31 {strides = array<i32>} : memref<8x128xbf16, #tpu.memory_space<vmem>>, vector<8x128xbf16>,
    } else {
    }
    return
  }
  func.func @transform_0(%arg0: i32, %arg1: i32, %arg2: i32) -> (i32, i32) {
    %c0_i32 = arith.constant 0 : i32
    return %arg0, %arg2 : i32, i32
  }
  func.func @transform_1(%arg0: i32, %arg1: i32, %arg2: i32) -> (i32, i32) {
    %c0_i32 = arith.constant 0 : i32
    return %arg2, %arg1 : i32, i32
  }
  func.func @transform_2(%arg0: i32, %arg1: i32, %arg2: i32) -> (i32, i32) {
    %c0_i32 = arith.constant 0 : i32
    %c0_i32_0 = arith.constant 0 : i32
    return %c0_i32, %arg2 : i32, i32
  }
  func.func @transform_3(%arg0: i32, %arg1: i32, %arg2: i32) -> (i32, i32) {
    %c0_i32 = arith.constant 0 : i32
    %c0_i32_0 = arith.constant 0 : i32
    return %c0_i32, %arg2 : i32, i32
  }
  func.func @transform_4(%arg0: i32, %arg1: i32, %arg2: i32) -> (i32, i32) {
    %c0_i32 = arith.constant 0 : i32
    %c0_i32_0 = arith.constant 0 : i32
    return %c0_i32, %arg1 : i32, i32
  }
  func.func @transform_5(%arg0: i32, %arg1: i32, %arg2: i32) -> (i32, i32) {
    %c0_i32 = arith.constant 0 : i32
    %c0_i32_0 = arith.constant 0 : i32
    return %c0_i32, %arg1 : i32, i32
  }
  func.func @transform_6(%arg0: i32, %arg1: i32, %arg2: i32) -> (i32, i32) {
    %c0_i32 = arith.constant 0 : i32
    return %arg0, %arg1 : i32, i32
  }
}

module attributes {stable_mosaic.version = 11 : i64} {
  func.func @_fmm_kernel(%arg0: i32, %arg1: i32, %arg2: i32, %arg3: memref<8x512xbf16, #tpu.memory_space<vmem>>, %arg4: memref<512x128xbf16, #tpu.memory_space<vmem>>, %arg5: memref<1x512xf32, #tpu.memory_space<vmem>>, %arg6: memref<1x512xf32, #tpu.memory_space<vmem>>, %arg7: memref<1x128xf32, #tpu.memory_space<vmem>>, %arg8: memref<1x128xf32, #tpu.memory_space<vmem>>, %arg9: memref<8x128xbf16, #tpu.memory_space<vmem>>, %arg10: memref<8x128xf32, #tpu.memory_space<vmem>>) attributes {dimension_semantics = [#tpu.dimension_semantics<parallel>, #tpu.dimension_semantics<parallel>, #tpu.dimension_semantics<arbitrary>], iteration_bounds = array<i64: 1, 1, 2>, scalar_prefetch = 0 : i64, scratch_operands = 1 : i64, tpu.core_type = #tpu.core_type<tc>, window_params = [{transform_indices = @transform_0, window_bounds = array<i64: 8, 512>}, {transform_indices = @transform_1, window_bounds = array<i64: 512, 128>}, {transform_indices = @transform_2, window_bounds = array<i64: 1, 512>}, {transform_indices = @transform_3, window_bounds = array<i64: 1, 512>}, {transform_indices = @transform_4, window_bounds = array<i64: 1, 128>}, {transform_indices = @transform_5, window_bounds = array<i64: 1, 128>}, {transform_indices = @transform_6, window_bounds = array<i64: 8, 128>}]} {
    %c0_i32 = arith.constant 0 : i32
    %0 = arith.cmpi eq, %arg2, %c0_i32 : i32
    %1 = arith.extui %0 : i1 to i32
    %c0_i32_0 = arith.constant 0 : i32
    %2 = arith.cmpi ne, %1, %c0_i32_0 : i32
    scf.if %2 {
      %cst_14 = arith.constant 0.000000e+00 : f32
      %22 = vector.broadcast %cst_14 : f32 to vector<8x128xf32>
      %c0_15 = arith.constant 0 : index
      %c0_16 = arith.constant 0 : index
      %23 = vector.load %arg10[%c0_15, %c0_16] : memref<8x128xf32, #tpu.memory_space<vmem>>, vector<8x128xf32>
      tpu.vector_store %arg10[%c0_15, %c0_16], %22 {strides = array<i32>} : memref<8x128xf32, #tpu.memory_space<vmem>>, vector<8x128xf32>,
    } else {
    }
    %c0 = arith.constant 0 : index
    %c0_1 = arith.constant 0 : index
    %3 = vector.load %arg3[%c0, %c0_1] : memref<8x512xbf16, #tpu.memory_space<vmem>>, vector<8x512xbf16>
    %4 = arith.extf %3 : vector<8x512xbf16> to vector<8x512xf32>
    %c0_2 = arith.constant 0 : index
    %c0_3 = arith.constant 0 : index
    %5 = vector.load %arg5[%c0_2, %c0_3] : memref<1x512xf32, #tpu.memory_space<vmem>>, vector<1x512xf32>
    %6 = vector.broadcast %5 : vector<1x512xf32> to vector<8x512xf32>
    %7 = arith.mulf %4, %6 : vector<8x512xf32>
    %c0_4 = arith.constant 0 : index
    %c0_5 = arith.constant 0 : index
    %8 = vector.load %arg6[%c0_4, %c0_5] : memref<1x512xf32, #tpu.memory_space<vmem>>, vector<1x512xf32>
    %9 = vector.broadcast %8 : vector<1x512xf32> to vector<8x512xf32>
    %10 = arith.addf %7, %9 : vector<8x512xf32>
    %cst = arith.constant 0.000000e+00 : f32
    %11 = vector.broadcast %cst : f32 to vector<8x512xf32>
    %12 = arith.maximumf %10, %11 : vector<8x512xf32>
    %c0_6 = arith.constant 0 : index
    %c0_7 = arith.constant 0 : index
    %13 = vector.load %arg10[%c0_6, %c0_7] : memref<8x128xf32, #tpu.memory_space<vmem>>, vector<8x128xf32>
    %14 = arith.truncf %12 : vector<8x512xf32> to vector<8x512xbf16>
    %c0_8 = arith.constant 0 : index
    %c0_9 = arith.constant 0 : index
    %15 = vector.load %arg4[%c0_8, %c0_9] : memref<512x128xbf16, #tpu.memory_space<vmem>>, vector<512x128xbf16>
    %cst_10 = arith.constant dense<0.000000e+00> : vector<8x128xf32>
    %16 = tpu.matmul %14, %15, %cst_10 {dimension_numbers = #tpu.dot_dimension_numbers<[1], [0], [0], [1], [0, 0, 1, 1], [], []>} : vector<8x512xbf16>, vector<512x128xbf16>, vector<8x128xf32> -> vector<8x128xf32>
    %17 = arith.addf %13, %16 : vector<8x128xf32>
    %c0_11 = arith.constant 0 : index
    %c0_12 = arith.constant 0 : index
    %18 = vector.load %arg10[%c0_11, %c0_12] : memref<8x128xf32, #tpu.memory_space<vmem>>, vector<8x128xf32>
    tpu.vector_store %arg10[%c0_11, %c0_12], %17 {strides = array<i32>} : memref<8x128xf32, #tpu.memory_space<vmem>>, vector<8x128xf32>,
    %c1_i32 = arith.constant 1 : i32
    %19 = arith.cmpi eq, %arg2, %c1_i32 : i32
    %20 = arith.extui %19 : i1 to i32
    %c0_i32_13 = arith.constant 0 : i32
    %21 = arith.cmpi ne, %20, %c0_i32_13 : i32
    scf.if %21 {
      %c0_14 = arith.constant 0 : index
      %c0_15 = arith.constant 0 : index
      %22 = vector.load %arg10[%c0_14, %c0_15] : memref<8x128xf32, #tpu.memory_space<vmem>>, vector<8x128xf32>
      %c0_16 = arith.constant 0 : index
      %c0_17 = arith.constant 0 : index
      %23 = vector.load %arg7[%c0_16, %c0_17] : memref<1x128xf32, #tpu.memory_space<vmem>>, vector<1x128xf32>
      %24 = vector.broadcast %23 : vector<1x128xf32> to vector<8x128xf32>
      %25 = arith.mulf %22, %24 : vector<8x128xf32>
      %c0_18 = arith.constant 0 : index
      %c0_19 = arith.constant 0 : index
      %26 = vector.load %arg8[%c0_18, %c0_19] : memref<1x128xf32, #tpu.memory_space<vmem>>, vector<1x128xf32>
      %27 = vector.broadcast %26 : vector<1x128xf32> to vector<8x128xf32>
      %28 = arith.addf %25, %27 : vector<8x128xf32>
      %cst_20 = arith.constant 0.000000e+00 : f32
      %29 = vector.broadcast %cst_20 : f32 to vector<8x128xf32>
      %30 = arith.maximumf %28, %29 : vector<8x128xf32>
      %31 = arith.truncf %30 : vector<8x128xf32> to vector<8x128xbf16>
      %c0_21 = arith.constant 0 : index
      %c0_22 = arith.constant 0 : index
      %32 = vector.load %arg9[%c0_21, %c0_22] : memref<8x128xbf16, #tpu.memory_space<vmem>>, vector<8x128xbf16>
      tpu.vector_store %arg9[%c0_21, %c0_22], %31 {strides = array<i32>} : memref<8x128xbf16, #tpu.memory_space<vmem>>, vector<8x128xbf16>,
    } else {
    }
    return
  }
  func.func @transform_0(%arg0: i32, %arg1: i32, %arg2: i32) -> (i32, i32) {
    %c0_i32 = arith.constant 0 : i32
    return %arg0, %arg2 : i32, i32
  }
  func.func @transform_1(%arg0: i32, %arg1: i32, %arg2: i32) -> (i32, i32) {
    %c0_i32 = arith.constant 0 : i32
    return %arg2, %arg1 : i32, i32
  }
  func.func @transform_2(%arg0: i32, %arg1: i32, %arg2: i32) -> (i32, i32) {
    %c0_i32 = arith.constant 0 : i32
    %c0_i32_0 = arith.constant 0 : i32
    return %c0_i32, %arg2 : i32, i32
  }
  func.func @transform_3(%arg0: i32, %arg1: i32, %arg2: i32) -> (i32, i32) {
    %c0_i32 = arith.constant 0 : i32
    %c0_i32_0 = arith.constant 0 : i32
    return %c0_i32, %arg2 : i32, i32
  }
  func.func @transform_4(%arg0: i32, %arg1: i32, %arg2: i32) -> (i32, i32) {
    %c0_i32 = arith.constant 0 : i32
    %c0_i32_0 = arith.constant 0 : i32
    return %c0_i32, %arg1 : i32, i32
  }
  func.func @transform_5(%arg0: i32, %arg1: i32, %arg2: i32) -> (i32, i32) {
    %c0_i32 = arith.constant 0 : i32
    %c0_i32_0 = arith.constant 0 : i32
    return %c0_i32, %arg1 : i32, i32
  }
  func.func @transform_6(%arg0: i32, %arg1: i32, %arg2: i32) -> (i32, i32) {
    %c0_i32 = arith.constant 0 : i32
    return %arg0, %arg1 : i32, i32
  }
}

module attributes {stable_mosaic.version = 11 : i64} {
  func.func @_fmm_kernel(%arg0: i32, %arg1: i32, %arg2: i32, %arg3: memref<8x512xbf16, #tpu.memory_space<vmem>>, %arg4: memref<512x256xbf16, #tpu.memory_space<vmem>>, %arg5: memref<1x512xf32, #tpu.memory_space<vmem>>, %arg6: memref<1x512xf32, #tpu.memory_space<vmem>>, %arg7: memref<1x256xf32, #tpu.memory_space<vmem>>, %arg8: memref<1x256xf32, #tpu.memory_space<vmem>>, %arg9: memref<8x256xbf16, #tpu.memory_space<vmem>>, %arg10: memref<8x256xf32, #tpu.memory_space<vmem>>) attributes {dimension_semantics = [#tpu.dimension_semantics<parallel>, #tpu.dimension_semantics<parallel>, #tpu.dimension_semantics<arbitrary>], iteration_bounds = array<i64: 1, 2, 2>, scalar_prefetch = 0 : i64, scratch_operands = 1 : i64, tpu.core_type = #tpu.core_type<tc>, window_params = [{transform_indices = @transform_0, window_bounds = array<i64: 8, 512>}, {transform_indices = @transform_1, window_bounds = array<i64: 512, 256>}, {transform_indices = @transform_2, window_bounds = array<i64: 1, 512>}, {transform_indices = @transform_3, window_bounds = array<i64: 1, 512>}, {transform_indices = @transform_4, window_bounds = array<i64: 1, 256>}, {transform_indices = @transform_5, window_bounds = array<i64: 1, 256>}, {transform_indices = @transform_6, window_bounds = array<i64: 8, 256>}]} {
    %c0_i32 = arith.constant 0 : i32
    %0 = arith.cmpi eq, %arg2, %c0_i32 : i32
    %1 = arith.extui %0 : i1 to i32
    %c0_i32_0 = arith.constant 0 : i32
    %2 = arith.cmpi ne, %1, %c0_i32_0 : i32
    scf.if %2 {
      %cst_14 = arith.constant 0.000000e+00 : f32
      %22 = vector.broadcast %cst_14 : f32 to vector<8x256xf32>
      %c0_15 = arith.constant 0 : index
      %c0_16 = arith.constant 0 : index
      %23 = vector.load %arg10[%c0_15, %c0_16] : memref<8x256xf32, #tpu.memory_space<vmem>>, vector<8x256xf32>
      tpu.vector_store %arg10[%c0_15, %c0_16], %22 {strides = array<i32>} : memref<8x256xf32, #tpu.memory_space<vmem>>, vector<8x256xf32>,
    } else {
    }
    %c0 = arith.constant 0 : index
    %c0_1 = arith.constant 0 : index
    %3 = vector.load %arg3[%c0, %c0_1] : memref<8x512xbf16, #tpu.memory_space<vmem>>, vector<8x512xbf16>
    %4 = arith.extf %3 : vector<8x512xbf16> to vector<8x512xf32>
    %c0_2 = arith.constant 0 : index
    %c0_3 = arith.constant 0 : index
    %5 = vector.load %arg5[%c0_2, %c0_3] : memref<1x512xf32, #tpu.memory_space<vmem>>, vector<1x512xf32>
    %6 = vector.broadcast %5 : vector<1x512xf32> to vector<8x512xf32>
    %7 = arith.mulf %4, %6 : vector<8x512xf32>
    %c0_4 = arith.constant 0 : index
    %c0_5 = arith.constant 0 : index
    %8 = vector.load %arg6[%c0_4, %c0_5] : memref<1x512xf32, #tpu.memory_space<vmem>>, vector<1x512xf32>
    %9 = vector.broadcast %8 : vector<1x512xf32> to vector<8x512xf32>
    %10 = arith.addf %7, %9 : vector<8x512xf32>
    %cst = arith.constant 0.000000e+00 : f32
    %11 = vector.broadcast %cst : f32 to vector<8x512xf32>
    %12 = arith.maximumf %10, %11 : vector<8x512xf32>
    %c0_6 = arith.constant 0 : index
    %c0_7 = arith.constant 0 : index
    %13 = vector.load %arg10[%c0_6, %c0_7] : memref<8x256xf32, #tpu.memory_space<vmem>>, vector<8x256xf32>
    %14 = arith.truncf %12 : vector<8x512xf32> to vector<8x512xbf16>
    %c0_8 = arith.constant 0 : index
    %c0_9 = arith.constant 0 : index
    %15 = vector.load %arg4[%c0_8, %c0_9] : memref<512x256xbf16, #tpu.memory_space<vmem>>, vector<512x256xbf16>
    %cst_10 = arith.constant dense<0.000000e+00> : vector<8x256xf32>
    %16 = tpu.matmul %14, %15, %cst_10 {dimension_numbers = #tpu.dot_dimension_numbers<[1], [0], [0], [1], [0, 0, 1, 1], [], []>} : vector<8x512xbf16>, vector<512x256xbf16>, vector<8x256xf32> -> vector<8x256xf32>
    %17 = arith.addf %13, %16 : vector<8x256xf32>
    %c0_11 = arith.constant 0 : index
    %c0_12 = arith.constant 0 : index
    %18 = vector.load %arg10[%c0_11, %c0_12] : memref<8x256xf32, #tpu.memory_space<vmem>>, vector<8x256xf32>
    tpu.vector_store %arg10[%c0_11, %c0_12], %17 {strides = array<i32>} : memref<8x256xf32, #tpu.memory_space<vmem>>, vector<8x256xf32>,
    %c1_i32 = arith.constant 1 : i32
    %19 = arith.cmpi eq, %arg2, %c1_i32 : i32
    %20 = arith.extui %19 : i1 to i32
    %c0_i32_13 = arith.constant 0 : i32
    %21 = arith.cmpi ne, %20, %c0_i32_13 : i32
    scf.if %21 {
      %c0_14 = arith.constant 0 : index
      %c0_15 = arith.constant 0 : index
      %22 = vector.load %arg10[%c0_14, %c0_15] : memref<8x256xf32, #tpu.memory_space<vmem>>, vector<8x256xf32>
      %23 = arith.truncf %22 : vector<8x256xf32> to vector<8x256xbf16>
      %c0_16 = arith.constant 0 : index
      %c0_17 = arith.constant 0 : index
      %24 = vector.load %arg9[%c0_16, %c0_17] : memref<8x256xbf16, #tpu.memory_space<vmem>>, vector<8x256xbf16>
      tpu.vector_store %arg9[%c0_16, %c0_17], %23 {strides = array<i32>} : memref<8x256xbf16, #tpu.memory_space<vmem>>, vector<8x256xbf16>,
    } else {
    }
    return
  }
  func.func @transform_0(%arg0: i32, %arg1: i32, %arg2: i32) -> (i32, i32) {
    %c0_i32 = arith.constant 0 : i32
    return %arg0, %arg2 : i32, i32
  }
  func.func @transform_1(%arg0: i32, %arg1: i32, %arg2: i32) -> (i32, i32) {
    %c0_i32 = arith.constant 0 : i32
    return %arg2, %arg1 : i32, i32
  }
  func.func @transform_2(%arg0: i32, %arg1: i32, %arg2: i32) -> (i32, i32) {
    %c0_i32 = arith.constant 0 : i32
    %c0_i32_0 = arith.constant 0 : i32
    return %c0_i32, %arg2 : i32, i32
  }
  func.func @transform_3(%arg0: i32, %arg1: i32, %arg2: i32) -> (i32, i32) {
    %c0_i32 = arith.constant 0 : i32
    %c0_i32_0 = arith.constant 0 : i32
    return %c0_i32, %arg2 : i32, i32
  }
  func.func @transform_4(%arg0: i32, %arg1: i32, %arg2: i32) -> (i32, i32) {
    %c0_i32 = arith.constant 0 : i32
    %c0_i32_0 = arith.constant 0 : i32
    return %c0_i32, %arg1 : i32, i32
  }
  func.func @transform_5(%arg0: i32, %arg1: i32, %arg2: i32) -> (i32, i32) {
    %c0_i32 = arith.constant 0 : i32
    %c0_i32_0 = arith.constant 0 : i32
    return %c0_i32, %arg1 : i32, i32
  }
  func.func @transform_6(%arg0: i32, %arg1: i32, %arg2: i32) -> (i32, i32) {
    %c0_i32 = arith.constant 0 : i32
    return %arg0, %arg1 : i32, i32
  }
}

module attributes {stable_mosaic.version = 11 : i64} {
  func.func @_stack_reduce_kernel(%arg0: i32, %arg1: memref<4x8x512xbf16, #tpu.memory_space<vmem>>, %arg2: memref<8x512xbf16, #tpu.memory_space<vmem>>) attributes {dimension_semantics = [#tpu.dimension_semantics<parallel>], iteration_bounds = array<i64: 1>, scalar_prefetch = 0 : i64, scratch_operands = 0 : i64, tpu.core_type = #tpu.core_type<tc>, window_params = [{transform_indices = @transform_0, window_bounds = array<i64: 4, 8, 512>}, {transform_indices = @transform_1, window_bounds = array<i64: 8, 512>}]} {
    %c0 = arith.constant 0 : index
    %c0_0 = arith.constant 0 : index
    %c0_1 = arith.constant 0 : index
    %0 = vector.load %arg1[%c0, %c0_0, %c0_1] : memref<4x8x512xbf16, #tpu.memory_space<vmem>>, vector<4x8x512xbf16>
    %1 = arith.extf %0 : vector<4x8x512xbf16> to vector<4x8x512xf32>
    %cst = arith.constant dense<0.000000e+00> : vector<8x512xf32>
    %2 = vector.multi_reduction <add>, %1, %cst [0] : vector<4x8x512xf32> to vector<8x512xf32>
    %cst_2 = arith.constant 2.500000e-01 : f32
    %3 = vector.broadcast %cst_2 : f32 to vector<8x512xf32>
    %4 = arith.mulf %2, %3 : vector<8x512xf32>
    %5 = arith.truncf %4 : vector<8x512xf32> to vector<8x512xbf16>
    %c0_3 = arith.constant 0 : index
    %c0_4 = arith.constant 0 : index
    %6 = vector.load %arg2[%c0_3, %c0_4] : memref<8x512xbf16, #tpu.memory_space<vmem>>, vector<8x512xbf16>
    tpu.vector_store %arg2[%c0_3, %c0_4], %5 {strides = array<i32>} : memref<8x512xbf16, #tpu.memory_space<vmem>>, vector<8x512xbf16>,
    return
  }
  func.func @transform_0(%arg0: i32) -> (i32, i32, i32) {
    %c0_i32 = arith.constant 0 : i32
    %c0_i32_0 = arith.constant 0 : i32
    %c0_i32_1 = arith.constant 0 : i32
    return %c0_i32, %arg0, %c0_i32_0 : i32, i32, i32
  }
  func.func @transform_1(%arg0: i32) -> (i32, i32) {
    %c0_i32 = arith.constant 0 : i32
    %c0_i32_0 = arith.constant 0 : i32
    return %arg0, %c0_i32 : i32, i32
  }
}

module attributes {stable_mosaic.version = 11 : i64} {
  func.func @_gap_bn_relu_kernel(%arg0: memref<1x8x1024xbf16, #tpu.memory_space<vmem>>, %arg1: memref<1x1x1024xf32, #tpu.memory_space<vmem>>, %arg2: memref<1x1x1024xf32, #tpu.memory_space<vmem>>, %arg3: memref<8x1024xf32, #tpu.memory_space<vmem>>) attributes {dimension_semantics = [], scalar_prefetch = 0 : i64, scratch_operands = 0 : i64, tpu.core_type = #tpu.core_type<tc>} {
    %c0 = arith.constant 0 : index
    %c0_0 = arith.constant 0 : index
    %c0_1 = arith.constant 0 : index
    %0 = vector.load %arg0[%c0, %c0_0, %c0_1] : memref<1x8x1024xbf16, #tpu.memory_space<vmem>>, vector<1x8x1024xbf16>
    %1 = arith.extf %0 : vector<1x8x1024xbf16> to vector<1x8x1024xf32>
    %c0_2 = arith.constant 0 : index
    %c0_3 = arith.constant 0 : index
    %c0_4 = arith.constant 0 : index
    %2 = vector.load %arg1[%c0_2, %c0_3, %c0_4] : memref<1x1x1024xf32, #tpu.memory_space<vmem>>, vector<1x1x1024xf32>
    %3 = vector.broadcast %2 : vector<1x1x1024xf32> to vector<1x8x1024xf32>
    %4 = arith.mulf %1, %3 : vector<1x8x1024xf32>
    %c0_5 = arith.constant 0 : index
    %c0_6 = arith.constant 0 : index
    %c0_7 = arith.constant 0 : index
    %5 = vector.load %arg2[%c0_5, %c0_6, %c0_7] : memref<1x1x1024xf32, #tpu.memory_space<vmem>>, vector<1x1x1024xf32>
    %6 = vector.broadcast %5 : vector<1x1x1024xf32> to vector<1x8x1024xf32>
    %7 = arith.addf %4, %6 : vector<1x8x1024xf32>
    %cst = arith.constant 0.000000e+00 : f32
    %8 = vector.broadcast %cst : f32 to vector<1x8x1024xf32>
    %9 = arith.maximumf %7, %8 : vector<1x8x1024xf32>
    %cst_8 = arith.constant dense<0.000000e+00> : vector<8x1024xf32>
    %10 = vector.multi_reduction <add>, %9, %cst_8 [0] : vector<1x8x1024xf32> to vector<8x1024xf32>
    %cst_9 = arith.constant 1.000000e+00 : f32
    %11 = vector.broadcast %cst_9 : f32 to vector<8x1024xf32>
    %12 = arith.divf %10, %11 : vector<8x1024xf32>
    %c0_10 = arith.constant 0 : index
    %c0_11 = arith.constant 0 : index
    %13 = vector.load %arg3[%c0_10, %c0_11] : memref<8x1024xf32, #tpu.memory_space<vmem>>, vector<8x1024xf32>
    tpu.vector_store %arg3[%c0_10, %c0_11], %12 {strides = array<i32>} : memref<8x1024xf32, #tpu.memory_space<vmem>>, vector<8x1024xf32>,
    return
  }
}

module attributes {stable_mosaic.version = 11 : i64} {
  func.func @_fmm_kernel(%arg0: i32, %arg1: i32, %arg2: i32, %arg3: memref<8x512xbf16, #tpu.memory_space<vmem>>, %arg4: memref<512x128xbf16, #tpu.memory_space<vmem>>, %arg5: memref<1x512xf32, #tpu.memory_space<vmem>>, %arg6: memref<1x512xf32, #tpu.memory_space<vmem>>, %arg7: memref<1x128xf32, #tpu.memory_space<vmem>>, %arg8: memref<1x128xf32, #tpu.memory_space<vmem>>, %arg9: memref<8x128xf32, #tpu.memory_space<vmem>>, %arg10: memref<8x128xf32, #tpu.memory_space<vmem>>) attributes {dimension_semantics = [#tpu.dimension_semantics<parallel>, #tpu.dimension_semantics<parallel>, #tpu.dimension_semantics<arbitrary>], iteration_bounds = array<i64: 1, 1, 2>, scalar_prefetch = 0 : i64, scratch_operands = 1 : i64, tpu.core_type = #tpu.core_type<tc>, window_params = [{transform_indices = @transform_0, window_bounds = array<i64: 8, 512>}, {transform_indices = @transform_1, window_bounds = array<i64: 512, 128>}, {transform_indices = @transform_2, window_bounds = array<i64: 1, 512>}, {transform_indices = @transform_3, window_bounds = array<i64: 1, 512>}, {transform_indices = @transform_4, window_bounds = array<i64: 1, 128>}, {transform_indices = @transform_5, window_bounds = array<i64: 1, 128>}, {transform_indices = @transform_6, window_bounds = array<i64: 8, 128>}]} {
    %c0_i32 = arith.constant 0 : i32
    %0 = arith.cmpi eq, %arg2, %c0_i32 : i32
    %1 = arith.extui %0 : i1 to i32
    %c0_i32_0 = arith.constant 0 : i32
    %2 = arith.cmpi ne, %1, %c0_i32_0 : i32
    scf.if %2 {
      %cst_9 = arith.constant 0.000000e+00 : f32
      %12 = vector.broadcast %cst_9 : f32 to vector<8x128xf32>
      %c0_10 = arith.constant 0 : index
      %c0_11 = arith.constant 0 : index
      %13 = vector.load %arg10[%c0_10, %c0_11] : memref<8x128xf32, #tpu.memory_space<vmem>>, vector<8x128xf32>
      tpu.vector_store %arg10[%c0_10, %c0_11], %12 {strides = array<i32>} : memref<8x128xf32, #tpu.memory_space<vmem>>, vector<8x128xf32>,
    } else {
    }
    %c0 = arith.constant 0 : index
    %c0_1 = arith.constant 0 : index
    %3 = vector.load %arg3[%c0, %c0_1] : memref<8x512xbf16, #tpu.memory_space<vmem>>, vector<8x512xbf16>
    %c0_2 = arith.constant 0 : index
    %c0_3 = arith.constant 0 : index
    %4 = vector.load %arg10[%c0_2, %c0_3] : memref<8x128xf32, #tpu.memory_space<vmem>>, vector<8x128xf32>
    %c0_4 = arith.constant 0 : index
    %c0_5 = arith.constant 0 : index
    %5 = vector.load %arg4[%c0_4, %c0_5] : memref<512x128xbf16, #tpu.memory_space<vmem>>, vector<512x128xbf16>
    %cst = arith.constant dense<0.000000e+00> : vector<8x128xf32>
    %6 = tpu.matmul %3, %5, %cst {dimension_numbers = #tpu.dot_dimension_numbers<[1], [0], [0], [1], [0, 0, 1, 1], [], []>} : vector<8x512xbf16>, vector<512x128xbf16>, vector<8x128xf32> -> vector<8x128xf32>
    %7 = arith.addf %4, %6 : vector<8x128xf32>
    %c0_6 = arith.constant 0 : index
    %c0_7 = arith.constant 0 : index
    %8 = vector.load %arg10[%c0_6, %c0_7] : memref<8x128xf32, #tpu.memory_space<vmem>>, vector<8x128xf32>
    tpu.vector_store %arg10[%c0_6, %c0_7], %7 {strides = array<i32>} : memref<8x128xf32, #tpu.memory_space<vmem>>, vector<8x128xf32>,
    %c1_i32 = arith.constant 1 : i32
    %9 = arith.cmpi eq, %arg2, %c1_i32 : i32
    %10 = arith.extui %9 : i1 to i32
    %c0_i32_8 = arith.constant 0 : i32
    %11 = arith.cmpi ne, %10, %c0_i32_8 : i32
    scf.if %11 {
      %c0_9 = arith.constant 0 : index
      %c0_10 = arith.constant 0 : index
      %12 = vector.load %arg10[%c0_9, %c0_10] : memref<8x128xf32, #tpu.memory_space<vmem>>, vector<8x128xf32>
      %c0_11 = arith.constant 0 : index
      %c0_12 = arith.constant 0 : index
      %13 = vector.load %arg8[%c0_11, %c0_12] : memref<1x128xf32, #tpu.memory_space<vmem>>, vector<1x128xf32>
      %14 = vector.broadcast %13 : vector<1x128xf32> to vector<8x128xf32>
      %15 = arith.addf %12, %14 : vector<8x128xf32>
      %cst_13 = arith.constant 0.000000e+00 : f32
      %16 = vector.broadcast %cst_13 : f32 to vector<8x128xf32>
      %17 = arith.subf %16, %15 : vector<8x128xf32>
      %18 = math.exp %17 : vector<8x128xf32>
      %cst_14 = arith.constant 1.000000e+00 : f32
      %19 = vector.broadcast %cst_14 : f32 to vector<8x128xf32>
      %20 = arith.addf %19, %18 : vector<8x128xf32>
      %cst_15 = arith.constant 1.000000e+00 : f32
      %21 = vector.broadcast %cst_15 : f32 to vector<8x128xf32>
      %22 = arith.divf %21, %20 : vector<8x128xf32>
      %c0_16 = arith.constant 0 : index
      %c0_17 = arith.constant 0 : index
      %23 = vector.load %arg9[%c0_16, %c0_17] : memref<8x128xf32, #tpu.memory_space<vmem>>, vector<8x128xf32>
      tpu.vector_store %arg9[%c0_16, %c0_17], %22 {strides = array<i32>} : memref<8x128xf32, #tpu.memory_space<vmem>>, vector<8x128xf32>,
    } else {
    }
    return
  }
  func.func @transform_0(%arg0: i32, %arg1: i32, %arg2: i32) -> (i32, i32) {
    %c0_i32 = arith.constant 0 : i32
    return %arg0, %arg2 : i32, i32
  }
  func.func @transform_1(%arg0: i32, %arg1: i32, %arg2: i32) -> (i32, i32) {
    %c0_i32 = arith.constant 0 : i32
    return %arg2, %arg1 : i32, i32
  }
  func.func @transform_2(%arg0: i32, %arg1: i32, %arg2: i32) -> (i32, i32) {
    %c0_i32 = arith.constant 0 : i32
    %c0_i32_0 = arith.constant 0 : i32
    return %c0_i32, %arg2 : i32, i32
  }
  func.func @transform_3(%arg0: i32, %arg1: i32, %arg2: i32) -> (i32, i32) {
    %c0_i32 = arith.constant 0 : i32
    %c0_i32_0 = arith.constant 0 : i32
    return %c0_i32, %arg2 : i32, i32
  }
  func.func @transform_4(%arg0: i32, %arg1: i32, %arg2: i32) -> (i32, i32) {
    %c0_i32 = arith.constant 0 : i32
    %c0_i32_0 = arith.constant 0 : i32
    return %c0_i32, %arg1 : i32, i32
  }
  func.func @transform_5(%arg0: i32, %arg1: i32, %arg2: i32) -> (i32, i32) {
    %c0_i32 = arith.constant 0 : i32
    %c0_i32_0 = arith.constant 0 : i32
    return %c0_i32, %arg1 : i32, i32
  }
  func.func @transform_6(%arg0: i32, %arg1: i32, %arg2: i32) -> (i32, i32) {
    %c0_i32 = arith.constant 0 : i32
    return %arg0, %arg1 : i32, i32
  }
}

</mosaic_0001>

<bundles_post_ra>
// kernel: densenet121_forward.126
= control target key start
LH: loop header
LB: loop body
LE: loop exit
PB: predicated region body
PF: predicated region fallthrough
CT: control target
= control target key end

     0   :  { %s1971_s21 = smov 0   ;;  %s1973_s22 = smov 0   ;;  %s2182_s0 = inlined_call_operand.vmem [shape: bf16[512,256], index: 0, kind: input, shape index: {}]   ;;  %s2183_s1 = inlined_call_operand.vmem [shape: bf16[256,128], index: 1, kind: input, shape index: {}]   ;;  %s2184_s2 = inlined_call_operand.vmem [shape: f32[1,256], index: 2, kind: input, shape index: {}, may-alias: {2,3}]   ;;  %s2185_s3 = inlined_call_operand.vmem [shape: f32[1,256], index: 3, kind: input, shape index: {}, may-alias: {2,3}]   ;;  %s2186_s4 = inlined_call_operand.vmem [shape: f32[1,128], index: 4, kind: input, shape index: {}]   ;;  %s2187_s5 = inlined_call_operand.vmem [shape: f32[1,128], index: 5, kind: input, shape index: {}]   ;;  %s2188_s6 = inlined_call_operand.vmem [shape: bf16[512,128], index: 6, kind: output, shape index: {}]  }
   0x1   :  { %s1975_s23 = smov 0  }
   0x2 LB: > { %s35_s2 = sadd.s32 1, %s1930_s22  ;;  %p1478_p0 = scmp.ge.s32.totalorder %s1934_s23, 1  ;;  %s1934_s23 = sphi %s1975_s23, %s16_s23   ;;  %s1930_s22 = sphi %s1973_s22, %s2190_s22   ;;  %s1926_s21 = sphi %s1971_s21, %s2189_s21  }
   0x3   : > { %p37_p1 = scmp.ge.s32.totalorder %s35_s2, 2  ;;  %p294_p2 = scmp.lt.s32.totalorder %s1934_s23, 3 }
   0x5   : > { %s2192_s2 = smov (%p37_p1, %s35_s2), 0  ;;  %p295_p3 = pnand %p1478_p0, %p294_p2 }
   0x6   : > { %v1848_v0 = vld [vmem:[%s2183_s1 + $0x40] sm:$0xff] (!%p295_p3)   ;;  %s1479_s25 = sshll.u32 (!%p295_p3), %s1926_s21, 5  ;;  %v1850_v2 = vld [vmem:[%s2183_s1 + $0x48] sm:$0xff] (!%p295_p3)   ;;  %v1852_v4 = vld [vmem:[%s2183_s1 + $0x50] sm:$0xff] (!%p295_p3)  }
   0x7   : > { %298 = sbr.rel (%p295_p3) target bundleno = 322 (0x142), region = 44  ;;  %v1849_v1 = vld [vmem:[%s2183_s1] sm:$0xff] (!%p295_p3)   ;;  %1696 = vmatprep.subr.bf16.mxu0 (!%p295_p3), %v1848_v0  ;;  %1808 = vmatprep.subr.bf16.mxu1 (!%p295_p3), %v1848_v0  ;;  %v1851_v3 = vld [vmem:[%s2183_s1 + $0x8] sm:$0xff] (!%p295_p3)   ;;  %p356_p4 = scmp.lt.s32.totalorder (!%p295_p3), %s1479_s25, 63  ;;  %v1853_v5 = vld [vmem:[%s2183_s1 + $0x10] sm:$0xff] (!%p295_p3)  }
   0x8   : > { %1697 = vmatpush3.bf16.msra.mxu0 (!%p295_p3), %v1849_v1  ;;  %1816 = vmatpush3.bf16.msra.mxu1 (!%p295_p3), %v1849_v1  ;;  %v1854_v6 = vld [vmem:[%s2183_s1 + $0x58] sm:$0xff] (!%p295_p3)   ;;  %v1856_v8 = vld [vmem:[%s2183_s1 + $0x60] sm:$0xff] (!%p295_p3)   ;;  %v1858_v10 = vld [vmem:[%s2183_s1 + $0x68] sm:$0xff] (!%p295_p3)  }
   0x9   : > { %1698 = vmatprep.subr.bf16.mxu0 (!%p295_p3), %v1850_v2  ;;  %1809 = vmatprep.subr.bf16.mxu1 (!%p295_p3), %v1850_v2  ;;  %v1855_v7 = vld [vmem:[%s2183_s1 + $0x18] sm:$0xff] (!%p295_p3)   ;;  %v1857_v9 = vld [vmem:[%s2183_s1 + $0x20] sm:$0xff] (!%p295_p3)   ;;  %v1859_v13 = vld [vmem:[%s2183_s1 + $0x28] sm:$0xff] (!%p295_p3)  }
   0xa   : > { %v1860_v14 = vld [vmem:[%s2183_s1 + $0x70] sm:$0xff] (!%p295_p3)   ;;  %v1862_v16 = vld [vmem:[%s2183_s1 + $0x78] sm:$0xff] (!%p295_p3)   ;;  %v2080_v51 = vld [vmem:[%s2186_s4] ss:$0 sm:$0xff] (!%p295_p3) }
   0xb   : > { %v1861_v15 = vld [vmem:[%s2183_s1 + $0x30] sm:$0xff] (!%p295_p3)   ;;  %v1863_v17 = vld [vmem:[%s2183_s1 + $0x38] sm:$0xff] (!%p295_p3)   ;;  %v2085_v57 = vld [vmem:[%s2187_s5] ss:$0 sm:$0xff] (!%p295_p3) }
   0xc   : > { %1699 = vmatpush3.bf16.msra.mxu0 (!%p295_p3), %v1851_v3  ;;  %1817 = vmatpush3.bf16.msra.mxu1 (!%p295_p3), %v1851_v3 }
   0xd   : > { %1700 = vmatprep.subr.bf16.mxu0 (!%p295_p3), %v1852_v4  ;;  %1810 = vmatprep.subr.bf16.mxu1 (!%p295_p3), %v1852_v4 }
   0xe   : > { %s2194_s25 = smov (!%p356_p4, %s1479_s25), 63 }
   0xf   : > { %s1568_s16 = sshll.u32 %s2194_s25, 3  ;;  %s1483_s18 = sshll.u32 %s2194_s25, 2 }
  0x10   : > { %1701 = vmatpush3.bf16.msra.mxu0 %v1853_v5  ;;  %1818 = vmatpush3.bf16.msra.mxu1 %v1853_v5  ;;  %s2022_s21 = scalar_lea.vmem %s2182_s0, %s1568_s16  ;;  %s2099_s25 = scalar_lea.vmem %s2188_s6, %s1483_s18 }
  0x11   : > { %1702 = vmatprep.subr.bf16.mxu0 %v1854_v6  ;;  %1811 = vmatprep.subr.bf16.mxu1 %v1854_v6  ;;  %v1866_v11 = vld [vmem:[%s2022_s21 + $0x4] ss:$8 sps:$4 sm:$0xff]   ;;  %v1864_v18 = vld [vmem:[%s2022_s21] ss:$8 sps:$4 sm:$0xff]   ;;  %v1870_v20 = vld [vmem:[%s2022_s21 + $0x14] ss:$8 sps:$4 sm:$0xff]  }
  0x12   : > { %v1869_v12 = vld [vmem:[%s2022_s21 + $0x84] ss:$8 sps:$4 sm:$0xff]   ;;  %821 = vmatprep.mubr.bf16.mxu0 %v1866_v11  ;;  %v1867_v19 = vld [vmem:[%s2022_s21 + $0x80] ss:$8 sps:$4 sm:$0xff]   ;;  %v1872_v21 = vld [vmem:[%s2022_s21 + $0x94] ss:$8 sps:$4 sm:$0xff]  }
  0x13   : > { %885 = vmatprep.mubr.bf16.mxu1 %v1869_v12  ;;  %v1874_v22 = vld [vmem:[%s2022_s21 + $0x10] ss:$8 sps:$4 sm:$0xff]   ;;  %v1876_v24 = vld [vmem:[%s2022_s21 + $0x24] ss:$8 sps:$4 sm:$0xff]   ;;  %v1880_v26 = vld [vmem:[%s2022_s21 + $0x20] ss:$8 sps:$4 sm:$0xff]  }
  0x14   : > { %1703 = vmatpush3.bf16.msra.mxu0 %v1855_v7  ;;  %1819 = vmatpush3.bf16.msra.mxu1 %v1855_v7  ;;  %v1875_v23 = vld [vmem:[%s2022_s21 + $0x90] ss:$8 sps:$4 sm:$0xff]   ;;  %v1878_v25 = vld [vmem:[%s2022_s21 + $0xa4] ss:$8 sps:$4 sm:$0xff]   ;;  %v1881_v27 = vld [vmem:[%s2022_s21 + $0xa0] ss:$8 sps:$4 sm:$0xff]  }
  0x15   : > { %1704 = vmatprep.subr.bf16.mxu0 %v1856_v8  ;;  %1812 = vmatprep.subr.bf16.mxu1 %v1856_v8  ;;  %v1882_v28 = vld [vmem:[%s2022_s21 + $0x34] ss:$8 sps:$4 sm:$0xff]   ;;  %v1886_v30 = vld [vmem:[%s2022_s21 + $0x30] ss:$8 sps:$4 sm:$0xff]   ;;  %v1888_v32 = vld [vmem:[%s2022_s21 + $0x44] ss:$8 sps:$4 sm:$0xff]  }
  0x16   : > { %v1884_v29 = vld [vmem:[%s2022_s21 + $0xb4] ss:$8 sps:$4 sm:$0xff]   ;;  %v1887_v31 = vld [vmem:[%s2022_s21 + $0xb0] ss:$8 sps:$4 sm:$0xff]   ;;  %v1890_v33 = vld [vmem:[%s2022_s21 + $0xc4] ss:$8 sps:$4 sm:$0xff]  }
  0x17   : > { %v1892_v34 = vld [vmem:[%s2022_s21 + $0x40] ss:$8 sps:$4 sm:$0xff]   ;;  %v1894_v36 = vld [vmem:[%s2022_s21 + $0x54] ss:$8 sps:$4 sm:$0xff]   ;;  %v1898_v38 = vld [vmem:[%s2022_s21 + $0x50] ss:$8 sps:$4 sm:$0xff]  }
  0x18   : > { %1705 = vmatpush3.bf16.msra.mxu0 %v1857_v9  ;;  %1820 = vmatpush3.bf16.msra.mxu1 %v1857_v9  ;;  %v1893_v35 = vld [vmem:[%s2022_s21 + $0xc0] ss:$8 sps:$4 sm:$0xff]   ;;  %v1896_v37 = vld [vmem:[%s2022_s21 + $0xd4] ss:$8 sps:$4 sm:$0xff]   ;;  %v1899_v39 = vld [vmem:[%s2022_s21 + $0xd0] ss:$8 sps:$4 sm:$0xff]  }
  0x19   : > { %1706 = vmatprep.subr.bf16.mxu0 %v1858_v10  ;;  %1813 = vmatprep.subr.bf16.mxu1 %v1858_v10  ;;  %v1900_v40 = vld [vmem:[%s2022_s21 + $0x64] ss:$8 sps:$4 sm:$0xff]   ;;  %v1904_v42 = vld [vmem:[%s2022_s21 + $0x60] ss:$8 sps:$4 sm:$0xff]   ;;  %v1906_v44 = vld [vmem:[%s2022_s21 + $0x74] ss:$8 sps:$4 sm:$0xff]  }
  0x1a   : > { %v1902_v41 = vld [vmem:[%s2022_s21 + $0xe4] ss:$8 sps:$4 sm:$0xff]   ;;  %v1905_v43 = vld [vmem:[%s2022_s21 + $0xe0] ss:$8 sps:$4 sm:$0xff]   ;;  %v1908_v45 = vld [vmem:[%s2022_s21 + $0xf4] ss:$8 sps:$4 sm:$0xff]  }
  0x1b   : > { %v1910_v46 = vld [vmem:[%s2022_s21 + $0x70] ss:$8 sps:$4 sm:$0xff]  }
  0x1c   : > { %1707 = vmatpush3.bf16.msra.mxu0 %v1859_v13  ;;  %1821 = vmatpush3.bf16.msra.mxu1 %v1859_v13  ;;  %v1911_v47 = vld [vmem:[%s2022_s21 + $0xf0] ss:$8 sps:$4 sm:$0xff]  }
  0x1d   : > { %1708 = vmatprep.subr.bf16.mxu0 %v1860_v14  ;;  %1814 = vmatprep.subr.bf16.mxu1 %v1860_v14 }
  0x20   : > { %1709 = vmatpush3.bf16.msra.mxu0 %v1861_v15  ;;  %1822 = vmatpush3.bf16.msra.mxu1 %v1861_v15 }
  0x21   : > { %1710 = vmatprep.subr.bf16.mxu0 %v1862_v16  ;;  %1815 = vmatprep.subr.bf16.mxu1 %v1862_v16 }
  0x24   : > { %1711 = vmatpush3.bf16.msra.mxu0 %v1863_v17  ;;  %1823 = vmatpush3.bf16.msra.mxu1 %v1863_v17 }
  0x27   : > { %822 = vmatmul.mubr.bf16.vlgmr.msra.gmra.mrb[0].mxu0 %v1864_v18  ;;  %886 = vmatmul.mubr.bf16.vlgmr.msra.gmra.mrb[0].mxu1 %v1867_v19 }
  0x28   : > { %829 = vmatprep.mubr.bf16.mxu0 %v1870_v20  ;;  %893 = vmatprep.mubr.bf16.mxu1 %v1872_v21 }
  0x2f   : > { %830 = vmatmul.mubr.bf16.gmra.mrb[4].mxu0 %v1874_v22  ;;  %894 = vmatmul.mubr.bf16.gmra.mrb[4].mxu1 %v1875_v23 }
  0x30   : > { %837 = vmatprep.mubr.bf16.mxu0 %v1876_v24  ;;  %901 = vmatprep.mubr.bf16.mxu1 %v1878_v25 }
  0x37   : > { %838 = vmatmul.mubr.bf16.gmra.mrb[8].mxu0 %v1880_v26  ;;  %902 = vmatmul.mubr.bf16.gmra.mrb[8].mxu1 %v1881_v27 }
  0x38   : > { %845 = vmatprep.mubr.bf16.mxu0 %v1882_v28  ;;  %909 = vmatprep.mubr.bf16.mxu1 %v1884_v29 }
  0x3f   : > { %846 = vmatmul.mubr.bf16.gmra.mrb[12].mxu0 %v1886_v30  ;;  %910 = vmatmul.mubr.bf16.gmra.mrb[12].mxu1 %v1887_v31 }
  0x40   : > { %853 = vmatprep.mubr.bf16.mxu0 %v1888_v32  ;;  %917 = vmatprep.mubr.bf16.mxu1 %v1890_v33 }
  0x47   : > { %854 = vmatmul.mubr.bf16.gmra.mrb[16].mxu0 %v1892_v34  ;;  %918 = vmatmul.mubr.bf16.gmra.mrb[16].mxu1 %v1893_v35 }
  0x48   : > { %861 = vmatprep.mubr.bf16.mxu0 %v1894_v36  ;;  %925 = vmatprep.mubr.bf16.mxu1 %v1896_v37 }
  0x4f   : > { %862 = vmatmul.mubr.bf16.gmra.mrb[20].mxu0 %v1898_v38  ;;  %926 = vmatmul.mubr.bf16.gmra.mrb[20].mxu1 %v1899_v39 }
  0x50   : > { %869 = vmatprep.mubr.bf16.mxu0 %v1900_v40  ;;  %933 = vmatprep.mubr.bf16.mxu1 %v1902_v41 }
  0x57   : > { %870 = vmatmul.mubr.bf16.gmra.mrb[24].mxu0 %v1904_v42  ;;  %934 = vmatmul.mubr.bf16.gmra.mrb[24].mxu1 %v1905_v43 }
  0x58   : > { %877 = vmatprep.mubr.bf16.mxu0 %v1906_v44  ;;  %941 = vmatprep.mubr.bf16.mxu1 %v1908_v45 }
  0x5f   : > { %878 = vmatmul.mubr.bf16.gmra.mrb[28].mxu0 %v1910_v46  ;;  %942 = vmatmul.mubr.bf16.gmra.mrb[28].mxu1 %v1911_v47 }
  0xfa   : > { %v1712_v48 = vpop.f32.mrb[0].mxu0  ;;  %v1760_v49 = vpop.f32.mrb[0].mxu1 }
  0xfb   : > { %v1713_v50 = vpop.f32.mrb[1].mxu0  ;;  %v1761_v52 = vpop.f32.mrb[1].mxu1 }
  0xfc   : > { %v1714_v53 = vadd.f32 %v1713_v50, %v1712_v48  ;;  %v1762_v54 = vadd.f32 %v1761_v52, %v1760_v49  ;;  %v1715_v55 = vpop.f32.mrb[2].mxu0  ;;  %v1763_v56 = vpop.f32.mrb[2].mxu1 }
  0xfd   : > { %v1716_v58 = vpop.f32.mrb[3].mxu0  ;;  %v1764_v59 = vpop.f32.mrb[3].mxu1 }
  0xfe   : > { %v1056_v60 = vmul.f32 %v1714_v53, %v2080_v51  ;;  %v1072_v61 = vmul.f32 %v1762_v54, %v2080_v51  ;;  %v1717_v62 = vadd.f32 %v1716_v58, %v1715_v55  ;;  %v1765_v63 = vadd.f32 %v1764_v59, %v1763_v56 }
 0x100   : > { %v1095_v0 = vadd.f32 %v2085_v57, %v1056_v60  ;;  %v1111_v1 = vadd.f32 %v2085_v57, %v1072_v61  ;;  %v1057_v2 = vmul.f32 %v1717_v62, %v2080_v51  ;;  %v1073_v3 = vmul.f32 %v1765_v63, %v2080_v51 }
 0x102   : > { %v1096_v4 = vadd.f32 %v2085_v57, %v1057_v2  ;;  %v1112_v5 = vadd.f32 %v2085_v57, %v1073_v3  ;;  %v1718_v6 = vpop.f32.mrb[4].mxu0  ;;  %v1766_v7 = vpop.f32.mrb[4].mxu1  ;;  %v1127_v8 = vmax.f32 %v1095_v0, 0.0  ;;  %v1143_v9 = vmax.f32 %v1111_v1, 0.0 }
 0x103   : > { %v1719_v10 = vpop.f32.mrb[5].mxu0  ;;  %v1767_v11 = vpop.f32.mrb[5].mxu1 }
 0x104   : > { %v1128_v12 = vmax.f32 %v1096_v4, 0.0  ;;  %v1144_v13 = vmax.f32 %v1112_v5, 0.0  ;;  %v1720_v14 = vadd.f32 %v1719_v10, %v1718_v6  ;;  %v1768_v15 = vadd.f32 %v1767_v11, %v1766_v7  ;;  %v1721_v16 = vpop.f32.mrb[6].mxu0  ;;  %v1769_v17 = vpop.f32.mrb[6].mxu1 }
 0x105   : > { %v1722_v18 = vpop.f32.mrb[7].mxu0  ;;  %v1770_v19 = vpop.f32.mrb[7].mxu1 }
 0x106   : > { %v1604_v20 = vpack.c.bf16 %v1128_v12, %v1127_v8  ;;  %v1644_v21 = vpack.c.bf16 %v1144_v13, %v1143_v9  ;;  %v1058_v22 = vmul.f32 %v1720_v14, %v2080_v51  ;;  %v1074_v23 = vmul.f32 %v1768_v15, %v2080_v51 }
 0x107   : > { %v1723_v24 = vadd.f32 %v1722_v18, %v1721_v16  ;;  %v1771_v25 = vadd.f32 %v1770_v19, %v1769_v17 }
 0x108   : > { %1605 = vst [vmem:[%s2099_s25] sm:$0xff] %v1604_v20   ;;  %1688 = vst [vmem:[%s2099_s25 + $0x40] sm:$0xff] %v1644_v21   ;;  %v1097_v26 = vadd.f32 %v2085_v57, %v1058_v22  ;;  %v1113_v27 = vadd.f32 %v2085_v57, %v1074_v23 }
 0x109   : > { %v1059_v28 = vmul.f32 %v1723_v24, %v2080_v51  ;;  %v1075_v29 = vmul.f32 %v1771_v25, %v2080_v51 }
 0x10a   : > { %v1724_v30 = vpop.f32.mrb[8].mxu0  ;;  %v1772_v31 = vpop.f32.mrb[8].mxu1  ;;  %v1129_v40 = vmax.f32 %v1097_v26, 0.0  ;;  %v1145_v41 = vmax.f32 %v1113_v27, 0.0 }
 0x10b   : > { %v1098_v32 = vadd.f32 %v2085_v57, %v1059_v28  ;;  %v1114_v33 = vadd.f32 %v2085_v57, %v1075_v29  ;;  %v1725_v34 = vpop.f32.mrb[9].mxu0  ;;  %v1773_v35 = vpop.f32.mrb[9].mxu1 }
 0x10c   : > { %v1726_v36 = vadd.f32 %v1725_v34, %v1724_v30  ;;  %v1774_v37 = vadd.f32 %v1773_v35, %v1772_v31  ;;  %v1727_v38 = vpop.f32.mrb[10].mxu0  ;;  %v1775_v39 = vpop.f32.mrb[10].mxu1 }
 0x10d   : > { %v1130_v42 = vmax.f32 %v1098_v32, 0.0  ;;  %v1146_v43 = vmax.f32 %v1114_v33, 0.0  ;;  %v1728_v44 = vpop.f32.mrb[11].mxu0  ;;  %v1776_v45 = vpop.f32.mrb[11].mxu1 }
 0x10e   : > { %v1060_v46 = vmul.f32 %v1726_v36, %v2080_v51  ;;  %v1076_v47 = vmul.f32 %v1774_v37, %v2080_v51  ;;  %v1729_v48 = vadd.f32 %v1728_v44, %v1727_v38  ;;  %v1777_v49 = vadd.f32 %v1776_v45, %v1775_v39 }
 0x10f   : > { %v1609_v50 = vpack.c.bf16 %v1130_v42, %v1129_v40  ;;  %v1649_v52 = vpack.c.bf16 %v1146_v43, %v1145_v41 }
 0x110   : > { %v1099_v53 = vadd.f32 %v2085_v57, %v1060_v46  ;;  %v1115_v54 = vadd.f32 %v2085_v57, %v1076_v47  ;;  %v1061_v55 = vmul.f32 %v1729_v48, %v2080_v51  ;;  %v1077_v56 = vmul.f32 %v1777_v49, %v2080_v51 }
 0x111   : > { %1681 = vst [vmem:[%s2099_s25 + $0x8] sm:$0xff] %v1609_v50   ;;  %1689 = vst [vmem:[%s2099_s25 + $0x48] sm:$0xff] %v1649_v52  }
 0x112   : > { %v1100_v58 = vadd.f32 %v2085_v57, %v1061_v55  ;;  %v1116_v59 = vadd.f32 %v2085_v57, %v1077_v56  ;;  %v1730_v60 = vpop.f32.mrb[12].mxu0  ;;  %v1778_v61 = vpop.f32.mrb[12].mxu1  ;;  %v1131_v62 = vmax.f32 %v1099_v53, 0.0  ;;  %v1147_v63 = vmax.f32 %v1115_v54, 0.0 }
 0x113   : > { %v1731_v0 = vpop.f32.mrb[13].mxu0  ;;  %v1779_v1 = vpop.f32.mrb[13].mxu1 }
 0x114   : > { %v1132_v2 = vmax.f32 %v1100_v58, 0.0  ;;  %v1148_v3 = vmax.f32 %v1116_v59, 0.0  ;;  %v1732_v4 = vadd.f32 %v1731_v0, %v1730_v60  ;;  %v1780_v5 = vadd.f32 %v1779_v1, %v1778_v61  ;;  %v1733_v6 = vpop.f32.mrb[14].mxu0  ;;  %v1781_v7 = vpop.f32.mrb[14].mxu1 }
 0x115   : > { %v1734_v8 = vpop.f32.mrb[15].mxu0  ;;  %v1782_v9 = vpop.f32.mrb[15].mxu1 }
 0x116   : > { %v1614_v10 = vpack.c.bf16 %v1132_v2, %v1131_v62  ;;  %v1654_v11 = vpack.c.bf16 %v1148_v3, %v1147_v63  ;;  %v1062_v12 = vmul.f32 %v1732_v4, %v2080_v51  ;;  %v1078_v13 = vmul.f32 %v1780_v5, %v2080_v51 }
 0x117   : > { %v1735_v14 = vadd.f32 %v1734_v8, %v1733_v6  ;;  %v1783_v15 = vadd.f32 %v1782_v9, %v1781_v7 }
 0x118   : > { %1682 = vst [vmem:[%s2099_s25 + $0x10] sm:$0xff] %v1614_v10   ;;  %1690 = vst [vmem:[%s2099_s25 + $0x50] sm:$0xff] %v1654_v11   ;;  %v1101_v16 = vadd.f32 %v2085_v57, %v1062_v12  ;;  %v1117_v17 = vadd.f32 %v2085_v57, %v1078_v13 }
 0x119   : > { %v1063_v18 = vmul.f32 %v1735_v14, %v2080_v51  ;;  %v1079_v19 = vmul.f32 %v1783_v15, %v2080_v51 }
 0x11a   : > { %v1736_v20 = vpop.f32.mrb[16].mxu0  ;;  %v1784_v21 = vpop.f32.mrb[16].mxu1  ;;  %v1133_v30 = vmax.f32 %v1101_v16, 0.0  ;;  %v1149_v31 = vmax.f32 %v1117_v17, 0.0 }
 0x11b   : > { %v1102_v22 = vadd.f32 %v2085_v57, %v1063_v18  ;;  %v1118_v23 = vadd.f32 %v2085_v57, %v1079_v19  ;;  %v1737_v24 = vpop.f32.mrb[17].mxu0  ;;  %v1785_v25 = vpop.f32.mrb[17].mxu1 }
 0x11c   : > { %v1738_v26 = vadd.f32 %v1737_v24, %v1736_v20  ;;  %v1786_v27 = vadd.f32 %v1785_v25, %v1784_v21  ;;  %v1739_v28 = vpop.f32.mrb[18].mxu0  ;;  %v1787_v29 = vpop.f32.mrb[18].mxu1 }
 0x11d   : > { %v1134_v32 = vmax.f32 %v1102_v22, 0.0  ;;  %v1150_v33 = vmax.f32 %v1118_v23, 0.0  ;;  %v1740_v34 = vpop.f32.mrb[19].mxu0  ;;  %v1788_v35 = vpop.f32.mrb[19].mxu1 }
 0x11e   : > { %v1064_v36 = vmul.f32 %v1738_v26, %v2080_v51  ;;  %v1080_v37 = vmul.f32 %v1786_v27, %v2080_v51  ;;  %v1741_v38 = vadd.f32 %v1740_v34, %v1739_v28  ;;  %v1789_v39 = vadd.f32 %v1788_v35, %v1787_v29 }
 0x11f   : > { %v1619_v40 = vpack.c.bf16 %v1134_v32, %v1133_v30  ;;  %v1659_v41 = vpack.c.bf16 %v1150_v33, %v1149_v31 }
 0x120   : > { %v1103_v42 = vadd.f32 %v2085_v57, %v1064_v36  ;;  %v1119_v43 = vadd.f32 %v2085_v57, %v1080_v37  ;;  %v1065_v44 = vmul.f32 %v1741_v38, %v2080_v51  ;;  %v1081_v45 = vmul.f32 %v1789_v39, %v2080_v51 }
 0x121   : > { %1683 = vst [vmem:[%s2099_s25 + $0x18] sm:$0xff] %v1619_v40   ;;  %1691 = vst [vmem:[%s2099_s25 + $0x58] sm:$0xff] %v1659_v41  }
 0x122   : > { %v1104_v46 = vadd.f32 %v2085_v57, %v1065_v44  ;;  %v1120_v47 = vadd.f32 %v2085_v57, %v1081_v45  ;;  %v1742_v48 = vpop.f32.mrb[20].mxu0  ;;  %v1790_v49 = vpop.f32.mrb[20].mxu1  ;;  %v1135_v50 = vmax.f32 %v1103_v42, 0.0  ;;  %v1151_v52 = vmax.f32 %v1119_v43, 0.0 }
 0x123   : > { %v1743_v53 = vpop.f32.mrb[21].mxu0  ;;  %v1791_v54 = vpop.f32.mrb[21].mxu1 }
 0x124   : > { %v1136_v55 = vmax.f32 %v1104_v46, 0.0  ;;  %v1152_v56 = vmax.f32 %v1120_v47, 0.0  ;;  %v1744_v58 = vadd.f32 %v1743_v53, %v1742_v48  ;;  %v1792_v59 = vadd.f32 %v1791_v54, %v1790_v49  ;;  %v1745_v60 = vpop.f32.mrb[22].mxu0  ;;  %v1793_v61 = vpop.f32.mrb[22].mxu1 }
 0x125   : > { %v1746_v62 = vpop.f32.mrb[23].mxu0  ;;  %v1794_v63 = vpop.f32.mrb[23].mxu1 }
 0x126   : > { %v1624_v0 = vpack.c.bf16 %v1136_v55, %v1135_v50  ;;  %v1664_v1 = vpack.c.bf16 %v1152_v56, %v1151_v52  ;;  %v1066_v2 = vmul.f32 %v1744_v58, %v2080_v51  ;;  %v1082_v3 = vmul.f32 %v1792_v59, %v2080_v51 }
 0x127   : > { %v1747_v4 = vadd.f32 %v1746_v62, %v1745_v60  ;;  %v1795_v5 = vadd.f32 %v1794_v63, %v1793_v61 }
 0x128   : > { %1684 = vst [vmem:[%s2099_s25 + $0x20] sm:$0xff] %v1624_v0   ;;  %1692 = vst [vmem:[%s2099_s25 + $0x60] sm:$0xff] %v1664_v1   ;;  %v1105_v6 = vadd.f32 %v2085_v57, %v1066_v2  ;;  %v1121_v7 = vadd.f32 %v2085_v57, %v1082_v3 }
 0x129   : > { %v1067_v8 = vmul.f32 %v1747_v4, %v2080_v51  ;;  %v1083_v9 = vmul.f32 %v1795_v5, %v2080_v51 }
 0x12a   : > { %v1748_v10 = vpop.f32.mrb[24].mxu0  ;;  %v1796_v11 = vpop.f32.mrb[24].mxu1  ;;  %v1137_v20 = vmax.f32 %v1105_v6, 0.0  ;;  %v1153_v21 = vmax.f32 %v1121_v7, 0.0 }
 0x12b   : > { %v1106_v12 = vadd.f32 %v2085_v57, %v1067_v8  ;;  %v1122_v13 = vadd.f32 %v2085_v57, %v1083_v9  ;;  %v1749_v14 = vpop.f32.mrb[25].mxu0  ;;  %v1797_v15 = vpop.f32.mrb[25].mxu1 }
 0x12c   : > { %v1750_v16 = vadd.f32 %v1749_v14, %v1748_v10  ;;  %v1798_v17 = vadd.f32 %v1797_v15, %v1796_v11  ;;  %v1751_v18 = vpop.f32.mrb[26].mxu0  ;;  %v1799_v19 = vpop.f32.mrb[26].mxu1 }
 0x12d   : > { %v1138_v22 = vmax.f32 %v1106_v12, 0.0  ;;  %v1154_v23 = vmax.f32 %v1122_v13, 0.0  ;;  %v1752_v24 = vpop.f32.mrb[27].mxu0  ;;  %v1800_v25 = vpop.f32.mrb[27].mxu1 }
 0x12e   : > { %v1068_v26 = vmul.f32 %v1750_v16, %v2080_v51  ;;  %v1084_v27 = vmul.f32 %v1798_v17, %v2080_v51  ;;  %v1753_v28 = vadd.f32 %v1752_v24, %v1751_v18  ;;  %v1801_v29 = vadd.f32 %v1800_v25, %v1799_v19 }
 0x12f   : > { %v1629_v30 = vpack.c.bf16 %v1138_v22, %v1137_v20  ;;  %v1669_v31 = vpack.c.bf16 %v1154_v23, %v1153_v21 }
 0x130   : > { %v1107_v32 = vadd.f32 %v2085_v57, %v1068_v26  ;;  %v1123_v33 = vadd.f32 %v2085_v57, %v1084_v27  ;;  %v1069_v34 = vmul.f32 %v1753_v28, %v2080_v51  ;;  %v1085_v35 = vmul.f32 %v1801_v29, %v2080_v51 }
 0x131   : > { %1685 = vst [vmem:[%s2099_s25 + $0x28] sm:$0xff] %v1629_v30   ;;  %1693 = vst [vmem:[%s2099_s25 + $0x68] sm:$0xff] %v1669_v31  }
 0x132   : > { %v1108_v36 = vadd.f32 %v2085_v57, %v1069_v34  ;;  %v1124_v37 = vadd.f32 %v2085_v57, %v1085_v35  ;;  %v1754_v38 = vpop.f32.mrb[28].mxu0  ;;  %v1802_v39 = vpop.f32.mrb[28].mxu1  ;;  %v1139_v40 = vmax.f32 %v1107_v32, 0.0  ;;  %v1155_v41 = vmax.f32 %v1123_v33, 0.0 }
 0x133   : > { %v1755_v42 = vpop.f32.mrb[29].mxu0  ;;  %v1803_v43 = vpop.f32.mrb[29].mxu1 }
 0x134   : > { %v1140_v44 = vmax.f32 %v1108_v36, 0.0  ;;  %v1156_v45 = vmax.f32 %v1124_v37, 0.0  ;;  %v1756_v46 = vadd.f32 %v1755_v42, %v1754_v38  ;;  %v1804_v47 = vadd.f32 %v1803_v43, %v1802_v39  ;;  %v1757_v48 = vpop.f32.mrb[30].mxu0  ;;  %v1805_v49 = vpop.f32.mrb[30].mxu1 }
 0x135   : > { %v1758_v50 = vpop.f32.mrb[31].mxu0  ;;  %v1806_v52 = vpop.f32.mrb[31].mxu1 }
 0x136   : > { %v1634_v53 = vpack.c.bf16 %v1140_v44, %v1139_v40  ;;  %v1674_v54 = vpack.c.bf16 %v1156_v45, %v1155_v41  ;;  %v1070_v55 = vmul.f32 %v1756_v46, %v2080_v51  ;;  %v1086_v56 = vmul.f32 %v1804_v47, %v2080_v51 }
 0x137   : > { %v1759_v58 = vadd.f32 %v1758_v50, %v1757_v48  ;;  %v1807_v59 = vadd.f32 %v1806_v52, %v1805_v49 }
 0x138   : > { %1686 = vst [vmem:[%s2099_s25 + $0x30] sm:$0xff] %v1634_v53   ;;  %1694 = vst [vmem:[%s2099_s25 + $0x70] sm:$0xff] %v1674_v54   ;;  %v1109_v60 = vadd.f32 %v2085_v57, %v1070_v55  ;;  %v1125_v61 = vadd.f32 %v2085_v57, %v1086_v56 }
 0x139   : > { %v1071_v62 = vmul.f32 %v1759_v58, %v2080_v51  ;;  %v1087_v63 = vmul.f32 %v1807_v59, %v2080_v51 }
 0x13a   : > { %v1141_v2 = vmax.f32 %v1109_v60, 0.0  ;;  %v1157_v3 = vmax.f32 %v1125_v61, 0.0 }
 0x13b   : > { %v1110_v0 = vadd.f32 %v2085_v57, %v1071_v62  ;;  %v1126_v1 = vadd.f32 %v2085_v57, %v1087_v63 }
 0x13d   : > { %v1142_v4 = vmax.f32 %v1110_v0, 0.0  ;;  %v1158_v5 = vmax.f32 %v1126_v1, 0.0 }
 0x13f   : > { %v1639_v6 = vpack.c.bf16 %v1142_v4, %v1141_v2  ;;  %v1679_v7 = vpack.c.bf16 %v1158_v5, %v1157_v3 }
 0x141   : > { %1687 = vst [vmem:[%s2099_s25 + $0x38] sm:$0xff] %v1639_v6   ;;  %1695 = vst [vmem:[%s2099_s25 + $0x78] sm:$0xff] %v1679_v7  }
 0x142 PF: > { %s16_s23 = sadd.s32 1, %s1934_s23   ;;  %s2189_s21 = smov %s1930_s22 }
 0x143   : > { %p13_p5 = scmp.ge.s32.totalorder %s16_s23, 4   ;;  %s2190_s22 = smov %s2192_s2 }
 0x145   :  { %15 = sbr.rel (!%p13_p5) target bundleno = 2 (0x2), region = 97 }

// kernel: densenet121_forward.127
= control target key start
LH: loop header
LB: loop body
LE: loop exit
PB: predicated region body
PF: predicated region fallthrough
CT: control target
= control target key end

     0   :  { %vm153_vm0 = vcmask 1043456   ;;  %s1400_s0 = inlined_call_operand.vmem [shape: bf16[9,128,128], index: 0, kind: input, shape index: {}]   ;;  %s1401_s1 = inlined_call_operand.vmem [shape: bf16[128,128], index: 1, kind: output, shape index: {}]  }
   0x1   :  { %v9_v0 = vld [vmem:[%s1400_s0] sm:$0xf]  ;;  %v10_v3 = vld [vmem:[%s1400_s0 + $0x4] sm:$0xf]  ;;  %v11_v39 = vld [vmem:[%s1400_s0 + $0x8] sm:$0xf] }
   0x2   :  { %v25_v1 = vld [vmem:[%s1400_s0 + $0x40] sm:$0xf]  ;;  %v26_v4 = vld [vmem:[%s1400_s0 + $0x44] sm:$0xf]  ;;  %v156_v7 = vsel %vm153_vm0, %v9_v0, 4286644096 }
   0x3   :  { %v41_v2 = vld [vmem:[%s1400_s0 + $0x80] sm:$0xf]  ;;  %v42_v5 = vld [vmem:[%s1400_s0 + $0x84] sm:$0xf]  ;;  %v159_v8 = vsel %vm153_vm0, %v25_v1, 4286644096 }
   0x4   :  { %v57_v6 = vld [vmem:[%s1400_s0 + $0xc0] sm:$0xf]  ;;  %v163_v9 = vsel %vm153_vm0, %v41_v2, 4286644096  ;;  %v161_v11 = vmax.bf16 %v159_v8, %v156_v7  ;;  %v58_v12 = vld [vmem:[%s1400_s0 + $0xc4] sm:$0xf] }
   0x5   :  { %v73_v10 = vld [vmem:[%s1400_s0 + $0x100] sm:$0xf]  ;;  %v167_v14 = vsel %vm153_vm0, %v57_v6, 4286644096  ;;  %v191_v16 = vsel %vm153_vm0, %v10_v3, 4286644096 }
   0x6   :  { %v89_v13 = vld [vmem:[%s1400_s0 + $0x140] sm:$0xf]  ;;  %v165_v15 = vmax.bf16 %v163_v9, %v161_v11  ;;  %v194_v17 = vsel %vm153_vm0, %v26_v4, 4286644096  ;;  %v198_v18 = vsel %vm153_vm0, %v42_v5, 4286644096 }
   0x7   :  { %v74_v19 = vld [vmem:[%s1400_s0 + $0x104] sm:$0xf]  ;;  %v171_v20 = vsel %vm153_vm0, %v73_v10, 4286644096  ;;  %v196_v21 = vmax.bf16 %v194_v17, %v191_v16  ;;  %v105_v23 = vld [vmem:[%s1400_s0 + $0x180] sm:$0xf] }
   0x8   :  { %v90_v22 = vld [vmem:[%s1400_s0 + $0x144] sm:$0xf]  ;;  %v169_v24 = vmax.bf16 %v167_v14, %v165_v15  ;;  %v202_v25 = vsel %vm153_vm0, %v58_v12, 4286644096  ;;  %v175_v27 = vsel %vm153_vm0, %v89_v13, 4286644096 }
   0x9   :  { %v106_v26 = vld [vmem:[%s1400_s0 + $0x184] sm:$0xf]  ;;  %v200_v28 = vmax.bf16 %v198_v18, %v196_v21  ;;  %v121_v29 = vld [vmem:[%s1400_s0 + $0x1c0] sm:$0xf]  ;;  %v206_v32 = vsel %vm153_vm0, %v74_v19, 4286644096 }
   0xa   :  { %v137_v30 = vld [vmem:[%s1400_s0 + $0x200] sm:$0xf]  ;;  %v173_v31 = vmax.bf16 %v171_v20, %v169_v24  ;;  %v122_v33 = vld [vmem:[%s1400_s0 + $0x1c4] sm:$0xf]  ;;  %v179_v34 = vsel %vm153_vm0, %v105_v23, 4286644096 }
   0xb   :  { %v204_v35 = vmax.bf16 %v202_v25, %v200_v28  ;;  %v210_v36 = vsel %vm153_vm0, %v90_v22, 4286644096  ;;  %v138_v37 = vld [vmem:[%s1400_s0 + $0x204] sm:$0xf]  ;;  %v27_v40 = vld [vmem:[%s1400_s0 + $0x48] sm:$0xf] }
   0xc   :  { %v177_v38 = vmax.bf16 %v175_v27, %v173_v31  ;;  %v43_v41 = vld [vmem:[%s1400_s0 + $0x88] sm:$0xf]  ;;  %v183_v42 = vsel %vm153_vm0, %v121_v29, 4286644096  ;;  %v187_v43 = vsel %vm153_vm0, %v137_v30, 4286644096 }
   0xd   :  { %v208_v44 = vmax.bf16 %v206_v32, %v204_v35  ;;  %v214_v45 = vsel %vm153_vm0, %v106_v26, 4286644096  ;;  %v12_v47 = vld [vmem:[%s1400_s0 + $0xc] sm:$0xf]  ;;  %v59_v48 = vld [vmem:[%s1400_s0 + $0xc8] sm:$0xf] }
   0xe   :  { %v181_v46 = vmax.bf16 %v179_v34, %v177_v38  ;;  %v75_v49 = vld [vmem:[%s1400_s0 + $0x108] sm:$0xf]  ;;  %v226_v51 = vsel %vm153_vm0, %v11_v39, 4286644096  ;;  %v229_v52 = vsel %vm153_vm0, %v27_v40, 4286644096 }
   0xf   :  { %v212_v50 = vmax.bf16 %v210_v36, %v208_v44  ;;  %v233_v53 = vsel %vm153_vm0, %v43_v41, 4286644096  ;;  %v218_v55 = vsel %vm153_vm0, %v122_v33, 4286644096  ;;  %v28_v56 = vld [vmem:[%s1400_s0 + $0x4c] sm:$0xf]  ;;  %v231_v58 = vmax.bf16 %v229_v52, %v226_v51 }
  0x10   :  { %v185_v54 = vmax.bf16 %v183_v42, %v181_v46  ;;  %v44_v57 = vld [vmem:[%s1400_s0 + $0x8c] sm:$0xf]  ;;  %v222_v60 = vsel %vm153_vm0, %v138_v37, 4286644096  ;;  %v237_v62 = vsel %vm153_vm0, %v59_v48, 4286644096 }
  0x11   :  { %v216_v59 = vmax.bf16 %v214_v45, %v212_v50  ;;  %v60_v61 = vld [vmem:[%s1400_s0 + $0xcc] sm:$0xf]  ;;  %v91_v63 = vld [vmem:[%s1400_s0 + $0x148] sm:$0xf]  ;;  %v235_v0 = vmax.bf16 %v233_v53, %v231_v58  ;;  %v241_v1 = vsel %vm153_vm0, %v75_v49, 4286644096 }
  0x12   :  { %v261_v2 = vsel %vm153_vm0, %v12_v47, 4286644096  ;;  %v189_v3 = vmax.bf16 %v187_v43, %v185_v54  ;;  %v264_v5 = vsel %vm153_vm0, %v28_v56, 4286644096  ;;  %v268_v6 = vsel %vm153_vm0, %v44_v57, 4286644096 }
  0x13   :  { %v220_v4 = vmax.bf16 %v218_v55, %v216_v59  ;;  %v76_v7 = vld [vmem:[%s1400_s0 + $0x10c] sm:$0xf]  ;;  %v107_v8 = vld [vmem:[%s1400_s0 + $0x188] sm:$0xf]  ;;  %v239_v9 = vmax.bf16 %v237_v62, %v235_v0  ;;  %v266_v10 = vmax.bf16 %v264_v5, %v261_v2  ;;  %v245_v12 = vsel %vm153_vm0, %v91_v63, 4286644096 }
  0x14   :  { %v272_v13 = vsel %vm153_vm0, %v60_v61, 4286644096  ;;  %v92_v14 = vld [vmem:[%s1400_s0 + $0x14c] sm:$0xf]  ;;  %v123_v16 = vld [vmem:[%s1400_s0 + $0x1c8] sm:$0xf] }
  0x15   :  { %v224_v11 = vmax.bf16 %v222_v60, %v220_v4  ;;  %v108_v15 = vld [vmem:[%s1400_s0 + $0x18c] sm:$0xf]  ;;  %v243_v17 = vmax.bf16 %v241_v1, %v239_v9  ;;  %v270_v18 = vmax.bf16 %v268_v6, %v266_v10  ;;  %v139_v20 = vld [vmem:[%s1400_s0 + $0x208] sm:$0xf]  ;;  %v249_v21 = vsel %vm153_vm0, %v107_v8, 4286644096 }
  0x16   :  { %v276_v22 = vsel %vm153_vm0, %v76_v7, 4286644096  ;;  %v124_v23 = vld [vmem:[%s1400_s0 + $0x1cc] sm:$0xf]  ;;  %v13_v26 = vld [vmem:[%s1400_s0 + $0x10] sm:$0xf] }
  0x17   :  { %v775_v19 = vcombine.low %v189_v3, %v224_v11  ;;  %v247_v24 = vmax.bf16 %v245_v12, %v243_v17  ;;  %v274_v25 = vmax.bf16 %v272_v13, %v270_v18  ;;  %v29_v27 = vld [vmem:[%s1400_s0 + $0x50] sm:$0xf]  ;;  %v140_v29 = vld [vmem:[%s1400_s0 + $0x20c] sm:$0xf]  ;;  %v253_v30 = vsel %vm153_vm0, %v123_v16, 4286644096 }
  0x18   :  { %v45_v28 = vld [vmem:[%s1400_s0 + $0x90] sm:$0xf]  ;;  %v280_v31 = vsel %vm153_vm0, %v92_v14, 4286644096  ;;  %v257_v33 = vsel %vm153_vm0, %v139_v20, 4286644096 }
  0x19   :  { %739 = vst [vmem:[%s1401_s1] sm:$0xff] %v775_v19   ;;  %v251_v32 = vmax.bf16 %v249_v21, %v247_v24  ;;  %v278_v34 = vmax.bf16 %v276_v22, %v274_v25  ;;  %v284_v35 = vsel %vm153_vm0, %v108_v15, 4286644096  ;;  %v61_v36 = vld [vmem:[%s1400_s0 + $0xd0] sm:$0xf]  ;;  %v296_v37 = vsel %vm153_vm0, %v13_v26, 4286644096 }
  0x1a   :  { %v299_v38 = vsel %vm153_vm0, %v29_v27, 4286644096  ;;  %v303_v39 = vsel %vm153_vm0, %v45_v28, 4286644096  ;;  %v14_v42 = vld [vmem:[%s1400_s0 + $0x14] sm:$0xf] }
  0x1b   :  { %v255_v40 = vmax.bf16 %v253_v30, %v251_v32  ;;  %v282_v41 = vmax.bf16 %v280_v31, %v278_v34  ;;  %v30_v43 = vld [vmem:[%s1400_s0 + $0x54] sm:$0xf]  ;;  %v77_v44 = vld [vmem:[%s1400_s0 + $0x110] sm:$0xf]  ;;  %v301_v45 = vmax.bf16 %v299_v38, %v296_v37  ;;  %v288_v46 = vsel %vm153_vm0, %v124_v23, 4286644096 }
  0x1c   :  { %v46_v47 = vld [vmem:[%s1400_s0 + $0x94] sm:$0xf]  ;;  %v307_v48 = vsel %vm153_vm0, %v61_v36, 4286644096  ;;  %v292_v50 = vsel %vm153_vm0, %v140_v29, 4286644096 }
  0x1d   :  { %v286_v49 = vmax.bf16 %v284_v35, %v282_v41  ;;  %v62_v51 = vld [vmem:[%s1400_s0 + $0xd4] sm:$0xf]  ;;  %v93_v52 = vld [vmem:[%s1400_s0 + $0x150] sm:$0xf]  ;;  %v305_v53 = vmax.bf16 %v303_v39, %v301_v45  ;;  %v259_v54 = vmax.bf16 %v257_v33, %v255_v40  ;;  %v311_v55 = vsel %vm153_vm0, %v77_v44, 4286644096 }
  0x1e   :  { %v331_v56 = vsel %vm153_vm0, %v14_v42, 4286644096  ;;  %v334_v57 = vsel %vm153_vm0, %v30_v43, 4286644096  ;;  %v78_v59 = vld [vmem:[%s1400_s0 + $0x114] sm:$0xf] }
  0x1f   :  { %v290_v58 = vmax.bf16 %v288_v46, %v286_v49  ;;  %v109_v60 = vld [vmem:[%s1400_s0 + $0x190] sm:$0xf]  ;;  %v309_v61 = vmax.bf16 %v307_v48, %v305_v53  ;;  %v336_v62 = vmax.bf16 %v334_v57, %v331_v56  ;;  %v338_v63 = vsel %vm153_vm0, %v46_v47, 4286644096  ;;  %v94_v3 = vld [vmem:[%s1400_s0 + $0x154] sm:$0xf] }
  0x20   :  { %v315_v0 = vsel %vm153_vm0, %v93_v52, 4286644096  ;;  %v342_v1 = vsel %vm153_vm0, %v62_v51, 4286644096  ;;  %v110_v4 = vld [vmem:[%s1400_s0 + $0x194] sm:$0xf] }
  0x21   :  { %v294_v2 = vmax.bf16 %v292_v50, %v290_v58  ;;  %v125_v5 = vld [vmem:[%s1400_s0 + $0x1d0] sm:$0xf]  ;;  %v313_v6 = vmax.bf16 %v311_v55, %v309_v61  ;;  %v340_v7 = vmax.bf16 %v338_v63, %v336_v62  ;;  %v319_v9 = vsel %vm153_vm0, %v109_v60, 4286644096  ;;  %v126_v12 = vld [vmem:[%s1400_s0 + $0x1d4] sm:$0xf] }
  0x22   :  { %v141_v8 = vld [vmem:[%s1400_s0 + $0x210] sm:$0xf]  ;;  %v346_v10 = vsel %vm153_vm0, %v78_v59, 4286644096  ;;  %v15_v15 = vld [vmem:[%s1400_s0 + $0x18] sm:$0xf] }
  0x23   :  { %v776_v11 = vcombine.low %v259_v54, %v294_v2  ;;  %v317_v13 = vmax.bf16 %v315_v0, %v313_v6  ;;  %v344_v14 = vmax.bf16 %v342_v1, %v340_v7  ;;  %v31_v16 = vld [vmem:[%s1400_s0 + $0x58] sm:$0xf]  ;;  %v142_v18 = vld [vmem:[%s1400_s0 + $0x214] sm:$0xf]  ;;  %v323_v19 = vsel %vm153_vm0, %v125_v5, 4286644096 }
  0x24   :  { %v47_v17 = vld [vmem:[%s1400_s0 + $0x98] sm:$0xf]  ;;  %v350_v20 = vsel %vm153_vm0, %v94_v3, 4286644096  ;;  %v354_v23 = vsel %vm153_vm0, %v110_v4, 4286644096 }
  0x25   :  { %777 = vst [vmem:[%s1401_s1 + $0x8] sm:$0xff] %v776_v11   ;;  %v321_v21 = vmax.bf16 %v319_v9, %v317_v13  ;;  %v348_v22 = vmax.bf16 %v346_v10, %v344_v14  ;;  %v16_v24 = vld [vmem:[%s1400_s0 + $0x1c] sm:$0xf]  ;;  %v63_v25 = vld [vmem:[%s1400_s0 + $0xd8] sm:$0xf] }
  0x26   :  { %v366_v26 = vsel %vm153_vm0, %v15_v15, 4286644096  ;;  %v369_v27 = vsel %vm153_vm0, %v31_v16, 4286644096  ;;  %v373_v28 = vsel %vm153_vm0, %v47_v17, 4286644096 }
  0x27   :  { %v325_v29 = vmax.bf16 %v323_v19, %v321_v21  ;;  %v327_v30 = vsel %vm153_vm0, %v141_v8, 4286644096  ;;  %v352_v31 = vmax.bf16 %v350_v20, %v348_v22  ;;  %v32_v32 = vld [vmem:[%s1400_s0 + $0x5c] sm:$0xf]  ;;  %v79_v33 = vld [vmem:[%s1400_s0 + $0x118] sm:$0xf]  ;;  %v371_v34 = vmax.bf16 %v369_v27, %v366_v26 }
  0x28   :  { %v358_v35 = vsel %vm153_vm0, %v126_v12, 4286644096  ;;  %v48_v36 = vld [vmem:[%s1400_s0 + $0x9c] sm:$0xf]  ;;  %v377_v37 = vsel %vm153_vm0, %v63_v25, 4286644096 }
  0x29   :  { %v356_v38 = vmax.bf16 %v354_v23, %v352_v31  ;;  %v362_v39 = vsel %vm153_vm0, %v142_v18, 4286644096  ;;  %v64_v40 = vld [vmem:[%s1400_s0 + $0xdc] sm:$0xf]  ;;  %v95_v41 = vld [vmem:[%s1400_s0 + $0x158] sm:$0xf]  ;;  %v375_v42 = vmax.bf16 %v373_v28, %v371_v34  ;;  %v329_v43 = vmax.bf16 %v327_v30, %v325_v29 }
  0x2a   :  { %v381_v44 = vsel %vm153_vm0, %v79_v33, 4286644096  ;;  %v401_v45 = vsel %vm153_vm0, %v16_v24, 4286644096  ;;  %v404_v46 = vsel %vm153_vm0, %v32_v32, 4286644096 }
  0x2b   :  { %v360_v47 = vmax.bf16 %v358_v35, %v356_v38  ;;  %v80_v48 = vld [vmem:[%s1400_s0 + $0x11c] sm:$0xf]  ;;  %v111_v49 = vld [vmem:[%s1400_s0 + $0x198] sm:$0xf]  ;;  %v379_v50 = vmax.bf16 %v377_v37, %v375_v42  ;;  %v406_v51 = vmax.bf16 %v404_v46, %v401_v45  ;;  %v408_v52 = vsel %vm153_vm0, %v48_v36, 4286644096 }
  0x2c   :  { %v385_v53 = vsel %vm153_vm0, %v95_v41, 4286644096  ;;  %v412_v54 = vsel %vm153_vm0, %v64_v40, 4286644096  ;;  %v96_v56 = vld [vmem:[%s1400_s0 + $0x15c] sm:$0xf] }
  0x2d   :  { %v364_v55 = vmax.bf16 %v362_v39, %v360_v47  ;;  %v112_v57 = vld [vmem:[%s1400_s0 + $0x19c] sm:$0xf]  ;;  %v127_v58 = vld [vmem:[%s1400_s0 + $0x1d8] sm:$0xf]  ;;  %v383_v59 = vmax.bf16 %v381_v44, %v379_v50  ;;  %v410_v60 = vmax.bf16 %v408_v52, %v406_v51  ;;  %v389_v62 = vsel %vm153_vm0, %v111_v49, 4286644096 }
  0x2e   :  { %v143_v61 = vld [vmem:[%s1400_s0 + $0x218] sm:$0xf]  ;;  %v416_v63 = vsel %vm153_vm0, %v80_v48, 4286644096  ;;  %v128_v1 = vld [vmem:[%s1400_s0 + $0x1dc] sm:$0xf] }
  0x2f   :  { %v778_v0 = vcombine.low %v329_v43, %v364_v55  ;;  %v387_v2 = vmax.bf16 %v385_v53, %v383_v59  ;;  %v414_v3 = vmax.bf16 %v412_v54, %v410_v60  ;;  %v17_v4 = vld [vmem:[%s1400_s0 + $0x20] sm:$0xf]  ;;  %v144_v7 = vld [vmem:[%s1400_s0 + $0x21c] sm:$0xf]  ;;  %v393_v8 = vsel %vm153_vm0, %v127_v58, 4286644096 }
  0x30   :  { %v33_v5 = vld [vmem:[%s1400_s0 + $0x60] sm:$0xf]  ;;  %v420_v9 = vsel %vm153_vm0, %v96_v56, 4286644096  ;;  %v424_v12 = vsel %vm153_vm0, %v112_v57, 4286644096 }
  0x31   :  { %v49_v6 = vld [vmem:[%s1400_s0 + $0xa0] sm:$0xf]  ;;  %779 = vst [vmem:[%s1401_s1 + $0x10] sm:$0xff] %v778_v0   ;;  %v391_v10 = vmax.bf16 %v389_v62, %v387_v2  ;;  %v418_v11 = vmax.bf16 %v416_v63, %v414_v3  ;;  %v18_v13 = vld [vmem:[%s1400_s0 + $0x24] sm:$0xf] }
  0x32   :  { %v65_v14 = vld [vmem:[%s1400_s0 + $0xe0] sm:$0xf]  ;;  %v436_v15 = vsel %vm153_vm0, %v17_v4, 4286644096  ;;  %v439_v16 = vsel %vm153_vm0, %v33_v5, 4286644096 }
  0x33   :  { %v443_v17 = vsel %vm153_vm0, %v49_v6, 4286644096  ;;  %v395_v18 = vmax.bf16 %v393_v8, %v391_v10  ;;  %v397_v19 = vsel %vm153_vm0, %v143_v61, 4286644096  ;;  %v422_v20 = vmax.bf16 %v420_v9, %v418_v11  ;;  %v34_v21 = vld [vmem:[%s1400_s0 + $0x64] sm:$0xf] }
  0x34   :  { %v81_v22 = vld [vmem:[%s1400_s0 + $0x120] sm:$0xf]  ;;  %v441_v23 = vmax.bf16 %v439_v16, %v436_v15  ;;  %v428_v24 = vsel %vm153_vm0, %v128_v1, 4286644096  ;;  %v50_v25 = vld [vmem:[%s1400_s0 + $0xa4] sm:$0xf] }
  0x35   :  { %v447_v26 = vsel %vm153_vm0, %v65_v14, 4286644096  ;;  %v426_v27 = vmax.bf16 %v424_v12, %v422_v20  ;;  %v432_v28 = vsel %vm153_vm0, %v144_v7, 4286644096  ;;  %v66_v29 = vld [vmem:[%s1400_s0 + $0xe4] sm:$0xf]  ;;  %v399_v32 = vmax.bf16 %v397_v19, %v395_v18 }
  0x36   :  { %v97_v30 = vld [vmem:[%s1400_s0 + $0x160] sm:$0xf]  ;;  %v445_v31 = vmax.bf16 %v443_v17, %v441_v23  ;;  %v451_v33 = vsel %vm153_vm0, %v81_v22, 4286644096  ;;  %v471_v34 = vsel %vm153_vm0, %v18_v13, 4286644096 }
  0x37   :  { %v474_v35 = vsel %vm153_vm0, %v34_v21, 4286644096  ;;  %v430_v36 = vmax.bf16 %v428_v24, %v426_v27  ;;  %v82_v37 = vld [vmem:[%s1400_s0 + $0x124] sm:$0xf]  ;;  %v113_v38 = vld [vmem:[%s1400_s0 + $0x1a0] sm:$0xf] }
  0x38   :  { %v449_v39 = vmax.bf16 %v447_v26, %v445_v31  ;;  %v476_v40 = vmax.bf16 %v474_v35, %v471_v34  ;;  %v478_v41 = vsel %vm153_vm0, %v50_v25, 4286644096  ;;  %v455_v42 = vsel %vm153_vm0, %v97_v30, 4286644096  ;;  %v98_v45 = vld [vmem:[%s1400_s0 + $0x164] sm:$0xf] }
  0x39   :  { %v482_v43 = vsel %vm153_vm0, %v66_v29, 4286644096  ;;  %v434_v44 = vmax.bf16 %v432_v28, %v430_v36  ;;  %v114_v46 = vld [vmem:[%s1400_s0 + $0x1a4] sm:$0xf]  ;;  %v129_v47 = vld [vmem:[%s1400_s0 + $0x1e0] sm:$0xf] }
  0x3a   :  { %v453_v48 = vmax.bf16 %v451_v33, %v449_v39  ;;  %v480_v49 = vmax.bf16 %v478_v41, %v476_v40  ;;  %v145_v50 = vld [vmem:[%s1400_s0 + $0x220] sm:$0xf]  ;;  %v459_v51 = vsel %vm153_vm0, %v113_v38, 4286644096  ;;  %v486_v52 = vsel %vm153_vm0, %v82_v37, 4286644096 }
  0x3b   :  { %v780_v53 = vcombine.low %v399_v32, %v434_v44  ;;  %v130_v54 = vld [vmem:[%s1400_s0 + $0x1e4] sm:$0xf]  ;;  %v19_v57 = vld [vmem:[%s1400_s0 + $0x28] sm:$0xf]  ;;  %v463_v61 = vsel %vm153_vm0, %v129_v47, 4286644096 }
  0x3c   :  { %v457_v55 = vmax.bf16 %v455_v42, %v453_v48  ;;  %v484_v56 = vmax.bf16 %v482_v43, %v480_v49  ;;  %v35_v58 = vld [vmem:[%s1400_s0 + $0x68] sm:$0xf]  ;;  %v146_v60 = vld [vmem:[%s1400_s0 + $0x224] sm:$0xf]  ;;  %v490_v62 = vsel %vm153_vm0, %v98_v45, 4286644096 }
  0x3d   :  { %v51_v59 = vld [vmem:[%s1400_s0 + $0xa8] sm:$0xf]  ;;  %781 = vst [vmem:[%s1401_s1 + $0x18] sm:$0xff] %v780_v53   ;;  %v494_v1 = vsel %vm153_vm0, %v114_v46, 4286644096 }
  0x3e   :  { %v461_v63 = vmax.bf16 %v459_v51, %v457_v55  ;;  %v488_v0 = vmax.bf16 %v486_v52, %v484_v56  ;;  %v20_v2 = vld [vmem:[%s1400_s0 + $0x2c] sm:$0xf]  ;;  %v67_v3 = vld [vmem:[%s1400_s0 + $0xe8] sm:$0xf]  ;;  %v506_v4 = vsel %vm153_vm0, %v19_v57, 4286644096 }
  0x3f   :  { %v509_v5 = vsel %vm153_vm0, %v35_v58, 4286644096  ;;  %v513_v6 = vsel %vm153_vm0, %v51_v59, 4286644096  ;;  %v467_v8 = vsel %vm153_vm0, %v145_v50, 4286644096 }
  0x40   :  { %v465_v7 = vmax.bf16 %v463_v61, %v461_v63  ;;  %v492_v9 = vmax.bf16 %v490_v62, %v488_v0  ;;  %v36_v10 = vld [vmem:[%s1400_s0 + $0x6c] sm:$0xf]  ;;  %v83_v11 = vld [vmem:[%s1400_s0 + $0x128] sm:$0xf]  ;;  %v511_v12 = vmax.bf16 %v509_v5, %v506_v4  ;;  %v498_v13 = vsel %vm153_vm0, %v130_v54, 4286644096 }
  0x41   :  { %v52_v14 = vld [vmem:[%s1400_s0 + $0xac] sm:$0xf]  ;;  %v517_v15 = vsel %vm153_vm0, %v67_v3, 4286644096  ;;  %v502_v17 = vsel %vm153_vm0, %v146_v60, 4286644096 }
  0x42   :  { %v496_v16 = vmax.bf16 %v494_v1, %v492_v9  ;;  %v68_v18 = vld [vmem:[%s1400_s0 + $0xec] sm:$0xf]  ;;  %v99_v19 = vld [vmem:[%s1400_s0 + $0x168] sm:$0xf]  ;;  %v515_v20 = vmax.bf16 %v513_v6, %v511_v12  ;;  %v469_v21 = vmax.bf16 %v467_v8, %v465_v7  ;;  %v521_v22 = vsel %vm153_vm0, %v83_v11, 4286644096 }
  0x43   :  { %v541_v23 = vsel %vm153_vm0, %v20_v2, 4286644096  ;;  %v544_v24 = vsel %vm153_vm0, %v36_v10, 4286644096  ;;  %v84_v26 = vld [vmem:[%s1400_s0 + $0x12c] sm:$0xf] }
  0x44   :  { %v500_v25 = vmax.bf16 %v498_v13, %v496_v16  ;;  %v115_v27 = vld [vmem:[%s1400_s0 + $0x1a8] sm:$0xf]  ;;  %v519_v28 = vmax.bf16 %v517_v15, %v515_v20  ;;  %v546_v29 = vmax.bf16 %v544_v24, %v541_v23  ;;  %v548_v30 = vsel %vm153_vm0, %v52_v14, 4286644096  ;;  %v100_v34 = vld [vmem:[%s1400_s0 + $0x16c] sm:$0xf] }
  0x45   :  { %v525_v31 = vsel %vm153_vm0, %v99_v19, 4286644096  ;;  %v552_v32 = vsel %vm153_vm0, %v68_v18, 4286644096  ;;  %v116_v35 = vld [vmem:[%s1400_s0 + $0x1ac] sm:$0xf] }
  0x46   :  { %v504_v33 = vmax.bf16 %v502_v17, %v500_v25  ;;  %v131_v36 = vld [vmem:[%s1400_s0 + $0x1e8] sm:$0xf]  ;;  %v523_v37 = vmax.bf16 %v521_v22, %v519_v28  ;;  %v550_v38 = vmax.bf16 %v548_v30, %v546_v29  ;;  %v529_v40 = vsel %vm153_vm0, %v115_v27, 4286644096  ;;  %v132_v43 = vld [vmem:[%s1400_s0 + $0x1ec] sm:$0xf] }
  0x47   :  { %v147_v39 = vld [vmem:[%s1400_s0 + $0x228] sm:$0xf]  ;;  %v556_v41 = vsel %vm153_vm0, %v84_v26, 4286644096  ;;  %v21_v46 = vld [vmem:[%s1400_s0 + $0x30] sm:$0xf] }
  0x48   :  { %v782_v42 = vcombine.low %v469_v21, %v504_v33  ;;  %v527_v44 = vmax.bf16 %v525_v31, %v523_v37  ;;  %v554_v45 = vmax.bf16 %v552_v32, %v550_v38  ;;  %v37_v47 = vld [vmem:[%s1400_s0 + $0x70] sm:$0xf]  ;;  %v148_v49 = vld [vmem:[%s1400_s0 + $0x22c] sm:$0xf]  ;;  %v533_v50 = vsel %vm153_vm0, %v131_v36, 4286644096 }
  0x49   :  { %v53_v48 = vld [vmem:[%s1400_s0 + $0xb0] sm:$0xf]  ;;  %v560_v51 = vsel %vm153_vm0, %v100_v34, 4286644096  ;;  %v564_v54 = vsel %vm153_vm0, %v116_v35, 4286644096 }
  0x4a   :  { %783 = vst [vmem:[%s1401_s1 + $0x20] sm:$0xff] %v782_v42   ;;  %v531_v52 = vmax.bf16 %v529_v40, %v527_v44  ;;  %v558_v53 = vmax.bf16 %v556_v41, %v554_v45  ;;  %v22_v55 = vld [vmem:[%s1400_s0 + $0x34] sm:$0xf]  ;;  %v69_v56 = vld [vmem:[%s1400_s0 + $0xf0] sm:$0xf] }
  0x4b   :  { %v576_v57 = vsel %vm153_vm0, %v21_v46, 4286644096  ;;  %v579_v58 = vsel %vm153_vm0, %v37_v47, 4286644096  ;;  %v583_v59 = vsel %vm153_vm0, %v53_v48, 4286644096 }
  0x4c   :  { %v535_v60 = vmax.bf16 %v533_v50, %v531_v52  ;;  %v537_v61 = vsel %vm153_vm0, %v147_v39, 4286644096  ;;  %v562_v62 = vmax.bf16 %v560_v51, %v558_v53  ;;  %v38_v63 = vld [vmem:[%s1400_s0 + $0x74] sm:$0xf]  ;;  %v85_v0 = vld [vmem:[%s1400_s0 + $0x130] sm:$0xf]  ;;  %v581_v1 = vmax.bf16 %v579_v58, %v576_v57 }
  0x4d   :  { %v568_v2 = vsel %vm153_vm0, %v132_v43, 4286644096  ;;  %v54_v3 = vld [vmem:[%s1400_s0 + $0xb4] sm:$0xf]  ;;  %v587_v4 = vsel %vm153_vm0, %v69_v56, 4286644096 }
  0x4e   :  { %v566_v5 = vmax.bf16 %v564_v54, %v562_v62  ;;  %v572_v6 = vsel %vm153_vm0, %v148_v49, 4286644096  ;;  %v70_v7 = vld [vmem:[%s1400_s0 + $0xf4] sm:$0xf]  ;;  %v101_v8 = vld [vmem:[%s1400_s0 + $0x170] sm:$0xf]  ;;  %v585_v9 = vmax.bf16 %v583_v59, %v581_v1  ;;  %v539_v10 = vmax.bf16 %v537_v61, %v535_v60 }
  0x4f   :  { %v591_v11 = vsel %vm153_vm0, %v85_v0, 4286644096  ;;  %v611_v12 = vsel %vm153_vm0, %v22_v55, 4286644096  ;;  %v614_v13 = vsel %vm153_vm0, %v38_v63, 4286644096 }
  0x50   :  { %v570_v14 = vmax.bf16 %v568_v2, %v566_v5  ;;  %v86_v15 = vld [vmem:[%s1400_s0 + $0x134] sm:$0xf]  ;;  %v117_v16 = vld [vmem:[%s1400_s0 + $0x1b0] sm:$0xf]  ;;  %v589_v17 = vmax.bf16 %v587_v4, %v585_v9  ;;  %v616_v18 = vmax.bf16 %v614_v13, %v611_v12  ;;  %v618_v19 = vsel %vm153_vm0, %v54_v3, 4286644096 }
  0x51   :  { %v595_v20 = vsel %vm153_vm0, %v101_v8, 4286644096  ;;  %v622_v21 = vsel %vm153_vm0, %v70_v7, 4286644096  ;;  %v102_v23 = vld [vmem:[%s1400_s0 + $0x174] sm:$0xf] }
  0x52   :  { %v574_v22 = vmax.bf16 %v572_v6, %v570_v14  ;;  %v118_v24 = vld [vmem:[%s1400_s0 + $0x1b4] sm:$0xf]  ;;  %v133_v25 = vld [vmem:[%s1400_s0 + $0x1f0] sm:$0xf]  ;;  %v593_v26 = vmax.bf16 %v591_v11, %v589_v17  ;;  %v620_v27 = vmax.bf16 %v618_v19, %v616_v18  ;;  %v599_v29 = vsel %vm153_vm0, %v117_v16, 4286644096 }
  0x53   :  { %v149_v28 = vld [vmem:[%s1400_s0 + $0x230] sm:$0xf]  ;;  %v626_v30 = vsel %vm153_vm0, %v86_v15, 4286644096  ;;  %v134_v32 = vld [vmem:[%s1400_s0 + $0x1f4] sm:$0xf] }
  0x54   :  { %v784_v31 = vcombine.low %v539_v10, %v574_v22  ;;  %v597_v33 = vmax.bf16 %v595_v20, %v593_v26  ;;  %v624_v34 = vmax.bf16 %v622_v21, %v620_v27  ;;  %v23_v35 = vld [vmem:[%s1400_s0 + $0x38] sm:$0xf]  ;;  %v150_v38 = vld [vmem:[%s1400_s0 + $0x234] sm:$0xf]  ;;  %v603_v39 = vsel %vm153_vm0, %v133_v25, 4286644096 }
  0x55   :  { %v39_v36 = vld [vmem:[%s1400_s0 + $0x78] sm:$0xf]  ;;  %v630_v40 = vsel %vm153_vm0, %v102_v23, 4286644096  ;;  %v634_v43 = vsel %vm153_vm0, %v118_v24, 4286644096 }
  0x56   :  { %v55_v37 = vld [vmem:[%s1400_s0 + $0xb8] sm:$0xf]  ;;  %785 = vst [vmem:[%s1401_s1 + $0x28] sm:$0xff] %v784_v31   ;;  %v601_v41 = vmax.bf16 %v599_v29, %v597_v33  ;;  %v628_v42 = vmax.bf16 %v626_v30, %v624_v34  ;;  %v24_v44 = vld [vmem:[%s1400_s0 + $0x3c] sm:$0xf] }
  0x57   :  { %v71_v45 = vld [vmem:[%s1400_s0 + $0xf8] sm:$0xf]  ;;  %v646_v46 = vsel %vm153_vm0, %v23_v35, 4286644096  ;;  %v649_v47 = vsel %vm153_vm0, %v39_v36, 4286644096 }
  0x58   :  { %v653_v48 = vsel %vm153_vm0, %v55_v37, 4286644096  ;;  %v605_v49 = vmax.bf16 %v603_v39, %v601_v41  ;;  %v607_v50 = vsel %vm153_vm0, %v149_v28, 4286644096  ;;  %v632_v51 = vmax.bf16 %v630_v40, %v628_v42  ;;  %v40_v52 = vld [vmem:[%s1400_s0 + $0x7c] sm:$0xf] }
  0x59   :  { %v87_v53 = vld [vmem:[%s1400_s0 + $0x138] sm:$0xf]  ;;  %v651_v54 = vmax.bf16 %v649_v47, %v646_v46  ;;  %v638_v55 = vsel %vm153_vm0, %v134_v32, 4286644096  ;;  %v56_v56 = vld [vmem:[%s1400_s0 + $0xbc] sm:$0xf] }
  0x5a   :  { %v657_v57 = vsel %vm153_vm0, %v71_v45, 4286644096  ;;  %v636_v58 = vmax.bf16 %v634_v43, %v632_v51  ;;  %v642_v59 = vsel %vm153_vm0, %v150_v38, 4286644096  ;;  %v72_v60 = vld [vmem:[%s1400_s0 + $0xfc] sm:$0xf]  ;;  %v609_v63 = vmax.bf16 %v607_v50, %v605_v49 }
  0x5b   :  { %v103_v61 = vld [vmem:[%s1400_s0 + $0x178] sm:$0xf]  ;;  %v655_v62 = vmax.bf16 %v653_v48, %v651_v54  ;;  %v661_v0 = vsel %vm153_vm0, %v87_v53, 4286644096  ;;  %v681_v1 = vsel %vm153_vm0, %v24_v44, 4286644096 }
  0x5c   :  { %v684_v2 = vsel %vm153_vm0, %v40_v52, 4286644096  ;;  %v640_v3 = vmax.bf16 %v638_v55, %v636_v58  ;;  %v88_v4 = vld [vmem:[%s1400_s0 + $0x13c] sm:$0xf]  ;;  %v119_v5 = vld [vmem:[%s1400_s0 + $0x1b8] sm:$0xf] }
  0x5d   :  { %v659_v6 = vmax.bf16 %v657_v57, %v655_v62  ;;  %v686_v7 = vmax.bf16 %v684_v2, %v681_v1  ;;  %v688_v8 = vsel %vm153_vm0, %v56_v56, 4286644096  ;;  %v665_v9 = vsel %vm153_vm0, %v103_v61, 4286644096  ;;  %v104_v12 = vld [vmem:[%s1400_s0 + $0x17c] sm:$0xf] }
  0x5e   :  { %v692_v10 = vsel %vm153_vm0, %v72_v60, 4286644096  ;;  %v644_v11 = vmax.bf16 %v642_v59, %v640_v3  ;;  %v135_v13 = vld [vmem:[%s1400_s0 + $0x1f8] sm:$0xf]  ;;  %v669_v16 = vsel %vm153_vm0, %v119_v5, 4286644096 }
  0x5f   :  { %v663_v14 = vmax.bf16 %v661_v0, %v659_v6  ;;  %v690_v15 = vmax.bf16 %v688_v8, %v686_v7  ;;  %v696_v17 = vsel %vm153_vm0, %v88_v4, 4286644096  ;;  %v120_v19 = vld [vmem:[%s1400_s0 + $0x1bc] sm:$0xf]  ;;  %v673_v22 = vsel %vm153_vm0, %v135_v13, 4286644096 }
  0x60   :  { %v786_v18 = vcombine.low %v609_v63, %v644_v11  ;;  %v700_v23 = vsel %vm153_vm0, %v104_v12, 4286644096  ;;  %v136_v24 = vld [vmem:[%s1400_s0 + $0x1fc] sm:$0xf]  ;;  %v151_v25 = vld [vmem:[%s1400_s0 + $0x238] sm:$0xf] }
  0x61   :  { %v667_v20 = vmax.bf16 %v665_v9, %v663_v14  ;;  %v694_v21 = vmax.bf16 %v692_v10, %v690_v15  ;;  %v704_v28 = vsel %vm153_vm0, %v120_v19, 4286644096  ;;  %v152_v29 = vld [vmem:[%s1400_s0 + $0x23c] sm:$0xf]  ;;  %v677_v32 = vsel %vm153_vm0, %v151_v25, 4286644096 }
  0x62   :  { %787 = vst [vmem:[%s1401_s1 + $0x30] sm:$0xff] %v786_v18   ;;  %v708_v33 = vsel %vm153_vm0, %v136_v24, 4286644096  ;;  %v712_v35 = vsel %vm153_vm0, %v152_v29, 4286644096 }
  0x63   :  { %v671_v26 = vmax.bf16 %v669_v16, %v667_v20  ;;  %v698_v27 = vmax.bf16 %v696_v17, %v694_v21 }
  0x65   :  { %v675_v30 = vmax.bf16 %v673_v22, %v671_v26  ;;  %v702_v31 = vmax.bf16 %v700_v23, %v698_v27 }
  0x67   :  { %v706_v34 = vmax.bf16 %v704_v28, %v702_v31  ;;  %v679_v36 = vmax.bf16 %v677_v32, %v675_v30 }
  0x69   :  { %v710_v37 = vmax.bf16 %v708_v33, %v706_v34 }
  0x6b   :  { %v714_v38 = vmax.bf16 %v712_v35, %v710_v37 }
  0x6d   :  { %v788_v39 = vcombine.low %v679_v36, %v714_v38 }
  0x6f   :  { %789 = vst [vmem:[%s1401_s1 + $0x38] sm:$0xff] %v788_v39  }

// kernel: densenet121_forward.128
= control target key start
LH: loop header
LB: loop body
LE: loop exit
PB: predicated region body
PF: predicated region fallthrough
CT: control target
= control target key end

     0   :  { %s1024_s0 = inlined_call_operand.vmem [shape: bf16[128,256], index: 0, kind: input, shape index: {}]   ;;  %s1025_s1 = inlined_call_operand.vmem [shape: bf16[128,128], index: 1, kind: input, shape index: {}]   ;;  %s1026_s2 = inlined_call_operand.vmem [shape: f32[1,128], index: 2, kind: input, shape index: {}]   ;;  %s1027_s3 = inlined_call_operand.vmem [shape: f32[1,128], index: 3, kind: input, shape index: {}]   ;;  %s1028_s4 = inlined_call_operand.vmem [shape: f32[1,128], index: 4, kind: input, shape index: {}]   ;;  %s1029_s5 = inlined_call_operand.vmem [shape: f32[1,128], index: 5, kind: input, shape index: {}]   ;;  %s1030_s6 = inlined_call_operand.vmem [shape: bf16[128,128], index: 6, kind: output, shape index: {}]  }
   0x1   :  { %v819_v0 = vld [vmem:[%s1025_s1] sm:$0xff]   ;;  %v820_v1 = vld [vmem:[%s1025_s1 + $0x8] sm:$0xff]   ;;  %v821_v2 = vld [vmem:[%s1025_s1 + $0x10] sm:$0xff]  }
   0x2   :  { %771 = vmatprep.subr.bf16.mxu0 %v819_v0  ;;  %803 = vmatprep.subr.bf16.mxu1 %v819_v0  ;;  %v822_v3 = vld [vmem:[%s1025_s1 + $0x18] sm:$0xff]   ;;  %v28_v4 = vld [vmem:[%s1024_s0] sm:$0xf]  ;;  %v30_v5 = vld [vmem:[%s1024_s0 + $0x8] sm:$0xf] }
   0x3   :  { %772 = vmatpush3.bf16.msra.mxu0 %v819_v0  ;;  %811 = vmatpush3.bf16.msra.mxu1 %v819_v0  ;;  %29 = vst [vmem:[#allocation3] sm:$0xf] %v28_v4  ;;  %31 = vst [vmem:[#allocation3 + $0x4] sm:$0xf] %v30_v5  ;;  %v44_v6 = vld [vmem:[%s1024_s0 + $0x40] sm:$0xf] }
   0x4   :  { %773 = vmatprep.subr.bf16.mxu0 %v820_v1  ;;  %804 = vmatprep.subr.bf16.mxu1 %v820_v1  ;;  %v46_v7 = vld [vmem:[%s1024_s0 + $0x48] sm:$0xf]  ;;  %v823_v8 = vld [vmem:[%s1025_s1 + $0x20] sm:$0xff]   ;;  %45 = vst [vmem:[#allocation3 + $0x20] sm:$0xf] %v44_v6  ;;  %v825_v36 = vld [vmem:[%s1025_s1 + $0x30] sm:$0xff]  }
   0x5   :  { %47 = vst [vmem:[#allocation3 + $0x24] sm:$0xf] %v46_v7  ;;  %v32_v9 = vld [vmem:[%s1024_s0 + $0x10] sm:$0xf]  ;;  %v34_v10 = vld [vmem:[%s1024_s0 + $0x18] sm:$0xf] }
   0x6   :  { %v48_v11 = vld [vmem:[%s1024_s0 + $0x50] sm:$0xf]  ;;  %33 = vst [vmem:[#allocation3 + $0x8] sm:$0xf] %v32_v9  ;;  %35 = vst [vmem:[#allocation3 + $0xc] sm:$0xf] %v34_v10 }
   0x7   :  { %774 = vmatpush3.bf16.msra.mxu0 %v820_v1  ;;  %812 = vmatpush3.bf16.msra.mxu1 %v820_v1  ;;  %49 = vst [vmem:[#allocation3 + $0x28] sm:$0xf] %v48_v11  ;;  %v50_v12 = vld [vmem:[%s1024_s0 + $0x58] sm:$0xf]  ;;  %v36_v13 = vld [vmem:[%s1024_s0 + $0x20] sm:$0xf] }
   0x8   :  { %775 = vmatprep.subr.bf16.mxu0 %v821_v2  ;;  %805 = vmatprep.subr.bf16.mxu1 %v821_v2  ;;  %v38_v14 = vld [vmem:[%s1024_s0 + $0x28] sm:$0xf]  ;;  %51 = vst [vmem:[#allocation3 + $0x2c] sm:$0xf] %v50_v12  ;;  %37 = vst [vmem:[#allocation3 + $0x10] sm:$0xf] %v36_v13 }
   0x9   :  { %39 = vst [vmem:[#allocation3 + $0x14] sm:$0xf] %v38_v14  ;;  %v52_v15 = vld [vmem:[%s1024_s0 + $0x60] sm:$0xf]  ;;  %v54_v16 = vld [vmem:[%s1024_s0 + $0x68] sm:$0xf] }
   0xa   :  { %v40_v17 = vld [vmem:[%s1024_s0 + $0x30] sm:$0xf]  ;;  %53 = vst [vmem:[#allocation3 + $0x30] sm:$0xf] %v52_v15  ;;  %55 = vst [vmem:[#allocation3 + $0x34] sm:$0xf] %v54_v16 }
   0xb   :  { %776 = vmatpush3.bf16.msra.mxu0 %v821_v2  ;;  %813 = vmatpush3.bf16.msra.mxu1 %v821_v2  ;;  %41 = vst [vmem:[#allocation3 + $0x18] sm:$0xf] %v40_v17  ;;  %v42_v18 = vld [vmem:[%s1024_s0 + $0x38] sm:$0xf]  ;;  %v56_v19 = vld [vmem:[%s1024_s0 + $0x70] sm:$0xf] }
   0xc   :  { %777 = vmatprep.subr.bf16.mxu0 %v822_v3  ;;  %806 = vmatprep.subr.bf16.mxu1 %v822_v3  ;;  %v58_v20 = vld [vmem:[%s1024_s0 + $0x78] sm:$0xf]  ;;  %43 = vst [vmem:[#allocation3 + $0x1c] sm:$0xf] %v42_v18  ;;  %57 = vst [vmem:[#allocation3 + $0x38] sm:$0xf] %v56_v19 }
   0xd   :  { %59 = vst [vmem:[#allocation3 + $0x3c] sm:$0xf] %v58_v20  ;;  %v824_v21 = vld [vmem:[%s1025_s1 + $0x28] sm:$0xff]   ;;  %v670_v22 = vld [vmem:[#allocation3] sm:$0xff]   ;;  %v826_v54 = vld [vmem:[%s1025_s1 + $0x38] sm:$0xff]  }
   0xe   :  { %v931_v23 = vld [vmem:[%s1026_s2] ss:$0 sm:$0xff]  ;;  %v671_v24 = vunpack.c.l.bf16 %v670_v22  ;;  %v672_v25 = vunpack.c.h.bf16 %v670_v22  ;;  %v741_v30 = vld [vmem:[#allocation3 + $0x8] sm:$0xff]  }
   0xf   :  { %778 = vmatpush3.bf16.msra.mxu0 %v822_v3  ;;  %814 = vmatpush3.bf16.msra.mxu1 %v822_v3  ;;  %v744_v26 = vld [vmem:[#allocation3 + $0x20] sm:$0xff]   ;;  %v675_v33 = vunpack.c.l.bf16 %v741_v30  ;;  %v676_v34 = vunpack.c.h.bf16 %v741_v30  ;;  %v745_v35 = vld [vmem:[#allocation3 + $0x28] sm:$0xff]  }
  0x10   :  { %779 = vmatprep.subr.bf16.mxu0 %v823_v8  ;;  %807 = vmatprep.subr.bf16.mxu1 %v823_v8  ;;  %v936_v27 = vld [vmem:[%s1027_s3] ss:$0 sm:$0xff]  ;;  %v687_v28 = vunpack.c.l.bf16 %v744_v26  ;;  %v688_v29 = vunpack.c.h.bf16 %v744_v26  ;;  %v184_v31 = vmul.f32 %v671_v24, %v931_v23  ;;  %v185_v32 = vmul.f32 %v672_v25, %v931_v23  ;;  %v742_v49 = vld [vmem:[#allocation3 + $0x10] sm:$0xff]  }
  0x11   :  { %v691_v39 = vunpack.c.l.bf16 %v745_v35  ;;  %v692_v40 = vunpack.c.h.bf16 %v745_v35  ;;  %v186_v43 = vmul.f32 %v675_v33, %v931_v23  ;;  %v187_v44 = vmul.f32 %v676_v34, %v931_v23  ;;  %v746_v59 = vld [vmem:[#allocation3 + $0x30] sm:$0xff]  }
  0x12   :  { %v192_v37 = vmul.f32 %v687_v28, %v931_v23  ;;  %v193_v38 = vmul.f32 %v688_v29, %v931_v23  ;;  %v207_v41 = vadd.f32 %v936_v27, %v184_v31  ;;  %v208_v42 = vadd.f32 %v936_v27, %v185_v32 }
  0x13   :  { %780 = vmatpush3.bf16.msra.mxu0 %v823_v8  ;;  %815 = vmatpush3.bf16.msra.mxu1 %v823_v8  ;;  %v194_v47 = vmul.f32 %v691_v39, %v931_v23  ;;  %v195_v48 = vmul.f32 %v692_v40, %v931_v23  ;;  %v209_v52 = vadd.f32 %v936_v27, %v186_v43  ;;  %v679_v63 = vunpack.c.l.bf16 %v742_v49  ;;  %v743_v0 = vld [vmem:[#allocation3 + $0x18] sm:$0xff]  }
  0x14   :  { %781 = vmatprep.subr.bf16.mxu0 %v824_v21  ;;  %808 = vmatprep.subr.bf16.mxu1 %v824_v21  ;;  %v215_v45 = vadd.f32 %v936_v27, %v192_v37  ;;  %v216_v46 = vadd.f32 %v936_v27, %v193_v38  ;;  %v223_v50 = vmax.f32 %v207_v41, 0.0  ;;  %v224_v51 = vmax.f32 %v208_v42, 0.0  ;;  %v747_v5 = vld [vmem:[#allocation3 + $0x38] sm:$0xff]  }
  0x15   :  { %v210_v53 = vadd.f32 %v936_v27, %v187_v44  ;;  %v217_v57 = vadd.f32 %v936_v27, %v194_v47  ;;  %v218_v58 = vadd.f32 %v936_v27, %v195_v48  ;;  %v225_v61 = vmax.f32 %v209_v52, 0.0 }
  0x16   :  { %v231_v55 = vmax.f32 %v215_v45, 0.0  ;;  %v232_v56 = vmax.f32 %v216_v46, 0.0  ;;  %v255_v60 = vpack.c.bf16 %v224_v51, %v223_v50  ;;  %v680_v4 = vunpack.c.h.bf16 %v742_v49  ;;  %v982_v45 = vld [vmem:[%s1029_s5] ss:$0 sm:$0xff] }
  0x17   :  { %782 = vmatpush3.bf16.msra.mxu0 %v824_v21  ;;  %816 = vmatpush3.bf16.msra.mxu1 %v824_v21  ;;  %v226_v62 = vmax.f32 %v210_v53, 0.0  ;;  %v233_v2 = vmax.f32 %v217_v57, 0.0  ;;  %v234_v3 = vmax.f32 %v218_v58, 0.0  ;;  %v188_v7 = vmul.f32 %v679_v63, %v931_v23 }
  0x18   :  { %783 = vmatprep.subr.bf16.mxu0 %v825_v36  ;;  %809 = vmatprep.subr.bf16.mxu1 %v825_v36  ;;  %v259_v1 = vpack.c.bf16 %v232_v56, %v231_v55  ;;  %v695_v8 = vunpack.c.l.bf16 %v746_v59  ;;  %v696_v9 = vunpack.c.h.bf16 %v746_v59  ;;  %v189_v11 = vmul.f32 %v680_v4, %v931_v23 }
  0x19   :  { %v256_v6 = vpack.c.bf16 %v226_v62, %v225_v61  ;;  %v260_v10 = vpack.c.bf16 %v234_v3, %v233_v2  ;;  %v683_v12 = vunpack.c.l.bf16 %v743_v0  ;;  %v684_v13 = vunpack.c.h.bf16 %v743_v0  ;;  %787 = vmatprep.mubr.bf16.mxu0 %v255_v60 }
  0x1a   :  { %795 = vmatprep.mubr.bf16.mxu1 %v259_v1  ;;  %v211_v14 = vadd.f32 %v936_v27, %v188_v7  ;;  %v196_v15 = vmul.f32 %v695_v8, %v931_v23  ;;  %v197_v16 = vmul.f32 %v696_v9, %v931_v23  ;;  %v699_v17 = vunpack.c.l.bf16 %v747_v5 }
  0x1b   :  { %784 = vmatpush3.bf16.msra.mxu0 %v825_v36  ;;  %817 = vmatpush3.bf16.msra.mxu1 %v825_v36  ;;  %v212_v18 = vadd.f32 %v936_v27, %v189_v11  ;;  %v190_v19 = vmul.f32 %v683_v12, %v931_v23  ;;  %v191_v20 = vmul.f32 %v684_v13, %v931_v23  ;;  %v700_v21 = vunpack.c.h.bf16 %v747_v5 }
  0x1c   :  { %785 = vmatprep.subr.bf16.mxu0 %v826_v54  ;;  %810 = vmatprep.subr.bf16.mxu1 %v826_v54  ;;  %v227_v22 = vmax.f32 %v211_v14, 0.0  ;;  %v219_v24 = vadd.f32 %v936_v27, %v196_v15  ;;  %v220_v25 = vadd.f32 %v936_v27, %v197_v16  ;;  %v198_v26 = vmul.f32 %v699_v17, %v931_v23 }
  0x1d   :  { %v228_v28 = vmax.f32 %v212_v18, 0.0  ;;  %v213_v29 = vadd.f32 %v936_v27, %v190_v19  ;;  %v214_v30 = vadd.f32 %v936_v27, %v191_v20  ;;  %v199_v31 = vmul.f32 %v700_v21, %v931_v23  ;;  %v635_v23 = vld [vmem:[%s1028_s4] ss:$0 sm:$0xff] }
  0x1e   :  { %v235_v32 = vmax.f32 %v219_v24, 0.0  ;;  %v236_v33 = vmax.f32 %v220_v25, 0.0  ;;  %v221_v34 = vadd.f32 %v936_v27, %v198_v26 }
  0x1f   :  { %786 = vmatpush3.bf16.msra.mxu0 %v826_v54  ;;  %818 = vmatpush3.bf16.msra.mxu1 %v826_v54  ;;  %v257_v35 = vpack.c.bf16 %v228_v28, %v227_v22  ;;  %v229_v36 = vmax.f32 %v213_v29, 0.0  ;;  %v230_v37 = vmax.f32 %v214_v30, 0.0  ;;  %v222_v38 = vadd.f32 %v936_v27, %v199_v31 }
  0x20   :  { %v261_v39 = vpack.c.bf16 %v236_v33, %v235_v32  ;;  %v237_v40 = vmax.f32 %v221_v34, 0.0 }
  0x21   :  { %v238_v41 = vmax.f32 %v222_v38, 0.0  ;;  %v258_v42 = vpack.c.bf16 %v230_v37, %v229_v36 }
  0x22   :  { %788 = vmatmul.mubr.bf16.vlgmr.msra.gmra.mrb[0].mxu0 %v256_v6  ;;  %796 = vmatmul.mubr.bf16.vlgmr.msra.gmra.mrb[0].mxu1 %v260_v10 }
  0x23   :  { %791 = vmatprep.mubr.bf16.mxu0 %v257_v35  ;;  %799 = vmatprep.mubr.bf16.mxu1 %v261_v39  ;;  %v262_v43 = vpack.c.bf16 %v238_v41, %v237_v40 }
  0x2a   :  { %792 = vmatmul.mubr.bf16.gmra.mrb[4].mxu0 %v258_v42  ;;  %800 = vmatmul.mubr.bf16.gmra.mrb[4].mxu1 %v262_v43 }
  0xf5   :  { %v789_v44 = vpop.f32.mrb[0].mxu0  ;;  %v797_v27 = vpop.f32.mrb[0].mxu1 }
  0xf6   :  { %v484_v46 = vmul.f32 %v789_v44, %v635_v23  ;;  %v492_v47 = vmul.f32 %v797_v27, %v635_v23  ;;  %v361_v48 = vpop.f32.mrb[1].mxu0  ;;  %v393_v49 = vpop.f32.mrb[1].mxu1 }
  0xf7   :  { %v482_v50 = vmul.f32 %v635_v23, %v361_v48  ;;  %v490_v51 = vmul.f32 %v635_v23, %v393_v49  ;;  %v790_v52 = vpop.f32.mrb[2].mxu0  ;;  %v798_v53 = vpop.f32.mrb[2].mxu1 }
  0xf8   :  { %v507_v54 = vadd.f32 %v982_v45, %v484_v46  ;;  %v515_v55 = vadd.f32 %v982_v45, %v492_v47  ;;  %v485_v56 = vmul.f32 %v790_v52, %v635_v23  ;;  %v493_v57 = vmul.f32 %v798_v53, %v635_v23  ;;  %v364_v58 = vpop.f32.mrb[3].mxu0  ;;  %v396_v59 = vpop.f32.mrb[3].mxu1 }
  0xf9   :  { %v505_v60 = vadd.f32 %v982_v45, %v482_v50  ;;  %v513_v61 = vadd.f32 %v982_v45, %v490_v51  ;;  %v483_v62 = vmul.f32 %v635_v23, %v364_v58  ;;  %v491_v63 = vmul.f32 %v635_v23, %v396_v59 }
  0xfa   :  { %v508_v0 = vadd.f32 %v982_v45, %v485_v56  ;;  %v516_v1 = vadd.f32 %v982_v45, %v493_v57  ;;  %v523_v4 = vmax.f32 %v507_v54, 0.0  ;;  %v531_v5 = vmax.f32 %v515_v55, 0.0 }
  0xfb   :  { %v506_v2 = vadd.f32 %v982_v45, %v483_v62  ;;  %v514_v3 = vadd.f32 %v982_v45, %v491_v63  ;;  %v521_v8 = vmax.f32 %v505_v60, 0.0  ;;  %v529_v9 = vmax.f32 %v513_v61, 0.0 }
  0xfc   :  { %v524_v6 = vmax.f32 %v508_v0, 0.0  ;;  %v532_v7 = vmax.f32 %v516_v1, 0.0 }
  0xfd   :  { %v522_v10 = vmax.f32 %v506_v2, 0.0  ;;  %v530_v11 = vmax.f32 %v514_v3, 0.0  ;;  %v793_v12 = vpop.f32.mrb[4].mxu0  ;;  %v801_v13 = vpop.f32.mrb[4].mxu1 }
  0xfe   :  { %v709_v14 = vpack.c.bf16 %v524_v6, %v523_v4  ;;  %v729_v15 = vpack.c.bf16 %v532_v7, %v531_v5  ;;  %v488_v16 = vmul.f32 %v793_v12, %v635_v23  ;;  %v496_v17 = vmul.f32 %v801_v13, %v635_v23  ;;  %v377_v18 = vpop.f32.mrb[5].mxu0  ;;  %v409_v19 = vpop.f32.mrb[5].mxu1 }
  0xff   :  { %v704_v20 = vpack.c.bf16 %v522_v10, %v521_v8  ;;  %v724_v21 = vpack.c.bf16 %v530_v11, %v529_v9  ;;  %v486_v22 = vmul.f32 %v635_v23, %v377_v18  ;;  %v494_v24 = vmul.f32 %v635_v23, %v409_v19  ;;  %v794_v25 = vpop.f32.mrb[6].mxu0  ;;  %v802_v26 = vpop.f32.mrb[6].mxu1 }
 0x100   :  { %748 = vst [vmem:[%s1030_s6 + $0x8] sm:$0xff] %v709_v14   ;;  %752 = vst [vmem:[%s1030_s6 + $0x28] sm:$0xff] %v729_v15   ;;  %v511_v28 = vadd.f32 %v982_v45, %v488_v16  ;;  %v519_v29 = vadd.f32 %v982_v45, %v496_v17  ;;  %v489_v30 = vmul.f32 %v794_v25, %v635_v23  ;;  %v380_v32 = vpop.f32.mrb[7].mxu0  ;;  %v412_v33 = vpop.f32.mrb[7].mxu1 }
 0x101   :  { %v497_v31 = vmul.f32 %v802_v26, %v635_v23  ;;  %705 = vst [vmem:[%s1030_s6] sm:$0xff] %v704_v20   ;;  %751 = vst [vmem:[%s1030_s6 + $0x20] sm:$0xff] %v724_v21   ;;  %v509_v34 = vadd.f32 %v982_v45, %v486_v22  ;;  %v517_v35 = vadd.f32 %v982_v45, %v494_v24 }
 0x102   :  { %v487_v36 = vmul.f32 %v635_v23, %v380_v32  ;;  %v495_v37 = vmul.f32 %v635_v23, %v412_v33  ;;  %v512_v38 = vadd.f32 %v982_v45, %v489_v30  ;;  %v527_v42 = vmax.f32 %v511_v28, 0.0 }
 0x103   :  { %v520_v39 = vadd.f32 %v982_v45, %v497_v31  ;;  %v535_v43 = vmax.f32 %v519_v29, 0.0  ;;  %v525_v46 = vmax.f32 %v509_v34, 0.0  ;;  %v533_v47 = vmax.f32 %v517_v35, 0.0 }
 0x104   :  { %v510_v40 = vadd.f32 %v982_v45, %v487_v36  ;;  %v518_v41 = vadd.f32 %v982_v45, %v495_v37  ;;  %v528_v44 = vmax.f32 %v512_v38, 0.0 }
 0x105   :  { %v536_v27 = vmax.f32 %v520_v39, 0.0 }
 0x106   :  { %v526_v48 = vmax.f32 %v510_v40, 0.0  ;;  %v534_v49 = vmax.f32 %v518_v41, 0.0  ;;  %v719_v50 = vpack.c.bf16 %v528_v44, %v527_v42 }
 0x107   :  { %v739_v51 = vpack.c.bf16 %v536_v27, %v535_v43 }
 0x108   :  { %v714_v52 = vpack.c.bf16 %v526_v48, %v525_v46  ;;  %v734_v23 = vpack.c.bf16 %v534_v49, %v533_v47  ;;  %750 = vst [vmem:[%s1030_s6 + $0x18] sm:$0xff] %v719_v50  }
 0x109   :  { %754 = vst [vmem:[%s1030_s6 + $0x38] sm:$0xff] %v739_v51  }
 0x10a   :  { %749 = vst [vmem:[%s1030_s6 + $0x10] sm:$0xff] %v714_v52   ;;  %753 = vst [vmem:[%s1030_s6 + $0x30] sm:$0xff] %v734_v23  }

// kernel: densenet121_forward.129
= control target key start
LH: loop header
LB: loop body
LE: loop exit
PB: predicated region body
PF: predicated region fallthrough
CT: control target
= control target key end

     0   :  { %s1406_s21 = smov 0   ;;  %s1408_s22 = smov 0   ;;  %s1560_s0 = inlined_call_operand.vmem [shape: bf16[128,128], index: 0, kind: input, shape index: {}]   ;;  %s1561_s1 = inlined_call_operand.vmem [shape: bf16[128,384], index: 1, kind: input, shape index: {}]   ;;  %s1562_s2 = inlined_call_operand.vmem [shape: f32[1,128], index: 2, kind: input, shape index: {}, may-alias: {2,3}]   ;;  %s1563_s3 = inlined_call_operand.vmem [shape: f32[1,128], index: 3, kind: input, shape index: {}, may-alias: {2,3}]   ;;  %s1564_s4 = inlined_call_operand.vmem [shape: f32[1,384], index: 4, kind: input, shape index: {}, may-alias: {4,5}]   ;;  %s1565_s5 = inlined_call_operand.vmem [shape: f32[1,384], index: 5, kind: input, shape index: {}, may-alias: {4,5}]   ;;  %s1566_s6 = inlined_call_operand.vmem [shape: bf16[128,384], index: 6, kind: output, shape index: {}]  }
   0x1   :  { %s1410_s23 = smov 0   ;;  %s1412_s24 = smov 0  }
   0x2   :  { %s1414_s2 = smov 0  }
   0x3 LB: > { %s31_s3 = sadd.s32 1, %s1365_s24  ;;  %s1100_s4 = sadd.s32 4294967295, %s1369_s2   ;;  %s1369_s2 = sphi %s1414_s2, %s16_s2   ;;  %s1365_s24 = sphi %s1412_s24, %s1571_s24   ;;  %s1361_s23 = sphi %s1410_s23, %s1570_s23   ;;  %s1357_s22 = sphi %s1408_s22, %s1569_s22   ;;  %s1353_s21 = sphi %s1406_s21, %s1568_s21  }
   0x4   : > { %p33_p0 = scmp.ge.s32.totalorder %s31_s3, 3  ;;  %p79_p1 = scmp.ne.s32.totalorder %s1357_s22, %s1353_s21 }
   0x5   : > { %p80_p2 = scmp.eq.s32.totalorder %s1369_s2, 0  ;;  %p215_p4 = scmp.eq.s32.totalorder %s1100_s4, 2 }
   0x6   : > { %s1573_s3 = smov (%p33_p0, %s31_s3), 0  ;;  %s72_s25 = sadd.s32 1, %s1357_s22 }
   0x7   : > { %p81_p3 = por %p80_p2, %p79_p1  ;;  %s68_s5 = ssub.s32 %s1365_s24, %s1573_s3 }
   0x8   : > { %p70_p5 = scmp.eq.s32.totalorder %s68_s5, 0  ;;  %p1441_p6 = por %p215_p4, %p79_p1 }
   0x9   : > { %p1106_p7 = scmp.ge.s32.totalorder %s1369_s2, 3 }
   0xa   : > { %s1446_s27 = scalar_select %p70_p5, %s1357_s22, %s72_s25  }
   0xb   : > { %261 = sbr.rel (%p1106_p7) target bundleno = 32 (0x20), region = 28 }
  0x12   : > { %264 = sbr.rel (!%p81_p3) target bundleno = 32 (0x20), region = 32  ;;  %s266_s28 = sand.u32 (%p81_p3), 1, %s1357_s22  }
  0x13   : > { %s1108_s29 = sshll.u32 (%p81_p3), %s1365_s24, 2  ;;  %s1107_s30 = sshll.u32 (%p81_p3), %s266_s28, 6 }
  0x14   : > { %s1454_s9 = scalar_lea.vmem (%p81_p3), %s1561_s1, %s1108_s29  ;;  %s268_s10 = scalar_lea.vmem (%p81_p3), [#allocation3], %s1107_s30 }
  0x15   : > { %v289_v0 = vld [vmem:[%s1454_s9] sm:$0xf] (%p81_p3)  ;;  %v291_v1 = vld [vmem:[%s1454_s9 + $0xc] sm:$0xf] (%p81_p3)  ;;  %v293_v2 = vld [vmem:[%s1454_s9 + $0x18] sm:$0xf] (%p81_p3) }
  0x16   : > { %290 = vst [vmem:[%s268_s10] sm:$0xf] (%p81_p3), %v289_v0  ;;  %292 = vst [vmem:[%s268_s10 + $0x4] sm:$0xf] (%p81_p3), %v291_v1  ;;  %v295_v3 = vld [vmem:[%s1454_s9 + $0x24] sm:$0xf] (%p81_p3) }
  0x17   : > { %v297_v4 = vld [vmem:[%s1454_s9 + $0x30] sm:$0xf] (%p81_p3)  ;;  %294 = vst [vmem:[%s268_s10 + $0x8] sm:$0xf] (%p81_p3), %v293_v2  ;;  %296 = vst [vmem:[%s268_s10 + $0xc] sm:$0xf] (%p81_p3), %v295_v3 }
  0x18   : > { %298 = vst [vmem:[%s268_s10 + $0x10] sm:$0xf] (%p81_p3), %v297_v4  ;;  %v299_v5 = vld [vmem:[%s1454_s9 + $0x3c] sm:$0xf] (%p81_p3)  ;;  %v301_v6 = vld [vmem:[%s1454_s9 + $0x48] sm:$0xf] (%p81_p3) }
  0x19   : > { %v303_v7 = vld [vmem:[%s1454_s9 + $0x54] sm:$0xf]  ;;  %300 = vst [vmem:[%s268_s10 + $0x14] sm:$0xf] %v299_v5  ;;  %302 = vst [vmem:[%s268_s10 + $0x18] sm:$0xf] %v301_v6 }
  0x1a   : > { %304 = vst [vmem:[%s268_s10 + $0x1c] sm:$0xf] %v303_v7  ;;  %v305_v8 = vld [vmem:[%s1454_s9 + $0x60] sm:$0xf]  ;;  %v307_v9 = vld [vmem:[%s1454_s9 + $0x6c] sm:$0xf] }
  0x1b   : > { %v309_v10 = vld [vmem:[%s1454_s9 + $0x78] sm:$0xf]  ;;  %306 = vst [vmem:[%s268_s10 + $0x20] sm:$0xf] %v305_v8  ;;  %308 = vst [vmem:[%s268_s10 + $0x24] sm:$0xf] %v307_v9 }
  0x1c   : > { %310 = vst [vmem:[%s268_s10 + $0x28] sm:$0xf] %v309_v10  ;;  %v311_v11 = vld [vmem:[%s1454_s9 + $0x84] sm:$0xf]  ;;  %v313_v12 = vld [vmem:[%s1454_s9 + $0x90] sm:$0xf] }
  0x1d   : > { %v315_v13 = vld [vmem:[%s1454_s9 + $0x9c] sm:$0xf]  ;;  %312 = vst [vmem:[%s268_s10 + $0x2c] sm:$0xf] %v311_v11  ;;  %314 = vst [vmem:[%s268_s10 + $0x30] sm:$0xf] %v313_v12 }
  0x1e   : > { %316 = vst [vmem:[%s268_s10 + $0x34] sm:$0xf] %v315_v13  ;;  %v317_v14 = vld [vmem:[%s1454_s9 + $0xa8] sm:$0xf]  ;;  %v319_v15 = vld [vmem:[%s1454_s9 + $0xb4] sm:$0xf] }
  0x1f   : > { %318 = vst [vmem:[%s268_s10 + $0x38] sm:$0xf] %v317_v14  ;;  %320 = vst [vmem:[%s268_s10 + $0x3c] sm:$0xf] %v319_v15 }
  0x20 PF: > { %p1109_p8 = scmp.ge.s32.totalorder %s1369_s2, 1  ;;  %p386_p9 = scmp.lt.s32.totalorder %s1369_s2, 4 }
  0x22   : > { %p387_p10 = pnand %p1109_p8, %p386_p9 }
  0x23   : > { %s393_s11 = sand.u32 (!%p387_p10), 1, %s1353_s21   ;;  %v1323_v16 = vld [vmem:[%s1560_s0] sm:$0xff] (!%p387_p10)   ;;  %v1325_v26 = vld [vmem:[%s1560_s0 + $0x8] sm:$0xff] (!%p387_p10)   ;;  %v1327_v28 = vld [vmem:[%s1560_s0 + $0x10] sm:$0xff] (!%p387_p10)  }
  0x24   : > { %390 = sbr.rel (%p387_p10) target bundleno = 308 (0x134), region = 81  ;;  %s1478_s14 = sshll.u32 (!%p387_p10), %s393_s11, 6  ;;  %v1324_v17 = vld [vmem:[%s1560_s0 + $0x20] sm:$0xff] (!%p387_p10)   ;;  %1243 = vmatprep.mubr.bf16.mxu0 (!%p387_p10), %v1323_v16  ;;  %v1326_v27 = vld [vmem:[%s1560_s0 + $0x28] sm:$0xff] (!%p387_p10)   ;;  %v1328_v29 = vld [vmem:[%s1560_s0 + $0x30] sm:$0xff] (!%p387_p10)  }
  0x25   : > { %s1484_s17 = scalar_lea.vmem (!%p387_p10), [#allocation3], %s1478_s14  ;;  %1251 = vmatprep.mubr.bf16.mxu1 (!%p387_p10), %v1324_v17  ;;  %v1329_v30 = vld [vmem:[%s1560_s0 + $0x18] sm:$0xff] (!%p387_p10)   ;;  %s1513_s9 = scalar_lea.vmem (!%p387_p10), [#allocation4], %s1478_s14 }
  0x26   : > { %v1315_v18 = vld [vmem:[%s1484_s17] sm:$0xff] (!%p387_p10)   ;;  %v1316_v19 = vld [vmem:[%s1484_s17 + $0x8] sm:$0xff] (!%p387_p10)   ;;  %v1317_v20 = vld [vmem:[%s1484_s17 + $0x10] sm:$0xff] (!%p387_p10)  }
  0x27   : > { %1227 = vmatprep.subr.bf16.mxu0 (!%p387_p10), %v1315_v18  ;;  %1259 = vmatprep.subr.bf16.mxu1 (!%p387_p10), %v1315_v18  ;;  %v1318_v21 = vld [vmem:[%s1484_s17 + $0x18] sm:$0xff] (!%p387_p10)   ;;  %v1319_v22 = vld [vmem:[%s1484_s17 + $0x20] sm:$0xff] (!%p387_p10)   ;;  %v1320_v23 = vld [vmem:[%s1484_s17 + $0x28] sm:$0xff] (!%p387_p10)  }
  0x28   : > { %1228 = vmatpush3.bf16.msra.mxu0 (!%p387_p10), %v1315_v18  ;;  %1267 = vmatpush3.bf16.msra.mxu1 (!%p387_p10), %v1315_v18  ;;  %v1321_v24 = vld [vmem:[%s1484_s17 + $0x30] sm:$0xff] (!%p387_p10)   ;;  %v1322_v25 = vld [vmem:[%s1484_s17 + $0x38] sm:$0xff] (!%p387_p10)  }
  0x29   : > { %1229 = vmatprep.subr.bf16.mxu0 (!%p387_p10), %v1316_v19  ;;  %1260 = vmatprep.subr.bf16.mxu1 (!%p387_p10), %v1316_v19  ;;  %v1330_v31 = vld [vmem:[%s1560_s0 + $0x38] sm:$0xff] (!%p387_p10)  }
  0x2b   : > { %s1145_s10 = sshll.u32 (%p1441_p6), %s1361_s23, 2 }
  0x2c   : > { %1230 = vmatpush3.bf16.msra.mxu0 %v1316_v19  ;;  %1268 = vmatpush3.bf16.msra.mxu1 %v1316_v19  ;;  %s868_s13 = scalar_lea.vmem (%p1441_p6), %s1566_s6, %s1145_s10 }
  0x2d   : > { %1231 = vmatprep.subr.bf16.mxu0 %v1317_v20  ;;  %1261 = vmatprep.subr.bf16.mxu1 %v1317_v20 }
  0x30   : > { %1232 = vmatpush3.bf16.msra.mxu0 %v1317_v20  ;;  %1269 = vmatpush3.bf16.msra.mxu1 %v1317_v20 }
  0x31   : > { %1233 = vmatprep.subr.bf16.mxu0 %v1318_v21  ;;  %1262 = vmatprep.subr.bf16.mxu1 %v1318_v21 }
  0x34   : > { %1234 = vmatpush3.bf16.msra.mxu0 %v1318_v21  ;;  %1270 = vmatpush3.bf16.msra.mxu1 %v1318_v21 }
  0x35   : > { %1235 = vmatprep.subr.bf16.mxu0 %v1319_v22  ;;  %1263 = vmatprep.subr.bf16.mxu1 %v1319_v22 }
  0x38   : > { %1236 = vmatpush3.bf16.msra.mxu0 %v1319_v22  ;;  %1271 = vmatpush3.bf16.msra.mxu1 %v1319_v22 }
  0x39   : > { %1237 = vmatprep.subr.bf16.mxu0 %v1320_v23  ;;  %1264 = vmatprep.subr.bf16.mxu1 %v1320_v23 }
  0x3c   : > { %1238 = vmatpush3.bf16.msra.mxu0 %v1320_v23  ;;  %1272 = vmatpush3.bf16.msra.mxu1 %v1320_v23 }
  0x3d   : > { %1239 = vmatprep.subr.bf16.mxu0 %v1321_v24  ;;  %1265 = vmatprep.subr.bf16.mxu1 %v1321_v24 }
  0x40   : > { %1240 = vmatpush3.bf16.msra.mxu0 %v1321_v24  ;;  %1273 = vmatpush3.bf16.msra.mxu1 %v1321_v24 }
  0x41   : > { %1241 = vmatprep.subr.bf16.mxu0 %v1322_v25  ;;  %1266 = vmatprep.subr.bf16.mxu1 %v1322_v25 }
  0x44   : > { %1242 = vmatpush3.bf16.msra.mxu0 %v1322_v25  ;;  %1274 = vmatpush3.bf16.msra.mxu1 %v1322_v25 }
  0x47   : > { %1244 = vmatmul.mubr.bf16.vlgmr.msra.gmra.mrb[0].mxu0 %v1325_v26  ;;  %1252 = vmatmul.mubr.bf16.vlgmr.msra.gmra.mrb[0].mxu1 %v1326_v27 }
  0x48   : > { %1247 = vmatprep.mubr.bf16.mxu0 %v1327_v28  ;;  %1255 = vmatprep.mubr.bf16.mxu1 %v1328_v29 }
  0x4f   : > { %1248 = vmatmul.mubr.bf16.gmra.mrb[4].mxu0 %v1329_v30  ;;  %1256 = vmatmul.mubr.bf16.gmra.mrb[4].mxu1 %v1330_v31 }
 0x11a   : > { %v1245_v32 = vpop.f32.mrb[0].mxu0  ;;  %v1253_v33 = vpop.f32.mrb[0].mxu1 }
 0x11b   : > { %v663_v34 = vpop.f32.mrb[1].mxu0  ;;  %v695_v35 = vpop.f32.mrb[1].mxu1 }
 0x11c   : > { %v1246_v36 = vpop.f32.mrb[2].mxu0  ;;  %v1254_v37 = vpop.f32.mrb[2].mxu1 }
 0x11d   : > { %v1172_v38 = vpack.c.bf16 %v1246_v36, %v1245_v32  ;;  %v1192_v39 = vpack.c.bf16 %v1254_v37, %v1253_v33  ;;  %v666_v40 = vpop.f32.mrb[3].mxu0  ;;  %v698_v41 = vpop.f32.mrb[3].mxu1 }
 0x11e   : > { %v1167_v42 = vpack.c.bf16 %v666_v40, %v663_v34  ;;  %v1187_v43 = vpack.c.bf16 %v698_v41, %v695_v35 }
 0x11f   : > { %1204 = vst [vmem:[%s1513_s9 + $0x8] sm:$0xff] %v1172_v38   ;;  %1208 = vst [vmem:[%s1513_s9 + $0x28] sm:$0xff] %v1192_v39  }
 0x120   : > { %1168 = vst [vmem:[%s1513_s9] sm:$0xff] %v1167_v42   ;;  %1207 = vst [vmem:[%s1513_s9 + $0x20] sm:$0xff] %v1187_v43  }
 0x122   : > { %v1249_v44 = vpop.f32.mrb[4].mxu0  ;;  %v1257_v45 = vpop.f32.mrb[4].mxu1  ;;  %863 = sbr.rel (!%p1441_p6) target bundleno = 308 (0x134), region = 97 }
 0x123   : > { %v679_v46 = vpop.f32.mrb[5].mxu0  ;;  %v711_v47 = vpop.f32.mrb[5].mxu1 }
 0x124   : > { %v1250_v48 = vpop.f32.mrb[6].mxu0  ;;  %v1258_v49 = vpop.f32.mrb[6].mxu1 }
 0x125   : > { %v1182_v50 = vpack.c.bf16 %v1250_v48, %v1249_v44  ;;  %v1202_v51 = vpack.c.bf16 %v1258_v49, %v1257_v45  ;;  %v682_v52 = vpop.f32.mrb[7].mxu0  ;;  %v714_v53 = vpop.f32.mrb[7].mxu1 }
 0x126   : > { %v1177_v54 = vpack.c.bf16 %v682_v52, %v679_v46  ;;  %v1197_v55 = vpack.c.bf16 %v714_v53, %v711_v47  ;;  %v888_v58 = vld [vmem:[%s1513_s9 + $0x8] sm:$0xf] (%p1441_p6)  ;;  %v890_v59 = vld [vmem:[%s1513_s9 + $0xc] sm:$0xf] (%p1441_p6) }
 0x127   : > { %1206 = vst [vmem:[%s1513_s9 + $0x18] sm:$0xff] %v1182_v50   ;;  %1210 = vst [vmem:[%s1513_s9 + $0x38] sm:$0xff] %v1202_v51   ;;  %v884_v56 = vld [vmem:[%s1513_s9] sm:$0xf] (%p1441_p6)  ;;  %v886_v57 = vld [vmem:[%s1513_s9 + $0x4] sm:$0xf] (%p1441_p6) }
 0x128   : > { %1205 = vst [vmem:[%s1513_s9 + $0x10] sm:$0xff] %v1177_v54   ;;  %1209 = vst [vmem:[%s1513_s9 + $0x30] sm:$0xff] %v1197_v55   ;;  %v900_v0 = vld [vmem:[%s1513_s9 + $0x20] sm:$0xf] (%p1441_p6)  ;;  %v902_v1 = vld [vmem:[%s1513_s9 + $0x24] sm:$0xf] (%p1441_p6) }
 0x129   : > { %885 = vst [vmem:[%s868_s13] sm:$0xf] %v884_v56  ;;  %887 = vst [vmem:[%s868_s13 + $0xc] sm:$0xf] %v886_v57  ;;  %v904_v2 = vld [vmem:[%s1513_s9 + $0x28] sm:$0xf] }
 0x12a   : > { %889 = vst [vmem:[%s868_s13 + $0x18] sm:$0xf] %v888_v58  ;;  %891 = vst [vmem:[%s868_s13 + $0x24] sm:$0xf] %v890_v59  ;;  %v906_v3 = vld [vmem:[%s1513_s9 + $0x2c] sm:$0xf] }
 0x12b   : > { %901 = vst [vmem:[%s868_s13 + $0x60] sm:$0xf] %v900_v0  ;;  %903 = vst [vmem:[%s868_s13 + $0x6c] sm:$0xf] %v902_v1 }
 0x12c   : > { %905 = vst [vmem:[%s868_s13 + $0x78] sm:$0xf] %v904_v2  ;;  %907 = vst [vmem:[%s868_s13 + $0x84] sm:$0xf] %v906_v3 }
 0x12e   : > { %v896_v62 = vld [vmem:[%s1513_s9 + $0x18] sm:$0xf]  ;;  %v898_v63 = vld [vmem:[%s1513_s9 + $0x1c] sm:$0xf] }
 0x12f   : > { %v892_v60 = vld [vmem:[%s1513_s9 + $0x10] sm:$0xf]  ;;  %v894_v61 = vld [vmem:[%s1513_s9 + $0x14] sm:$0xf]  ;;  %897 = vst [vmem:[%s868_s13 + $0x48] sm:$0xf] %v896_v62 }
 0x130   : > { %893 = vst [vmem:[%s868_s13 + $0x30] sm:$0xf] %v892_v60  ;;  %895 = vst [vmem:[%s868_s13 + $0x3c] sm:$0xf] %v894_v61  ;;  %v908_v4 = vld [vmem:[%s1513_s9 + $0x30] sm:$0xf] }
 0x131   : > { %899 = vst [vmem:[%s868_s13 + $0x54] sm:$0xf] %v898_v63  ;;  %v910_v5 = vld [vmem:[%s1513_s9 + $0x34] sm:$0xf]  ;;  %909 = vst [vmem:[%s868_s13 + $0x90] sm:$0xf] %v908_v4 }
 0x132   : > { %911 = vst [vmem:[%s868_s13 + $0x9c] sm:$0xf] %v910_v5  ;;  %v912_v6 = vld [vmem:[%s1513_s9 + $0x38] sm:$0xf]  ;;  %v914_v7 = vld [vmem:[%s1513_s9 + $0x3c] sm:$0xf] }
 0x133   : > { %913 = vst [vmem:[%s868_s13 + $0xa8] sm:$0xf] %v912_v6  ;;  %915 = vst [vmem:[%s868_s13 + $0xb4] sm:$0xf] %v914_v7 }
 0x134 PF: > { %s16_s2 = sadd.s32 1, %s1369_s2   ;;  %s1568_s21 = smov %s1357_s22 }
 0x135   : > { %p13_p11 = scmp.ge.s32.totalorder %s16_s2, 5   ;;  %s1569_s22 = smov %s1446_s27 }
 0x136   : > { %s1570_s23 = smov %s1365_s24  ;;  %s1571_s24 = smov %s1573_s3 }
 0x137   :  { %15 = sbr.rel (!%p13_p11) target bundleno = 3 (0x3), region = 184 }

// kernel: densenet121_forward.134
= control target key start
LH: loop header
LB: loop body
LE: loop exit
PB: predicated region body
PF: predicated region fallthrough
CT: control target
= control target key end

     0   :  { %v94_v5 = vlaneseq  ;;  %s1138_s1 = inlined_call_operand.vmem [shape: bf16[256,128], index: 1, kind: input, shape index: {}]   ;;  %s1139_s0 = inlined_call_operand.vmem [shape: bf16[128,256], index: 0, kind: input, shape index: {}]   ;;  %s1140_s2 = inlined_call_operand.vmem [shape: f32[1,256], index: 2, kind: input, shape index: {}]   ;;  %s1141_s3 = inlined_call_operand.vmem [shape: f32[1,256], index: 3, kind: input, shape index: {}]   ;;  %s1142_s4 = inlined_call_operand.vmem [shape: f32[1,128], index: 4, kind: input, shape index: {}]   ;;  %s1143_s5 = inlined_call_operand.vmem [shape: f32[1,128], index: 5, kind: input, shape index: {}]   ;;  %s1144_s6 = inlined_call_operand.vmem [shape: bf16[128,128], index: 6, kind: output, shape index: {}]  }
   0x1   :  { %v843_v0 = vld [vmem:[%s1138_s1 + $0x40] sm:$0xff]   ;;  %v845_v2 = vld [vmem:[%s1138_s1 + $0x48] sm:$0xff]   ;;  %v847_v4 = vld [vmem:[%s1138_s1 + $0x50] sm:$0xff]  }
   0x2   :  { %v844_v1 = vld [vmem:[%s1138_s1] sm:$0xff]   ;;  %763 = vmatprep.subr.bf16.mxu0 %v843_v0  ;;  %827 = vmatprep.subr.bf16.mxu1 %v843_v0  ;;  %v846_v3 = vld [vmem:[%s1138_s1 + $0x8] sm:$0xff]   ;;  %v848_v6 = vld [vmem:[%s1138_s1 + $0x10] sm:$0xff]   ;;  %v95_v8 = vshrl.u32 %v94_v5, 7 }
   0x3   :  { %764 = vmatpush3.bf16.msra.mxu0 %v844_v1  ;;  %835 = vmatpush3.bf16.msra.mxu1 %v844_v1  ;;  %v849_v7 = vld [vmem:[%s1138_s1 + $0x58] sm:$0xff]   ;;  %v851_v10 = vld [vmem:[%s1138_s1 + $0x60] sm:$0xff]   ;;  %v853_v14 = vld [vmem:[%s1138_s1 + $0x68] sm:$0xff]  }
   0x4   :  { %765 = vmatprep.subr.bf16.mxu0 %v845_v2  ;;  %828 = vmatprep.subr.bf16.mxu1 %v845_v2  ;;  %v850_v9 = vld [vmem:[%s1138_s1 + $0x18] sm:$0xff]   ;;  %v96_v11 = vsub.s32 0, %v95_v8  ;;  %v852_v12 = vld [vmem:[%s1138_s1 + $0x20] sm:$0xff]   ;;  %v100_v13 = vsub.s32 1, %v95_v8  ;;  %v45_v16 = vld [vmem:[%s1139_s0 + $0x8] sm:$0xff] }
   0x5   :  { %v44_v15 = vld [vmem:[%s1139_s0] sm:$0xff]  ;;  %v62_v20 = vunpack.c.l.bf16 %v45_v16  ;;  %v63_v21 = vunpack.c.h.bf16 %v45_v16  ;;  %v53_v24 = vld [vmem:[%s1139_s0 + $0x48] sm:$0xff]  ;;  %v956_v29 = vld [vmem:[%s1139_s0 + $0x10] sm:$0xff] }
   0x6   :  { %v92_v17 = vld [vmem:[%s1140_s2] sm:$0x3]  ;;  %v60_v18 = vunpack.c.l.bf16 %v44_v15  ;;  %v61_v19 = vunpack.c.h.bf16 %v44_v15  ;;  %v854_v30 = vld [vmem:[%s1138_s1 + $0x28] sm:$0xff]   ;;  %v78_v33 = vunpack.c.l.bf16 %v53_v24  ;;  %v79_v34 = vunpack.c.h.bf16 %v53_v24  ;;  %v855_v35 = vld [vmem:[%s1138_s1 + $0x70] sm:$0xff]  }
   0x7   :  { %766 = vmatpush3.bf16.msra.mxu0 %v846_v3  ;;  %836 = vmatpush3.bf16.msra.mxu1 %v846_v3  ;;  %v136_v22 = vld [vmem:[%s1141_s3] sm:$0x3]  ;;  %v945_v25 = vrot.slane %v92_v17, %v96_v11  ;;  %v947_v26 = vrot.slane %v92_v17, %v100_v13  ;;  %v47_v39 = vld [vmem:[%s1139_s0 + $0x18] sm:$0xff]  ;;  %v65_v40 = vunpack.c.h.bf16 %v956_v29  ;;  %v856_v49 = vld [vmem:[%s1138_s1 + $0x30] sm:$0xff]  }
   0x8   :  { %767 = vmatprep.subr.bf16.mxu0 %v847_v4  ;;  %829 = vmatprep.subr.bf16.mxu1 %v847_v4  ;;  %v52_v23 = vld [vmem:[%s1139_s0 + $0x40] sm:$0xff]  ;;  %v949_v27 = vrot.slane %v136_v22, %v96_v11  ;;  %v951_v28 = vrot.slane %v136_v22, %v100_v13  ;;  %v67_v53 = vunpack.c.h.bf16 %v47_v39  ;;  %v857_v54 = vld [vmem:[%s1138_s1 + $0x78] sm:$0xff]   ;;  %v54_v59 = vld [vmem:[%s1139_s0 + $0x50] sm:$0xff]  ;;  %v64_v13 = vunpack.c.l.bf16 %v956_v29 }
   0x9   :  { %v76_v31 = vunpack.c.l.bf16 %v52_v23  ;;  %v77_v32 = vunpack.c.h.bf16 %v52_v23  ;;  %v105_v36 = vmul.f32 %v947_v26, %v61_v19  ;;  %v107_v37 = vmul.f32 %v947_v26, %v63_v21  ;;  %v55_v0 = vld [vmem:[%s1139_s0 + $0x58] sm:$0xff] }
   0xa   :  { %v104_v38 = vmul.f32 %v945_v25, %v60_v18  ;;  %v123_v42 = vmul.f32 %v947_v26, %v79_v34  ;;  %v106_v43 = vmul.f32 %v945_v25, %v62_v20  ;;  %v122_v48 = vmul.f32 %v945_v25, %v78_v33  ;;  %v858_v5 = vld [vmem:[%s1138_s1 + $0x38] sm:$0xff]   ;;  %v48_v18 = vld [vmem:[%s1139_s0 + $0x20] sm:$0xff] }
   0xb   :  { %768 = vmatpush3.bf16.msra.mxu0 %v848_v6  ;;  %837 = vmatpush3.bf16.msra.mxu1 %v848_v6  ;;  %v121_v41 = vmul.f32 %v947_v26, %v77_v32  ;;  %v120_v44 = vmul.f32 %v945_v25, %v76_v31  ;;  %v149_v45 = vadd.f32 %v951_v28, %v105_v36  ;;  %v66_v16 = vunpack.c.l.bf16 %v47_v39  ;;  %v49_v31 = vld [vmem:[%s1139_s0 + $0x28] sm:$0xff]  ;;  %v56_v36 = vld [vmem:[%s1139_s0 + $0x60] sm:$0xff] }
   0xc   :  { %769 = vmatprep.subr.bf16.mxu0 %v849_v7  ;;  %830 = vmatprep.subr.bf16.mxu1 %v849_v7  ;;  %v151_v46 = vadd.f32 %v951_v28, %v107_v37  ;;  %v148_v47 = vadd.f32 %v949_v27, %v104_v38  ;;  %v167_v51 = vadd.f32 %v951_v28, %v123_v42  ;;  %v80_v17 = vunpack.c.l.bf16 %v54_v59 }
   0xd   :  { %v165_v50 = vadd.f32 %v951_v28, %v121_v41  ;;  %v150_v52 = vadd.f32 %v949_v27, %v106_v43  ;;  %v181_v55 = vmax.f32 %v149_v45, 0.0  ;;  %v164_v58 = vadd.f32 %v949_v27, %v120_v44  ;;  %v57_v41 = vld [vmem:[%s1139_s0 + $0x68] sm:$0xff] }
   0xe   :  { %v183_v56 = vmax.f32 %v151_v46, 0.0  ;;  %v180_v57 = vmax.f32 %v148_v47, 0.0  ;;  %v199_v61 = vmax.f32 %v167_v51, 0.0  ;;  %v166_v63 = vadd.f32 %v949_v27, %v122_v48 }
   0xf   :  { %770 = vmatpush3.bf16.msra.mxu0 %v850_v9  ;;  %838 = vmatpush3.bf16.msra.mxu1 %v850_v9  ;;  %v197_v60 = vmax.f32 %v165_v50, 0.0  ;;  %v182_v62 = vmax.f32 %v150_v52, 0.0  ;;  %v196_v2 = vmax.f32 %v164_v58, 0.0  ;;  %v109_v3 = vmul.f32 %v947_v26, %v65_v40 }
  0x10   :  { %771 = vmatprep.subr.bf16.mxu0 %v851_v10  ;;  %831 = vmatprep.subr.bf16.mxu1 %v851_v10  ;;  %v229_v1 = vpack.c.bf16 %v183_v56, %v181_v55  ;;  %v111_v4 = vmul.f32 %v947_v26, %v67_v53  ;;  %v198_v8 = vmax.f32 %v166_v63, 0.0  ;;  %v81_v9 = vunpack.c.h.bf16 %v54_v59 }
  0x11   :  { %v237_v6 = vpack.c.bf16 %v199_v61, %v197_v60  ;;  %v228_v7 = vpack.c.bf16 %v182_v62, %v180_v57  ;;  %v153_v10 = vadd.f32 %v951_v28, %v109_v3  ;;  %v108_v22 = vmul.f32 %v945_v25, %v64_v13  ;;  %v50_v62 = vld [vmem:[%s1139_s0 + $0x30] sm:$0xff] }
  0x12   :  { %v155_v11 = vadd.f32 %v951_v28, %v111_v4  ;;  %404 = vmatprep.mubr.bf16.mxu0 %v229_v1  ;;  %v125_v15 = vmul.f32 %v947_v26, %v81_v9  ;;  %v110_v24 = vmul.f32 %v945_v25, %v66_v16  ;;  %v82_v29 = vunpack.c.l.bf16 %v55_v0 }
  0x13   :  { %772 = vmatpush3.bf16.msra.mxu0 %v852_v12  ;;  %839 = vmatpush3.bf16.msra.mxu1 %v852_v12  ;;  %v83_v12 = vunpack.c.h.bf16 %v55_v0  ;;  %v185_v19 = vmax.f32 %v153_v10, 0.0  ;;  %v152_v34 = vadd.f32 %v949_v27, %v108_v22  ;;  %v71_v44 = vunpack.c.h.bf16 %v49_v31 }
  0x14   :  { %773 = vmatprep.subr.bf16.mxu0 %v853_v14  ;;  %832 = vmatprep.subr.bf16.mxu1 %v853_v14  ;;  %v236_v14 = vpack.c.bf16 %v198_v8, %v196_v2  ;;  %v187_v20 = vmax.f32 %v155_v11, 0.0  ;;  %v169_v23 = vadd.f32 %v951_v28, %v125_v15  ;;  %v154_v38 = vadd.f32 %v949_v27, %v110_v24 }
  0x15   :  { %436 = vmatprep.mubr.bf16.mxu1 %v237_v6  ;;  %v127_v21 = vmul.f32 %v947_v26, %v83_v12  ;;  %v126_v39 = vmul.f32 %v945_v25, %v82_v29  ;;  %v184_v43 = vmax.f32 %v152_v34, 0.0  ;;  %v115_v51 = vmul.f32 %v947_v26, %v71_v44  ;;  %v58_v12 = vld [vmem:[%s1139_s0 + $0x70] sm:$0xff] }
  0x16   :  { %v231_v32 = vpack.c.bf16 %v187_v20, %v185_v19  ;;  %v201_v37 = vmax.f32 %v169_v23, 0.0  ;;  %v186_v46 = vmax.f32 %v154_v38, 0.0  ;;  %v87_v53 = vunpack.c.h.bf16 %v57_v41 }
  0x17   :  { %774 = vmatpush3.bf16.msra.mxu0 %v854_v30  ;;  %840 = vmatpush3.bf16.msra.mxu1 %v854_v30  ;;  %v124_v30 = vmul.f32 %v945_v25, %v80_v17  ;;  %v171_v33 = vadd.f32 %v951_v28, %v127_v21  ;;  %v170_v47 = vadd.f32 %v949_v27, %v126_v39  ;;  %v68_v57 = vunpack.c.l.bf16 %v48_v18  ;;  %v59_v17 = vld [vmem:[%s1139_s0 + $0x78] sm:$0xff] }
  0x18   :  { %775 = vmatprep.subr.bf16.mxu0 %v855_v35  ;;  %833 = vmatprep.subr.bf16.mxu1 %v855_v35  ;;  %v69_v35 = vunpack.c.h.bf16 %v48_v18  ;;  %v159_v58 = vadd.f32 %v951_v28, %v115_v51  ;;  %v131_v60 = vmul.f32 %v947_v26, %v87_v53  ;;  %v70_v61 = vunpack.c.l.bf16 %v49_v31 }
  0x19   :  { %v168_v40 = vadd.f32 %v949_v27, %v124_v30  ;;  %v203_v42 = vmax.f32 %v171_v33, 0.0  ;;  %v202_v55 = vmax.f32 %v170_v47, 0.0  ;;  %v112_v1 = vmul.f32 %v945_v25, %v68_v57 }
  0x1a   :  { %v113_v45 = vmul.f32 %v947_v26, %v69_v35  ;;  %v84_v2 = vunpack.c.l.bf16 %v56_v36  ;;  %v191_v3 = vmax.f32 %v159_v58, 0.0  ;;  %v175_v4 = vadd.f32 %v951_v28, %v131_v60 }
  0x1b   :  { %776 = vmatpush3.bf16.msra.mxu0 %v856_v49  ;;  %841 = vmatpush3.bf16.msra.mxu1 %v856_v49  ;;  %v200_v48 = vmax.f32 %v168_v40, 0.0  ;;  %v85_v49 = vunpack.c.h.bf16 %v56_v36  ;;  %v239_v50 = vpack.c.bf16 %v203_v42, %v201_v37  ;;  %v86_v6 = vunpack.c.l.bf16 %v57_v41 }
  0x1c   :  { %777 = vmatprep.subr.bf16.mxu0 %v857_v54  ;;  %834 = vmatprep.subr.bf16.mxu1 %v857_v54  ;;  %v157_v52 = vadd.f32 %v951_v28, %v113_v45  ;;  %v230_v54 = vpack.c.bf16 %v186_v46, %v184_v43  ;;  %v156_v9 = vadd.f32 %v949_v27, %v112_v1  ;;  %v73_v11 = vunpack.c.h.bf16 %v50_v62 }
  0x1d   :  { %v129_v56 = vmul.f32 %v947_v26, %v85_v49  ;;  %v238_v63 = vpack.c.bf16 %v202_v55, %v200_v48  ;;  %v128_v10 = vmul.f32 %v945_v25, %v84_v2  ;;  %v130_v16 = vmul.f32 %v945_v25, %v86_v6 }
  0x1e   :  { %v189_v59 = vmax.f32 %v157_v52, 0.0  ;;  %v188_v18 = vmax.f32 %v156_v9, 0.0  ;;  %v117_v21 = vmul.f32 %v947_v26, %v73_v11  ;;  %v89_v29 = vunpack.c.h.bf16 %v58_v12 }
  0x1f   :  { %778 = vmatpush3.bf16.msra.mxu0 %v858_v5  ;;  %842 = vmatpush3.bf16.msra.mxu1 %v858_v5  ;;  %v173_v0 = vadd.f32 %v951_v28, %v129_v56  ;;  %v114_v5 = vmul.f32 %v945_v25, %v70_v61  ;;  %v172_v19 = vadd.f32 %v949_v27, %v128_v10  ;;  %v91_v33 = vunpack.c.h.bf16 %v59_v17 }
  0x20   :  { %v233_v13 = vpack.c.bf16 %v191_v3, %v189_v59  ;;  %v174_v24 = vadd.f32 %v949_v27, %v130_v16  ;;  %v133_v36 = vmul.f32 %v947_v26, %v89_v29  ;;  %v72_v37 = vunpack.c.l.bf16 %v50_v62 }
  0x21   :  { %v205_v8 = vmax.f32 %v173_v0, 0.0  ;;  %v158_v15 = vadd.f32 %v949_v27, %v114_v5  ;;  %v204_v30 = vmax.f32 %v172_v19, 0.0  ;;  %v135_v40 = vmul.f32 %v947_v26, %v91_v33 }
  0x22   :  { %405 = vmatmul.mubr.bf16.vlgmr.msra.gmra.mrb[0].mxu0 %v228_v7  ;;  %437 = vmatmul.mubr.bf16.vlgmr.msra.gmra.mrb[0].mxu1 %v236_v14  ;;  %v51_v7 = vld [vmem:[%s1139_s0 + $0x38] sm:$0xff]  ;;  %v207_v14 = vmax.f32 %v175_v4, 0.0  ;;  %v206_v35 = vmax.f32 %v174_v24, 0.0  ;;  %v177_v43 = vadd.f32 %v951_v28, %v133_v36  ;;  %v116_v44 = vmul.f32 %v945_v25, %v72_v37 }
  0x23   :  { %412 = vmatprep.mubr.bf16.mxu0 %v231_v32  ;;  %444 = vmatprep.mubr.bf16.mxu1 %v239_v50  ;;  %v75_v20 = vunpack.c.h.bf16 %v51_v7  ;;  %v190_v23 = vmax.f32 %v158_v15, 0.0  ;;  %v161_v32 = vadd.f32 %v951_v28, %v117_v21  ;;  %v74_v41 = vunpack.c.l.bf16 %v51_v7  ;;  %v1080_v7 = vld [vmem:[%s1143_s5] ss:$0 sm:$0xff] }
  0x24   :  { %v241_v22 = vpack.c.bf16 %v207_v14, %v205_v8  ;;  %v240_v42 = vpack.c.bf16 %v206_v35, %v204_v30  ;;  %v88_v45 = vunpack.c.l.bf16 %v58_v12  ;;  %v179_v47 = vadd.f32 %v951_v28, %v135_v40 }
  0x25   :  { %v119_v31 = vmul.f32 %v947_v26, %v75_v20  ;;  %v232_v34 = vpack.c.bf16 %v190_v23, %v188_v18  ;;  %v193_v39 = vmax.f32 %v161_v32, 0.0  ;;  %v118_v48 = vmul.f32 %v945_v25, %v74_v41 }
  0x26   :  { %v90_v49 = vunpack.c.l.bf16 %v59_v17  ;;  %v209_v50 = vmax.f32 %v177_v43, 0.0  ;;  %v160_v51 = vadd.f32 %v949_v27, %v116_v44  ;;  %v132_v26 = vmul.f32 %v945_v25, %v88_v45 }
  0x27   :  { %v163_v38 = vadd.f32 %v951_v28, %v119_v31  ;;  %v211_v53 = vmax.f32 %v179_v47, 0.0 }
  0x28   :  { %v134_v55 = vmul.f32 %v945_v25, %v90_v49  ;;  %v192_v56 = vmax.f32 %v160_v51, 0.0  ;;  %v176_v57 = vadd.f32 %v949_v27, %v132_v26  ;;  %v1075_v25 = vld [vmem:[%s1142_s4] ss:$0 sm:$0xff] }
  0x29   :  { %v195_v46 = vmax.f32 %v163_v38, 0.0  ;;  %v243_v28 = vpack.c.bf16 %v211_v53, %v209_v50 }
  0x2a   :  { %413 = vmatmul.mubr.bf16.gmra.mrb[4].mxu0 %v230_v54  ;;  %445 = vmatmul.mubr.bf16.gmra.mrb[4].mxu1 %v238_v63  ;;  %v162_v54 = vadd.f32 %v949_v27, %v118_v48  ;;  %v178_v59 = vadd.f32 %v949_v27, %v134_v55  ;;  %v208_v60 = vmax.f32 %v176_v57, 0.0 }
  0x2b   :  { %420 = vmatprep.mubr.bf16.mxu0 %v233_v13  ;;  %452 = vmatprep.mubr.bf16.mxu1 %v241_v22  ;;  %v235_v52 = vpack.c.bf16 %v195_v46, %v193_v39 }
  0x2c   :  { %v194_v58 = vmax.f32 %v162_v54, 0.0  ;;  %v210_v62 = vmax.f32 %v178_v59, 0.0 }
  0x2e   :  { %v234_v61 = vpack.c.bf16 %v194_v58, %v192_v56  ;;  %v242_v63 = vpack.c.bf16 %v210_v62, %v208_v60 }
  0x32   :  { %421 = vmatmul.mubr.bf16.gmra.mrb[8].mxu0 %v232_v34  ;;  %453 = vmatmul.mubr.bf16.gmra.mrb[8].mxu1 %v240_v42 }
  0x33   :  { %428 = vmatprep.mubr.bf16.mxu0 %v235_v52  ;;  %460 = vmatprep.mubr.bf16.mxu1 %v243_v28 }
  0x3a   :  { %429 = vmatmul.mubr.bf16.gmra.mrb[12].mxu0 %v234_v61  ;;  %461 = vmatmul.mubr.bf16.gmra.mrb[12].mxu1 %v242_v63 }
  0xf5   :  { %v779_v0 = vpop.f32.mrb[0].mxu0  ;;  %v803_v1 = vpop.f32.mrb[0].mxu1 }
  0xf6   :  { %v780_v2 = vpop.f32.mrb[1].mxu0  ;;  %v804_v3 = vpop.f32.mrb[1].mxu1 }
  0xf7   :  { %v781_v4 = vadd.f32 %v780_v2, %v779_v0  ;;  %v805_v5 = vadd.f32 %v804_v3, %v803_v1  ;;  %v782_v6 = vpop.f32.mrb[2].mxu0  ;;  %v806_v27 = vpop.f32.mrb[2].mxu1 }
  0xf8   :  { %v783_v8 = vpop.f32.mrb[3].mxu0  ;;  %v807_v9 = vpop.f32.mrb[3].mxu1 }
  0xf9   :  { %v527_v10 = vmul.f32 %v781_v4, %v1075_v25  ;;  %v535_v11 = vmul.f32 %v805_v5, %v1075_v25  ;;  %v784_v12 = vadd.f32 %v783_v8, %v782_v6  ;;  %v808_v13 = vadd.f32 %v807_v9, %v806_v27 }
  0xfb   :  { %v550_v14 = vadd.f32 %v1080_v7, %v527_v10  ;;  %v558_v15 = vadd.f32 %v1080_v7, %v535_v11  ;;  %v528_v16 = vmul.f32 %v784_v12, %v1075_v25  ;;  %v536_v17 = vmul.f32 %v808_v13, %v1075_v25 }
  0xfd   :  { %v551_v18 = vadd.f32 %v1080_v7, %v528_v16  ;;  %v559_v19 = vadd.f32 %v1080_v7, %v536_v17  ;;  %v785_v20 = vpop.f32.mrb[4].mxu0  ;;  %v809_v21 = vpop.f32.mrb[4].mxu1  ;;  %v566_v22 = vmax.f32 %v550_v14, 0.0  ;;  %v574_v23 = vmax.f32 %v558_v15, 0.0 }
  0xfe   :  { %v786_v24 = vpop.f32.mrb[5].mxu0  ;;  %v810_v29 = vpop.f32.mrb[5].mxu1 }
  0xff   :  { %v567_v30 = vmax.f32 %v551_v18, 0.0  ;;  %v575_v31 = vmax.f32 %v559_v19, 0.0  ;;  %v787_v32 = vadd.f32 %v786_v24, %v785_v20  ;;  %v811_v33 = vadd.f32 %v810_v29, %v809_v21  ;;  %v788_v34 = vpop.f32.mrb[6].mxu0  ;;  %v812_v35 = vpop.f32.mrb[6].mxu1 }
 0x100   :  { %v789_v36 = vpop.f32.mrb[7].mxu0  ;;  %v813_v37 = vpop.f32.mrb[7].mxu1 }
 0x101   :  { %v719_v38 = vpack.c.bf16 %v567_v30, %v566_v22  ;;  %v739_v39 = vpack.c.bf16 %v575_v31, %v574_v23  ;;  %v529_v40 = vmul.f32 %v787_v32, %v1075_v25  ;;  %v537_v41 = vmul.f32 %v811_v33, %v1075_v25 }
 0x102   :  { %v790_v42 = vadd.f32 %v789_v36, %v788_v34  ;;  %v814_v43 = vadd.f32 %v813_v37, %v812_v35 }
 0x103   :  { %720 = vst [vmem:[%s1144_s6] sm:$0xff] %v719_v38   ;;  %759 = vst [vmem:[%s1144_s6 + $0x20] sm:$0xff] %v739_v39   ;;  %v552_v44 = vadd.f32 %v1080_v7, %v529_v40  ;;  %v560_v45 = vadd.f32 %v1080_v7, %v537_v41 }
 0x104   :  { %v530_v46 = vmul.f32 %v790_v42, %v1075_v25  ;;  %v538_v47 = vmul.f32 %v814_v43, %v1075_v25 }
 0x105   :  { %v791_v48 = vpop.f32.mrb[8].mxu0  ;;  %v815_v49 = vpop.f32.mrb[8].mxu1  ;;  %v568_v57 = vmax.f32 %v552_v44, 0.0  ;;  %v576_v28 = vmax.f32 %v560_v45, 0.0 }
 0x106   :  { %v553_v50 = vadd.f32 %v1080_v7, %v530_v46  ;;  %v561_v51 = vadd.f32 %v1080_v7, %v538_v47  ;;  %v792_v26 = vpop.f32.mrb[9].mxu0  ;;  %v816_v52 = vpop.f32.mrb[9].mxu1 }
 0x107   :  { %v793_v53 = vadd.f32 %v792_v26, %v791_v48  ;;  %v817_v54 = vadd.f32 %v816_v52, %v815_v49  ;;  %v794_v55 = vpop.f32.mrb[10].mxu0  ;;  %v818_v56 = vpop.f32.mrb[10].mxu1 }
 0x108   :  { %v569_v58 = vmax.f32 %v553_v50, 0.0  ;;  %v577_v59 = vmax.f32 %v561_v51, 0.0  ;;  %v795_v60 = vpop.f32.mrb[11].mxu0  ;;  %v819_v61 = vpop.f32.mrb[11].mxu1 }
 0x109   :  { %v531_v62 = vmul.f32 %v793_v53, %v1075_v25  ;;  %v539_v63 = vmul.f32 %v817_v54, %v1075_v25  ;;  %v796_v0 = vadd.f32 %v795_v60, %v794_v55  ;;  %v820_v1 = vadd.f32 %v819_v61, %v818_v56 }
 0x10a   :  { %v724_v2 = vpack.c.bf16 %v569_v58, %v568_v57  ;;  %v744_v3 = vpack.c.bf16 %v577_v59, %v576_v28 }
 0x10b   :  { %v554_v4 = vadd.f32 %v1080_v7, %v531_v62  ;;  %v562_v5 = vadd.f32 %v1080_v7, %v539_v63  ;;  %v532_v6 = vmul.f32 %v796_v0, %v1075_v25  ;;  %v540_v27 = vmul.f32 %v820_v1, %v1075_v25 }
 0x10c   :  { %756 = vst [vmem:[%s1144_s6 + $0x8] sm:$0xff] %v724_v2   ;;  %760 = vst [vmem:[%s1144_s6 + $0x28] sm:$0xff] %v744_v3  }
 0x10d   :  { %v555_v8 = vadd.f32 %v1080_v7, %v532_v6  ;;  %v563_v9 = vadd.f32 %v1080_v7, %v540_v27  ;;  %v797_v10 = vpop.f32.mrb[12].mxu0  ;;  %v570_v11 = vmax.f32 %v554_v4, 0.0  ;;  %v821_v12 = vpop.f32.mrb[12].mxu1  ;;  %v578_v14 = vmax.f32 %v562_v5, 0.0 }
 0x10e   :  { %v798_v13 = vpop.f32.mrb[13].mxu0  ;;  %v822_v18 = vpop.f32.mrb[13].mxu1 }
 0x10f   :  { %v571_v15 = vmax.f32 %v555_v8, 0.0  ;;  %v579_v16 = vmax.f32 %v563_v9, 0.0  ;;  %v799_v17 = vadd.f32 %v798_v13, %v797_v10  ;;  %v800_v19 = vpop.f32.mrb[14].mxu0  ;;  %v823_v20 = vadd.f32 %v822_v18, %v821_v12  ;;  %v824_v21 = vpop.f32.mrb[14].mxu1 }
 0x110   :  { %v801_v22 = vpop.f32.mrb[15].mxu0  ;;  %v825_v31 = vpop.f32.mrb[15].mxu1 }
 0x111   :  { %v729_v23 = vpack.c.bf16 %v571_v15, %v570_v11  ;;  %v749_v24 = vpack.c.bf16 %v579_v16, %v578_v14  ;;  %v533_v29 = vmul.f32 %v799_v17, %v1075_v25  ;;  %v802_v30 = vadd.f32 %v801_v22, %v800_v19 }
 0x112   :  { %v541_v32 = vmul.f32 %v823_v20, %v1075_v25  ;;  %v826_v33 = vadd.f32 %v825_v31, %v824_v21 }
 0x113   :  { %757 = vst [vmem:[%s1144_s6 + $0x10] sm:$0xff] %v729_v23   ;;  %761 = vst [vmem:[%s1144_s6 + $0x30] sm:$0xff] %v749_v24   ;;  %v556_v34 = vadd.f32 %v1080_v7, %v533_v29  ;;  %v534_v35 = vmul.f32 %v802_v30, %v1075_v25 }
 0x114   :  { %v564_v36 = vadd.f32 %v1080_v7, %v541_v32  ;;  %v542_v37 = vmul.f32 %v826_v33, %v1075_v25 }
 0x115   :  { %v557_v38 = vadd.f32 %v1080_v7, %v534_v35  ;;  %v572_v40 = vmax.f32 %v556_v34, 0.0 }
 0x116   :  { %v565_v39 = vadd.f32 %v1080_v7, %v542_v37  ;;  %v580_v42 = vmax.f32 %v564_v36, 0.0 }
 0x117   :  { %v573_v41 = vmax.f32 %v557_v38, 0.0 }
 0x118   :  { %v581_v43 = vmax.f32 %v565_v39, 0.0 }
 0x119   :  { %v734_v44 = vpack.c.bf16 %v573_v41, %v572_v40 }
 0x11a   :  { %v754_v45 = vpack.c.bf16 %v581_v43, %v580_v42 }
 0x11b   :  { %758 = vst [vmem:[%s1144_s6 + $0x18] sm:$0xff] %v734_v44  }
 0x11c   :  { %762 = vst [vmem:[%s1144_s6 + $0x38] sm:$0xff] %v754_v45  }

// kernel: densenet121_forward.140
= control target key start
LH: loop header
LB: loop body
LE: loop exit
PB: predicated region body
PF: predicated region fallthrough
CT: control target
= control target key end

     0   :  { %v94_v5 = vlaneseq  ;;  %s1032_s1 = inlined_call_operand.vmem [shape: bf16[256,128], index: 1, kind: input, shape index: {}]   ;;  %s1033_s4 = inlined_call_operand.vmem [shape: f32[1,128], index: 4, kind: input, shape index: {}, may-alias: {4,5}]   ;;  %s1034_s5 = inlined_call_operand.vmem [shape: f32[1,128], index: 5, kind: input, shape index: {}, may-alias: {4,5}]   ;;  %s1035_s0 = inlined_call_operand.vmem [shape: bf16[128,256], index: 0, kind: input, shape index: {}]   ;;  %s1036_s2 = inlined_call_operand.vmem [shape: f32[1,256], index: 2, kind: input, shape index: {}]   ;;  %s1037_s3 = inlined_call_operand.vmem [shape: f32[1,256], index: 3, kind: input, shape index: {}]   ;;  %s1038_s6 = inlined_call_operand.vmem [shape: bf16[128,128], index: 6, kind: output, shape index: {}]  }
   0x1   :  { %v779_v0 = vld [vmem:[%s1032_s1 + $0x40] sm:$0xff]   ;;  %v781_v2 = vld [vmem:[%s1032_s1 + $0x48] sm:$0xff]   ;;  %v783_v4 = vld [vmem:[%s1032_s1 + $0x50] sm:$0xff]  }
   0x2   :  { %v780_v1 = vld [vmem:[%s1032_s1] sm:$0xff]   ;;  %699 = vmatprep.subr.bf16.mxu0 %v779_v0  ;;  %763 = vmatprep.subr.bf16.mxu1 %v779_v0  ;;  %v782_v3 = vld [vmem:[%s1032_s1 + $0x8] sm:$0xff]   ;;  %v784_v6 = vld [vmem:[%s1032_s1 + $0x10] sm:$0xff]   ;;  %v95_v8 = vshrl.u32 %v94_v5, 7 }
   0x3   :  { %700 = vmatpush3.bf16.msra.mxu0 %v780_v1  ;;  %771 = vmatpush3.bf16.msra.mxu1 %v780_v1  ;;  %v785_v7 = vld [vmem:[%s1032_s1 + $0x58] sm:$0xff]   ;;  %v787_v10 = vld [vmem:[%s1032_s1 + $0x60] sm:$0xff]   ;;  %v789_v14 = vld [vmem:[%s1032_s1 + $0x68] sm:$0xff]  }
   0x4   :  { %701 = vmatprep.subr.bf16.mxu0 %v781_v2  ;;  %764 = vmatprep.subr.bf16.mxu1 %v781_v2  ;;  %v786_v9 = vld [vmem:[%s1032_s1 + $0x18] sm:$0xff]   ;;  %v96_v11 = vsub.s32 0, %v95_v8  ;;  %v788_v12 = vld [vmem:[%s1032_s1 + $0x20] sm:$0xff]   ;;  %v100_v13 = vsub.s32 1, %v95_v8  ;;  %v45_v16 = vld [vmem:[%s1035_s0 + $0x8] sm:$0xff] }
   0x5   :  { %v44_v15 = vld [vmem:[%s1035_s0] sm:$0xff]  ;;  %v62_v20 = vunpack.c.l.bf16 %v45_v16  ;;  %v63_v21 = vunpack.c.h.bf16 %v45_v16  ;;  %v53_v24 = vld [vmem:[%s1035_s0 + $0x48] sm:$0xff]  ;;  %v892_v29 = vld [vmem:[%s1035_s0 + $0x10] sm:$0xff] }
   0x6   :  { %v92_v17 = vld [vmem:[%s1036_s2] sm:$0x3]  ;;  %v60_v18 = vunpack.c.l.bf16 %v44_v15  ;;  %v61_v19 = vunpack.c.h.bf16 %v44_v15  ;;  %v790_v30 = vld [vmem:[%s1032_s1 + $0x28] sm:$0xff]   ;;  %v78_v33 = vunpack.c.l.bf16 %v53_v24  ;;  %v79_v34 = vunpack.c.h.bf16 %v53_v24  ;;  %v791_v35 = vld [vmem:[%s1032_s1 + $0x70] sm:$0xff]  }
   0x7   :  { %702 = vmatpush3.bf16.msra.mxu0 %v782_v3  ;;  %772 = vmatpush3.bf16.msra.mxu1 %v782_v3  ;;  %v136_v22 = vld [vmem:[%s1037_s3] sm:$0x3]  ;;  %v881_v25 = vrot.slane %v92_v17, %v96_v11  ;;  %v883_v26 = vrot.slane %v92_v17, %v100_v13  ;;  %v47_v39 = vld [vmem:[%s1035_s0 + $0x18] sm:$0xff]  ;;  %v65_v40 = vunpack.c.h.bf16 %v892_v29  ;;  %v792_v49 = vld [vmem:[%s1032_s1 + $0x30] sm:$0xff]  }
   0x8   :  { %703 = vmatprep.subr.bf16.mxu0 %v783_v4  ;;  %765 = vmatprep.subr.bf16.mxu1 %v783_v4  ;;  %v52_v23 = vld [vmem:[%s1035_s0 + $0x40] sm:$0xff]  ;;  %v885_v27 = vrot.slane %v136_v22, %v96_v11  ;;  %v887_v28 = vrot.slane %v136_v22, %v100_v13  ;;  %v67_v53 = vunpack.c.h.bf16 %v47_v39  ;;  %v793_v54 = vld [vmem:[%s1032_s1 + $0x78] sm:$0xff]   ;;  %v54_v59 = vld [vmem:[%s1035_s0 + $0x50] sm:$0xff]  ;;  %v64_v13 = vunpack.c.l.bf16 %v892_v29 }
   0x9   :  { %v76_v31 = vunpack.c.l.bf16 %v52_v23  ;;  %v77_v32 = vunpack.c.h.bf16 %v52_v23  ;;  %v105_v36 = vmul.f32 %v883_v26, %v61_v19  ;;  %v107_v37 = vmul.f32 %v883_v26, %v63_v21  ;;  %v55_v0 = vld [vmem:[%s1035_s0 + $0x58] sm:$0xff] }
   0xa   :  { %v104_v38 = vmul.f32 %v881_v25, %v60_v18  ;;  %v123_v42 = vmul.f32 %v883_v26, %v79_v34  ;;  %v106_v43 = vmul.f32 %v881_v25, %v62_v20  ;;  %v122_v48 = vmul.f32 %v881_v25, %v78_v33  ;;  %v794_v5 = vld [vmem:[%s1032_s1 + $0x38] sm:$0xff]   ;;  %v48_v18 = vld [vmem:[%s1035_s0 + $0x20] sm:$0xff] }
   0xb   :  { %704 = vmatpush3.bf16.msra.mxu0 %v784_v6  ;;  %773 = vmatpush3.bf16.msra.mxu1 %v784_v6  ;;  %v121_v41 = vmul.f32 %v883_v26, %v77_v32  ;;  %v120_v44 = vmul.f32 %v881_v25, %v76_v31  ;;  %v149_v45 = vadd.f32 %v887_v28, %v105_v36  ;;  %v66_v16 = vunpack.c.l.bf16 %v47_v39  ;;  %v49_v31 = vld [vmem:[%s1035_s0 + $0x28] sm:$0xff]  ;;  %v56_v36 = vld [vmem:[%s1035_s0 + $0x60] sm:$0xff] }
   0xc   :  { %705 = vmatprep.subr.bf16.mxu0 %v785_v7  ;;  %766 = vmatprep.subr.bf16.mxu1 %v785_v7  ;;  %v151_v46 = vadd.f32 %v887_v28, %v107_v37  ;;  %v148_v47 = vadd.f32 %v885_v27, %v104_v38  ;;  %v167_v51 = vadd.f32 %v887_v28, %v123_v42  ;;  %v80_v17 = vunpack.c.l.bf16 %v54_v59 }
   0xd   :  { %v165_v50 = vadd.f32 %v887_v28, %v121_v41  ;;  %v150_v52 = vadd.f32 %v885_v27, %v106_v43  ;;  %v181_v55 = vmax.f32 %v149_v45, 0.0  ;;  %v164_v58 = vadd.f32 %v885_v27, %v120_v44  ;;  %v57_v41 = vld [vmem:[%s1035_s0 + $0x68] sm:$0xff] }
   0xe   :  { %v183_v56 = vmax.f32 %v151_v46, 0.0  ;;  %v180_v57 = vmax.f32 %v148_v47, 0.0  ;;  %v199_v61 = vmax.f32 %v167_v51, 0.0  ;;  %v166_v63 = vadd.f32 %v885_v27, %v122_v48 }
   0xf   :  { %706 = vmatpush3.bf16.msra.mxu0 %v786_v9  ;;  %774 = vmatpush3.bf16.msra.mxu1 %v786_v9  ;;  %v197_v60 = vmax.f32 %v165_v50, 0.0  ;;  %v182_v62 = vmax.f32 %v150_v52, 0.0  ;;  %v196_v2 = vmax.f32 %v164_v58, 0.0  ;;  %v109_v3 = vmul.f32 %v883_v26, %v65_v40 }
  0x10   :  { %707 = vmatprep.subr.bf16.mxu0 %v787_v10  ;;  %767 = vmatprep.subr.bf16.mxu1 %v787_v10  ;;  %v229_v1 = vpack.c.bf16 %v183_v56, %v181_v55  ;;  %v111_v4 = vmul.f32 %v883_v26, %v67_v53  ;;  %v198_v8 = vmax.f32 %v166_v63, 0.0  ;;  %v81_v9 = vunpack.c.h.bf16 %v54_v59 }
  0x11   :  { %v237_v6 = vpack.c.bf16 %v199_v61, %v197_v60  ;;  %v228_v7 = vpack.c.bf16 %v182_v62, %v180_v57  ;;  %v153_v10 = vadd.f32 %v887_v28, %v109_v3  ;;  %v108_v22 = vmul.f32 %v881_v25, %v64_v13  ;;  %v50_v62 = vld [vmem:[%s1035_s0 + $0x30] sm:$0xff] }
  0x12   :  { %v155_v11 = vadd.f32 %v887_v28, %v111_v4  ;;  %404 = vmatprep.mubr.bf16.mxu0 %v229_v1  ;;  %v125_v15 = vmul.f32 %v883_v26, %v81_v9  ;;  %v110_v24 = vmul.f32 %v881_v25, %v66_v16  ;;  %v82_v29 = vunpack.c.l.bf16 %v55_v0 }
  0x13   :  { %708 = vmatpush3.bf16.msra.mxu0 %v788_v12  ;;  %775 = vmatpush3.bf16.msra.mxu1 %v788_v12  ;;  %v83_v12 = vunpack.c.h.bf16 %v55_v0  ;;  %v185_v19 = vmax.f32 %v153_v10, 0.0  ;;  %v152_v34 = vadd.f32 %v885_v27, %v108_v22  ;;  %v71_v44 = vunpack.c.h.bf16 %v49_v31 }
  0x14   :  { %709 = vmatprep.subr.bf16.mxu0 %v789_v14  ;;  %768 = vmatprep.subr.bf16.mxu1 %v789_v14  ;;  %v236_v14 = vpack.c.bf16 %v198_v8, %v196_v2  ;;  %v187_v20 = vmax.f32 %v155_v11, 0.0  ;;  %v169_v23 = vadd.f32 %v887_v28, %v125_v15  ;;  %v154_v38 = vadd.f32 %v885_v27, %v110_v24 }
  0x15   :  { %436 = vmatprep.mubr.bf16.mxu1 %v237_v6  ;;  %v127_v21 = vmul.f32 %v883_v26, %v83_v12  ;;  %v126_v39 = vmul.f32 %v881_v25, %v82_v29  ;;  %v184_v43 = vmax.f32 %v152_v34, 0.0  ;;  %v115_v51 = vmul.f32 %v883_v26, %v71_v44  ;;  %v58_v12 = vld [vmem:[%s1035_s0 + $0x70] sm:$0xff] }
  0x16   :  { %v231_v32 = vpack.c.bf16 %v187_v20, %v185_v19  ;;  %v201_v37 = vmax.f32 %v169_v23, 0.0  ;;  %v186_v46 = vmax.f32 %v154_v38, 0.0  ;;  %v87_v53 = vunpack.c.h.bf16 %v57_v41 }
  0x17   :  { %710 = vmatpush3.bf16.msra.mxu0 %v790_v30  ;;  %776 = vmatpush3.bf16.msra.mxu1 %v790_v30  ;;  %v124_v30 = vmul.f32 %v881_v25, %v80_v17  ;;  %v171_v33 = vadd.f32 %v887_v28, %v127_v21  ;;  %v170_v47 = vadd.f32 %v885_v27, %v126_v39  ;;  %v68_v57 = vunpack.c.l.bf16 %v48_v18  ;;  %v59_v17 = vld [vmem:[%s1035_s0 + $0x78] sm:$0xff] }
  0x18   :  { %711 = vmatprep.subr.bf16.mxu0 %v791_v35  ;;  %769 = vmatprep.subr.bf16.mxu1 %v791_v35  ;;  %v69_v35 = vunpack.c.h.bf16 %v48_v18  ;;  %v159_v58 = vadd.f32 %v887_v28, %v115_v51  ;;  %v131_v60 = vmul.f32 %v883_v26, %v87_v53  ;;  %v70_v61 = vunpack.c.l.bf16 %v49_v31 }
  0x19   :  { %v168_v40 = vadd.f32 %v885_v27, %v124_v30  ;;  %v203_v42 = vmax.f32 %v171_v33, 0.0  ;;  %v202_v55 = vmax.f32 %v170_v47, 0.0  ;;  %v112_v1 = vmul.f32 %v881_v25, %v68_v57 }
  0x1a   :  { %v113_v45 = vmul.f32 %v883_v26, %v69_v35  ;;  %v84_v2 = vunpack.c.l.bf16 %v56_v36  ;;  %v191_v3 = vmax.f32 %v159_v58, 0.0  ;;  %v175_v4 = vadd.f32 %v887_v28, %v131_v60 }
  0x1b   :  { %712 = vmatpush3.bf16.msra.mxu0 %v792_v49  ;;  %777 = vmatpush3.bf16.msra.mxu1 %v792_v49  ;;  %v200_v48 = vmax.f32 %v168_v40, 0.0  ;;  %v85_v49 = vunpack.c.h.bf16 %v56_v36  ;;  %v239_v50 = vpack.c.bf16 %v203_v42, %v201_v37  ;;  %v86_v6 = vunpack.c.l.bf16 %v57_v41 }
  0x1c   :  { %713 = vmatprep.subr.bf16.mxu0 %v793_v54  ;;  %770 = vmatprep.subr.bf16.mxu1 %v793_v54  ;;  %v157_v52 = vadd.f32 %v887_v28, %v113_v45  ;;  %v230_v54 = vpack.c.bf16 %v186_v46, %v184_v43  ;;  %v156_v9 = vadd.f32 %v885_v27, %v112_v1  ;;  %v73_v11 = vunpack.c.h.bf16 %v50_v62 }
  0x1d   :  { %v129_v56 = vmul.f32 %v883_v26, %v85_v49  ;;  %v238_v63 = vpack.c.bf16 %v202_v55, %v200_v48  ;;  %v128_v10 = vmul.f32 %v881_v25, %v84_v2  ;;  %v130_v16 = vmul.f32 %v881_v25, %v86_v6 }
  0x1e   :  { %v189_v59 = vmax.f32 %v157_v52, 0.0  ;;  %v188_v18 = vmax.f32 %v156_v9, 0.0  ;;  %v117_v21 = vmul.f32 %v883_v26, %v73_v11  ;;  %v89_v29 = vunpack.c.h.bf16 %v58_v12 }
  0x1f   :  { %714 = vmatpush3.bf16.msra.mxu0 %v794_v5  ;;  %778 = vmatpush3.bf16.msra.mxu1 %v794_v5  ;;  %v173_v0 = vadd.f32 %v887_v28, %v129_v56  ;;  %v114_v5 = vmul.f32 %v881_v25, %v70_v61  ;;  %v172_v19 = vadd.f32 %v885_v27, %v128_v10  ;;  %v91_v33 = vunpack.c.h.bf16 %v59_v17 }
  0x20   :  { %v233_v13 = vpack.c.bf16 %v191_v3, %v189_v59  ;;  %v174_v24 = vadd.f32 %v885_v27, %v130_v16  ;;  %v133_v36 = vmul.f32 %v883_v26, %v89_v29  ;;  %v72_v37 = vunpack.c.l.bf16 %v50_v62 }
  0x21   :  { %v205_v8 = vmax.f32 %v173_v0, 0.0  ;;  %v158_v15 = vadd.f32 %v885_v27, %v114_v5  ;;  %v204_v30 = vmax.f32 %v172_v19, 0.0  ;;  %v135_v40 = vmul.f32 %v883_v26, %v91_v33 }
  0x22   :  { %405 = vmatmul.mubr.bf16.vlgmr.msra.gmra.mrb[0].mxu0 %v228_v7  ;;  %437 = vmatmul.mubr.bf16.vlgmr.msra.gmra.mrb[0].mxu1 %v236_v14  ;;  %v51_v7 = vld [vmem:[%s1035_s0 + $0x38] sm:$0xff]  ;;  %v207_v14 = vmax.f32 %v175_v4, 0.0  ;;  %v206_v35 = vmax.f32 %v174_v24, 0.0  ;;  %v177_v43 = vadd.f32 %v887_v28, %v133_v36  ;;  %v116_v44 = vmul.f32 %v881_v25, %v72_v37 }
  0x23   :  { %412 = vmatprep.mubr.bf16.mxu0 %v231_v32  ;;  %444 = vmatprep.mubr.bf16.mxu1 %v239_v50  ;;  %v75_v20 = vunpack.c.h.bf16 %v51_v7  ;;  %v190_v23 = vmax.f32 %v158_v15, 0.0  ;;  %v161_v32 = vadd.f32 %v887_v28, %v117_v21  ;;  %v74_v41 = vunpack.c.l.bf16 %v51_v7 }
  0x24   :  { %v241_v22 = vpack.c.bf16 %v207_v14, %v205_v8  ;;  %v240_v42 = vpack.c.bf16 %v206_v35, %v204_v30  ;;  %v88_v45 = vunpack.c.l.bf16 %v58_v12  ;;  %v179_v47 = vadd.f32 %v887_v28, %v135_v40 }
  0x25   :  { %v119_v31 = vmul.f32 %v883_v26, %v75_v20  ;;  %v232_v34 = vpack.c.bf16 %v190_v23, %v188_v18  ;;  %v193_v39 = vmax.f32 %v161_v32, 0.0  ;;  %v118_v48 = vmul.f32 %v881_v25, %v74_v41 }
  0x26   :  { %v90_v49 = vunpack.c.l.bf16 %v59_v17  ;;  %v209_v50 = vmax.f32 %v177_v43, 0.0  ;;  %v160_v51 = vadd.f32 %v885_v27, %v116_v44  ;;  %v132_v26 = vmul.f32 %v881_v25, %v88_v45 }
  0x27   :  { %v163_v38 = vadd.f32 %v887_v28, %v119_v31  ;;  %v211_v53 = vmax.f32 %v179_v47, 0.0 }
  0x28   :  { %v134_v55 = vmul.f32 %v881_v25, %v90_v49  ;;  %v192_v56 = vmax.f32 %v160_v51, 0.0  ;;  %v176_v57 = vadd.f32 %v885_v27, %v132_v26 }
  0x29   :  { %v195_v46 = vmax.f32 %v163_v38, 0.0  ;;  %v243_v28 = vpack.c.bf16 %v211_v53, %v209_v50 }
  0x2a   :  { %413 = vmatmul.mubr.bf16.gmra.mrb[4].mxu0 %v230_v54  ;;  %445 = vmatmul.mubr.bf16.gmra.mrb[4].mxu1 %v238_v63  ;;  %v162_v54 = vadd.f32 %v885_v27, %v118_v48  ;;  %v178_v59 = vadd.f32 %v885_v27, %v134_v55  ;;  %v208_v60 = vmax.f32 %v176_v57, 0.0 }
  0x2b   :  { %420 = vmatprep.mubr.bf16.mxu0 %v233_v13  ;;  %452 = vmatprep.mubr.bf16.mxu1 %v241_v22  ;;  %v235_v52 = vpack.c.bf16 %v195_v46, %v193_v39 }
  0x2c   :  { %v194_v58 = vmax.f32 %v162_v54, 0.0  ;;  %v210_v62 = vmax.f32 %v178_v59, 0.0 }
  0x2e   :  { %v234_v61 = vpack.c.bf16 %v194_v58, %v192_v56  ;;  %v242_v63 = vpack.c.bf16 %v210_v62, %v208_v60 }
  0x32   :  { %421 = vmatmul.mubr.bf16.gmra.mrb[8].mxu0 %v232_v34  ;;  %453 = vmatmul.mubr.bf16.gmra.mrb[8].mxu1 %v240_v42 }
  0x33   :  { %428 = vmatprep.mubr.bf16.mxu0 %v235_v52  ;;  %460 = vmatprep.mubr.bf16.mxu1 %v243_v28 }
  0x3a   :  { %429 = vmatmul.mubr.bf16.gmra.mrb[12].mxu0 %v234_v61  ;;  %461 = vmatmul.mubr.bf16.gmra.mrb[12].mxu1 %v242_v63 }
  0xf5   :  { %v715_v0 = vpop.f32.mrb[0].mxu0  ;;  %v739_v1 = vpop.f32.mrb[0].mxu1 }
  0xf6   :  { %v716_v2 = vpop.f32.mrb[1].mxu0  ;;  %v740_v3 = vpop.f32.mrb[1].mxu1 }
  0xf7   :  { %v717_v25 = vadd.f32 %v716_v2, %v715_v0  ;;  %v741_v4 = vadd.f32 %v740_v3, %v739_v1  ;;  %v718_v5 = vpop.f32.mrb[2].mxu0  ;;  %v742_v6 = vpop.f32.mrb[2].mxu1 }
  0xf8   :  { %v719_v7 = vpop.f32.mrb[3].mxu0  ;;  %v743_v8 = vpop.f32.mrb[3].mxu1 }
  0xf9   :  { %v720_v9 = vadd.f32 %v719_v7, %v718_v5  ;;  %v744_v10 = vadd.f32 %v743_v8, %v742_v6 }
  0xfb   :  { %v655_v27 = vpack.c.bf16 %v720_v9, %v717_v25  ;;  %v675_v11 = vpack.c.bf16 %v744_v10, %v741_v4 }
  0xfd   :  { %656 = vst [vmem:[%s1038_s6] sm:$0xff] %v655_v27   ;;  %695 = vst [vmem:[%s1038_s6 + $0x20] sm:$0xff] %v675_v11   ;;  %v721_v12 = vpop.f32.mrb[4].mxu0  ;;  %v745_v13 = vpop.f32.mrb[4].mxu1 }
  0xfe   :  { %v722_v14 = vpop.f32.mrb[5].mxu0  ;;  %v746_v15 = vpop.f32.mrb[5].mxu1 }
  0xff   :  { %v723_v16 = vadd.f32 %v722_v14, %v721_v12  ;;  %v747_v17 = vadd.f32 %v746_v15, %v745_v13  ;;  %v724_v18 = vpop.f32.mrb[6].mxu0  ;;  %v748_v19 = vpop.f32.mrb[6].mxu1 }
 0x100   :  { %v725_v20 = vpop.f32.mrb[7].mxu0  ;;  %v749_v21 = vpop.f32.mrb[7].mxu1 }
 0x101   :  { %v726_v22 = vadd.f32 %v725_v20, %v724_v18  ;;  %v750_v23 = vadd.f32 %v749_v21, %v748_v19 }
 0x103   :  { %v660_v24 = vpack.c.bf16 %v726_v22, %v723_v16  ;;  %v680_v29 = vpack.c.bf16 %v750_v23, %v747_v17 }
 0x105   :  { %692 = vst [vmem:[%s1038_s6 + $0x8] sm:$0xff] %v660_v24   ;;  %696 = vst [vmem:[%s1038_s6 + $0x28] sm:$0xff] %v680_v29   ;;  %v727_v30 = vpop.f32.mrb[8].mxu0  ;;  %v751_v31 = vpop.f32.mrb[8].mxu1 }
 0x106   :  { %v728_v32 = vpop.f32.mrb[9].mxu0  ;;  %v752_v33 = vpop.f32.mrb[9].mxu1 }
 0x107   :  { %v729_v34 = vadd.f32 %v728_v32, %v727_v30  ;;  %v753_v35 = vadd.f32 %v752_v33, %v751_v31  ;;  %v730_v36 = vpop.f32.mrb[10].mxu0  ;;  %v754_v37 = vpop.f32.mrb[10].mxu1 }
 0x108   :  { %v731_v38 = vpop.f32.mrb[11].mxu0  ;;  %v755_v39 = vpop.f32.mrb[11].mxu1 }
 0x109   :  { %v732_v40 = vadd.f32 %v731_v38, %v730_v36  ;;  %v756_v41 = vadd.f32 %v755_v39, %v754_v37 }
 0x10b   :  { %v665_v42 = vpack.c.bf16 %v732_v40, %v729_v34  ;;  %v685_v43 = vpack.c.bf16 %v756_v41, %v753_v35 }
 0x10d   :  { %693 = vst [vmem:[%s1038_s6 + $0x10] sm:$0xff] %v665_v42   ;;  %697 = vst [vmem:[%s1038_s6 + $0x30] sm:$0xff] %v685_v43   ;;  %v733_v44 = vpop.f32.mrb[12].mxu0  ;;  %v757_v45 = vpop.f32.mrb[12].mxu1 }
 0x10e   :  { %v734_v46 = vpop.f32.mrb[13].mxu0  ;;  %v758_v48 = vpop.f32.mrb[13].mxu1 }
 0x10f   :  { %v735_v47 = vadd.f32 %v734_v46, %v733_v44  ;;  %v736_v49 = vpop.f32.mrb[14].mxu0  ;;  %v759_v50 = vadd.f32 %v758_v48, %v757_v45  ;;  %v760_v51 = vpop.f32.mrb[14].mxu1 }
 0x110   :  { %v737_v26 = vpop.f32.mrb[15].mxu0  ;;  %v761_v53 = vpop.f32.mrb[15].mxu1 }
 0x111   :  { %v738_v52 = vadd.f32 %v737_v26, %v736_v49  ;;  %v762_v54 = vadd.f32 %v761_v53, %v760_v51 }
 0x113   :  { %v670_v55 = vpack.c.bf16 %v738_v52, %v735_v47  ;;  %v690_v56 = vpack.c.bf16 %v762_v54, %v759_v50 }
 0x115   :  { %694 = vst [vmem:[%s1038_s6 + $0x18] sm:$0xff] %v670_v55   ;;  %698 = vst [vmem:[%s1038_s6 + $0x38] sm:$0xff] %v690_v56  }

// kernel: densenet121_forward.141
= control target key start
LH: loop header
LB: loop body
LE: loop exit
PB: predicated region body
PF: predicated region fallthrough
CT: control target
= control target key end

     0   :  { %s178_s0 = inlined_call_operand.vmem [shape: bf16[4,32,128], index: 0, kind: input, shape index: {}]   ;;  %s179_s1 = inlined_call_operand.vmem [shape: bf16[32,128], index: 1, kind: output, shape index: {}]  }
   0x1   :  { %v89_v0 = vld [vmem:[%s178_s0] sm:$0xff]   ;;  %v131_v1 = vld [vmem:[%s178_s0 + $0x10] sm:$0xff]   ;;  %v130_v8 = vld [vmem:[%s178_s0 + $0x8] sm:$0xff]  }
   0x2   :  { %v133_v2 = vld [vmem:[%s178_s0 + $0x20] sm:$0xff]   ;;  %v90_v3 = vunpack.c.l.bf16 %v89_v0  ;;  %v91_v4 = vunpack.c.h.bf16 %v89_v0  ;;  %v98_v5 = vunpack.c.l.bf16 %v131_v1  ;;  %v99_v6 = vunpack.c.h.bf16 %v131_v1  ;;  %v135_v7 = vld [vmem:[%s178_s0 + $0x30] sm:$0xff]   ;;  %v132_v9 = vld [vmem:[%s178_s0 + $0x18] sm:$0xff]  }
   0x3   :  { %v106_v10 = vunpack.c.l.bf16 %v133_v2  ;;  %v107_v11 = vunpack.c.h.bf16 %v133_v2  ;;  %v114_v12 = vunpack.c.l.bf16 %v135_v7  ;;  %v115_v13 = vunpack.c.h.bf16 %v135_v7  ;;  %v134_v14 = vld [vmem:[%s178_s0 + $0x28] sm:$0xff]   ;;  %v136_v19 = vld [vmem:[%s178_s0 + $0x38] sm:$0xff]  }
   0x4   :  { %v40_v15 = vadd.f32 %v98_v5, %v90_v3  ;;  %v43_v16 = vadd.f32 %v99_v6, %v91_v4  ;;  %v94_v17 = vunpack.c.l.bf16 %v130_v8  ;;  %v95_v18 = vunpack.c.h.bf16 %v130_v8 }
   0x5   :  { %v102_v20 = vunpack.c.l.bf16 %v132_v9  ;;  %v103_v21 = vunpack.c.h.bf16 %v132_v9  ;;  %v110_v22 = vunpack.c.l.bf16 %v134_v14  ;;  %v111_v23 = vunpack.c.h.bf16 %v134_v14 }
   0x6   :  { %v41_v24 = vadd.f32 %v106_v10, %v40_v15  ;;  %v44_v25 = vadd.f32 %v107_v11, %v43_v16  ;;  %v118_v26 = vunpack.c.l.bf16 %v136_v19  ;;  %v119_v27 = vunpack.c.h.bf16 %v136_v19 }
   0x7   :  { %v46_v28 = vadd.f32 %v102_v20, %v94_v17  ;;  %v49_v29 = vadd.f32 %v103_v21, %v95_v18 }
   0x8   :  { %v42_v30 = vadd.f32 %v114_v12, %v41_v24  ;;  %v45_v31 = vadd.f32 %v115_v13, %v44_v25 }
   0x9   :  { %v47_v32 = vadd.f32 %v110_v22, %v46_v28  ;;  %v50_v33 = vadd.f32 %v111_v23, %v49_v29 }
   0xa   :  { %v52_v34 = vmul.f32 0.25, %v42_v30  ;;  %v53_v35 = vmul.f32 0.25, %v45_v31 }
   0xb   :  { %v48_v36 = vadd.f32 %v118_v26, %v47_v32  ;;  %v51_v37 = vadd.f32 %v119_v27, %v50_v33 }
   0xc   :  { %v123_v38 = vpack.c.bf16 %v53_v35, %v52_v34 }
   0xd   :  { %v54_v39 = vmul.f32 0.25, %v48_v36  ;;  %v55_v40 = vmul.f32 0.25, %v51_v37 }
   0xe   :  { %124 = vst [vmem:[%s179_s1] sm:$0xff] %v123_v38  }
   0xf   :  { %v128_v41 = vpack.c.bf16 %v55_v40, %v54_v39 }
  0x11   :  { %137 = vst [vmem:[%s179_s1 + $0x8] sm:$0xff] %v128_v41  }

// kernel: densenet121_forward.142
= control target key start
LH: loop header
LB: loop body
LE: loop exit
PB: predicated region body
PF: predicated region fallthrough
CT: control target
= control target key end

     0   :  { %s474_s0 = inlined_call_operand.vmem [shape: bf16[32,512], index: 0, kind: input, shape index: {}]   ;;  %s475_s1 = inlined_call_operand.vmem [shape: bf16[128,128], index: 1, kind: input, shape index: {}]   ;;  %s476_s2 = inlined_call_operand.vmem [shape: f32[1,128], index: 2, kind: input, shape index: {}]   ;;  %s477_s3 = inlined_call_operand.vmem [shape: f32[1,128], index: 3, kind: input, shape index: {}]   ;;  %s478_s4 = inlined_call_operand.vmem [shape: f32[1,128], index: 4, kind: input, shape index: {}]   ;;  %s479_s5 = inlined_call_operand.vmem [shape: f32[1,128], index: 5, kind: input, shape index: {}]   ;;  %s480_s6 = inlined_call_operand.vmem [shape: bf16[32,128], index: 6, kind: output, shape index: {}]  }
   0x1   :  { %v377_v0 = vld [vmem:[%s475_s1] sm:$0xff]   ;;  %v378_v1 = vld [vmem:[%s475_s1 + $0x8] sm:$0xff]   ;;  %v379_v2 = vld [vmem:[%s475_s1 + $0x10] sm:$0xff]  }
   0x2   :  { %357 = vmatprep.subr.bf16.mxu0 %v377_v0  ;;  %v380_v3 = vld [vmem:[%s475_s1 + $0x18] sm:$0xff]   ;;  %v28_v4 = vld [vmem:[%s474_s0] sm:$0xf]  ;;  %v30_v5 = vld [vmem:[%s474_s0 + $0x10] sm:$0xf] }
   0x3   :  { %358 = vmatpush3.bf16.msra.mxu0 %v377_v0  ;;  %29 = vst [vmem:[#allocation3] sm:$0xf] %v28_v4  ;;  %31 = vst [vmem:[#allocation3 + $0x4] sm:$0xf] %v30_v5  ;;  %v32_v6 = vld [vmem:[%s474_s0 + $0x20] sm:$0xf] }
   0x4   :  { %359 = vmatprep.subr.bf16.mxu0 %v378_v1  ;;  %v34_v7 = vld [vmem:[%s474_s0 + $0x30] sm:$0xf]  ;;  %33 = vst [vmem:[#allocation3 + $0x8] sm:$0xf] %v32_v6  ;;  %v381_v8 = vld [vmem:[%s475_s1 + $0x20] sm:$0xff]   ;;  %v382_v9 = vld [vmem:[%s475_s1 + $0x28] sm:$0xff]  }
   0x5   :  { %35 = vst [vmem:[#allocation3 + $0xc] sm:$0xf] %v34_v7  ;;  %v307_v11 = vld [vmem:[%s476_s2] ss:$0 sm:$0xff]  ;;  %v383_v20 = vld [vmem:[%s475_s1 + $0x30] sm:$0xff]   ;;  %v384_v29 = vld [vmem:[%s475_s1 + $0x38] sm:$0xff]  }
   0x6   :  { %v308_v15 = vld [vmem:[%s477_s3] ss:$0 sm:$0xff] }
   0x7   :  { %360 = vmatpush3.bf16.msra.mxu0 %v378_v1  ;;  %v317_v34 = vld [vmem:[%s478_s4] ss:$0 sm:$0xff] }
   0x8   :  { %361 = vmatprep.subr.bf16.mxu0 %v379_v2  ;;  %v318_v36 = vld [vmem:[%s479_s5] ss:$0 sm:$0xff] }
   0xa   :  { %v328_v10 = vld [vmem:[#allocation3] sm:$0xff]  }
   0xb   :  { %362 = vmatpush3.bf16.msra.mxu0 %v379_v2  ;;  %v329_v12 = vunpack.c.l.bf16 %v328_v10  ;;  %v330_v13 = vunpack.c.h.bf16 %v328_v10 }
   0xc   :  { %363 = vmatprep.subr.bf16.mxu0 %v380_v3  ;;  %v345_v14 = vld [vmem:[#allocation3 + $0x8] sm:$0xff]  }
   0xd   :  { %v333_v16 = vunpack.c.l.bf16 %v345_v14  ;;  %v334_v17 = vunpack.c.h.bf16 %v345_v14  ;;  %v100_v18 = vmul.f32 %v329_v12, %v307_v11  ;;  %v101_v19 = vmul.f32 %v330_v13, %v307_v11 }
   0xf   :  { %364 = vmatpush3.bf16.msra.mxu0 %v380_v3  ;;  %v102_v21 = vmul.f32 %v333_v16, %v307_v11  ;;  %v103_v22 = vmul.f32 %v334_v17, %v307_v11  ;;  %v111_v23 = vadd.f32 %v308_v15, %v100_v18  ;;  %v112_v24 = vadd.f32 %v308_v15, %v101_v19 }
  0x10   :  { %365 = vmatprep.subr.bf16.mxu0 %v381_v8 }
  0x11   :  { %v113_v25 = vadd.f32 %v308_v15, %v102_v21  ;;  %v114_v26 = vadd.f32 %v308_v15, %v103_v22  ;;  %v115_v27 = vmax.f32 %v111_v23, 0.0  ;;  %v116_v28 = vmax.f32 %v112_v24, 0.0 }
  0x13   :  { %366 = vmatpush3.bf16.msra.mxu0 %v381_v8  ;;  %v123_v30 = vpack.c.bf16 %v116_v28, %v115_v27  ;;  %v117_v31 = vmax.f32 %v113_v25, 0.0  ;;  %v118_v32 = vmax.f32 %v114_v26, 0.0 }
  0x14   :  { %367 = vmatprep.subr.bf16.mxu0 %v382_v9 }
  0x15   :  { %373 = vmatprep.mubr.bf16.mxu0 %v123_v30  ;;  %v124_v33 = vpack.c.bf16 %v118_v32, %v117_v31 }
  0x17   :  { %368 = vmatpush3.bf16.msra.mxu0 %v382_v9 }
  0x18   :  { %369 = vmatprep.subr.bf16.mxu0 %v383_v20 }
  0x1b   :  { %370 = vmatpush3.bf16.msra.mxu0 %v383_v20 }
  0x1c   :  { %371 = vmatprep.subr.bf16.mxu0 %v384_v29 }
  0x1f   :  { %372 = vmatpush3.bf16.msra.mxu0 %v384_v29 }
  0x22   :  { %374 = vmatmul.mubr.bf16.vlgmr.msra.gmra.mrb[0].mxu0 %v124_v33 }
  0xf5   :  { %v375_v35 = vpop.f32.mrb[0].mxu0 }
  0xf6   :  { %v262_v37 = vmul.f32 %v375_v35, %v317_v34  ;;  %v223_v38 = vpop.f32.mrb[1].mxu0 }
  0xf7   :  { %v260_v39 = vmul.f32 %v317_v34, %v223_v38  ;;  %v376_v40 = vpop.f32.mrb[2].mxu0 }
  0xf8   :  { %v273_v41 = vadd.f32 %v318_v36, %v262_v37  ;;  %v263_v42 = vmul.f32 %v376_v40, %v317_v34  ;;  %v226_v43 = vpop.f32.mrb[3].mxu0 }
  0xf9   :  { %v271_v44 = vadd.f32 %v318_v36, %v260_v39  ;;  %v261_v45 = vmul.f32 %v317_v34, %v226_v43 }
  0xfa   :  { %v274_v46 = vadd.f32 %v318_v36, %v263_v42  ;;  %v277_v48 = vmax.f32 %v273_v41, 0.0 }
  0xfb   :  { %v272_v47 = vadd.f32 %v318_v36, %v261_v45  ;;  %v275_v50 = vmax.f32 %v271_v44, 0.0 }
  0xfc   :  { %v278_v49 = vmax.f32 %v274_v46, 0.0 }
  0xfd   :  { %v276_v51 = vmax.f32 %v272_v47, 0.0 }
  0xfe   :  { %v343_v52 = vpack.c.bf16 %v278_v49, %v277_v48 }
  0xff   :  { %v338_v53 = vpack.c.bf16 %v276_v51, %v275_v50 }
 0x100   :  { %346 = vst [vmem:[%s480_s6 + $0x8] sm:$0xff] %v343_v52  }
 0x101   :  { %339 = vst [vmem:[%s480_s6] sm:$0xff] %v338_v53  }

// kernel: densenet121_forward.143
= control target key start
LH: loop header
LB: loop body
LE: loop exit
PB: predicated region body
PF: predicated region fallthrough
CT: control target
= control target key end

     0   :  { %s1036_s21 = smov 0   ;;  %s1038_s22 = smov 0   ;;  %s1136_s0 = inlined_call_operand.vmem [shape: bf16[32,128], index: 0, kind: input, shape index: {}]   ;;  %s1137_s1 = inlined_call_operand.vmem [shape: bf16[128,384], index: 1, kind: input, shape index: {}]   ;;  %s1138_s2 = inlined_call_operand.vmem [shape: f32[1,128], index: 2, kind: input, shape index: {}, may-alias: {2,3}]   ;;  %s1139_s3 = inlined_call_operand.vmem [shape: f32[1,128], index: 3, kind: input, shape index: {}, may-alias: {2,3}]   ;;  %s1140_s4 = inlined_call_operand.vmem [shape: f32[1,384], index: 4, kind: input, shape index: {}, may-alias: {4,5}]   ;;  %s1141_s5 = inlined_call_operand.vmem [shape: f32[1,384], index: 5, kind: input, shape index: {}, may-alias: {4,5}]   ;;  %s1142_s6 = inlined_call_operand.vmem [shape: bf16[32,384], index: 6, kind: output, shape index: {}]  }
   0x1   :  { %s1040_s23 = smov 0   ;;  %s1042_s24 = smov 0  }
   0x2   :  { %s1044_s2 = smov 0  }
   0x3 LB: > { %s31_s3 = sadd.s32 1, %s995_s24  ;;  %s836_s4 = sadd.s32 4294967295, %s999_s2   ;;  %s999_s2 = sphi %s1044_s2, %s16_s2   ;;  %s995_s24 = sphi %s1042_s24, %s1147_s24   ;;  %s991_s23 = sphi %s1040_s23, %s1146_s23   ;;  %s987_s22 = sphi %s1038_s22, %s1145_s22   ;;  %s983_s21 = sphi %s1036_s21, %s1144_s21  }
   0x4   : > { %p33_p0 = scmp.ge.s32.totalorder %s31_s3, 3  ;;  %p79_p1 = scmp.ne.s32.totalorder %s987_s22, %s983_s21 }
   0x5   : > { %p80_p2 = scmp.eq.s32.totalorder %s999_s2, 0  ;;  %p215_p4 = scmp.eq.s32.totalorder %s836_s4, 2 }
   0x6   : > { %s1149_s3 = smov (%p33_p0, %s31_s3), 0  ;;  %s72_s25 = sadd.s32 1, %s987_s22 }
   0x7   : > { %p81_p3 = por %p80_p2, %p79_p1  ;;  %s68_s5 = ssub.s32 %s995_s24, %s1149_s3 }
   0x8   : > { %p70_p5 = scmp.eq.s32.totalorder %s68_s5, 0  ;;  %p1071_p6 = por %p215_p4, %p79_p1 }
   0x9   : > { %p842_p7 = scmp.ge.s32.totalorder %s999_s2, 3 }
   0xa   : > { %s1076_s27 = scalar_select %p70_p5, %s987_s22, %s72_s25  }
   0xb   : > { %261 = sbr.rel (%p842_p7) target bundleno = 32 (0x20), region = 28 }
  0x12   : > { %264 = sbr.rel (!%p81_p3) target bundleno = 32 (0x20), region = 32  ;;  %s266_s28 = sand.u32 (%p81_p3), 1, %s987_s22  }
  0x13   : > { %s844_s29 = sshll.u32 (%p81_p3), %s995_s24, 2  ;;  %s843_s30 = sshll.u32 (%p81_p3), %s266_s28, 6 }
  0x14   : > { %s1084_s9 = scalar_lea.vmem (%p81_p3), %s1137_s1, %s844_s29  ;;  %s268_s10 = scalar_lea.vmem (%p81_p3), [#allocation3], %s843_s30 }
  0x15   : > { %v289_v0 = vld [vmem:[%s1084_s9] sm:$0xf] (%p81_p3)  ;;  %v291_v1 = vld [vmem:[%s1084_s9 + $0xc] sm:$0xf] (%p81_p3)  ;;  %v293_v2 = vld [vmem:[%s1084_s9 + $0x18] sm:$0xf] (%p81_p3) }
  0x16   : > { %290 = vst [vmem:[%s268_s10] sm:$0xf] (%p81_p3), %v289_v0  ;;  %292 = vst [vmem:[%s268_s10 + $0x4] sm:$0xf] (%p81_p3), %v291_v1  ;;  %v295_v3 = vld [vmem:[%s1084_s9 + $0x24] sm:$0xf] (%p81_p3) }
  0x17   : > { %v297_v4 = vld [vmem:[%s1084_s9 + $0x30] sm:$0xf] (%p81_p3)  ;;  %294 = vst [vmem:[%s268_s10 + $0x8] sm:$0xf] (%p81_p3), %v293_v2  ;;  %296 = vst [vmem:[%s268_s10 + $0xc] sm:$0xf] (%p81_p3), %v295_v3 }
  0x18   : > { %298 = vst [vmem:[%s268_s10 + $0x10] sm:$0xf] (%p81_p3), %v297_v4  ;;  %v299_v5 = vld [vmem:[%s1084_s9 + $0x3c] sm:$0xf] (%p81_p3)  ;;  %v301_v6 = vld [vmem:[%s1084_s9 + $0x48] sm:$0xf] (%p81_p3) }
  0x19   : > { %v303_v7 = vld [vmem:[%s1084_s9 + $0x54] sm:$0xf]  ;;  %300 = vst [vmem:[%s268_s10 + $0x14] sm:$0xf] %v299_v5  ;;  %302 = vst [vmem:[%s268_s10 + $0x18] sm:$0xf] %v301_v6 }
  0x1a   : > { %304 = vst [vmem:[%s268_s10 + $0x1c] sm:$0xf] %v303_v7  ;;  %v305_v8 = vld [vmem:[%s1084_s9 + $0x60] sm:$0xf]  ;;  %v307_v9 = vld [vmem:[%s1084_s9 + $0x6c] sm:$0xf] }
  0x1b   : > { %v309_v10 = vld [vmem:[%s1084_s9 + $0x78] sm:$0xf]  ;;  %306 = vst [vmem:[%s268_s10 + $0x20] sm:$0xf] %v305_v8  ;;  %308 = vst [vmem:[%s268_s10 + $0x24] sm:$0xf] %v307_v9 }
  0x1c   : > { %310 = vst [vmem:[%s268_s10 + $0x28] sm:$0xf] %v309_v10  ;;  %v311_v11 = vld [vmem:[%s1084_s9 + $0x84] sm:$0xf]  ;;  %v313_v12 = vld [vmem:[%s1084_s9 + $0x90] sm:$0xf] }
  0x1d   : > { %v315_v13 = vld [vmem:[%s1084_s9 + $0x9c] sm:$0xf]  ;;  %312 = vst [vmem:[%s268_s10 + $0x2c] sm:$0xf] %v311_v11  ;;  %314 = vst [vmem:[%s268_s10 + $0x30] sm:$0xf] %v313_v12 }
  0x1e   : > { %316 = vst [vmem:[%s268_s10 + $0x34] sm:$0xf] %v315_v13  ;;  %v317_v14 = vld [vmem:[%s1084_s9 + $0xa8] sm:$0xf]  ;;  %v319_v15 = vld [vmem:[%s1084_s9 + $0xb4] sm:$0xf] }
  0x1f   : > { %318 = vst [vmem:[%s268_s10 + $0x38] sm:$0xf] %v317_v14  ;;  %320 = vst [vmem:[%s268_s10 + $0x3c] sm:$0xf] %v319_v15 }
  0x20 PF: > { %p845_p8 = scmp.ge.s32.totalorder %s999_s2, 1  ;;  %p386_p9 = scmp.lt.s32.totalorder %s999_s2, 4 }
  0x22   : > { %p387_p10 = pnand %p845_p8, %p386_p9 }
  0x23   : > { %s393_s11 = sand.u32 (!%p387_p10), 1, %s983_s21   ;;  %v959_v16 = vld [vmem:[%s1136_s0] sm:$0xff] (!%p387_p10)   ;;  %v960_v25 = vld [vmem:[%s1136_s0 + $0x8] sm:$0xff] (!%p387_p10)  }
  0x24   : > { %390 = sbr.rel (%p387_p10) target bundleno = 298 (0x12a), region = 81  ;;  %s846_s14 = sshll.u32 (!%p387_p10), %s393_s11, 6  ;;  %907 = vmatprep.mubr.bf16.mxu0 (!%p387_p10), %v959_v16 }
  0x25   : > { %s395_s15 = scalar_lea.vmem (!%p387_p10), [#allocation3], %s846_s14  ;;  %s847_s18 = sshll.u32 (!%p387_p10), %s393_s11, 4 }
  0x26   : > { %v951_v17 = vld [vmem:[%s395_s15] sm:$0xff] (!%p387_p10)   ;;  %v952_v18 = vld [vmem:[%s395_s15 + $0x8] sm:$0xff] (!%p387_p10)   ;;  %v953_v19 = vld [vmem:[%s395_s15 + $0x10] sm:$0xff] (!%p387_p10)   ;;  %s440_s19 = scalar_lea.vmem (!%p387_p10), [#allocation4], %s847_s18 }
  0x27   : > { %891 = vmatprep.subr.bf16.mxu0 (!%p387_p10), %v951_v17  ;;  %v954_v20 = vld [vmem:[%s395_s15 + $0x18] sm:$0xff] (!%p387_p10)   ;;  %v955_v21 = vld [vmem:[%s395_s15 + $0x20] sm:$0xff] (!%p387_p10)   ;;  %v956_v22 = vld [vmem:[%s395_s15 + $0x28] sm:$0xff] (!%p387_p10)  }
  0x28   : > { %892 = vmatpush3.bf16.msra.mxu0 (!%p387_p10), %v951_v17  ;;  %v957_v23 = vld [vmem:[%s395_s15 + $0x30] sm:$0xff] (!%p387_p10)   ;;  %v958_v24 = vld [vmem:[%s395_s15 + $0x38] sm:$0xff] (!%p387_p10)  }
  0x29   : > { %893 = vmatprep.subr.bf16.mxu0 (!%p387_p10), %v952_v18 }
  0x2b   : > { %s863_s20 = sshll.u32 (%p1071_p6), %s991_s23, 2 }
  0x2c   : > { %894 = vmatpush3.bf16.msra.mxu0 %v952_v18  ;;  %s652_s21 = scalar_lea.vmem (%p1071_p6), %s1142_s6, %s863_s20 }
  0x2d   : > { %895 = vmatprep.subr.bf16.mxu0 %v953_v19 }
  0x30   : > { %896 = vmatpush3.bf16.msra.mxu0 %v953_v19 }
  0x31   : > { %897 = vmatprep.subr.bf16.mxu0 %v954_v20 }
  0x34   : > { %898 = vmatpush3.bf16.msra.mxu0 %v954_v20 }
  0x35   : > { %899 = vmatprep.subr.bf16.mxu0 %v955_v21 }
  0x38   : > { %900 = vmatpush3.bf16.msra.mxu0 %v955_v21 }
  0x39   : > { %901 = vmatprep.subr.bf16.mxu0 %v956_v22 }
  0x3c   : > { %902 = vmatpush3.bf16.msra.mxu0 %v956_v22 }
  0x3d   : > { %903 = vmatprep.subr.bf16.mxu0 %v957_v23 }
  0x40   : > { %904 = vmatpush3.bf16.msra.mxu0 %v957_v23 }
  0x41   : > { %905 = vmatprep.subr.bf16.mxu0 %v958_v24 }
  0x44   : > { %906 = vmatpush3.bf16.msra.mxu0 %v958_v24 }
  0x47   : > { %908 = vmatmul.mubr.bf16.vlgmr.msra.gmra.mrb[0].mxu0 %v960_v25 }
 0x11a   : > { %v909_v26 = vpop.f32.mrb[0].mxu0  ;;  %647 = sbr.rel (!%p1071_p6) target bundleno = 298 (0x12a), region = 97 }
 0x11b   : > { %v591_v27 = vpop.f32.mrb[1].mxu0 }
 0x11c   : > { %v910_v28 = vpop.f32.mrb[2].mxu0 }
 0x11d   : > { %v878_v29 = vpack.c.bf16 %v910_v28, %v909_v26  ;;  %v594_v30 = vpop.f32.mrb[3].mxu0 }
 0x11e   : > { %v873_v31 = vpack.c.bf16 %v594_v30, %v591_v27 }
 0x11f   : > { %880 = vst [vmem:[%s440_s19 + $0x8] sm:$0xff] %v878_v29  }
 0x120   : > { %874 = vst [vmem:[%s440_s19] sm:$0xff] %v873_v31  }
 0x126   : > { %v672_v34 = vld [vmem:[%s440_s19 + $0x8] sm:$0xf]  ;;  %v674_v35 = vld [vmem:[%s440_s19 + $0xc] sm:$0xf] }
 0x127   : > { %v668_v32 = vld [vmem:[%s440_s19] sm:$0xf]  ;;  %v670_v33 = vld [vmem:[%s440_s19 + $0x4] sm:$0xf]  ;;  %673 = vst [vmem:[%s652_s21 + $0x18] sm:$0xf] %v672_v34 }
 0x128   : > { %669 = vst [vmem:[%s652_s21] sm:$0xf] %v668_v32  ;;  %671 = vst [vmem:[%s652_s21 + $0xc] sm:$0xf] %v670_v33 }
 0x129   : > { %675 = vst [vmem:[%s652_s21 + $0x24] sm:$0xf] %v674_v35 }
 0x12a PF: > { %s16_s2 = sadd.s32 1, %s999_s2   ;;  %s1144_s21 = smov %s987_s22 }
 0x12b   : > { %p13_p11 = scmp.ge.s32.totalorder %s16_s2, 5   ;;  %s1145_s22 = smov %s1076_s27 }
 0x12c   : > { %s1146_s23 = smov %s995_s24  ;;  %s1147_s24 = smov %s1149_s3 }
 0x12d   :  { %15 = sbr.rel (!%p13_p11) target bundleno = 3 (0x3), region = 184 }

// kernel: densenet121_forward.144
= control target key start
LH: loop header
LB: loop body
LE: loop exit
PB: predicated region body
PF: predicated region fallthrough
CT: control target
= control target key end

     0   :  { %v92_v5 = vlaneseq  ;;  %s602_s0 = inlined_call_operand.vmem [shape: bf16[32,512], index: 0, kind: input, shape index: {}]   ;;  %s603_s1 = inlined_call_operand.vmem [shape: bf16[256,128], index: 1, kind: input, shape index: {}]   ;;  %s604_s2 = inlined_call_operand.vmem [shape: f32[1,256], index: 2, kind: input, shape index: {}]   ;;  %s605_s3 = inlined_call_operand.vmem [shape: f32[1,256], index: 3, kind: input, shape index: {}]   ;;  %s606_s4 = inlined_call_operand.vmem [shape: f32[1,128], index: 4, kind: input, shape index: {}]   ;;  %s607_s5 = inlined_call_operand.vmem [shape: f32[1,128], index: 5, kind: input, shape index: {}]   ;;  %s608_s6 = inlined_call_operand.vmem [shape: bf16[32,128], index: 6, kind: output, shape index: {}]  }
   0x1   :  { %v473_v0 = vld [vmem:[%s603_s1 + $0x40] sm:$0xff]   ;;  %v475_v2 = vld [vmem:[%s603_s1 + $0x48] sm:$0xff]   ;;  %v477_v4 = vld [vmem:[%s603_s1 + $0x50] sm:$0xff]  }
   0x2   :  { %v474_v1 = vld [vmem:[%s603_s1] sm:$0xff]   ;;  %429 = vmatprep.subr.bf16.mxu0 %v473_v0  ;;  %457 = vmatprep.subr.bf16.mxu1 %v473_v0  ;;  %v476_v3 = vld [vmem:[%s603_s1 + $0x8] sm:$0xff]   ;;  %v478_v6 = vld [vmem:[%s603_s1 + $0x10] sm:$0xff]   ;;  %v93_v8 = vshrl.u32 %v92_v5, 7 }
   0x3   :  { %430 = vmatpush3.bf16.msra.mxu0 %v474_v1  ;;  %465 = vmatpush3.bf16.msra.mxu1 %v474_v1  ;;  %v479_v7 = vld [vmem:[%s603_s1 + $0x58] sm:$0xff]   ;;  %v481_v10 = vld [vmem:[%s603_s1 + $0x60] sm:$0xff]   ;;  %v483_v14 = vld [vmem:[%s603_s1 + $0x68] sm:$0xff]  }
   0x4   :  { %431 = vmatprep.subr.bf16.mxu0 %v475_v2  ;;  %458 = vmatprep.subr.bf16.mxu1 %v475_v2  ;;  %v480_v9 = vld [vmem:[%s603_s1 + $0x18] sm:$0xff]   ;;  %v94_v11 = vsub.s32 0, %v93_v8  ;;  %v482_v12 = vld [vmem:[%s603_s1 + $0x20] sm:$0xff]   ;;  %v98_v13 = vsub.s32 1, %v93_v8  ;;  %v48_v16 = vld [vmem:[%s602_s0 + $0x10] sm:$0xff] }
   0x5   :  { %v46_v15 = vld [vmem:[%s602_s0] sm:$0xff]  ;;  %v84_v20 = vunpack.c.l.bf16 %v48_v16  ;;  %v85_v21 = vunpack.c.h.bf16 %v48_v16  ;;  %v52_v24 = vld [vmem:[%s602_s0 + $0x30] sm:$0xff]  ;;  %v484_v29 = vld [vmem:[%s603_s1 + $0x28] sm:$0xff]  }
   0x6   :  { %v90_v17 = vld [vmem:[%s604_s2] sm:$0x3]  ;;  %v82_v18 = vunpack.c.l.bf16 %v46_v15  ;;  %v83_v19 = vunpack.c.h.bf16 %v46_v15  ;;  %v88_v32 = vunpack.c.l.bf16 %v52_v24  ;;  %v89_v33 = vunpack.c.h.bf16 %v52_v24  ;;  %v485_v34 = vld [vmem:[%s603_s1 + $0x70] sm:$0xff]   ;;  %v487_v50 = vld [vmem:[%s603_s1 + $0x78] sm:$0xff]  }
   0x7   :  { %432 = vmatpush3.bf16.msra.mxu0 %v476_v3  ;;  %466 = vmatpush3.bf16.msra.mxu1 %v476_v3  ;;  %v110_v22 = vld [vmem:[%s605_s3] sm:$0x3]  ;;  %v95_v25 = vrot.slane %v90_v17, %v94_v11  ;;  %v99_v26 = vrot.slane %v90_v17, %v98_v13  ;;  %v486_v46 = vld [vmem:[%s603_s1 + $0x30] sm:$0xff]   ;;  %v488_v61 = vld [vmem:[%s603_s1 + $0x38] sm:$0xff]  }
   0x8   :  { %433 = vmatprep.subr.bf16.mxu0 %v477_v4  ;;  %459 = vmatprep.subr.bf16.mxu1 %v477_v4  ;;  %v50_v23 = vld [vmem:[%s602_s0 + $0x20] sm:$0xff]  ;;  %v115_v27 = vrot.slane %v110_v22, %v94_v11  ;;  %v119_v28 = vrot.slane %v110_v22, %v98_v13 }
   0x9   :  { %v86_v30 = vunpack.c.l.bf16 %v50_v23  ;;  %v87_v31 = vunpack.c.h.bf16 %v50_v23  ;;  %v103_v35 = vmul.f32 %v99_v26, %v83_v19  ;;  %v105_v36 = vmul.f32 %v99_v26, %v85_v21  ;;  %v408_v5 = vld [vmem:[%s606_s4] ss:$0 sm:$0xff] }
   0xa   :  { %v102_v37 = vmul.f32 %v95_v25, %v82_v18  ;;  %v109_v39 = vmul.f32 %v99_v26, %v89_v33  ;;  %v104_v40 = vmul.f32 %v95_v25, %v84_v20  ;;  %v108_v45 = vmul.f32 %v95_v25, %v88_v32  ;;  %v409_v11 = vld [vmem:[%s607_s5] ss:$0 sm:$0xff] }
   0xb   :  { %434 = vmatpush3.bf16.msra.mxu0 %v478_v6  ;;  %467 = vmatpush3.bf16.msra.mxu1 %v478_v6  ;;  %v107_v38 = vmul.f32 %v99_v26, %v87_v31  ;;  %v106_v41 = vmul.f32 %v95_v25, %v86_v30  ;;  %v123_v42 = vadd.f32 %v119_v28, %v103_v35 }
   0xc   :  { %435 = vmatprep.subr.bf16.mxu0 %v479_v7  ;;  %460 = vmatprep.subr.bf16.mxu1 %v479_v7  ;;  %v125_v43 = vadd.f32 %v119_v28, %v105_v36  ;;  %v122_v44 = vadd.f32 %v115_v27, %v102_v37  ;;  %v129_v48 = vadd.f32 %v119_v28, %v109_v39 }
   0xd   :  { %v127_v47 = vadd.f32 %v119_v28, %v107_v38  ;;  %v124_v49 = vadd.f32 %v115_v27, %v104_v40  ;;  %v131_v51 = vmax.f32 %v123_v42, 0.0  ;;  %v126_v53 = vadd.f32 %v115_v27, %v106_v41 }
   0xe   :  { %v133_v52 = vmax.f32 %v125_v43, 0.0  ;;  %v137_v55 = vmax.f32 %v129_v48, 0.0  ;;  %v128_v56 = vadd.f32 %v115_v27, %v108_v45  ;;  %v130_v58 = vmax.f32 %v122_v44, 0.0 }
   0xf   :  { %436 = vmatpush3.bf16.msra.mxu0 %v480_v9  ;;  %468 = vmatpush3.bf16.msra.mxu1 %v480_v9  ;;  %v135_v54 = vmax.f32 %v127_v47, 0.0  ;;  %v132_v59 = vmax.f32 %v124_v49, 0.0  ;;  %v134_v60 = vmax.f32 %v126_v53, 0.0 }
  0x10   :  { %437 = vmatprep.subr.bf16.mxu0 %v481_v10  ;;  %461 = vmatprep.subr.bf16.mxu1 %v481_v10  ;;  %v143_v57 = vpack.c.bf16 %v133_v52, %v131_v51  ;;  %v136_v63 = vmax.f32 %v128_v56, 0.0 }
  0x11   :  { %v145_v62 = vpack.c.bf16 %v137_v55, %v135_v54  ;;  %v142_v0 = vpack.c.bf16 %v132_v59, %v130_v58 }
  0x12   :  { %306 = vmatprep.mubr.bf16.mxu0 %v143_v57  ;;  %v144_v1 = vpack.c.bf16 %v136_v63, %v134_v60 }
  0x13   :  { %438 = vmatpush3.bf16.msra.mxu0 %v482_v12  ;;  %469 = vmatpush3.bf16.msra.mxu1 %v482_v12 }
  0x14   :  { %439 = vmatprep.subr.bf16.mxu0 %v483_v14  ;;  %462 = vmatprep.subr.bf16.mxu1 %v483_v14 }
  0x15   :  { %314 = vmatprep.mubr.bf16.mxu1 %v145_v62 }
  0x17   :  { %440 = vmatpush3.bf16.msra.mxu0 %v484_v29  ;;  %470 = vmatpush3.bf16.msra.mxu1 %v484_v29 }
  0x18   :  { %441 = vmatprep.subr.bf16.mxu0 %v485_v34  ;;  %463 = vmatprep.subr.bf16.mxu1 %v485_v34 }
  0x1b   :  { %442 = vmatpush3.bf16.msra.mxu0 %v486_v46  ;;  %471 = vmatpush3.bf16.msra.mxu1 %v486_v46 }
  0x1c   :  { %443 = vmatprep.subr.bf16.mxu0 %v487_v50  ;;  %464 = vmatprep.subr.bf16.mxu1 %v487_v50 }
  0x1f   :  { %444 = vmatpush3.bf16.msra.mxu0 %v488_v61  ;;  %472 = vmatpush3.bf16.msra.mxu1 %v488_v61 }
  0x22   :  { %307 = vmatmul.mubr.bf16.vlgmr.msra.gmra.mrb[0].mxu0 %v142_v0  ;;  %315 = vmatmul.mubr.bf16.vlgmr.msra.gmra.mrb[0].mxu1 %v144_v1 }
  0xf5   :  { %v445_v2 = vpop.f32.mrb[0].mxu0  ;;  %v451_v3 = vpop.f32.mrb[0].mxu1 }
  0xf6   :  { %v446_v4 = vpop.f32.mrb[1].mxu0  ;;  %v452_v6 = vpop.f32.mrb[1].mxu1 }
  0xf7   :  { %v447_v7 = vadd.f32 %v446_v4, %v445_v2  ;;  %v453_v8 = vadd.f32 %v452_v6, %v451_v3  ;;  %v448_v9 = vpop.f32.mrb[2].mxu0  ;;  %v454_v10 = vpop.f32.mrb[2].mxu1 }
  0xf8   :  { %v449_v12 = vpop.f32.mrb[3].mxu0  ;;  %v455_v13 = vpop.f32.mrb[3].mxu1 }
  0xf9   :  { %v345_v14 = vmul.f32 %v447_v7, %v408_v5  ;;  %v347_v15 = vmul.f32 %v453_v8, %v408_v5  ;;  %v450_v16 = vadd.f32 %v449_v12, %v448_v9  ;;  %v456_v17 = vadd.f32 %v455_v13, %v454_v10 }
  0xfb   :  { %v356_v18 = vadd.f32 %v409_v11, %v345_v14  ;;  %v358_v19 = vadd.f32 %v409_v11, %v347_v15  ;;  %v346_v20 = vmul.f32 %v450_v16, %v408_v5  ;;  %v348_v21 = vmul.f32 %v456_v17, %v408_v5 }
  0xfd   :  { %v357_v22 = vadd.f32 %v409_v11, %v346_v20  ;;  %v359_v23 = vadd.f32 %v409_v11, %v348_v21  ;;  %v360_v24 = vmax.f32 %v356_v18, 0.0  ;;  %v362_v25 = vmax.f32 %v358_v19, 0.0 }
  0xff   :  { %v361_v26 = vmax.f32 %v357_v22, 0.0  ;;  %v363_v27 = vmax.f32 %v359_v23, 0.0 }
 0x101   :  { %v421_v28 = vpack.c.bf16 %v361_v26, %v360_v24  ;;  %v426_v29 = vpack.c.bf16 %v363_v27, %v362_v25 }
 0x103   :  { %422 = vst [vmem:[%s608_s6] sm:$0xff] %v421_v28   ;;  %428 = vst [vmem:[%s608_s6 + $0x8] sm:$0xff] %v426_v29  }

// kernel: densenet121_forward.152
= control target key start
LH: loop header
LB: loop body
LE: loop exit
PB: predicated region body
PF: predicated region fallthrough
CT: control target
= control target key end

     0   :  { %s1004_s21 = smov 0   ;;  %s1006_s22 = smov 0   ;;  %s1104_s0 = inlined_call_operand.vmem [shape: bf16[32,512], index: 0, kind: input, shape index: {}]   ;;  %s1105_s1 = inlined_call_operand.vmem [shape: bf16[384,128], index: 1, kind: input, shape index: {}]   ;;  %s1106_s2 = inlined_call_operand.vmem [shape: f32[1,384], index: 2, kind: input, shape index: {}]   ;;  %s1107_s3 = inlined_call_operand.vmem [shape: f32[1,384], index: 3, kind: input, shape index: {}]   ;;  %s1108_s4 = inlined_call_operand.vmem [shape: f32[1,128], index: 4, kind: input, shape index: {}]   ;;  %s1109_s5 = inlined_call_operand.vmem [shape: f32[1,128], index: 5, kind: input, shape index: {}]   ;;  %s1110_s6 = inlined_call_operand.vmem [shape: bf16[32,128], index: 6, kind: output, shape index: {}]  }
   0x1   :  { %s1008_s23 = smov 0   ;;  %s1010_s24 = smov 0  }
   0x2   :  { %s1012_s25 = smov 0  }
   0x3 LB: > { %s28_s26 = sadd.s32 1, %s962_s24  ;;  %p51_p1 = scmp.ne.s32.totalorder %s954_s22, %s950_s21  ;;  %s966_s25 = sphi %s1012_s25, %s16_s25   ;;  %s962_s24 = sphi %s1010_s24, %s1114_s24   ;;  %s958_s23 = sphi %s1008_s23, %s1113_s23   ;;  %s954_s22 = sphi %s1006_s22, %s1112_s22   ;;  %s950_s21 = sphi %s1004_s21, %s1111_s21  }
   0x4   : > { %p29_p0 = scmp.ge.s32.totalorder %s28_s26, 3  ;;  %p52_p2 = scmp.eq.s32.totalorder %s966_s25, 0 }
   0x5   : > { %s44_s28 = sadd.s32 1, %s954_s22  ;;  %p796_p5 = scmp.ge.s32.totalorder %s966_s25, 3 }
   0x6   : > { %s1116_s26 = smov (%p29_p0, %s28_s26), 0  ;;  %p53_p3 = por %p52_p2, %p51_p1 }
   0x7   : > { %s40_s27 = ssub.s32 %s962_s24, %s1116_s26  ;;  %249 = sbr.rel (%p796_p5) target bundleno = 21 (0x15), region = 24 }
   0x8   : > { %p42_p4 = scmp.eq.s32.totalorder %s40_s27, 0 }
   0xa   : > { %s1039_s29 = scalar_select %p42_p4, %s954_s22, %s44_s28  }
   0xe   : > { %252 = sbr.rel (!%p53_p3) target bundleno = 21 (0x15), region = 28  ;;  %s254_s30 = sand.u32 (%p53_p3), 1, %s954_s22  }
   0xf   : > { %s798_s7 = sshll.u32 (%p53_p3), %s962_s24, 2  ;;  %s797_s8 = sshll.u32 (%p53_p3), %s254_s30, 4 }
  0x10   : > { %s261_s11 = scalar_lea.vmem (%p53_p3), %s1104_s0, %s798_s7  ;;  %s256_s12 = scalar_lea.vmem (%p53_p3), [#allocation3], %s797_s8 }
  0x11   : > { %v277_v0 = vld [vmem:[%s261_s11] sm:$0xf] (%p53_p3)  ;;  %v279_v1 = vld [vmem:[%s261_s11 + $0x10] sm:$0xf] (%p53_p3) }
  0x12   : > { %278 = vst [vmem:[%s256_s12] sm:$0xf] (%p53_p3), %v277_v0  ;;  %280 = vst [vmem:[%s256_s12 + $0x4] sm:$0xf] (%p53_p3), %v279_v1  ;;  %v281_v2 = vld [vmem:[%s261_s11 + $0x20] sm:$0xf] (%p53_p3) }
  0x13   : > { %v283_v3 = vld [vmem:[%s261_s11 + $0x30] sm:$0xf] (%p53_p3)  ;;  %282 = vst [vmem:[%s256_s12 + $0x8] sm:$0xf] (%p53_p3), %v281_v2 }
  0x14   : > { %284 = vst [vmem:[%s256_s12 + $0xc] sm:$0xf] (%p53_p3), %v283_v3 }
  0x15 PF: > { %p799_p6 = scmp.ge.s32.totalorder %s966_s25, 1  ;;  %p338_p7 = scmp.lt.s32.totalorder %s966_s25, 4 }
  0x17   : > { %p339_p8 = pnand %p799_p6, %p338_p7 }
  0x18   : > { %s345_s13 = sand.u32 (!%p339_p8), 1, %s950_s21   ;;  %s801_s14 = sshll.u32 (!%p339_p8), %s958_s23, 4 }
  0x19   : > { %342 = sbr.rel (%p339_p8) target bundleno = 306 (0x132), region = 81  ;;  %s1051_s15 = sshll.u32 (!%p339_p8), %s345_s13, 4 }
  0x1a   : > { %p399_p9 = scmp.lt.s32.totalorder (!%p339_p8), %s801_s14, 47  ;;  %p407_p10 = scmp.lt.s32.totalorder (!%p339_p8), %s958_s23, 2 }
  0x1b   : > { %s347_s9 = scalar_lea.vmem (!%p339_p8), [#allocation3], %s1051_s15  ;;  %p803_p11 = scmp.ne.s32.totalorder (!%p339_p8), %s958_s23, 0 }
  0x20   : > { %s1118_s14 = smov (!%p399_p9, %s801_s14), 47  ;;  %432 = sbr.rel (%p803_p11) target bundleno = 39 (0x27), region = 89 }
  0x21   : > { %s408_s16 = scalar_select %p407_p10, %s958_s23, 2 }
  0x22   : > { %s802_s17 = sshll.u32 %s1118_s14, 2  ;;  %v968_v4 = vmov (!%p803_p11), 0.0  }
  0x23   : > { %s1058_s20 = scalar_lea.vmem %s1105_s1, %s802_s17  ;;  %s409_s30 = scalar_lea.vmem %s1106_s2, %s408_s16  ;;  %433 = vst [vmem:[#allocation2] sm:$0xff] (!%p803_p11), %v968_v4  ;;  %434 = vst [vmem:[#allocation2 + $0x8] sm:$0xff] (!%p803_p11), %v968_v4 }
  0x24   : > { %s412_s8 = scalar_lea.vmem %s1107_s3, %s408_s16  ;;  %435 = vst [vmem:[#allocation2 + $0x10] sm:$0xff] (!%p803_p11), %v968_v4  ;;  %436 = vst [vmem:[#allocation2 + $0x18] sm:$0xff] (!%p803_p11), %v968_v4 }
  0x27 PF: > { %v920_v5 = vld [vmem:[%s1058_s20] sm:$0xff]   ;;  %v921_v6 = vld [vmem:[%s1058_s20 + $0x8] sm:$0xff]   ;;  %v922_v7 = vld [vmem:[%s1058_s20 + $0x10] sm:$0xff]   ;;  %p814_p12 = scmp.ne.s32.totalorder %s958_s23, 2 }
  0x28   : > { %859 = vmatprep.subr.bf16.mxu0 %v920_v5  ;;  %v923_v8 = vld [vmem:[%s1058_s20 + $0x18] sm:$0xff]   ;;  %v830_v9 = vld [vmem:[%s347_s9] sm:$0xff]   ;;  %v925_v24 = vld [vmem:[%s1058_s20 + $0x28] sm:$0xff]  }
  0x29   : > { %860 = vmatpush3.bf16.msra.mxu0 %v920_v5  ;;  %v804_v10 = vld [vmem:[%s409_s30] ss:$0 sm:$0xff]  ;;  %v831_v11 = vunpack.c.l.bf16 %v830_v9  ;;  %v832_v12 = vunpack.c.h.bf16 %v830_v9  ;;  %v847_v16 = vld [vmem:[%s347_s9 + $0x8] sm:$0xff]   ;;  %v926_v28 = vld [vmem:[%s1058_s20 + $0x30] sm:$0xff]  }
  0x2a   : > { %861 = vmatprep.subr.bf16.mxu0 %v921_v6  ;;  %v805_v13 = vld [vmem:[%s412_s8] ss:$0 sm:$0xff]  ;;  %v835_v20 = vunpack.c.l.bf16 %v847_v16  ;;  %v836_v21 = vunpack.c.h.bf16 %v847_v16  ;;  %v927_v31 = vld [vmem:[%s1058_s20 + $0x38] sm:$0xff]   ;;  %v472_v41 = vld [vmem:[#allocation2 + $0x8] sm:$0xff] }
  0x2b   : > { %v452_v14 = vmul.f32 %v831_v11, %v804_v10  ;;  %v453_v15 = vmul.f32 %v832_v12, %v804_v10  ;;  %v924_v17 = vld [vmem:[%s1058_s20 + $0x20] sm:$0xff]   ;;  %v473_v35 = vld [vmem:[#allocation2 + $0x10] sm:$0xff]  ;;  %v474_v38 = vld [vmem:[#allocation2 + $0x18] sm:$0xff] }
  0x2c   : > { %v454_v26 = vmul.f32 %v835_v20, %v804_v10  ;;  %v455_v27 = vmul.f32 %v836_v21, %v804_v10  ;;  %v471_v36 = vld [vmem:[#allocation2] sm:$0xff] }
  0x2d   : > { %862 = vmatpush3.bf16.msra.mxu0 %v921_v6  ;;  %v463_v18 = vadd.f32 %v805_v13, %v452_v14  ;;  %v464_v19 = vadd.f32 %v805_v13, %v453_v15  ;;  %v815_v49 = vld [vmem:[%s1108_s4] ss:$0 sm:$0xff] (!%p814_p12) }
  0x2e   : > { %863 = vmatprep.subr.bf16.mxu0 %v922_v7  ;;  %v465_v29 = vadd.f32 %v805_v13, %v454_v26  ;;  %v466_v30 = vadd.f32 %v805_v13, %v455_v27  ;;  %v816_v52 = vld [vmem:[%s1109_s5] ss:$0 sm:$0xff] (!%p814_p12) }
  0x2f   : > { %v467_v22 = vmax.f32 %v463_v18, 0.0  ;;  %v468_v23 = vmax.f32 %v464_v19, 0.0 }
  0x30   : > { %v469_v32 = vmax.f32 %v465_v29, 0.0  ;;  %v470_v33 = vmax.f32 %v466_v30, 0.0 }
  0x31   : > { %864 = vmatpush3.bf16.msra.mxu0 %v922_v7  ;;  %v475_v25 = vpack.c.bf16 %v468_v23, %v467_v22 }
  0x32   : > { %865 = vmatprep.subr.bf16.mxu0 %v923_v8  ;;  %v476_v34 = vpack.c.bf16 %v470_v33, %v469_v32 }
  0x33   : > { %875 = vmatprep.mubr.bf16.mxu0 %v475_v25 }
  0x35   : > { %866 = vmatpush3.bf16.msra.mxu0 %v923_v8 }
  0x36   : > { %867 = vmatprep.subr.bf16.mxu0 %v924_v17 }
  0x39   : > { %868 = vmatpush3.bf16.msra.mxu0 %v924_v17 }
  0x3a   : > { %869 = vmatprep.subr.bf16.mxu0 %v925_v24 }
  0x3d   : > { %870 = vmatpush3.bf16.msra.mxu0 %v925_v24 }
  0x3e   : > { %871 = vmatprep.subr.bf16.mxu0 %v926_v28 }
  0x41   : > { %872 = vmatpush3.bf16.msra.mxu0 %v926_v28 }
  0x42   : > { %873 = vmatprep.subr.bf16.mxu0 %v927_v31 }
  0x45   : > { %874 = vmatpush3.bf16.msra.mxu0 %v927_v31 }
  0x48   : > { %876 = vmatmul.mubr.bf16.vlgmr.msra.gmra.mrb[0].mxu0 %v476_v34 }
 0x11b   : > { %v877_v37 = vpop.f32.mrb[0].mxu0  ;;  %601 = sbr.rel (%p814_p12) target bundleno = 306 (0x132), region = 93 }
 0x11c   : > { %v592_v39 = vadd.f32 %v877_v37, %v473_v35  ;;  %v575_v40 = vpop.f32.mrb[1].mxu0 }
 0x11d   : > { %v590_v42 = vadd.f32 %v575_v40, %v471_v36  ;;  %v878_v43 = vpop.f32.mrb[2].mxu0 }
 0x11e   : > { %596 = vst [vmem:[#allocation2 + $0x10] sm:$0xff] %v592_v39  ;;  %v593_v44 = vadd.f32 %v878_v43, %v474_v38  ;;  %v578_v45 = vpop.f32.mrb[3].mxu0 }
 0x11f   : > { %594 = vst [vmem:[#allocation2] sm:$0xff] %v590_v42  ;;  %v591_v46 = vadd.f32 %v578_v45, %v472_v41 }
 0x120   : > { %597 = vst [vmem:[#allocation2 + $0x18] sm:$0xff] %v593_v44 }
 0x121   : > { %595 = vst [vmem:[#allocation2 + $0x8] sm:$0xff] %v591_v46 }
 0x125   : > { %v604_v53 = vld [vmem:[#allocation2 + $0x10] sm:$0xff] }
 0x126   : > { %v602_v47 = vld [vmem:[#allocation2] sm:$0xff]  ;;  %v615_v55 = vmul.f32 %v815_v49, %v604_v53 }
 0x127   : > { %v613_v50 = vmul.f32 %v815_v49, %v602_v47  ;;  %v605_v54 = vld [vmem:[#allocation2 + $0x18] sm:$0xff] }
 0x128   : > { %v603_v48 = vld [vmem:[#allocation2 + $0x8] sm:$0xff]  ;;  %v616_v56 = vmul.f32 %v815_v49, %v605_v54  ;;  %v626_v59 = vadd.f32 %v816_v52, %v615_v55 }
 0x129   : > { %v614_v51 = vmul.f32 %v815_v49, %v603_v48  ;;  %v624_v57 = vadd.f32 %v816_v52, %v613_v50 }
 0x12a   : > { %v627_v60 = vadd.f32 %v816_v52, %v616_v56  ;;  %v630_v63 = vmax.f32 %v626_v59, 0.0 }
 0x12b   : > { %v625_v58 = vadd.f32 %v816_v52, %v614_v51  ;;  %v628_v61 = vmax.f32 %v624_v57, 0.0 }
 0x12c   : > { %v631_v0 = vmax.f32 %v627_v60, 0.0 }
 0x12d   : > { %v629_v62 = vmax.f32 %v625_v58, 0.0 }
 0x12e   : > { %v845_v2 = vpack.c.bf16 %v631_v0, %v630_v63 }
 0x12f   : > { %v840_v1 = vpack.c.bf16 %v629_v62, %v628_v61 }
 0x130   : > { %848 = vst [vmem:[%s1110_s6 + $0x8] sm:$0xff] %v845_v2  }
 0x131   : > { %841 = vst [vmem:[%s1110_s6] sm:$0xff] %v840_v1  }
 0x132 PF: > { %s16_s25 = sadd.s32 1, %s966_s25   ;;  %s1111_s21 = smov %s954_s22 }
 0x133   : > { %p13_p13 = scmp.ge.s32.totalorder %s16_s25, 5   ;;  %s1112_s22 = smov %s1039_s29 }
 0x134   : > { %s1113_s23 = smov %s962_s24  ;;  %s1114_s24 = smov %s1116_s26 }
 0x135   :  { %15 = sbr.rel (!%p13_p13) target bundleno = 3 (0x3), region = 143 }

// kernel: densenet121_forward.160
= control target key start
LH: loop header
LB: loop body
LE: loop exit
PB: predicated region body
PF: predicated region fallthrough
CT: control target
= control target key end

     0   :  { %v58_v23 = vlaneseq  ;;  %s899_s1 = inlined_call_operand.vmem [shape: bf16[512,128], index: 1, kind: input, shape index: {}]   ;;  %s900_s0 = inlined_call_operand.vmem [shape: bf16[32,512], index: 0, kind: input, shape index: {}]   ;;  %s901_s2 = inlined_call_operand.vmem [shape: f32[1,512], index: 2, kind: input, shape index: {}]   ;;  %s902_s3 = inlined_call_operand.vmem [shape: f32[1,512], index: 3, kind: input, shape index: {}]   ;;  %s903_s4 = inlined_call_operand.vmem [shape: f32[1,128], index: 4, kind: input, shape index: {}]   ;;  %s904_s5 = inlined_call_operand.vmem [shape: f32[1,128], index: 5, kind: input, shape index: {}]   ;;  %s905_s6 = inlined_call_operand.vmem [shape: bf16[32,128], index: 6, kind: output, shape index: {}]  }
   0x1   :  { %v688_v0 = vld [vmem:[%s899_s1 + $0x40] sm:$0xff]   ;;  %v692_v4 = vld [vmem:[%s899_s1 + $0x48] sm:$0xff]   ;;  %v696_v8 = vld [vmem:[%s899_s1 + $0x50] sm:$0xff]  }
   0x2   :  { %v689_v1 = vld [vmem:[%s899_s1 + $0xc0] sm:$0xff]   ;;  %632 = vmatprep.subr.bf16.mxu0 %v688_v0  ;;  %v693_v5 = vld [vmem:[%s899_s1 + $0xc8] sm:$0xff]   ;;  %v697_v9 = vld [vmem:[%s899_s1 + $0xd0] sm:$0xff]   ;;  %v59_v28 = vshrl.u32 %v58_v23, 7 }
   0x3   :  { %v690_v2 = vld [vmem:[%s899_s1] sm:$0xff]   ;;  %660 = vmatprep.subr.bf16.mxu1 %v689_v1  ;;  %v694_v6 = vld [vmem:[%s899_s1 + $0x8] sm:$0xff]   ;;  %v698_v10 = vld [vmem:[%s899_s1 + $0x10] sm:$0xff]  }
   0x4   :  { %v691_v3 = vld [vmem:[%s899_s1 + $0x80] sm:$0xff]   ;;  %633 = vmatpush3.bf16.msra.mxu0 %v690_v2  ;;  %v695_v7 = vld [vmem:[%s899_s1 + $0x88] sm:$0xff]   ;;  %v699_v11 = vld [vmem:[%s899_s1 + $0x90] sm:$0xff]   ;;  %v64_v33 = vsub.s32 1, %v59_v28  ;;  %v72_v35 = vsub.s32 3, %v59_v28  ;;  %v60_v39 = vsub.s32 0, %v59_v28 }
   0x5   :  { %661 = vmatpush3.bf16.msra.mxu1 %v691_v3  ;;  %634 = vmatprep.subr.bf16.mxu0 %v692_v4  ;;  %v700_v12 = vld [vmem:[%s899_s1 + $0x58] sm:$0xff]   ;;  %v704_v16 = vld [vmem:[%s899_s1 + $0x60] sm:$0xff]   ;;  %v708_v20 = vld [vmem:[%s899_s1 + $0x68] sm:$0xff]   ;;  %v68_v40 = vsub.s32 2, %v59_v28 }
   0x6   :  { %662 = vmatprep.subr.bf16.mxu1 %v693_v5  ;;  %v701_v13 = vld [vmem:[%s899_s1 + $0xd8] sm:$0xff]   ;;  %v705_v17 = vld [vmem:[%s899_s1 + $0xe0] sm:$0xff]   ;;  %v709_v21 = vld [vmem:[%s899_s1 + $0xe8] sm:$0xff]  }
   0x7   :  { %v702_v14 = vld [vmem:[%s899_s1 + $0x18] sm:$0xff]   ;;  %v706_v18 = vld [vmem:[%s899_s1 + $0x20] sm:$0xff]   ;;  %v710_v22 = vld [vmem:[%s899_s1 + $0x28] sm:$0xff]  }
   0x8   :  { %635 = vmatpush3.bf16.msra.mxu0 %v694_v6  ;;  %v703_v15 = vld [vmem:[%s899_s1 + $0x98] sm:$0xff]   ;;  %v707_v19 = vld [vmem:[%s899_s1 + $0xa0] sm:$0xff]   ;;  %v711_v24 = vld [vmem:[%s899_s1 + $0xa8] sm:$0xff]  }
   0x9   :  { %663 = vmatpush3.bf16.msra.mxu1 %v695_v7  ;;  %636 = vmatprep.subr.bf16.mxu0 %v696_v8  ;;  %v712_v25 = vld [vmem:[%s899_s1 + $0x70] sm:$0xff]   ;;  %v716_v30 = vld [vmem:[%s899_s1 + $0x78] sm:$0xff]   ;;  %v32_v36 = vld [vmem:[%s900_s0] sm:$0xff] }
   0xa   :  { %664 = vmatprep.subr.bf16.mxu1 %v697_v9  ;;  %v713_v26 = vld [vmem:[%s899_s1 + $0xf0] sm:$0xff]   ;;  %v717_v31 = vld [vmem:[%s899_s1 + $0xf8] sm:$0xff]   ;;  %v56_v38 = vld [vmem:[%s901_s2] sm:$0xf]  ;;  %v40_v41 = vunpack.c.l.bf16 %v32_v36  ;;  %v41_v42 = vunpack.c.h.bf16 %v32_v36 }
   0xb   :  { %v714_v27 = vld [vmem:[%s899_s1 + $0x30] sm:$0xff]   ;;  %v718_v32 = vld [vmem:[%s899_s1 + $0x38] sm:$0xff]   ;;  %v94_v45 = vld [vmem:[%s902_s3] sm:$0xf]  ;;  %v65_v48 = vrot.slane %v56_v38, %v64_v33  ;;  %v73_v54 = vrot.slane %v56_v38, %v72_v35  ;;  %v61_v58 = vrot.slane %v56_v38, %v60_v39  ;;  %v69_v62 = vrot.slane %v56_v38, %v68_v40 }
   0xc   :  { %637 = vmatpush3.bf16.msra.mxu0 %v698_v10  ;;  %v715_v29 = vld [vmem:[%s899_s1 + $0xb0] sm:$0xff]   ;;  %v719_v34 = vld [vmem:[%s899_s1 + $0xb8] sm:$0xff]   ;;  %v33_v46 = vld [vmem:[%s900_s0 + $0x8] sm:$0xff]  ;;  %v103_v49 = vrot.slane %v94_v45, %v64_v33  ;;  %v111_v55 = vrot.slane %v94_v45, %v72_v35  ;;  %v99_v59 = vrot.slane %v94_v45, %v60_v39  ;;  %v869_v63 = vrot.slane %v94_v45, %v68_v40 }
   0xd   :  { %665 = vmatpush3.bf16.msra.mxu1 %v699_v11  ;;  %638 = vmatprep.subr.bf16.mxu0 %v700_v12  ;;  %v34_v37 = vld [vmem:[%s900_s0 + $0x10] sm:$0xff]  ;;  %v35_v47 = vld [vmem:[%s900_s0 + $0x18] sm:$0xff]  ;;  %v42_v50 = vunpack.c.l.bf16 %v33_v46  ;;  %v43_v51 = vunpack.c.h.bf16 %v33_v46  ;;  %v79_v56 = vmul.f32 %v65_v48, %v41_v42  ;;  %v78_v2 = vmul.f32 %v61_v58, %v40_v41  ;;  %v36_v8 = vld [vmem:[%s900_s0 + $0x20] sm:$0xff] }
   0xe   :  { %666 = vmatprep.subr.bf16.mxu1 %v701_v13  ;;  %v44_v43 = vunpack.c.l.bf16 %v34_v37  ;;  %v45_v44 = vunpack.c.h.bf16 %v34_v37  ;;  %v46_v52 = vunpack.c.l.bf16 %v35_v47  ;;  %v47_v53 = vunpack.c.h.bf16 %v35_v47  ;;  %v38_v13 = vld [vmem:[%s900_s0 + $0x30] sm:$0xff] }
   0xf   :  { %v81_v60 = vmul.f32 %v73_v54, %v43_v51  ;;  %v117_v0 = vadd.f32 %v103_v49, %v79_v56  ;;  %v80_v6 = vmul.f32 %v69_v62, %v42_v50  ;;  %v116_v11 = vadd.f32 %v99_v59, %v78_v2 }
  0x10   :  { %639 = vmatpush3.bf16.msra.mxu0 %v702_v14  ;;  %v83_v57 = vmul.f32 %v65_v48, %v45_v44  ;;  %v85_v61 = vmul.f32 %v73_v54, %v47_v53  ;;  %v82_v3 = vmul.f32 %v61_v58, %v44_v43  ;;  %v84_v7 = vmul.f32 %v69_v62, %v46_v52 }
  0x11   :  { %667 = vmatpush3.bf16.msra.mxu1 %v703_v15  ;;  %640 = vmatprep.subr.bf16.mxu0 %v704_v16  ;;  %v119_v4 = vadd.f32 %v111_v55, %v81_v60  ;;  %v133_v9 = vmax.f32 %v117_v0, 0.0  ;;  %v118_v16 = vadd.f32 %v869_v63, %v80_v6  ;;  %v49_v23 = vunpack.c.h.bf16 %v36_v8 }
  0x12   :  { %668 = vmatprep.subr.bf16.mxu1 %v705_v17  ;;  %v121_v1 = vadd.f32 %v103_v49, %v83_v57  ;;  %v123_v5 = vadd.f32 %v111_v55, %v85_v61  ;;  %v120_v12 = vadd.f32 %v99_v59, %v82_v3  ;;  %v122_v17 = vadd.f32 %v869_v63, %v84_v7 }
  0x13   :  { %v135_v14 = vmax.f32 %v119_v4, 0.0  ;;  %v52_v35 = vunpack.c.l.bf16 %v38_v13 }
  0x14   :  { %641 = vmatpush3.bf16.msra.mxu0 %v706_v18  ;;  %v137_v10 = vmax.f32 %v121_v1, 0.0  ;;  %v139_v15 = vmax.f32 %v123_v5, 0.0  ;;  %v37_v18 = vld [vmem:[%s900_s0 + $0x28] sm:$0xff] }
  0x15   :  { %669 = vmatpush3.bf16.msra.mxu1 %v707_v19  ;;  %642 = vmatprep.subr.bf16.mxu0 %v708_v20  ;;  %v39_v19 = vld [vmem:[%s900_s0 + $0x38] sm:$0xff]  ;;  %v50_v39 = vunpack.c.l.bf16 %v37_v18  ;;  %v90_v42 = vmul.f32 %v61_v58, %v52_v35 }
  0x16   :  { %670 = vmatprep.subr.bf16.mxu1 %v709_v21  ;;  %v153_v20 = vpack.c.bf16 %v137_v10, %v133_v9  ;;  %v132_v21 = vmax.f32 %v116_v11, 0.0  ;;  %v54_v43 = vunpack.c.l.bf16 %v39_v19 }
  0x17   :  { %v88_v47 = vmul.f32 %v69_v62, %v50_v39  ;;  %v128_v52 = vadd.f32 %v99_v59, %v90_v42 }
  0x18   :  { %643 = vmatpush3.bf16.msra.mxu0 %v710_v22  ;;  %v136_v22 = vmax.f32 %v120_v12, 0.0  ;;  %448 = vmatprep.mubr.bf16.mxu0 %v153_v20 }
  0x19   :  { %671 = vmatpush3.bf16.msra.mxu1 %v711_v24  ;;  %644 = vmatprep.subr.bf16.mxu0 %v712_v25  ;;  %v155_v24 = vpack.c.bf16 %v139_v15, %v135_v14  ;;  %v134_v25 = vmax.f32 %v118_v16, 0.0  ;;  %v126_v57 = vadd.f32 %v869_v63, %v88_v47  ;;  %v144_v61 = vmax.f32 %v128_v52, 0.0  ;;  %v612_v14 = vld [vmem:[%s904_s5] ss:$0 sm:$0xff] }
  0x1a   :  { %672 = vmatprep.subr.bf16.mxu1 %v713_v26  ;;  %v138_v26 = vmax.f32 %v122_v17, 0.0  ;;  %v152_v28 = vpack.c.bf16 %v136_v22, %v132_v21 }
  0x1b   :  { %497 = vmatprep.mubr.bf16.mxu1 %v155_v24 }
  0x1c   :  { %645 = vmatpush3.bf16.msra.mxu0 %v714_v27  ;;  %v53_v27 = vunpack.c.h.bf16 %v38_v13 }
  0x1d   :  { %673 = vmatpush3.bf16.msra.mxu1 %v715_v29  ;;  %646 = vmatprep.subr.bf16.mxu0 %v716_v30  ;;  %v87_v29 = vmul.f32 %v65_v48, %v49_v23  ;;  %v51_v30 = vunpack.c.h.bf16 %v37_v18 }
  0x1e   :  { %674 = vmatprep.subr.bf16.mxu1 %v717_v31  ;;  %v55_v31 = vunpack.c.h.bf16 %v39_v19  ;;  %v91_v33 = vmul.f32 %v65_v48, %v53_v27  ;;  %v92_v48 = vmul.f32 %v69_v62, %v54_v43 }
  0x1f   :  { %v125_v36 = vadd.f32 %v103_v49, %v87_v29  ;;  %v89_v37 = vmul.f32 %v73_v54, %v51_v30 }
  0x20   :  { %647 = vmatpush3.bf16.msra.mxu0 %v718_v32  ;;  %v154_v32 = vpack.c.bf16 %v138_v26, %v134_v25  ;;  %v93_v38 = vmul.f32 %v73_v54, %v55_v31  ;;  %v129_v40 = vadd.f32 %v103_v49, %v91_v33  ;;  %v130_v49 = vadd.f32 %v869_v63, %v92_v48  ;;  %v611_v63 = vld [vmem:[%s903_s4] ss:$0 sm:$0xff] }
  0x21   :  { %675 = vmatpush3.bf16.msra.mxu1 %v719_v34  ;;  %v48_v34 = vunpack.c.l.bf16 %v36_v8  ;;  %v141_v44 = vmax.f32 %v125_v36, 0.0  ;;  %v127_v45 = vadd.f32 %v111_v55, %v89_v37 }
  0x22   :  { %v131_v46 = vadd.f32 %v111_v55, %v93_v38  ;;  %v145_v50 = vmax.f32 %v129_v40, 0.0  ;;  %v146_v2 = vmax.f32 %v130_v49, 0.0 }
  0x23   :  { %449 = vmatmul.mubr.bf16.vlgmr.msra.gmra.mrb[0].mxu0 %v152_v28  ;;  %v86_v41 = vmul.f32 %v61_v58, %v48_v34  ;;  %v143_v53 = vmax.f32 %v127_v45, 0.0  ;;  %v142_v58 = vmax.f32 %v126_v57, 0.0 }
  0x24   :  { %498 = vmatmul.mubr.bf16.vlgmr.msra.gmra.mrb[0].mxu1 %v154_v32  ;;  %v147_v56 = vmax.f32 %v131_v46, 0.0  ;;  %v157_v60 = vpack.c.bf16 %v145_v50, %v141_v44 }
  0x25   :  { %v124_v51 = vadd.f32 %v99_v59, %v86_v41  ;;  %v158_v55 = vpack.c.bf16 %v146_v2, %v142_v58 }
  0x26   :  { %v159_v0 = vpack.c.bf16 %v147_v56, %v143_v53  ;;  %456 = vmatprep.mubr.bf16.mxu0 %v157_v60 }
  0x27   :  { %v140_v54 = vmax.f32 %v124_v51, 0.0 }
  0x28   :  { %505 = vmatprep.mubr.bf16.mxu1 %v159_v0 }
  0x29   :  { %v156_v1 = vpack.c.bf16 %v144_v61, %v140_v54 }
  0x2b   :  { %457 = vmatmul.mubr.bf16.gmra.mrb[4].mxu0 %v156_v1 }
  0x2c   :  { %506 = vmatmul.mubr.bf16.gmra.mrb[4].mxu1 %v158_v55 }
  0xf6   :  { %v648_v59 = vpop.f32.mrb[0].mxu0 }
  0xf7   :  { %v676_v62 = vpop.f32.mrb[0].mxu1  ;;  %v649_v3 = vpop.f32.mrb[1].mxu0 }
  0xf8   :  { %v650_v4 = vadd.f32 %v649_v3, %v648_v59  ;;  %v677_v5 = vpop.f32.mrb[1].mxu1  ;;  %v651_v6 = vpop.f32.mrb[2].mxu0 }
  0xf9   :  { %v678_v7 = vadd.f32 %v677_v5, %v676_v62  ;;  %v679_v8 = vpop.f32.mrb[2].mxu1  ;;  %v652_v9 = vpop.f32.mrb[3].mxu0 }
  0xfa   :  { %v653_v10 = vadd.f32 %v652_v9, %v651_v6  ;;  %v680_v11 = vpop.f32.mrb[3].mxu1 }
  0xfb   :  { %v500_v12 = vadd.f32 %v678_v7, %v650_v4  ;;  %v681_v13 = vadd.f32 %v680_v11, %v679_v8 }
  0xfd   :  { %v536_v15 = vmul.f32 %v611_v63, %v500_v12  ;;  %v503_v16 = vadd.f32 %v681_v13, %v653_v10 }
  0xfe   :  { %v654_v19 = vpop.f32.mrb[4].mxu0 }
  0xff   :  { %v547_v17 = vadd.f32 %v612_v14, %v536_v15  ;;  %v537_v18 = vmul.f32 %v611_v63, %v503_v16  ;;  %v655_v20 = vpop.f32.mrb[5].mxu0  ;;  %v682_v22 = vpop.f32.mrb[4].mxu1 }
 0x100   :  { %v656_v23 = vadd.f32 %v655_v20, %v654_v19  ;;  %v657_v24 = vpop.f32.mrb[6].mxu0  ;;  %v683_v25 = vpop.f32.mrb[5].mxu1 }
 0x101   :  { %v548_v21 = vadd.f32 %v612_v14, %v537_v18  ;;  %v658_v26 = vpop.f32.mrb[7].mxu0  ;;  %v551_v27 = vmax.f32 %v547_v17, 0.0  ;;  %v684_v29 = vadd.f32 %v683_v25, %v682_v22  ;;  %v685_v30 = vpop.f32.mrb[6].mxu1 }
 0x102   :  { %v659_v31 = vadd.f32 %v658_v26, %v657_v24  ;;  %v686_v32 = vpop.f32.mrb[7].mxu1 }
 0x103   :  { %v552_v28 = vmax.f32 %v548_v21, 0.0  ;;  %v508_v34 = vadd.f32 %v684_v29, %v656_v23  ;;  %v687_v35 = vadd.f32 %v686_v32, %v685_v30 }
 0x105   :  { %v624_v33 = vpack.c.bf16 %v552_v28, %v551_v27  ;;  %v538_v36 = vmul.f32 %v611_v63, %v508_v34  ;;  %v511_v37 = vadd.f32 %v687_v35, %v659_v31 }
 0x107   :  { %625 = vst [vmem:[%s905_s6] sm:$0xff] %v624_v33   ;;  %v549_v38 = vadd.f32 %v612_v14, %v538_v36  ;;  %v539_v39 = vmul.f32 %v611_v63, %v511_v37 }
 0x109   :  { %v550_v40 = vadd.f32 %v612_v14, %v539_v39  ;;  %v553_v41 = vmax.f32 %v549_v38, 0.0 }
 0x10b   :  { %v554_v42 = vmax.f32 %v550_v40, 0.0 }
 0x10d   :  { %v629_v43 = vpack.c.bf16 %v554_v42, %v553_v41 }
 0x10f   :  { %631 = vst [vmem:[%s905_s6 + $0x8] sm:$0xff] %v629_v43  }

// kernel: densenet121_forward.166
= control target key start
LH: loop header
LB: loop body
LE: loop exit
PB: predicated region body
PF: predicated region fallthrough
CT: control target
= control target key end

     0   :  { %v61_v37 = vlaneseq  ;;  %s1217_s1 = inlined_call_operand.vmem [shape: bf16[512,256], index: 1, kind: input, shape index: {}]   ;;  %s1218_s4 = inlined_call_operand.vmem [shape: f32[1,256], index: 4, kind: input, shape index: {}, may-alias: {4,5}]   ;;  %s1219_s5 = inlined_call_operand.vmem [shape: f32[1,256], index: 5, kind: input, shape index: {}, may-alias: {4,5}]   ;;  %s1220_s0 = inlined_call_operand.vmem [shape: bf16[32,512], index: 0, kind: input, shape index: {}]   ;;  %s1221_s2 = inlined_call_operand.vmem [shape: f32[1,512], index: 2, kind: input, shape index: {}]   ;;  %s1222_s3 = inlined_call_operand.vmem [shape: f32[1,512], index: 3, kind: input, shape index: {}]   ;;  %s1223_s6 = inlined_call_operand.vmem [shape: bf16[32,256], index: 6, kind: output, shape index: {}]  }
   0x1   :  { %v796_v0 = vld [vmem:[%s1217_s1 + $0x4] ss:$8 sps:$4 sm:$0xff]   ;;  %v800_v2 = vld [vmem:[%s1217_s1] ss:$8 sps:$4 sm:$0xff]   ;;  %v802_v4 = vld [vmem:[%s1217_s1 + $0x14] ss:$8 sps:$4 sm:$0xff]  }
   0x2   :  { %v798_v1 = vld [vmem:[%s1217_s1 + $0x104] ss:$8 sps:$4 sm:$0xff]   ;;  %551 = vmatprep.subr.bf16.mxu1 %v796_v0  ;;  %v801_v3 = vld [vmem:[%s1217_s1 + $0x100] ss:$8 sps:$4 sm:$0xff]   ;;  %v804_v5 = vld [vmem:[%s1217_s1 + $0x114] ss:$8 sps:$4 sm:$0xff]  }
   0x3   :  { %604 = vmatprep.subr.bf16.mxu0 %v798_v1  ;;  %552 = vmatpush1.bf16.msra.mxu1 %v800_v2  ;;  %v806_v6 = vld [vmem:[%s1217_s1 + $0x10] ss:$8 sps:$4 sm:$0xff]   ;;  %v808_v8 = vld [vmem:[%s1217_s1 + $0x24] ss:$8 sps:$4 sm:$0xff]   ;;  %v812_v10 = vld [vmem:[%s1217_s1 + $0x20] ss:$8 sps:$4 sm:$0xff]  }
   0x4   :  { %605 = vmatpush1.bf16.msra.mxu0 %v801_v3  ;;  %553 = vmatprep.subr.bf16.mxu1 %v802_v4  ;;  %v807_v7 = vld [vmem:[%s1217_s1 + $0x110] ss:$8 sps:$4 sm:$0xff]   ;;  %v810_v9 = vld [vmem:[%s1217_s1 + $0x124] ss:$8 sps:$4 sm:$0xff]   ;;  %v813_v11 = vld [vmem:[%s1217_s1 + $0x120] ss:$8 sps:$4 sm:$0xff]  }
   0x5   :  { %606 = vmatprep.subr.bf16.mxu0 %v804_v5  ;;  %v814_v12 = vld [vmem:[%s1217_s1 + $0x34] ss:$8 sps:$4 sm:$0xff]   ;;  %v818_v14 = vld [vmem:[%s1217_s1 + $0x30] ss:$8 sps:$4 sm:$0xff]   ;;  %v820_v16 = vld [vmem:[%s1217_s1 + $0x44] ss:$8 sps:$4 sm:$0xff]  }
   0x6   :  { %v816_v13 = vld [vmem:[%s1217_s1 + $0x134] ss:$8 sps:$4 sm:$0xff]   ;;  %v819_v15 = vld [vmem:[%s1217_s1 + $0x130] ss:$8 sps:$4 sm:$0xff]   ;;  %v822_v17 = vld [vmem:[%s1217_s1 + $0x144] ss:$8 sps:$4 sm:$0xff]  }
   0x7   :  { %554 = vmatpush1.bf16.msra.mxu1 %v806_v6  ;;  %v824_v18 = vld [vmem:[%s1217_s1 + $0x40] ss:$8 sps:$4 sm:$0xff]   ;;  %v826_v20 = vld [vmem:[%s1217_s1 + $0x54] ss:$8 sps:$4 sm:$0xff]   ;;  %v830_v22 = vld [vmem:[%s1217_s1 + $0x50] ss:$8 sps:$4 sm:$0xff]  }
   0x8   :  { %607 = vmatpush1.bf16.msra.mxu0 %v807_v7  ;;  %555 = vmatprep.subr.bf16.mxu1 %v808_v8  ;;  %v825_v19 = vld [vmem:[%s1217_s1 + $0x140] ss:$8 sps:$4 sm:$0xff]   ;;  %v828_v21 = vld [vmem:[%s1217_s1 + $0x154] ss:$8 sps:$4 sm:$0xff]   ;;  %v831_v23 = vld [vmem:[%s1217_s1 + $0x150] ss:$8 sps:$4 sm:$0xff]  }
   0x9   :  { %608 = vmatprep.subr.bf16.mxu0 %v810_v9  ;;  %v832_v24 = vld [vmem:[%s1217_s1 + $0x64] ss:$8 sps:$4 sm:$0xff]   ;;  %v836_v26 = vld [vmem:[%s1217_s1 + $0x60] ss:$8 sps:$4 sm:$0xff]   ;;  %v838_v28 = vld [vmem:[%s1217_s1 + $0x74] ss:$8 sps:$4 sm:$0xff]  }
   0xa   :  { %v834_v25 = vld [vmem:[%s1217_s1 + $0x164] ss:$8 sps:$4 sm:$0xff]   ;;  %v837_v27 = vld [vmem:[%s1217_s1 + $0x160] ss:$8 sps:$4 sm:$0xff]   ;;  %v840_v29 = vld [vmem:[%s1217_s1 + $0x174] ss:$8 sps:$4 sm:$0xff]  }
   0xb   :  { %556 = vmatpush1.bf16.msra.mxu1 %v812_v10  ;;  %v842_v30 = vld [vmem:[%s1217_s1 + $0x70] ss:$8 sps:$4 sm:$0xff]   ;;  %v844_v32 = vld [vmem:[%s1217_s1 + $0x84] ss:$8 sps:$4 sm:$0xff]   ;;  %v848_v34 = vld [vmem:[%s1217_s1 + $0x80] ss:$8 sps:$4 sm:$0xff]  }
   0xc   :  { %609 = vmatpush1.bf16.msra.mxu0 %v813_v11  ;;  %557 = vmatprep.subr.bf16.mxu1 %v814_v12  ;;  %v843_v31 = vld [vmem:[%s1217_s1 + $0x170] ss:$8 sps:$4 sm:$0xff]   ;;  %v846_v33 = vld [vmem:[%s1217_s1 + $0x184] ss:$8 sps:$4 sm:$0xff]   ;;  %v849_v35 = vld [vmem:[%s1217_s1 + $0x180] ss:$8 sps:$4 sm:$0xff]  }
   0xd   :  { %610 = vmatprep.subr.bf16.mxu0 %v816_v13  ;;  %v850_v36 = vld [vmem:[%s1217_s1 + $0x94] ss:$8 sps:$4 sm:$0xff]   ;;  %v854_v39 = vld [vmem:[%s1217_s1 + $0x90] ss:$8 sps:$4 sm:$0xff]   ;;  %v856_v41 = vld [vmem:[%s1217_s1 + $0xa4] ss:$8 sps:$4 sm:$0xff]  }
   0xe   :  { %v852_v38 = vld [vmem:[%s1217_s1 + $0x194] ss:$8 sps:$4 sm:$0xff]   ;;  %v855_v40 = vld [vmem:[%s1217_s1 + $0x190] ss:$8 sps:$4 sm:$0xff]   ;;  %v62_v42 = vshrl.u32 %v61_v37, 7  ;;  %v35_v50 = vld [vmem:[%s1220_s0] sm:$0xff] }
   0xf   :  { %558 = vmatpush1.bf16.msra.mxu1 %v818_v14  ;;  %v858_v43 = vld [vmem:[%s1217_s1 + $0x1a4] ss:$8 sps:$4 sm:$0xff]   ;;  %v860_v44 = vld [vmem:[%s1217_s1 + $0xa0] ss:$8 sps:$4 sm:$0xff]   ;;  %v862_v46 = vld [vmem:[%s1217_s1 + $0xb4] ss:$8 sps:$4 sm:$0xff]   ;;  %v43_v54 = vunpack.c.l.bf16 %v35_v50  ;;  %v44_v55 = vunpack.c.h.bf16 %v35_v50 }
  0x10   :  { %611 = vmatpush1.bf16.msra.mxu0 %v819_v15  ;;  %559 = vmatprep.subr.bf16.mxu1 %v820_v16  ;;  %v861_v45 = vld [vmem:[%s1217_s1 + $0x1a0] ss:$8 sps:$4 sm:$0xff]   ;;  %v67_v47 = vsub.s32 1, %v62_v42  ;;  %v864_v48 = vld [vmem:[%s1217_s1 + $0x1b4] ss:$8 sps:$4 sm:$0xff]   ;;  %v75_v51 = vsub.s32 3, %v62_v42 }
  0x11   :  { %612 = vmatprep.subr.bf16.mxu0 %v822_v17  ;;  %v866_v49 = vld [vmem:[%s1217_s1 + $0xb0] ss:$8 sps:$4 sm:$0xff]   ;;  %v63_v52 = vsub.s32 0, %v62_v42  ;;  %v59_v56 = vld [vmem:[%s1221_s2] sm:$0xf]  ;;  %v71_v58 = vsub.s32 2, %v62_v42 }
  0x12   :  { %v37_v53 = vld [vmem:[%s1220_s0 + $0x10] sm:$0xff]  ;;  %v97_v57 = vld [vmem:[%s1222_s3] sm:$0xf]  ;;  %v1083_v62 = vrot.slane %v59_v56, %v67_v47  ;;  %v36_v0 = vld [vmem:[%s1220_s0 + $0x8] sm:$0xff]  ;;  %v1106_v11 = vrot.slane %v59_v56, %v75_v51 }
  0x13   :  { %560 = vmatpush1.bf16.msra.mxu1 %v824_v18  ;;  %v867_v59 = vld [vmem:[%s1217_s1 + $0x1b0] ss:$8 sps:$4 sm:$0xff]   ;;  %v47_v60 = vunpack.c.l.bf16 %v37_v53  ;;  %v48_v61 = vunpack.c.h.bf16 %v37_v53  ;;  %v1085_v63 = vrot.slane %v97_v57, %v67_v47  ;;  %v868_v2 = vld [vmem:[%s1217_s1 + $0xc4] ss:$8 sps:$4 sm:$0xff]   ;;  %v45_v4 = vunpack.c.l.bf16 %v36_v0  ;;  %v872_v18 = vld [vmem:[%s1217_s1 + $0xc0] ss:$8 sps:$4 sm:$0xff]  }
  0x14   :  { %613 = vmatpush1.bf16.msra.mxu0 %v825_v19  ;;  %561 = vmatprep.subr.bf16.mxu1 %v826_v20  ;;  %v38_v1 = vld [vmem:[%s1220_s0 + $0x18] sm:$0xff]  ;;  %v870_v3 = vld [vmem:[%s1217_s1 + $0x1c4] ss:$8 sps:$4 sm:$0xff]   ;;  %v46_v5 = vunpack.c.h.bf16 %v36_v0  ;;  %v82_v9 = vmul.f32 %v1083_v62, %v44_v55  ;;  %v1108_v12 = vrot.slane %v97_v57, %v75_v51  ;;  %v1113_v13 = vld [vmem:[%s1220_s0 + $0x30] sm:$0xff]  ;;  %v1115_v14 = vrot.slane %v59_v56, %v63_v52 }
  0x15   :  { %614 = vmatprep.subr.bf16.mxu0 %v828_v21  ;;  %v49_v6 = vunpack.c.l.bf16 %v38_v1  ;;  %v50_v7 = vunpack.c.h.bf16 %v38_v1  ;;  %v1102_v8 = vld [vmem:[%s1220_s0 + $0x20] sm:$0xff]  ;;  %v86_v10 = vmul.f32 %v1083_v62, %v48_v61  ;;  %v1117_v15 = vrot.slane %v97_v57, %v63_v52  ;;  %v40_v37 = vld [vmem:[%s1220_s0 + $0x28] sm:$0xff]  ;;  %v886_v61 = vld [vmem:[%s1217_s1 + $0xf4] ss:$8 sps:$4 sm:$0xff]  }
  0x16   :  { %v1119_v16 = vrot.slane %v59_v56, %v71_v58  ;;  %v1121_v17 = vrot.slane %v97_v57, %v71_v58  ;;  %v873_v19 = vld [vmem:[%s1217_s1 + $0x1c0] ss:$8 sps:$4 sm:$0xff]   ;;  %v120_v20 = vadd.f32 %v1085_v63, %v82_v9  ;;  %v54_v51 = vunpack.c.h.bf16 %v40_v37 }
  0x17   :  { %562 = vmatpush1.bf16.msra.mxu1 %v830_v22  ;;  %v124_v21 = vadd.f32 %v1085_v63, %v86_v10  ;;  %v84_v22 = vmul.f32 %v1106_v11, %v46_v5  ;;  %v884_v55 = vld [vmem:[%s1217_s1 + $0xe0] ss:$8 sps:$4 sm:$0xff]  }
  0x18   :  { %615 = vmatpush1.bf16.msra.mxu0 %v831_v23  ;;  %563 = vmatprep.subr.bf16.mxu1 %v832_v24  ;;  %v52_v23 = vunpack.c.h.bf16 %v1102_v8  ;;  %v874_v24 = vld [vmem:[%s1217_s1 + $0xd4] ss:$8 sps:$4 sm:$0xff]   ;;  %v885_v56 = vld [vmem:[%s1217_s1 + $0x1e0] ss:$8 sps:$4 sm:$0xff]  }
  0x19   :  { %616 = vmatprep.subr.bf16.mxu0 %v834_v25  ;;  %v876_v25 = vld [vmem:[%s1217_s1 + $0x1d4] ss:$8 sps:$4 sm:$0xff]  }
  0x1a   :  { %v90_v42 = vmul.f32 %v1083_v62, %v52_v23 }
  0x1b   :  { %564 = vmatpush1.bf16.msra.mxu1 %v836_v26  ;;  %v88_v26 = vmul.f32 %v1106_v11, %v50_v7  ;;  %v890_v7 = vld [vmem:[%s1217_s1 + $0xf0] ss:$8 sps:$4 sm:$0xff]  }
  0x1c   :  { %617 = vmatpush1.bf16.msra.mxu0 %v837_v27  ;;  %565 = vmatprep.subr.bf16.mxu1 %v838_v28  ;;  %v81_v27 = vmul.f32 %v1115_v14, %v43_v54  ;;  %v85_v28 = vmul.f32 %v1115_v14, %v47_v60  ;;  %v128_v57 = vadd.f32 %v1085_v63, %v90_v42  ;;  %v51_v60 = vunpack.c.l.bf16 %v1102_v8 }
  0x1d   :  { %618 = vmatprep.subr.bf16.mxu0 %v840_v29  ;;  %v56_v29 = vunpack.c.h.bf16 %v1113_v13 }
  0x1e   :  { %v123_v47 = vadd.f32 %v1117_v15, %v85_v28  ;;  %v89_v9 = vmul.f32 %v1115_v14, %v51_v60 }
  0x1f   :  { %566 = vmatpush1.bf16.msra.mxu1 %v842_v30  ;;  %v136_v30 = vmax.f32 %v120_v20, 0.0  ;;  %v94_v50 = vmul.f32 %v1083_v62, %v56_v29  ;;  %v888_v62 = vld [vmem:[%s1217_s1 + $0x1f4] ss:$8 sps:$4 sm:$0xff]  }
  0x20   :  { %619 = vmatpush1.bf16.msra.mxu0 %v843_v31  ;;  %567 = vmatprep.subr.bf16.mxu1 %v844_v32  ;;  %v140_v31 = vmax.f32 %v124_v21, 0.0  ;;  %v122_v32 = vadd.f32 %v1108_v12, %v84_v22  ;;  %v139_v0 = vmax.f32 %v123_v47, 0.0 }
  0x21   :  { %620 = vmatprep.subr.bf16.mxu0 %v846_v33  ;;  %v83_v33 = vmul.f32 %v1119_v16, %v45_v4  ;;  %v132_v58 = vadd.f32 %v1085_v63, %v94_v50  ;;  %v53_v63 = vunpack.c.l.bf16 %v40_v37 }
  0x23   :  { %568 = vmatpush1.bf16.msra.mxu1 %v848_v34  ;;  %v126_v34 = vadd.f32 %v1108_v12, %v88_v26 }
  0x24   :  { %621 = vmatpush1.bf16.msra.mxu0 %v849_v35  ;;  %569 = vmatprep.subr.bf16.mxu1 %v850_v36  ;;  %v119_v35 = vadd.f32 %v1117_v15, %v81_v27  ;;  %v87_v36 = vmul.f32 %v1119_v16, %v49_v6 }
  0x25   :  { %622 = vmatprep.subr.bf16.mxu0 %v852_v38  ;;  %v878_v38 = vld [vmem:[%s1217_s1 + $0xd0] ss:$8 sps:$4 sm:$0xff]  }
  0x26   :  { %v135_v53 = vmax.f32 %v119_v35, 0.0 }
  0x27   :  { %570 = vmatpush1.bf16.msra.mxu1 %v854_v39  ;;  %v879_v39 = vld [vmem:[%s1217_s1 + $0x1d0] ss:$8 sps:$4 sm:$0xff]  }
  0x28   :  { %623 = vmatpush1.bf16.msra.mxu0 %v855_v40  ;;  %571 = vmatprep.subr.bf16.mxu1 %v856_v41  ;;  %v160_v40 = vpack.c.bf16 %v140_v31, %v136_v30  ;;  %v138_v41 = vmax.f32 %v122_v32, 0.0  ;;  %v159_v22 = vpack.c.bf16 %v139_v0, %v135_v53 }
  0x29   :  { %624 = vmatprep.subr.bf16.mxu0 %v858_v43  ;;  %v42_v43 = vld [vmem:[%s1220_s0 + $0x38] sm:$0xff] }
  0x2a   :  { %583 = vmatprep.mubr.bf16.mxu1 %v160_v40  ;;  %v58_v54 = vunpack.c.h.bf16 %v42_v43  ;;  %v57_v6 = vunpack.c.l.bf16 %v42_v43 }
  0x2b   :  { %572 = vmatpush1.bf16.msra.mxu1 %v860_v44  ;;  %v880_v44 = vld [vmem:[%s1217_s1 + $0xe4] ss:$8 sps:$4 sm:$0xff]  }
  0x2c   :  { %625 = vmatpush1.bf16.msra.mxu0 %v861_v45  ;;  %573 = vmatprep.subr.bf16.mxu1 %v862_v46  ;;  %v882_v45 = vld [vmem:[%s1217_s1 + $0x1e4] ss:$8 sps:$4 sm:$0xff]   ;;  %v142_v46 = vmax.f32 %v126_v34, 0.0  ;;  %v96_v1 = vmul.f32 %v1106_v11, %v58_v54  ;;  %v95_v21 = vmul.f32 %v1119_v16, %v57_v6 }
  0x2d   :  { %626 = vmatprep.subr.bf16.mxu0 %v864_v48  ;;  %v121_v48 = vadd.f32 %v1121_v17, %v83_v33 }
  0x2e   :  { %v162_v52 = vpack.c.bf16 %v142_v46, %v138_v41  ;;  %v134_v8 = vadd.f32 %v1108_v12, %v96_v1  ;;  %v133_v26 = vadd.f32 %v1121_v17, %v95_v21 }
  0x2f   :  { %574 = vmatpush1.bf16.msra.mxu1 %v866_v49  ;;  %v125_v49 = vadd.f32 %v1121_v17, %v87_v36 }
  0x30   :  { %627 = vmatpush1.bf16.msra.mxu0 %v867_v59  ;;  %575 = vmatprep.subr.bf16.mxu1 %v868_v2  ;;  %v92_v59 = vmul.f32 %v1106_v11, %v54_v51  ;;  %v55_v2 = vunpack.c.l.bf16 %v1113_v13  ;;  %v91_v11 = vmul.f32 %v1119_v16, %v53_v63  ;;  %v891_v13 = vld [vmem:[%s1217_s1 + $0x1f0] ss:$8 sps:$4 sm:$0xff]   ;;  %v149_v31 = vmax.f32 %v133_v26, 0.0 }
  0x31   :  { %628 = vmatprep.subr.bf16.mxu0 %v870_v3  ;;  %636 = vmatprep.mubr.bf16.mxu0 %v162_v52  ;;  %v137_v3 = vmax.f32 %v121_v48, 0.0  ;;  %v141_v4 = vmax.f32 %v125_v49, 0.0 }
  0x32   :  { %v130_v5 = vadd.f32 %v1108_v12, %v92_v59  ;;  %v93_v10 = vmul.f32 %v1115_v14, %v55_v2  ;;  %v150_v12 = vmax.f32 %v134_v8, 0.0  ;;  %v127_v14 = vadd.f32 %v1117_v15, %v89_v9 }
  0x33   :  { %576 = vmatpush1.bf16.msra.mxu1 %v872_v18  ;;  %v144_v18 = vmax.f32 %v128_v57, 0.0  ;;  %v161_v23 = vpack.c.bf16 %v141_v4, %v137_v3 }
  0x34   :  { %629 = vmatpush1.bf16.msra.mxu0 %v873_v19  ;;  %577 = vmatprep.subr.bf16.mxu1 %v874_v24  ;;  %v148_v19 = vmax.f32 %v132_v58, 0.0  ;;  %v146_v20 = vmax.f32 %v130_v5, 0.0  ;;  %v131_v24 = vadd.f32 %v1117_v15, %v93_v10  ;;  %v143_v16 = vmax.f32 %v127_v14, 0.0 }
  0x35   :  { %630 = vmatprep.subr.bf16.mxu0 %v876_v25  ;;  %v129_v25 = vadd.f32 %v1121_v17, %v91_v11 }
  0x36   :  { %v164_v27 = vpack.c.bf16 %v148_v19, %v144_v18  ;;  %v166_v28 = vpack.c.bf16 %v150_v12, %v146_v20  ;;  %v147_v29 = vmax.f32 %v131_v24, 0.0 }
  0x37   :  { %578 = vmatpush1.bf16.msra.mxu1 %v878_v38  ;;  %v145_v30 = vmax.f32 %v129_v25, 0.0 }
  0x38   :  { %631 = vmatpush1.bf16.msra.mxu0 %v879_v39  ;;  %579 = vmatprep.subr.bf16.mxu1 %v880_v44  ;;  %v163_v32 = vpack.c.bf16 %v147_v29, %v143_v16 }
  0x39   :  { %632 = vmatprep.subr.bf16.mxu0 %v882_v45  ;;  %v165_v33 = vpack.c.bf16 %v149_v31, %v145_v30 }
  0x3b   :  { %580 = vmatpush1.bf16.msra.mxu1 %v884_v55 }
  0x3c   :  { %633 = vmatpush1.bf16.msra.mxu0 %v885_v56  ;;  %581 = vmatprep.subr.bf16.mxu1 %v886_v61 }
  0x3d   :  { %634 = vmatprep.subr.bf16.mxu0 %v888_v62 }
  0x3f   :  { %582 = vmatpush1.bf16.msra.mxu1 %v890_v7 }
  0x40   :  { %635 = vmatpush1.bf16.msra.mxu0 %v891_v13 }
  0x42   :  { %584 = vmatmul.mubr.bf16.vlgmr.msra.gmra.mrb[0].mxu1 %v159_v22 }
  0x43   :  { %637 = vmatmul.mubr.bf16.vlgmr.msra.gmra.mrb[0].mxu0 %v161_v23  ;;  %593 = vmatprep.mubr.bf16.mxu1 %v164_v27 }
  0x44   :  { %646 = vmatprep.mubr.bf16.mxu0 %v166_v28 }
  0x4a   :  { %594 = vmatmul.mubr.bf16.gmra.mrb[4].mxu1 %v163_v32 }
  0x4b   :  { %647 = vmatmul.mubr.bf16.gmra.mrb[4].mxu0 %v165_v33 }
 0x115   :  { %v585_v15 = vpop.f32.mrb[0].mxu1 }
 0x116   :  { %v638_v34 = vpop.f32.mrb[0].mxu0  ;;  %v587_v17 = vpop.f32.mrb[1].mxu1 }
 0x117   :  { %v639_v35 = vadd.f32 %v638_v34, %v585_v15  ;;  %v640_v36 = vpop.f32.mrb[1].mxu0  ;;  %v589_v38 = vpop.f32.mrb[2].mxu1 }
 0x118   :  { %v641_v37 = vadd.f32 %v640_v36, %v587_v17  ;;  %v642_v39 = vpop.f32.mrb[2].mxu0  ;;  %v591_v41 = vpop.f32.mrb[3].mxu1 }
 0x119   :  { %v643_v40 = vadd.f32 %v642_v39, %v589_v38  ;;  %v644_v42 = vpop.f32.mrb[3].mxu0 }
 0x11a   :  { %v784_v43 = vpack.c.bf16 %v641_v37, %v639_v35  ;;  %v645_v44 = vadd.f32 %v644_v42, %v591_v41 }
 0x11c   :  { %708 = vst [vmem:[%s1223_s6] sm:$0xff] %v784_v43  ;;  %v785_v45 = vpack.c.bf16 %v645_v44, %v643_v40 }
 0x11d   :  { %v595_v46 = vpop.f32.mrb[4].mxu1 }
 0x11e   :  { %709 = vst [vmem:[%s1223_s6 + $0x8] sm:$0xff] %v785_v45  ;;  %v648_v47 = vpop.f32.mrb[4].mxu0  ;;  %v597_v49 = vpop.f32.mrb[5].mxu1 }
 0x11f   :  { %v649_v48 = vadd.f32 %v648_v47, %v595_v46  ;;  %v650_v50 = vpop.f32.mrb[5].mxu0  ;;  %v599_v52 = vpop.f32.mrb[6].mxu1 }
 0x120   :  { %v651_v51 = vadd.f32 %v650_v50, %v597_v49  ;;  %v652_v53 = vpop.f32.mrb[6].mxu0  ;;  %v601_v55 = vpop.f32.mrb[7].mxu1 }
 0x121   :  { %v653_v54 = vadd.f32 %v652_v53, %v599_v52  ;;  %v654_v56 = vpop.f32.mrb[7].mxu0 }
 0x122   :  { %v786_v57 = vpack.c.bf16 %v651_v51, %v649_v48  ;;  %v655_v58 = vadd.f32 %v654_v56, %v601_v55 }
 0x124   :  { %710 = vst [vmem:[%s1223_s6 + $0x10] sm:$0xff] %v786_v57  ;;  %v787_v59 = vpack.c.bf16 %v655_v58, %v653_v54 }
 0x126   :  { %711 = vst [vmem:[%s1223_s6 + $0x18] sm:$0xff] %v787_v59 }

// kernel: densenet121_forward.167
= control target key start
LH: loop header
LB: loop body
LE: loop exit
PB: predicated region body
PF: predicated region fallthrough
CT: control target
= control target key end

     0   :  { %s68_s0 = inlined_call_operand.vmem [shape: bf16[4,8,256], index: 0, kind: input, shape index: {}]   ;;  %s69_s1 = inlined_call_operand.vmem [shape: bf16[8,256], index: 1, kind: output, shape index: {}]  }
   0x1   :  { %v8_v0 = vld [vmem:[%s68_s0] sm:$0xff]  ;;  %v9_v1 = vld [vmem:[%s68_s0 + $0x8] sm:$0xff]  ;;  %v10_v2 = vld [vmem:[%s68_s0 + $0x10] sm:$0xff] }
   0x2   :  { %v11_v3 = vld [vmem:[%s68_s0 + $0x18] sm:$0xff]  ;;  %v12_v4 = vunpack.c.l.bf16 %v8_v0  ;;  %v13_v5 = vunpack.c.h.bf16 %v8_v0  ;;  %v14_v6 = vunpack.c.l.bf16 %v9_v1  ;;  %v15_v7 = vunpack.c.h.bf16 %v9_v1 }
   0x3   :  { %v16_v8 = vunpack.c.l.bf16 %v10_v2  ;;  %v17_v9 = vunpack.c.h.bf16 %v10_v2  ;;  %v18_v10 = vunpack.c.l.bf16 %v11_v3  ;;  %v19_v11 = vunpack.c.h.bf16 %v11_v3 }
   0x4   :  { %v20_v12 = vadd.f32 %v14_v6, %v12_v4  ;;  %v23_v13 = vadd.f32 %v15_v7, %v13_v5 }
   0x6   :  { %v21_v14 = vadd.f32 %v20_v12, %v16_v8  ;;  %v24_v15 = vadd.f32 %v23_v13, %v17_v9 }
   0x8   :  { %v22_v16 = vadd.f32 %v21_v14, %v18_v10  ;;  %v25_v17 = vadd.f32 %v24_v15, %v19_v11 }
   0xa   :  { %v26_v18 = vmul.f32 0.25, %v22_v16  ;;  %v27_v19 = vmul.f32 0.25, %v25_v17 }
   0xc   :  { %v42_v20 = vpack.c.bf16 %v27_v19, %v26_v18 }
   0xe   :  { %36 = vst [vmem:[%s69_s1] sm:$0xff] %v42_v20 }

// kernel: densenet121_forward.169
= control target key start
LH: loop header
LB: loop body
LE: loop exit
PB: predicated region body
PF: predicated region fallthrough
CT: control target
= control target key end

     0   :  { %s917_s21 = smov 0   ;;  %s919_s22 = smov 0   ;;  %s1004_s0 = inlined_call_operand.vmem [shape: bf16[8,128], index: 0, kind: input, shape index: {}]   ;;  %s1005_s1 = inlined_call_operand.vmem [shape: bf16[128,384], index: 1, kind: input, shape index: {}]   ;;  %s1006_s2 = inlined_call_operand.vmem [shape: f32[1,128], index: 2, kind: input, shape index: {}, may-alias: {2,3}]   ;;  %s1007_s3 = inlined_call_operand.vmem [shape: f32[1,128], index: 3, kind: input, shape index: {}, may-alias: {2,3}]   ;;  %s1008_s4 = inlined_call_operand.vmem [shape: f32[1,384], index: 4, kind: input, shape index: {}, may-alias: {4,5}]   ;;  %s1009_s5 = inlined_call_operand.vmem [shape: f32[1,384], index: 5, kind: input, shape index: {}, may-alias: {4,5}]   ;;  %s1010_s6 = inlined_call_operand.vmem [shape: bf16[8,384], index: 6, kind: output, shape index: {}]  }
   0x1   :  { %s921_s23 = smov 0   ;;  %s923_s24 = smov 0  }
   0x2   :  { %s925_s2 = smov 0  }
   0x3 LB: > { %s31_s3 = sadd.s32 1, %s874_s24  ;;  %p79_p1 = scmp.ne.s32.totalorder %s866_s22, %s862_s21  ;;  %s878_s2 = sphi %s925_s2, %s16_s2   ;;  %s874_s24 = sphi %s923_s24, %s1014_s24   ;;  %s870_s23 = sphi %s921_s23, %s1013_s23   ;;  %s866_s22 = sphi %s919_s22, %s1012_s22   ;;  %s862_s21 = sphi %s917_s21, %s1011_s21  }
   0x4   : > { %p33_p0 = scmp.ge.s32.totalorder %s31_s3, 3  ;;  %p80_p2 = scmp.eq.s32.totalorder %s878_s2, 0 }
   0x5   : > { %s72_s5 = sadd.s32 1, %s866_s22  ;;  %p745_p5 = scmp.ge.s32.totalorder %s878_s2, 3 }
   0x6   : > { %s1016_s3 = smov (%p33_p0, %s31_s3), 0  ;;  %p81_p3 = por %p80_p2, %p79_p1 }
   0x7   : > { %s68_s4 = ssub.s32 %s874_s24, %s1016_s3  ;;  %259 = sbr.rel (%p745_p5) target bundleno = 28 (0x1c), region = 28 }
   0x8   : > { %p70_p4 = scmp.eq.s32.totalorder %s68_s4, 0 }
   0xa   : > { %s952_s25 = scalar_select %p70_p4, %s866_s22, %s72_s5  }
   0xe   : > { %262 = sbr.rel (!%p81_p3) target bundleno = 28 (0x1c), region = 32  ;;  %s264_s26 = sand.u32 (%p81_p3), 1, %s866_s22  }
   0xf   : > { %s747_s27 = sshll.u32 (%p81_p3), %s874_s24, 2  ;;  %s746_s28 = sshll.u32 (%p81_p3), %s264_s26, 6 }
  0x10   : > { %s960_s7 = scalar_lea.vmem (%p81_p3), %s1005_s1, %s747_s27  ;;  %s266_s8 = scalar_lea.vmem (%p81_p3), [#allocation3], %s746_s28 }
  0x11   : > { %v287_v0 = vld [vmem:[%s960_s7] sm:$0xf] (%p81_p3)  ;;  %v289_v1 = vld [vmem:[%s960_s7 + $0xc] sm:$0xf] (%p81_p3)  ;;  %v291_v2 = vld [vmem:[%s960_s7 + $0x18] sm:$0xf] (%p81_p3) }
  0x12   : > { %288 = vst [vmem:[%s266_s8] sm:$0xf] (%p81_p3), %v287_v0  ;;  %290 = vst [vmem:[%s266_s8 + $0x4] sm:$0xf] (%p81_p3), %v289_v1  ;;  %v293_v3 = vld [vmem:[%s960_s7 + $0x24] sm:$0xf] (%p81_p3) }
  0x13   : > { %v295_v4 = vld [vmem:[%s960_s7 + $0x30] sm:$0xf] (%p81_p3)  ;;  %292 = vst [vmem:[%s266_s8 + $0x8] sm:$0xf] (%p81_p3), %v291_v2  ;;  %294 = vst [vmem:[%s266_s8 + $0xc] sm:$0xf] (%p81_p3), %v293_v3 }
  0x14   : > { %296 = vst [vmem:[%s266_s8 + $0x10] sm:$0xf] (%p81_p3), %v295_v4  ;;  %v297_v5 = vld [vmem:[%s960_s7 + $0x3c] sm:$0xf] (%p81_p3)  ;;  %v299_v6 = vld [vmem:[%s960_s7 + $0x48] sm:$0xf] (%p81_p3) }
  0x15   : > { %v301_v7 = vld [vmem:[%s960_s7 + $0x54] sm:$0xf]  ;;  %298 = vst [vmem:[%s266_s8 + $0x14] sm:$0xf] %v297_v5  ;;  %300 = vst [vmem:[%s266_s8 + $0x18] sm:$0xf] %v299_v6 }
  0x16   : > { %302 = vst [vmem:[%s266_s8 + $0x1c] sm:$0xf] %v301_v7  ;;  %v303_v8 = vld [vmem:[%s960_s7 + $0x60] sm:$0xf]  ;;  %v305_v9 = vld [vmem:[%s960_s7 + $0x6c] sm:$0xf] }
  0x17   : > { %v307_v10 = vld [vmem:[%s960_s7 + $0x78] sm:$0xf]  ;;  %304 = vst [vmem:[%s266_s8 + $0x20] sm:$0xf] %v303_v8  ;;  %306 = vst [vmem:[%s266_s8 + $0x24] sm:$0xf] %v305_v9 }
  0x18   : > { %308 = vst [vmem:[%s266_s8 + $0x28] sm:$0xf] %v307_v10  ;;  %v309_v11 = vld [vmem:[%s960_s7 + $0x84] sm:$0xf]  ;;  %v311_v12 = vld [vmem:[%s960_s7 + $0x90] sm:$0xf] }
  0x19   : > { %v313_v13 = vld [vmem:[%s960_s7 + $0x9c] sm:$0xf]  ;;  %310 = vst [vmem:[%s266_s8 + $0x2c] sm:$0xf] %v309_v11  ;;  %312 = vst [vmem:[%s266_s8 + $0x30] sm:$0xf] %v311_v12 }
  0x1a   : > { %314 = vst [vmem:[%s266_s8 + $0x34] sm:$0xf] %v313_v13  ;;  %v315_v14 = vld [vmem:[%s960_s7 + $0xa8] sm:$0xf]  ;;  %v317_v15 = vld [vmem:[%s960_s7 + $0xb4] sm:$0xf] }
  0x1b   : > { %316 = vst [vmem:[%s266_s8 + $0x38] sm:$0xf] %v315_v14  ;;  %318 = vst [vmem:[%s266_s8 + $0x3c] sm:$0xf] %v317_v15 }
  0x1c PF: > { %p748_p6 = scmp.ge.s32.totalorder %s878_s2, 1  ;;  %p384_p7 = scmp.lt.s32.totalorder %s878_s2, 4 }
  0x1e   : > { %p385_p8 = pnand %p748_p6, %p384_p7 }
  0x1f   : > { %s391_s9 = sand.u32 (!%p385_p8), 1, %s862_s21   ;;  %v880_v16 = vmov (!%p385_p8), 0.0   ;;  %vm881_vm0 = vmmov (!%p385_p8), 0   ;;  %v476_v25 = vld [vmem:[%s1004_s0] sm:$0xf] (!%p385_p8)  ;;  %p464_p9 = scmp.lt.s32.totalorder (!%p385_p8), %s870_s23, 2 }
  0x20   : > { %388 = sbr.rel (%p385_p8) target bundleno = 281 (0x119), region = 81  ;;  %770 = vmatprep.subr.bf16.mxu0 (!%p385_p8), %v880_v16  ;;  %s749_s10 = sshll.u32 (!%p385_p8), %s391_s9, 6  ;;  %786 = vmatprep.mubr.msk.bf16.mxu0 (!%p385_p8), %vm881_vm0, %v880_v16 }
  0x21   : > { %s393_s11 = scalar_lea.vmem (!%p385_p8), [#allocation3], %s749_s10 }
  0x22   : > { %v832_v17 = vld [vmem:[%s393_s11] sm:$0xff] (!%p385_p8)   ;;  %v833_v18 = vld [vmem:[%s393_s11 + $0x8] sm:$0xff] (!%p385_p8)   ;;  %v834_v19 = vld [vmem:[%s393_s11 + $0x10] sm:$0xff] (!%p385_p8)  }
  0x23   : > { %771 = vmatpush3.bf16.msra.mxu0 (!%p385_p8), %v832_v17  ;;  %v835_v20 = vld [vmem:[%s393_s11 + $0x18] sm:$0xff] (!%p385_p8)   ;;  %v836_v21 = vld [vmem:[%s393_s11 + $0x20] sm:$0xff] (!%p385_p8)   ;;  %v837_v22 = vld [vmem:[%s393_s11 + $0x28] sm:$0xff] (!%p385_p8)  }
  0x24   : > { %772 = vmatprep.subr.bf16.mxu0 (!%p385_p8), %v880_v16  ;;  %v838_v23 = vld [vmem:[%s393_s11 + $0x30] sm:$0xff] (!%p385_p8)   ;;  %v839_v24 = vld [vmem:[%s393_s11 + $0x38] sm:$0xff] (!%p385_p8)  }
  0x27   : > { %773 = vmatpush3.bf16.msra.mxu0 %v833_v18  ;;  %s1018_s23 = smov (!%p464_p9, %s870_s23), 2 }
  0x28   : > { %774 = vmatprep.subr.bf16.mxu0 %v880_v16  ;;  %s750_s14 = sshll.u32 %s1018_s23, 2 }
  0x29   : > { %s469_s17 = scalar_lea.vmem %s1010_s6, %s750_s14 }
  0x2b   : > { %775 = vmatpush3.bf16.msra.mxu0 %v834_v19 }
  0x2c   : > { %776 = vmatprep.subr.bf16.mxu0 %v880_v16 }
  0x2f   : > { %777 = vmatpush3.bf16.msra.mxu0 %v835_v20 }
  0x30   : > { %778 = vmatprep.subr.bf16.mxu0 %v880_v16 }
  0x33   : > { %779 = vmatpush3.bf16.msra.mxu0 %v836_v21 }
  0x34   : > { %780 = vmatprep.subr.bf16.mxu0 %v880_v16 }
  0x37   : > { %781 = vmatpush3.bf16.msra.mxu0 %v837_v22 }
  0x38   : > { %782 = vmatprep.subr.bf16.mxu0 %v880_v16 }
  0x3b   : > { %783 = vmatpush3.bf16.msra.mxu0 %v838_v23 }
  0x3c   : > { %784 = vmatprep.subr.bf16.mxu0 %v880_v16 }
  0x3f   : > { %785 = vmatpush3.bf16.msra.mxu0 %v839_v24 }
  0x42   : > { %787 = vmatmul.mubr.bf16.vlgmr.msra.gmra.mrb[0].mxu0 %v476_v25 }
 0x115   : > { %v576_v26 = vpop.f32.mrb[0].mxu0 }
 0x116   : > { %v588_v27 = vpack.c.bf16 %v576_v26, %v576_v26  ;;  %v788_v28 = vpop.f32.mrb[1].mxu0 }
 0x117   : > { %v579_v29 = vpop.f32.mrb[2].mxu0 }
 0x118   : > { %589 = vst [vmem:[%s469_s17] sm:$0xf] %v588_v27  ;;  %v789_v30 = vpop.f32.mrb[3].mxu0 }
 0x119 PF: > { %s16_s2 = sadd.s32 1, %s878_s2   ;;  %s1011_s21 = smov %s866_s22 }
 0x11a   : > { %p13_p10 = scmp.ge.s32.totalorder %s16_s2, 5   ;;  %s1012_s22 = smov %s952_s25 }
 0x11b   : > { %s1013_s23 = smov %s874_s24  ;;  %s1014_s24 = smov %s1016_s3 }
 0x11c   :  { %15 = sbr.rel (!%p13_p10) target bundleno = 3 (0x3), region = 143 }

// kernel: densenet121_forward.168
= control target key start
LH: loop header
LB: loop body
LE: loop exit
PB: predicated region body
PF: predicated region fallthrough
CT: control target
= control target key end

     0   :  { %v34_v5 = vlaneseq  ;;  %s419_s1 = inlined_call_operand.vmem [shape: bf16[256,128], index: 1, kind: input, shape index: {}]   ;;  %s420_s0 = inlined_call_operand.vmem [shape: bf16[8,1024], index: 0, kind: input, shape index: {}]   ;;  %s421_s2 = inlined_call_operand.vmem [shape: f32[1,256], index: 2, kind: input, shape index: {}]   ;;  %s422_s3 = inlined_call_operand.vmem [shape: f32[1,256], index: 3, kind: input, shape index: {}]   ;;  %s423_s4 = inlined_call_operand.vmem [shape: f32[1,128], index: 4, kind: input, shape index: {}]   ;;  %s424_s5 = inlined_call_operand.vmem [shape: f32[1,128], index: 5, kind: input, shape index: {}]   ;;  %s425_s6 = inlined_call_operand.vmem [shape: bf16[8,128], index: 6, kind: output, shape index: {}]  }
   0x1   :  { %v302_v0 = vld [vmem:[%s419_s1 + $0x40] sm:$0xff]   ;;  %v304_v2 = vld [vmem:[%s419_s1 + $0x48] sm:$0xff]   ;;  %v306_v4 = vld [vmem:[%s419_s1 + $0x50] sm:$0xff]  }
   0x2   :  { %v303_v1 = vld [vmem:[%s419_s1] sm:$0xff]   ;;  %280 = vmatprep.subr.bf16.mxu0 %v302_v0  ;;  %v305_v3 = vld [vmem:[%s419_s1 + $0x8] sm:$0xff]   ;;  %v307_v6 = vld [vmem:[%s419_s1 + $0x10] sm:$0xff]   ;;  %v35_v8 = vshrl.u32 %v34_v5, 7 }
   0x3   :  { %281 = vmatpush3.bf16.msra.mxu0 %v303_v1  ;;  %v308_v7 = vld [vmem:[%s419_s1 + $0x58] sm:$0xff]   ;;  %v310_v10 = vld [vmem:[%s419_s1 + $0x60] sm:$0xff]   ;;  %v312_v14 = vld [vmem:[%s419_s1 + $0x68] sm:$0xff]  }
   0x4   :  { %282 = vmatprep.subr.bf16.mxu0 %v304_v2  ;;  %v309_v9 = vld [vmem:[%s419_s1 + $0x18] sm:$0xff]   ;;  %v36_v11 = vsub.s32 0, %v35_v8  ;;  %v40_v12 = vsub.s32 1, %v35_v8  ;;  %v311_v13 = vld [vmem:[%s419_s1 + $0x20] sm:$0xff]   ;;  %v313_v24 = vld [vmem:[%s419_s1 + $0x28] sm:$0xff]  }
   0x5   :  { %v29_v15 = vld [vmem:[%s420_s0] sm:$0xff]  ;;  %v314_v27 = vld [vmem:[%s419_s1 + $0x70] sm:$0xff]   ;;  %v316_v32 = vld [vmem:[%s419_s1 + $0x78] sm:$0xff]  }
   0x6   :  { %v32_v16 = vld [vmem:[%s421_s2] sm:$0x3]  ;;  %v30_v18 = vunpack.c.l.bf16 %v29_v15  ;;  %v31_v19 = vunpack.c.h.bf16 %v29_v15  ;;  %v315_v30 = vld [vmem:[%s419_s1 + $0x30] sm:$0xff]   ;;  %v317_v35 = vld [vmem:[%s419_s1 + $0x38] sm:$0xff]  }
   0x7   :  { %283 = vmatpush3.bf16.msra.mxu0 %v305_v3  ;;  %v46_v17 = vld [vmem:[%s422_s3] sm:$0x3]  ;;  %v37_v20 = vrot.slane %v32_v16, %v36_v11  ;;  %v41_v21 = vrot.slane %v32_v16, %v40_v12 }
   0x8   :  { %284 = vmatprep.subr.bf16.mxu0 %v306_v4  ;;  %v51_v22 = vrot.slane %v46_v17, %v36_v11  ;;  %v55_v23 = vrot.slane %v46_v17, %v40_v12  ;;  %v278_v39 = vld [vmem:[%s423_s4] ss:$0 sm:$0xff] }
   0x9   :  { %v45_v25 = vmul.f32 %v41_v21, %v31_v19  ;;  %v44_v26 = vmul.f32 %v37_v20, %v30_v18  ;;  %v279_v42 = vld [vmem:[%s424_s5] ss:$0 sm:$0xff] }
   0xb   :  { %285 = vmatpush3.bf16.msra.mxu0 %v307_v6  ;;  %v59_v28 = vadd.f32 %v55_v23, %v45_v25  ;;  %v58_v29 = vadd.f32 %v51_v22, %v44_v26 }
   0xc   :  { %286 = vmatprep.subr.bf16.mxu0 %v308_v7 }
   0xd   :  { %v61_v31 = vmax.f32 %v59_v28, 0.0  ;;  %v60_v34 = vmax.f32 %v58_v29, 0.0 }
   0xf   :  { %287 = vmatpush3.bf16.msra.mxu0 %v309_v9  ;;  %v64_v33 = vpack.c.bf16 %v61_v31, %v61_v31  ;;  %v63_v36 = vpack.c.bf16 %v60_v34, %v60_v34 }
  0x10   :  { %288 = vmatprep.subr.bf16.mxu0 %v310_v10 }
  0x11   :  { %225 = vmatprep.mubr.bf16.mxu0 %v64_v33 }
  0x13   :  { %289 = vmatpush3.bf16.msra.mxu0 %v311_v13 }
  0x14   :  { %290 = vmatprep.subr.bf16.mxu0 %v312_v14 }
  0x17   :  { %291 = vmatpush3.bf16.msra.mxu0 %v313_v24 }
  0x18   :  { %292 = vmatprep.subr.bf16.mxu0 %v314_v27 }
  0x1b   :  { %293 = vmatpush3.bf16.msra.mxu0 %v315_v30 }
  0x1c   :  { %294 = vmatprep.subr.bf16.mxu0 %v316_v32 }
  0x1f   :  { %295 = vmatpush3.bf16.msra.mxu0 %v317_v35 }
  0x22   :  { %226 = vmatmul.mubr.bf16.vlgmr.msra.gmra.mrb[0].mxu0 %v63_v36 }
  0xf5   :  { %v296_v37 = vpop.f32.mrb[0].mxu0 }
  0xf6   :  { %v297_v38 = vpop.f32.mrb[1].mxu0 }
  0xf7   :  { %v298_v40 = vadd.f32 %v297_v38, %v296_v37  ;;  %v299_v41 = vpop.f32.mrb[2].mxu0 }
  0xf8   :  { %v300_v43 = vpop.f32.mrb[3].mxu0 }
  0xf9   :  { %v246_v44 = vmul.f32 %v298_v40, %v278_v39 }
  0xfb   :  { %v254_v45 = vadd.f32 %v279_v42, %v246_v44 }
  0xfd   :  { %v255_v46 = vmax.f32 %v254_v45, 0.0 }
  0xff   :  { %v256_v47 = vpack.c.bf16 %v255_v46, %v255_v46 }
 0x101   :  { %257 = vst [vmem:[%s425_s6] sm:$0xf] %v256_v47 }

// kernel: densenet121_forward.170
= control target key start
LH: loop header
LB: loop body
LE: loop exit
PB: predicated region body
PF: predicated region fallthrough
CT: control target
= control target key end

     0   :  { %s821_s21 = smov 0   ;;  %s823_s22 = smov 0   ;;  %s892_s0 = inlined_call_operand.vmem [shape: bf16[8,1024], index: 0, kind: input, shape index: {}]   ;;  %s893_s1 = inlined_call_operand.vmem [shape: bf16[384,128], index: 1, kind: input, shape index: {}]   ;;  %s894_s2 = inlined_call_operand.vmem [shape: f32[1,384], index: 2, kind: input, shape index: {}]   ;;  %s895_s3 = inlined_call_operand.vmem [shape: f32[1,384], index: 3, kind: input, shape index: {}]   ;;  %s896_s4 = inlined_call_operand.vmem [shape: f32[1,128], index: 4, kind: input, shape index: {}]   ;;  %s897_s5 = inlined_call_operand.vmem [shape: f32[1,128], index: 5, kind: input, shape index: {}]   ;;  %s898_s6 = inlined_call_operand.vmem [shape: bf16[8,128], index: 6, kind: output, shape index: {}]  }
   0x1   :  { %s825_s23 = smov 0  }
   0x2 LB: > { %s28_s24 = sadd.s32 1, %s777_s22  ;;  %p674_p0 = scmp.ge.s32.totalorder %s781_s23, 1  ;;  %s781_s23 = sphi %s825_s23, %s16_s23   ;;  %s777_s22 = sphi %s823_s22, %s900_s22   ;;  %s773_s21 = sphi %s821_s21, %s899_s21  }
   0x3   : > { %p29_p1 = scmp.ge.s32.totalorder %s28_s24, 3  ;;  %p286_p2 = scmp.lt.s32.totalorder %s781_s23, 4 }
   0x5   : > { %s902_s24 = smov (%p29_p1, %s28_s24), 0  ;;  %p287_p3 = pnand %p674_p0, %p286_p2 }
   0x6   : > { %p343_p4 = scmp.lt.s32.totalorder (!%p287_p3), %s773_s21, 7  ;;  %s676_s25 = sshll.u32 (!%p287_p3), %s773_s21, 4 }
   0x7   : > { %290 = sbr.rel (%p287_p3) target bundleno = 286 (0x11e), region = 44  ;;  %p350_p5 = scmp.lt.s32.totalorder (!%p287_p3), %s676_s25, 47 }
   0x8   : > { %p358_p6 = scmp.lt.s32.totalorder (!%p287_p3), %s773_s21, 2  ;;  %p678_p7 = scmp.ne.s32.totalorder (!%p287_p3), %s773_s21, 0 }
   0xe   : > { %s344_s26 = scalar_select %p343_p4, %s773_s21, 7 }
   0xf   : > { %s904_s25 = smov (!%p350_p5, %s676_s25), 47  ;;  %381 = sbr.rel (%p678_p7) target bundleno = 22 (0x16), region = 48 }
  0x10   : > { %s675_s27 = sshll.u32 %s344_s26, 2  ;;  %s677_s7 = sshll.u32 %s904_s25, 2  ;;  %v783_v0 = vmov (!%p678_p7), 0.0  }
  0x11   : > { %s348_s30 = scalar_lea.vmem %s892_s0, %s675_s27  ;;  %s851_s10 = scalar_lea.vmem %s893_s1, %s677_s7  ;;  %382 = vst [vmem:[#allocation2] sm:$0xff] (!%p678_p7), %v783_v0 }
  0x12   : > { %s854_s11 = scalar_select %p358_p6, %s773_s21, 2 }
  0x14   : > { %s360_s14 = scalar_lea.vmem %s894_s2, %s854_s11  ;;  %s363_s17 = scalar_lea.vmem %s895_s3, %s854_s11 }
  0x16 PF: > { %v751_v1 = vld [vmem:[%s851_s10] sm:$0xff]   ;;  %v784_v2 = vmov 0.0   ;;  %v752_v3 = vld [vmem:[%s851_s10 + $0x8] sm:$0xff]   ;;  %vm785_vm0 = vmmov 0   ;;  %v753_v4 = vld [vmem:[%s851_s10 + $0x10] sm:$0xff]   ;;  %p689_p8 = scmp.ne.s32.totalorder %s773_s21, 2 }
  0x17   : > { %704 = vmatprep.subr.bf16.mxu0 %v784_v2  ;;  %720 = vmatprep.mubr.msk.bf16.mxu0 %vm785_vm0, %v784_v2  ;;  %v754_v5 = vld [vmem:[%s851_s10 + $0x18] sm:$0xff]   ;;  %v383_v6 = vld [vmem:[%s348_s30] sm:$0xf]  ;;  %v756_v11 = vld [vmem:[%s851_s10 + $0x28] sm:$0xff]  }
  0x18   : > { %705 = vmatpush3.bf16.msra.mxu0 %v751_v1  ;;  %v384_v7 = vunpack.c.l.bf16 %v383_v6  ;;  %v755_v8 = vld [vmem:[%s851_s10 + $0x20] sm:$0xff]   ;;  %v757_v14 = vld [vmem:[%s851_s10 + $0x30] sm:$0xff]   ;;  %v758_v16 = vld [vmem:[%s851_s10 + $0x38] sm:$0xff]  }
  0x19   : > { %706 = vmatprep.subr.bf16.mxu0 %v784_v2  ;;  %v679_v9 = vld [vmem:[%s360_s14] ss:$0 sm:$0xff] }
  0x1a   : > { %v392_v10 = vmul.f32 %v679_v9, %v384_v7  ;;  %v680_v12 = vld [vmem:[%s363_s17] ss:$0 sm:$0xff] }
  0x1b   : > { %v402_v18 = vld [vmem:[#allocation2] sm:$0xff] }
  0x1c   : > { %707 = vmatpush3.bf16.msra.mxu0 %v752_v3  ;;  %v400_v13 = vadd.f32 %v680_v12, %v392_v10  ;;  %v690_v25 = vld [vmem:[%s896_s4] ss:$0 sm:$0xff] (!%p689_p8) }
  0x1d   : > { %708 = vmatprep.subr.bf16.mxu0 %v784_v2  ;;  %v691_v26 = vld [vmem:[%s897_s5] ss:$0 sm:$0xff] (!%p689_p8) }
  0x1e   : > { %v401_v15 = vmax.f32 %v400_v13, 0.0 }
  0x20   : > { %709 = vmatpush3.bf16.msra.mxu0 %v753_v4  ;;  %v403_v17 = vpack.c.bf16 %v401_v15, %v401_v15 }
  0x21   : > { %710 = vmatprep.subr.bf16.mxu0 %v784_v2 }
  0x24   : > { %711 = vmatpush3.bf16.msra.mxu0 %v754_v5 }
  0x25   : > { %712 = vmatprep.subr.bf16.mxu0 %v784_v2 }
  0x28   : > { %713 = vmatpush3.bf16.msra.mxu0 %v755_v8 }
  0x29   : > { %714 = vmatprep.subr.bf16.mxu0 %v784_v2 }
  0x2c   : > { %715 = vmatpush3.bf16.msra.mxu0 %v756_v11 }
  0x2d   : > { %716 = vmatprep.subr.bf16.mxu0 %v784_v2 }
  0x30   : > { %717 = vmatpush3.bf16.msra.mxu0 %v757_v14 }
  0x31   : > { %718 = vmatprep.subr.bf16.mxu0 %v784_v2 }
  0x34   : > { %719 = vmatpush3.bf16.msra.mxu0 %v758_v16 }
  0x37   : > { %721 = vmatmul.mubr.bf16.vlgmr.msra.gmra.mrb[0].mxu0 %v403_v17 }
 0x107   : > { %513 = sbr.rel (%p689_p8) target bundleno = 286 (0x11e), region = 52 }
 0x10a   : > { %v502_v19 = vpop.f32.mrb[0].mxu0 }
 0x10b   : > { %v508_v20 = vadd.f32 %v502_v19, %v402_v18  ;;  %v722_v21 = vpop.f32.mrb[1].mxu0 }
 0x10c   : > { %v505_v22 = vpop.f32.mrb[2].mxu0 }
 0x10d   : > { %509 = vst [vmem:[#allocation2] sm:$0xff] %v508_v20  ;;  %v723_v23 = vpop.f32.mrb[3].mxu0 }
 0x114   : > { %v514_v24 = vld [vmem:[#allocation2] sm:$0xff] }
 0x115   : > { %v522_v27 = vmul.f32 %v690_v25, %v514_v24 }
 0x117   : > { %v530_v28 = vadd.f32 %v691_v26, %v522_v27 }
 0x119   : > { %v531_v29 = vmax.f32 %v530_v28, 0.0 }
 0x11b   : > { %v532_v30 = vpack.c.bf16 %v531_v29, %v531_v29 }
 0x11d   : > { %533 = vst [vmem:[%s898_s6] sm:$0xf] %v532_v30 }
 0x11e PF: > { %s16_s23 = sadd.s32 1, %s781_s23   ;;  %s899_s21 = smov %s777_s22 }
 0x11f   : > { %p13_p9 = scmp.ge.s32.totalorder %s16_s23, 5   ;;  %s900_s22 = smov %s902_s24 }
 0x121   :  { %15 = sbr.rel (!%p13_p9) target bundleno = 2 (0x2), region = 97 }

// kernel: densenet121_forward.178
= control target key start
LH: loop header
LB: loop body
LE: loop exit
PB: predicated region body
PF: predicated region fallthrough
CT: control target
= control target key end

     0   :  { %v37_v21 = vlaneseq  ;;  %s723_s1 = inlined_call_operand.vmem [shape: bf16[512,128], index: 1, kind: input, shape index: {}]   ;;  %s724_s0 = inlined_call_operand.vmem [shape: bf16[8,1024], index: 0, kind: input, shape index: {}]   ;;  %s725_s2 = inlined_call_operand.vmem [shape: f32[1,512], index: 2, kind: input, shape index: {}]   ;;  %s726_s3 = inlined_call_operand.vmem [shape: f32[1,512], index: 3, kind: input, shape index: {}]   ;;  %s727_s4 = inlined_call_operand.vmem [shape: f32[1,128], index: 4, kind: input, shape index: {}]   ;;  %s728_s5 = inlined_call_operand.vmem [shape: f32[1,128], index: 5, kind: input, shape index: {}]   ;;  %s729_s6 = inlined_call_operand.vmem [shape: bf16[8,128], index: 6, kind: output, shape index: {}]  }
   0x1   :  { %v539_v0 = vld [vmem:[%s723_s1 + $0x40] sm:$0xff]   ;;  %v543_v4 = vld [vmem:[%s723_s1 + $0x48] sm:$0xff]   ;;  %v547_v8 = vld [vmem:[%s723_s1 + $0x50] sm:$0xff]  }
   0x2   :  { %v540_v1 = vld [vmem:[%s723_s1 + $0xc0] sm:$0xff]   ;;  %495 = vmatprep.subr.bf16.mxu0 %v539_v0  ;;  %v544_v5 = vld [vmem:[%s723_s1 + $0xc8] sm:$0xff]   ;;  %v548_v9 = vld [vmem:[%s723_s1 + $0xd0] sm:$0xff]   ;;  %v38_v26 = vshrl.u32 %v37_v21, 7 }
   0x3   :  { %v541_v2 = vld [vmem:[%s723_s1] sm:$0xff]   ;;  %517 = vmatprep.subr.bf16.mxu1 %v540_v1  ;;  %v545_v6 = vld [vmem:[%s723_s1 + $0x8] sm:$0xff]   ;;  %v549_v10 = vld [vmem:[%s723_s1 + $0x10] sm:$0xff]  }
   0x4   :  { %v542_v3 = vld [vmem:[%s723_s1 + $0x80] sm:$0xff]   ;;  %496 = vmatpush3.bf16.msra.mxu0 %v541_v2  ;;  %v546_v7 = vld [vmem:[%s723_s1 + $0x88] sm:$0xff]   ;;  %v550_v11 = vld [vmem:[%s723_s1 + $0x90] sm:$0xff]   ;;  %v43_v31 = vsub.s32 1, %v38_v26  ;;  %v51_v33 = vsub.s32 3, %v38_v26  ;;  %v39_v35 = vsub.s32 0, %v38_v26 }
   0x5   :  { %518 = vmatpush3.bf16.msra.mxu1 %v542_v3  ;;  %497 = vmatprep.subr.bf16.mxu0 %v543_v4  ;;  %v551_v12 = vld [vmem:[%s723_s1 + $0x58] sm:$0xff]   ;;  %v555_v16 = vld [vmem:[%s723_s1 + $0x60] sm:$0xff]   ;;  %v559_v20 = vld [vmem:[%s723_s1 + $0x68] sm:$0xff]   ;;  %v47_v37 = vsub.s32 2, %v38_v26 }
   0x6   :  { %519 = vmatprep.subr.bf16.mxu1 %v544_v5  ;;  %v552_v13 = vld [vmem:[%s723_s1 + $0xd8] sm:$0xff]   ;;  %v556_v17 = vld [vmem:[%s723_s1 + $0xe0] sm:$0xff]   ;;  %v560_v22 = vld [vmem:[%s723_s1 + $0xe8] sm:$0xff]  }
   0x7   :  { %v553_v14 = vld [vmem:[%s723_s1 + $0x18] sm:$0xff]   ;;  %v557_v18 = vld [vmem:[%s723_s1 + $0x20] sm:$0xff]   ;;  %v561_v23 = vld [vmem:[%s723_s1 + $0x28] sm:$0xff]  }
   0x8   :  { %498 = vmatpush3.bf16.msra.mxu0 %v545_v6  ;;  %v554_v15 = vld [vmem:[%s723_s1 + $0x98] sm:$0xff]   ;;  %v558_v19 = vld [vmem:[%s723_s1 + $0xa0] sm:$0xff]   ;;  %v562_v24 = vld [vmem:[%s723_s1 + $0xa8] sm:$0xff]  }
   0x9   :  { %520 = vmatpush3.bf16.msra.mxu1 %v546_v7  ;;  %499 = vmatprep.subr.bf16.mxu0 %v547_v8  ;;  %v563_v25 = vld [vmem:[%s723_s1 + $0x70] sm:$0xff]   ;;  %v567_v30 = vld [vmem:[%s723_s1 + $0x78] sm:$0xff]   ;;  %v29_v38 = vld [vmem:[%s724_s0] sm:$0xff] }
   0xa   :  { %521 = vmatprep.subr.bf16.mxu1 %v548_v9  ;;  %v564_v27 = vld [vmem:[%s723_s1 + $0xf0] sm:$0xff]   ;;  %v568_v32 = vld [vmem:[%s723_s1 + $0xf8] sm:$0xff]   ;;  %v35_v39 = vld [vmem:[%s725_s2] sm:$0xf]  ;;  %v31_v41 = vunpack.c.l.bf16 %v29_v38  ;;  %v32_v42 = vunpack.c.h.bf16 %v29_v38 }
   0xb   :  { %v565_v28 = vld [vmem:[%s723_s1 + $0x30] sm:$0xff]   ;;  %v569_v34 = vld [vmem:[%s723_s1 + $0x38] sm:$0xff]   ;;  %v61_v40 = vld [vmem:[%s726_s3] sm:$0xf]  ;;  %v44_v43 = vrot.slane %v35_v39, %v43_v31  ;;  %v52_v48 = vrot.slane %v35_v39, %v51_v33  ;;  %v40_v51 = vrot.slane %v35_v39, %v39_v35  ;;  %v48_v53 = vrot.slane %v35_v39, %v47_v37 }
   0xc   :  { %500 = vmatpush3.bf16.msra.mxu0 %v549_v10  ;;  %v566_v29 = vld [vmem:[%s723_s1 + $0xb0] sm:$0xff]   ;;  %v570_v36 = vld [vmem:[%s723_s1 + $0xb8] sm:$0xff]   ;;  %v70_v44 = vrot.slane %v61_v40, %v43_v31  ;;  %v30_v45 = vld [vmem:[%s724_s0 + $0x8] sm:$0xff]  ;;  %v78_v49 = vrot.slane %v61_v40, %v51_v33  ;;  %v66_v52 = vrot.slane %v61_v40, %v39_v35  ;;  %v74_v55 = vrot.slane %v61_v40, %v47_v37 }
   0xd   :  { %522 = vmatpush3.bf16.msra.mxu1 %v550_v11  ;;  %501 = vmatprep.subr.bf16.mxu0 %v551_v12  ;;  %v33_v46 = vunpack.c.l.bf16 %v30_v45  ;;  %v34_v47 = vunpack.c.h.bf16 %v30_v45  ;;  %v58_v50 = vmul.f32 %v44_v43, %v32_v42  ;;  %v57_v57 = vmul.f32 %v40_v51, %v31_v41 }
   0xe   :  { %523 = vmatprep.subr.bf16.mxu1 %v552_v13 }
   0xf   :  { %v60_v54 = vmul.f32 %v52_v48, %v34_v47  ;;  %v84_v56 = vadd.f32 %v70_v44, %v58_v50  ;;  %v59_v58 = vmul.f32 %v48_v53, %v33_v46  ;;  %v83_v61 = vadd.f32 %v66_v52, %v57_v57 }
  0x10   :  { %502 = vmatpush3.bf16.msra.mxu0 %v553_v14  ;;  %v493_v14 = vld [vmem:[%s727_s4] ss:$0 sm:$0xff] }
  0x11   :  { %524 = vmatpush3.bf16.msra.mxu1 %v554_v15  ;;  %503 = vmatprep.subr.bf16.mxu0 %v555_v16  ;;  %v86_v59 = vadd.f32 %v78_v49, %v60_v54  ;;  %v88_v60 = vmax.f32 %v84_v56, 0.0  ;;  %v85_v62 = vadd.f32 %v74_v55, %v59_v58  ;;  %v87_v1 = vmax.f32 %v83_v61, 0.0 }
  0x12   :  { %525 = vmatprep.subr.bf16.mxu1 %v556_v17 }
  0x13   :  { %v90_v63 = vmax.f32 %v86_v59, 0.0  ;;  %v93_v0 = vpack.c.bf16 %v88_v60, %v88_v60  ;;  %v89_v2 = vmax.f32 %v85_v62, 0.0  ;;  %v92_v4 = vpack.c.bf16 %v87_v1, %v87_v1 }
  0x14   :  { %504 = vmatpush3.bf16.msra.mxu0 %v557_v18  ;;  %v494_v18 = vld [vmem:[%s728_s5] ss:$0 sm:$0xff] }
  0x15   :  { %526 = vmatpush3.bf16.msra.mxu1 %v558_v19  ;;  %505 = vmatprep.subr.bf16.mxu0 %v559_v20  ;;  %v95_v3 = vpack.c.bf16 %v90_v63, %v90_v63  ;;  %v94_v5 = vpack.c.bf16 %v89_v2, %v89_v2 }
  0x16   :  { %527 = vmatprep.subr.bf16.mxu1 %v560_v22  ;;  %384 = vmatprep.mubr.bf16.mxu0 %v93_v0 }
  0x17   :  { %424 = vmatprep.mubr.bf16.mxu1 %v95_v3 }
  0x18   :  { %506 = vmatpush3.bf16.msra.mxu0 %v561_v23 }
  0x19   :  { %528 = vmatpush3.bf16.msra.mxu1 %v562_v24  ;;  %507 = vmatprep.subr.bf16.mxu0 %v563_v25 }
  0x1a   :  { %529 = vmatprep.subr.bf16.mxu1 %v564_v27 }
  0x1c   :  { %508 = vmatpush3.bf16.msra.mxu0 %v565_v28 }
  0x1d   :  { %530 = vmatpush3.bf16.msra.mxu1 %v566_v29  ;;  %509 = vmatprep.subr.bf16.mxu0 %v567_v30 }
  0x1e   :  { %531 = vmatprep.subr.bf16.mxu1 %v568_v32 }
  0x20   :  { %510 = vmatpush3.bf16.msra.mxu0 %v569_v34 }
  0x21   :  { %532 = vmatpush3.bf16.msra.mxu1 %v570_v36 }
  0x23   :  { %385 = vmatmul.mubr.bf16.vlgmr.msra.gmra.mrb[0].mxu0 %v92_v4 }
  0x24   :  { %425 = vmatmul.mubr.bf16.vlgmr.msra.gmra.mrb[0].mxu1 %v94_v5 }
  0xf6   :  { %v511_v6 = vpop.f32.mrb[0].mxu0 }
  0xf7   :  { %v533_v7 = vpop.f32.mrb[0].mxu1  ;;  %v512_v8 = vpop.f32.mrb[1].mxu0 }
  0xf8   :  { %v534_v9 = vpop.f32.mrb[1].mxu1  ;;  %v513_v10 = vadd.f32 %v512_v8, %v511_v6  ;;  %v514_v12 = vpop.f32.mrb[2].mxu0 }
  0xf9   :  { %v535_v11 = vadd.f32 %v534_v9, %v533_v7  ;;  %v536_v13 = vpop.f32.mrb[2].mxu1  ;;  %v515_v15 = vpop.f32.mrb[3].mxu0 }
  0xfa   :  { %v537_v16 = vpop.f32.mrb[3].mxu1 }
  0xfb   :  { %v427_v17 = vadd.f32 %v535_v11, %v513_v10 }
  0xfd   :  { %v445_v19 = vmul.f32 %v493_v14, %v427_v17 }
  0xff   :  { %v453_v20 = vadd.f32 %v494_v18, %v445_v19 }
 0x101   :  { %v454_v21 = vmax.f32 %v453_v20, 0.0 }
 0x103   :  { %v455_v22 = vpack.c.bf16 %v454_v21, %v454_v21 }
 0x105   :  { %456 = vst [vmem:[%s729_s6] sm:$0xf] %v455_v22 }

// kernel: densenet121_forward.186
= control target key start
LH: loop header
LB: loop body
LE: loop exit
PB: predicated region body
PF: predicated region fallthrough
CT: control target
= control target key end

     0   :  { %s821_s21 = smov 0   ;;  %s823_s22 = smov 0   ;;  %s892_s0 = inlined_call_operand.vmem [shape: bf16[8,1024], index: 0, kind: input, shape index: {}]   ;;  %s893_s1 = inlined_call_operand.vmem [shape: bf16[640,128], index: 1, kind: input, shape index: {}]   ;;  %s894_s2 = inlined_call_operand.vmem [shape: f32[1,640], index: 2, kind: input, shape index: {}]   ;;  %s895_s3 = inlined_call_operand.vmem [shape: f32[1,640], index: 3, kind: input, shape index: {}]   ;;  %s896_s4 = inlined_call_operand.vmem [shape: f32[1,128], index: 4, kind: input, shape index: {}]   ;;  %s897_s5 = inlined_call_operand.vmem [shape: f32[1,128], index: 5, kind: input, shape index: {}]   ;;  %s898_s6 = inlined_call_operand.vmem [shape: bf16[8,128], index: 6, kind: output, shape index: {}]  }
   0x1   :  { %s825_s23 = smov 0  }
   0x2 LB: > { %s28_s24 = sadd.s32 1, %s777_s22  ;;  %p674_p0 = scmp.ge.s32.totalorder %s781_s23, 1  ;;  %s781_s23 = sphi %s825_s23, %s16_s23   ;;  %s777_s22 = sphi %s823_s22, %s900_s22   ;;  %s773_s21 = sphi %s821_s21, %s899_s21  }
   0x3   : > { %p29_p1 = scmp.ge.s32.totalorder %s28_s24, 5  ;;  %p286_p2 = scmp.lt.s32.totalorder %s781_s23, 6 }
   0x5   : > { %s902_s24 = smov (%p29_p1, %s28_s24), 0  ;;  %p287_p3 = pnand %p674_p0, %p286_p2 }
   0x6   : > { %p343_p4 = scmp.lt.s32.totalorder (!%p287_p3), %s773_s21, 7  ;;  %s676_s25 = sshll.u32 (!%p287_p3), %s773_s21, 4 }
   0x7   : > { %290 = sbr.rel (%p287_p3) target bundleno = 286 (0x11e), region = 44  ;;  %p350_p5 = scmp.lt.s32.totalorder (!%p287_p3), %s676_s25, 79 }
   0x8   : > { %p358_p6 = scmp.lt.s32.totalorder (!%p287_p3), %s773_s21, 4  ;;  %p678_p7 = scmp.ne.s32.totalorder (!%p287_p3), %s773_s21, 0 }
   0xe   : > { %s344_s26 = scalar_select %p343_p4, %s773_s21, 7 }
   0xf   : > { %s904_s25 = smov (!%p350_p5, %s676_s25), 79  ;;  %381 = sbr.rel (%p678_p7) target bundleno = 22 (0x16), region = 48 }
  0x10   : > { %s675_s27 = sshll.u32 %s344_s26, 2  ;;  %s677_s7 = sshll.u32 %s904_s25, 2  ;;  %v783_v0 = vmov (!%p678_p7), 0.0  }
  0x11   : > { %s348_s30 = scalar_lea.vmem %s892_s0, %s675_s27  ;;  %s851_s10 = scalar_lea.vmem %s893_s1, %s677_s7  ;;  %382 = vst [vmem:[#allocation2] sm:$0xff] (!%p678_p7), %v783_v0 }
  0x12   : > { %s854_s11 = scalar_select %p358_p6, %s773_s21, 4 }
  0x14   : > { %s360_s14 = scalar_lea.vmem %s894_s2, %s854_s11  ;;  %s363_s17 = scalar_lea.vmem %s895_s3, %s854_s11 }
  0x16 PF: > { %v751_v1 = vld [vmem:[%s851_s10] sm:$0xff]   ;;  %v784_v2 = vmov 0.0   ;;  %v752_v3 = vld [vmem:[%s851_s10 + $0x8] sm:$0xff]   ;;  %vm785_vm0 = vmmov 0   ;;  %v753_v4 = vld [vmem:[%s851_s10 + $0x10] sm:$0xff]   ;;  %p689_p8 = scmp.ne.s32.totalorder %s773_s21, 4 }
  0x17   : > { %704 = vmatprep.subr.bf16.mxu0 %v784_v2  ;;  %720 = vmatprep.mubr.msk.bf16.mxu0 %vm785_vm0, %v784_v2  ;;  %v754_v5 = vld [vmem:[%s851_s10 + $0x18] sm:$0xff]   ;;  %v383_v6 = vld [vmem:[%s348_s30] sm:$0xf]  ;;  %v756_v11 = vld [vmem:[%s851_s10 + $0x28] sm:$0xff]  }
  0x18   : > { %705 = vmatpush3.bf16.msra.mxu0 %v751_v1  ;;  %v384_v7 = vunpack.c.l.bf16 %v383_v6  ;;  %v755_v8 = vld [vmem:[%s851_s10 + $0x20] sm:$0xff]   ;;  %v757_v14 = vld [vmem:[%s851_s10 + $0x30] sm:$0xff]   ;;  %v758_v16 = vld [vmem:[%s851_s10 + $0x38] sm:$0xff]  }
  0x19   : > { %706 = vmatprep.subr.bf16.mxu0 %v784_v2  ;;  %v679_v9 = vld [vmem:[%s360_s14] ss:$0 sm:$0xff] }
  0x1a   : > { %v392_v10 = vmul.f32 %v679_v9, %v384_v7  ;;  %v680_v12 = vld [vmem:[%s363_s17] ss:$0 sm:$0xff] }
  0x1b   : > { %v402_v18 = vld [vmem:[#allocation2] sm:$0xff] }
  0x1c   : > { %707 = vmatpush3.bf16.msra.mxu0 %v752_v3  ;;  %v400_v13 = vadd.f32 %v680_v12, %v392_v10  ;;  %v690_v25 = vld [vmem:[%s896_s4] ss:$0 sm:$0xff] (!%p689_p8) }
  0x1d   : > { %708 = vmatprep.subr.bf16.mxu0 %v784_v2  ;;  %v691_v26 = vld [vmem:[%s897_s5] ss:$0 sm:$0xff] (!%p689_p8) }
  0x1e   : > { %v401_v15 = vmax.f32 %v400_v13, 0.0 }
  0x20   : > { %709 = vmatpush3.bf16.msra.mxu0 %v753_v4  ;;  %v403_v17 = vpack.c.bf16 %v401_v15, %v401_v15 }
  0x21   : > { %710 = vmatprep.subr.bf16.mxu0 %v784_v2 }
  0x24   : > { %711 = vmatpush3.bf16.msra.mxu0 %v754_v5 }
  0x25   : > { %712 = vmatprep.subr.bf16.mxu0 %v784_v2 }
  0x28   : > { %713 = vmatpush3.bf16.msra.mxu0 %v755_v8 }
  0x29   : > { %714 = vmatprep.subr.bf16.mxu0 %v784_v2 }
  0x2c   : > { %715 = vmatpush3.bf16.msra.mxu0 %v756_v11 }
  0x2d   : > { %716 = vmatprep.subr.bf16.mxu0 %v784_v2 }
  0x30   : > { %717 = vmatpush3.bf16.msra.mxu0 %v757_v14 }
  0x31   : > { %718 = vmatprep.subr.bf16.mxu0 %v784_v2 }
  0x34   : > { %719 = vmatpush3.bf16.msra.mxu0 %v758_v16 }
  0x37   : > { %721 = vmatmul.mubr.bf16.vlgmr.msra.gmra.mrb[0].mxu0 %v403_v17 }
 0x107   : > { %513 = sbr.rel (%p689_p8) target bundleno = 286 (0x11e), region = 52 }
 0x10a   : > { %v502_v19 = vpop.f32.mrb[0].mxu0 }
 0x10b   : > { %v508_v20 = vadd.f32 %v502_v19, %v402_v18  ;;  %v722_v21 = vpop.f32.mrb[1].mxu0 }
 0x10c   : > { %v505_v22 = vpop.f32.mrb[2].mxu0 }
 0x10d   : > { %509 = vst [vmem:[#allocation2] sm:$0xff] %v508_v20  ;;  %v723_v23 = vpop.f32.mrb[3].mxu0 }
 0x114   : > { %v514_v24 = vld [vmem:[#allocation2] sm:$0xff] }
 0x115   : > { %v522_v27 = vmul.f32 %v690_v25, %v514_v24 }
 0x117   : > { %v530_v28 = vadd.f32 %v691_v26, %v522_v27 }
 0x119   : > { %v531_v29 = vmax.f32 %v530_v28, 0.0 }
 0x11b   : > { %v532_v30 = vpack.c.bf16 %v531_v29, %v531_v29 }
 0x11d   : > { %533 = vst [vmem:[%s898_s6] sm:$0xf] %v532_v30 }
 0x11e PF: > { %s16_s23 = sadd.s32 1, %s781_s23   ;;  %s899_s21 = smov %s777_s22 }
 0x11f   : > { %p13_p9 = scmp.ge.s32.totalorder %s16_s23, 7   ;;  %s900_s22 = smov %s902_s24 }
 0x121   :  { %15 = sbr.rel (!%p13_p9) target bundleno = 2 (0x2), region = 97 }

// kernel: densenet121_forward.194
= control target key start
LH: loop header
LB: loop body
LE: loop exit
PB: predicated region body
PF: predicated region fallthrough
CT: control target
= control target key end

     0   :  { %s921_s21 = smov 0   ;;  %s923_s22 = smov 0   ;;  %s1010_s0 = inlined_call_operand.vmem [shape: bf16[8,1024], index: 0, kind: input, shape index: {}]   ;;  %s1011_s1 = inlined_call_operand.vmem [shape: bf16[768,128], index: 1, kind: input, shape index: {}]   ;;  %s1012_s2 = inlined_call_operand.vmem [shape: f32[1,768], index: 2, kind: input, shape index: {}]   ;;  %s1013_s3 = inlined_call_operand.vmem [shape: f32[1,768], index: 3, kind: input, shape index: {}]   ;;  %s1014_s4 = inlined_call_operand.vmem [shape: f32[1,128], index: 4, kind: input, shape index: {}]   ;;  %s1015_s5 = inlined_call_operand.vmem [shape: f32[1,128], index: 5, kind: input, shape index: {}]   ;;  %s1016_s6 = inlined_call_operand.vmem [shape: bf16[8,128], index: 6, kind: output, shape index: {}]  }
   0x1   :  { %s925_s23 = smov 0  }
   0x2 LB: > { %s28_s24 = sadd.s32 1, %s879_s22  ;;  %p768_p0 = scmp.ge.s32.totalorder %s883_s23, 1  ;;  %s883_s23 = sphi %s925_s23, %s16_s23   ;;  %s879_s22 = sphi %s923_s22, %s1018_s22   ;;  %s875_s21 = sphi %s921_s21, %s1017_s21  }
   0x3   : > { %p29_p1 = scmp.ge.s32.totalorder %s28_s24, 3  ;;  %p292_p2 = scmp.lt.s32.totalorder %s883_s23, 4 }
   0x5   : > { %s1020_s24 = smov (%p29_p1, %s28_s24), 0  ;;  %p293_p3 = pnand %p768_p0, %p292_p2 }
   0x6   : > { %s769_s25 = sshll.u32 (!%p293_p3), %s875_s21, 1  ;;  %s771_s26 = sshll.u32 (!%p293_p3), %s875_s21, 5 }
   0x7   : > { %296 = sbr.rel (%p293_p3) target bundleno = 293 (0x125), region = 44  ;;  %p353_p4 = scmp.lt.s32.totalorder (!%p293_p3), %s769_s25, 7 }
   0x8   : > { %p361_p5 = scmp.lt.s32.totalorder (!%p293_p3), %s771_s26, 95  ;;  %p370_p6 = scmp.lt.s32.totalorder (!%p293_p3), %s769_s25, 5 }
   0x9   : > { %p775_p7 = scmp.ne.s32.totalorder (!%p293_p3), %s875_s21, 0 }
   0xe   : > { %s354_s27 = scalar_select %p353_p4, %s769_s25, 7 }
   0xf   : > { %s1022_s26 = smov (!%p361_p5, %s771_s26), 95  ;;  %s1024_s25 = smov (!%p370_p6, %s769_s25), 5 }
  0x10   : > { %s770_s28 = sshll.u32 %s354_s27, 2  ;;  %s772_s8 = sshll.u32 %s1022_s26, 2  ;;  %v885_v0 = vmov (!%p775_p7), 0.0  }
  0x11   : > { %s946_s7 = scalar_lea.vmem %s1010_s0, %s770_s28  ;;  %s951_s11 = scalar_lea.vmem %s1011_s1, %s772_s8  ;;  %397 = vst [vmem:[#allocation2] sm:$0xff] (!%p775_p7), %v885_v0 }
  0x12   : > { %s372_s14 = scalar_lea.vmem %s1012_s2, %s1024_s25  ;;  %s377_s17 = scalar_lea.vmem %s1013_s3, %s1024_s25 }
  0x13   : > { %396 = sbr.rel (%p775_p7) target bundleno = 26 (0x1a), region = 48 }
  0x1a PF: > { %v845_v1 = vld [vmem:[%s951_s11 + $0x40] sm:$0xff]   ;;  %v847_v3 = vld [vmem:[%s951_s11 + $0x48] sm:$0xff]   ;;  %v849_v5 = vld [vmem:[%s951_s11 + $0x50] sm:$0xff]   ;;  %v403_v6 = vlaneseq  ;;  %p792_p8 = scmp.ne.s32.totalorder %s875_s21, 2 }
  0x1b   : > { %v846_v2 = vld [vmem:[%s951_s11] sm:$0xff]   ;;  %798 = vmatprep.subr.bf16.mxu0 %v845_v1  ;;  %v848_v4 = vld [vmem:[%s951_s11 + $0x8] sm:$0xff]   ;;  %v850_v7 = vld [vmem:[%s951_s11 + $0x10] sm:$0xff]  }
  0x1c   : > { %799 = vmatpush3.bf16.msra.mxu0 %v846_v2  ;;  %v851_v8 = vld [vmem:[%s951_s11 + $0x58] sm:$0xff]   ;;  %v404_v9 = vshrl.u32 %v403_v6, 7  ;;  %v853_v11 = vld [vmem:[%s951_s11 + $0x60] sm:$0xff]   ;;  %v855_v15 = vld [vmem:[%s951_s11 + $0x68] sm:$0xff]  }
  0x1d   : > { %800 = vmatprep.subr.bf16.mxu0 %v847_v3  ;;  %v852_v10 = vld [vmem:[%s951_s11 + $0x18] sm:$0xff]   ;;  %v854_v14 = vld [vmem:[%s951_s11 + $0x20] sm:$0xff]   ;;  %v856_v25 = vld [vmem:[%s951_s11 + $0x28] sm:$0xff]  }
  0x1e   : > { %v405_v12 = vsub.s32 0, %v404_v9  ;;  %v409_v13 = vsub.s32 1, %v404_v9  ;;  %v398_v16 = vld [vmem:[%s946_s7] sm:$0xff]  ;;  %v857_v28 = vld [vmem:[%s951_s11 + $0x70] sm:$0xff]   ;;  %v859_v33 = vld [vmem:[%s951_s11 + $0x78] sm:$0xff]  }
  0x1f   : > { %v401_v17 = vld [vmem:[%s372_s14] sm:$0x3]  ;;  %v399_v19 = vunpack.c.l.bf16 %v398_v16  ;;  %v400_v20 = vunpack.c.h.bf16 %v398_v16  ;;  %v858_v31 = vld [vmem:[%s951_s11 + $0x30] sm:$0xff]   ;;  %v860_v36 = vld [vmem:[%s951_s11 + $0x38] sm:$0xff]  }
  0x20   : > { %801 = vmatpush3.bf16.msra.mxu0 %v848_v4  ;;  %v415_v18 = vld [vmem:[%s377_s17] sm:$0x3]  ;;  %v406_v21 = vrot.slane %v401_v17, %v405_v12  ;;  %v410_v22 = vrot.slane %v401_v17, %v409_v13 }
  0x21   : > { %802 = vmatprep.subr.bf16.mxu0 %v849_v5  ;;  %v420_v23 = vrot.slane %v415_v18, %v405_v12  ;;  %v424_v24 = vrot.slane %v415_v18, %v409_v13  ;;  %v431_v39 = vld [vmem:[#allocation2] sm:$0xff] }
  0x22   : > { %v414_v26 = vmul.f32 %v410_v22, %v400_v20  ;;  %v413_v27 = vmul.f32 %v406_v21, %v399_v19  ;;  %v793_v46 = vld [vmem:[%s1014_s4] ss:$0 sm:$0xff] (!%p792_p8) }
  0x23   : > { %v794_v47 = vld [vmem:[%s1015_s5] ss:$0 sm:$0xff] (!%p792_p8) }
  0x24   : > { %803 = vmatpush3.bf16.msra.mxu0 %v850_v7  ;;  %v428_v29 = vadd.f32 %v424_v24, %v414_v26  ;;  %v427_v30 = vadd.f32 %v420_v23, %v413_v27 }
  0x25   : > { %804 = vmatprep.subr.bf16.mxu0 %v851_v8 }
  0x26   : > { %v430_v32 = vmax.f32 %v428_v29, 0.0  ;;  %v429_v35 = vmax.f32 %v427_v30, 0.0 }
  0x28   : > { %805 = vmatpush3.bf16.msra.mxu0 %v852_v10  ;;  %v433_v34 = vpack.c.bf16 %v430_v32, %v430_v32  ;;  %v432_v37 = vpack.c.bf16 %v429_v35, %v429_v35 }
  0x29   : > { %806 = vmatprep.subr.bf16.mxu0 %v853_v11 }
  0x2a   : > { %594 = vmatprep.mubr.bf16.mxu0 %v433_v34 }
  0x2c   : > { %807 = vmatpush3.bf16.msra.mxu0 %v854_v14 }
  0x2d   : > { %808 = vmatprep.subr.bf16.mxu0 %v855_v15 }
  0x30   : > { %809 = vmatpush3.bf16.msra.mxu0 %v856_v25 }
  0x31   : > { %810 = vmatprep.subr.bf16.mxu0 %v857_v28 }
  0x34   : > { %811 = vmatpush3.bf16.msra.mxu0 %v858_v31 }
  0x35   : > { %812 = vmatprep.subr.bf16.mxu0 %v859_v33 }
  0x38   : > { %813 = vmatpush3.bf16.msra.mxu0 %v860_v36 }
  0x3b   : > { %595 = vmatmul.mubr.bf16.vlgmr.msra.gmra.mrb[0].mxu0 %v432_v37 }
 0x10e   : > { %v814_v38 = vpop.f32.mrb[0].mxu0  ;;  %607 = sbr.rel (%p792_p8) target bundleno = 293 (0x125), region = 52 }
 0x10f   : > { %v815_v40 = vpop.f32.mrb[1].mxu0 }
 0x110   : > { %v816_v41 = vadd.f32 %v815_v40, %v814_v38  ;;  %v817_v42 = vpop.f32.mrb[2].mxu0 }
 0x111   : > { %v818_v43 = vpop.f32.mrb[3].mxu0 }
 0x112   : > { %v602_v44 = vadd.f32 %v816_v41, %v431_v39 }
 0x114   : > { %603 = vst [vmem:[#allocation2] sm:$0xff] %v602_v44 }
 0x11b   : > { %v608_v45 = vld [vmem:[#allocation2] sm:$0xff] }
 0x11c   : > { %v616_v48 = vmul.f32 %v793_v46, %v608_v45 }
 0x11e   : > { %v624_v49 = vadd.f32 %v794_v47, %v616_v48 }
 0x120   : > { %v625_v50 = vmax.f32 %v624_v49, 0.0 }
 0x122   : > { %v626_v51 = vpack.c.bf16 %v625_v50, %v625_v50 }
 0x124   : > { %627 = vst [vmem:[%s1016_s6] sm:$0xf] %v626_v51 }
 0x125 PF: > { %s16_s23 = sadd.s32 1, %s883_s23   ;;  %s1017_s21 = smov %s879_s22 }
 0x126   : > { %p13_p9 = scmp.ge.s32.totalorder %s16_s23, 5   ;;  %s1018_s22 = smov %s1020_s24 }
 0x128   :  { %15 = sbr.rel (!%p13_p9) target bundleno = 2 (0x2), region = 97 }

// kernel: densenet121_forward.202
= control target key start
LH: loop header
LB: loop body
LE: loop exit
PB: predicated region body
PF: predicated region fallthrough
CT: control target
= control target key end

     0   :  { %s821_s21 = smov 0   ;;  %s823_s22 = smov 0   ;;  %s892_s0 = inlined_call_operand.vmem [shape: bf16[8,1024], index: 0, kind: input, shape index: {}]   ;;  %s893_s1 = inlined_call_operand.vmem [shape: bf16[896,128], index: 1, kind: input, shape index: {}]   ;;  %s894_s2 = inlined_call_operand.vmem [shape: f32[1,896], index: 2, kind: input, shape index: {}]   ;;  %s895_s3 = inlined_call_operand.vmem [shape: f32[1,896], index: 3, kind: input, shape index: {}]   ;;  %s896_s4 = inlined_call_operand.vmem [shape: f32[1,128], index: 4, kind: input, shape index: {}]   ;;  %s897_s5 = inlined_call_operand.vmem [shape: f32[1,128], index: 5, kind: input, shape index: {}]   ;;  %s898_s6 = inlined_call_operand.vmem [shape: bf16[8,128], index: 6, kind: output, shape index: {}]  }
   0x1   :  { %s825_s23 = smov 0  }
   0x2 LB: > { %s28_s24 = sadd.s32 1, %s777_s22  ;;  %p674_p0 = scmp.ge.s32.totalorder %s781_s23, 1  ;;  %s781_s23 = sphi %s825_s23, %s16_s23   ;;  %s777_s22 = sphi %s823_s22, %s900_s22   ;;  %s773_s21 = sphi %s821_s21, %s899_s21  }
   0x3   : > { %p29_p1 = scmp.ge.s32.totalorder %s28_s24, 7  ;;  %p286_p2 = scmp.lt.s32.totalorder %s781_s23, 8 }
   0x5   : > { %s902_s24 = smov (%p29_p1, %s28_s24), 0  ;;  %p287_p3 = pnand %p674_p0, %p286_p2 }
   0x6   : > { %p343_p4 = scmp.lt.s32.totalorder (!%p287_p3), %s773_s21, 7  ;;  %s676_s25 = sshll.u32 (!%p287_p3), %s773_s21, 4 }
   0x7   : > { %290 = sbr.rel (%p287_p3) target bundleno = 286 (0x11e), region = 44  ;;  %p350_p5 = scmp.lt.s32.totalorder (!%p287_p3), %s676_s25, 111 }
   0x8   : > { %p358_p6 = scmp.lt.s32.totalorder (!%p287_p3), %s773_s21, 6  ;;  %p678_p7 = scmp.ne.s32.totalorder (!%p287_p3), %s773_s21, 0 }
   0xe   : > { %s344_s26 = scalar_select %p343_p4, %s773_s21, 7 }
   0xf   : > { %s904_s25 = smov (!%p350_p5, %s676_s25), 111  ;;  %381 = sbr.rel (%p678_p7) target bundleno = 22 (0x16), region = 48 }
  0x10   : > { %s675_s27 = sshll.u32 %s344_s26, 2  ;;  %s677_s7 = sshll.u32 %s904_s25, 2  ;;  %v783_v0 = vmov (!%p678_p7), 0.0  }
  0x11   : > { %s348_s30 = scalar_lea.vmem %s892_s0, %s675_s27  ;;  %s851_s10 = scalar_lea.vmem %s893_s1, %s677_s7  ;;  %382 = vst [vmem:[#allocation2] sm:$0xff] (!%p678_p7), %v783_v0 }
  0x12   : > { %s854_s11 = scalar_select %p358_p6, %s773_s21, 6 }
  0x14   : > { %s360_s14 = scalar_lea.vmem %s894_s2, %s854_s11  ;;  %s363_s17 = scalar_lea.vmem %s895_s3, %s854_s11 }
  0x16 PF: > { %v751_v1 = vld [vmem:[%s851_s10] sm:$0xff]   ;;  %v784_v2 = vmov 0.0   ;;  %v752_v3 = vld [vmem:[%s851_s10 + $0x8] sm:$0xff]   ;;  %vm785_vm0 = vmmov 0   ;;  %v753_v4 = vld [vmem:[%s851_s10 + $0x10] sm:$0xff]   ;;  %p689_p8 = scmp.ne.s32.totalorder %s773_s21, 6 }
  0x17   : > { %704 = vmatprep.subr.bf16.mxu0 %v784_v2  ;;  %720 = vmatprep.mubr.msk.bf16.mxu0 %vm785_vm0, %v784_v2  ;;  %v754_v5 = vld [vmem:[%s851_s10 + $0x18] sm:$0xff]   ;;  %v383_v6 = vld [vmem:[%s348_s30] sm:$0xf]  ;;  %v756_v11 = vld [vmem:[%s851_s10 + $0x28] sm:$0xff]  }
  0x18   : > { %705 = vmatpush3.bf16.msra.mxu0 %v751_v1  ;;  %v384_v7 = vunpack.c.l.bf16 %v383_v6  ;;  %v755_v8 = vld [vmem:[%s851_s10 + $0x20] sm:$0xff]   ;;  %v757_v14 = vld [vmem:[%s851_s10 + $0x30] sm:$0xff]   ;;  %v758_v16 = vld [vmem:[%s851_s10 + $0x38] sm:$0xff]  }
  0x19   : > { %706 = vmatprep.subr.bf16.mxu0 %v784_v2  ;;  %v679_v9 = vld [vmem:[%s360_s14] ss:$0 sm:$0xff] }
  0x1a   : > { %v392_v10 = vmul.f32 %v679_v9, %v384_v7  ;;  %v680_v12 = vld [vmem:[%s363_s17] ss:$0 sm:$0xff] }
  0x1b   : > { %v402_v18 = vld [vmem:[#allocation2] sm:$0xff] }
  0x1c   : > { %707 = vmatpush3.bf16.msra.mxu0 %v752_v3  ;;  %v400_v13 = vadd.f32 %v680_v12, %v392_v10  ;;  %v690_v25 = vld [vmem:[%s896_s4] ss:$0 sm:$0xff] (!%p689_p8) }
  0x1d   : > { %708 = vmatprep.subr.bf16.mxu0 %v784_v2  ;;  %v691_v26 = vld [vmem:[%s897_s5] ss:$0 sm:$0xff] (!%p689_p8) }
  0x1e   : > { %v401_v15 = vmax.f32 %v400_v13, 0.0 }
  0x20   : > { %709 = vmatpush3.bf16.msra.mxu0 %v753_v4  ;;  %v403_v17 = vpack.c.bf16 %v401_v15, %v401_v15 }
  0x21   : > { %710 = vmatprep.subr.bf16.mxu0 %v784_v2 }
  0x24   : > { %711 = vmatpush3.bf16.msra.mxu0 %v754_v5 }
  0x25   : > { %712 = vmatprep.subr.bf16.mxu0 %v784_v2 }
  0x28   : > { %713 = vmatpush3.bf16.msra.mxu0 %v755_v8 }
  0x29   : > { %714 = vmatprep.subr.bf16.mxu0 %v784_v2 }
  0x2c   : > { %715 = vmatpush3.bf16.msra.mxu0 %v756_v11 }
  0x2d   : > { %716 = vmatprep.subr.bf16.mxu0 %v784_v2 }
  0x30   : > { %717 = vmatpush3.bf16.msra.mxu0 %v757_v14 }
  0x31   : > { %718 = vmatprep.subr.bf16.mxu0 %v784_v2 }
  0x34   : > { %719 = vmatpush3.bf16.msra.mxu0 %v758_v16 }
  0x37   : > { %721 = vmatmul.mubr.bf16.vlgmr.msra.gmra.mrb[0].mxu0 %v403_v17 }
 0x107   : > { %513 = sbr.rel (%p689_p8) target bundleno = 286 (0x11e), region = 52 }
 0x10a   : > { %v502_v19 = vpop.f32.mrb[0].mxu0 }
 0x10b   : > { %v508_v20 = vadd.f32 %v502_v19, %v402_v18  ;;  %v722_v21 = vpop.f32.mrb[1].mxu0 }
 0x10c   : > { %v505_v22 = vpop.f32.mrb[2].mxu0 }
 0x10d   : > { %509 = vst [vmem:[#allocation2] sm:$0xff] %v508_v20  ;;  %v723_v23 = vpop.f32.mrb[3].mxu0 }
 0x114   : > { %v514_v24 = vld [vmem:[#allocation2] sm:$0xff] }
 0x115   : > { %v522_v27 = vmul.f32 %v690_v25, %v514_v24 }
 0x117   : > { %v530_v28 = vadd.f32 %v691_v26, %v522_v27 }
 0x119   : > { %v531_v29 = vmax.f32 %v530_v28, 0.0 }
 0x11b   : > { %v532_v30 = vpack.c.bf16 %v531_v29, %v531_v29 }
 0x11d   : > { %533 = vst [vmem:[%s898_s6] sm:$0xf] %v532_v30 }
 0x11e PF: > { %s16_s23 = sadd.s32 1, %s781_s23   ;;  %s899_s21 = smov %s777_s22 }
 0x11f   : > { %p13_p9 = scmp.ge.s32.totalorder %s16_s23, 9   ;;  %s900_s22 = smov %s902_s24 }
 0x121   :  { %15 = sbr.rel (!%p13_p9) target bundleno = 2 (0x2), region = 97 }

// kernel: densenet121_forward.210
= control target key start
LH: loop header
LB: loop body
LE: loop exit
PB: predicated region body
PF: predicated region fallthrough
CT: control target
= control target key end

     0   :  { %s1174_s21 = smov 0   ;;  %s1176_s22 = smov 0   ;;  %s1281_s0 = inlined_call_operand.vmem [shape: bf16[8,1024], index: 0, kind: input, shape index: {}]   ;;  %s1282_s1 = inlined_call_operand.vmem [shape: bf16[1024,128], index: 1, kind: input, shape index: {}]   ;;  %s1283_s2 = inlined_call_operand.vmem [shape: f32[1,1024], index: 2, kind: input, shape index: {}]   ;;  %s1284_s3 = inlined_call_operand.vmem [shape: f32[1,1024], index: 3, kind: input, shape index: {}]   ;;  %s1285_s4 = inlined_call_operand.vmem [shape: f32[1,128], index: 4, kind: input, shape index: {}]   ;;  %s1286_s5 = inlined_call_operand.vmem [shape: f32[1,128], index: 5, kind: input, shape index: {}]   ;;  %s1287_s6 = inlined_call_operand.vmem [shape: bf16[8,128], index: 6, kind: output, shape index: {}]  }
   0x1   :  { %s1178_s23 = smov 0  }
   0x2 LB: > { %s28_s24 = sadd.s32 1, %s1132_s22  ;;  %p967_p0 = scmp.ge.s32.totalorder %s1136_s23, 1  ;;  %s1136_s23 = sphi %s1178_s23, %s16_s23   ;;  %s1132_s22 = sphi %s1176_s22, %s1289_s22   ;;  %s1128_s21 = sphi %s1174_s21, %s1288_s21  }
   0x3   : > { %p29_p1 = scmp.ge.s32.totalorder %s28_s24, 2  ;;  %p292_p2 = scmp.lt.s32.totalorder %s1136_s23, 3 }
   0x5   : > { %s1291_s24 = smov (%p29_p1, %s28_s24), 0  ;;  %p293_p3 = pnand %p967_p0, %p292_p2 }
   0x6   : > { %s968_s25 = sshll.u32 (!%p293_p3), %s1128_s21, 2  ;;  %s970_s26 = sshll.u32 (!%p293_p3), %s1128_s21, 6 }
   0x7   : > { %296 = sbr.rel (%p293_p3) target bundleno = 296 (0x128), region = 44  ;;  %p353_p4 = scmp.lt.s32.totalorder (!%p293_p3), %s968_s25, 7 }
   0x8   : > { %p361_p5 = scmp.lt.s32.totalorder (!%p293_p3), %s970_s26, 127  ;;  %p974_p6 = scmp.ne.s32.totalorder (!%p293_p3), %s1128_s21, 0 }
   0xe   : > { %s1293_s25 = smov (!%p353_p4, %s968_s25), 7  ;;  %s1295_s26 = smov (!%p361_p5, %s970_s26), 127 }
   0xf   : > { %s969_s27 = sshll.u32 %s1293_s25, 2  ;;  %s372_s30 = scalar_lea.vmem %s1283_s2, %s1293_s25  ;;  %v1138_v0 = vmov (!%p974_p6), 0.0  }
  0x10   : > { %s1206_s9 = scalar_lea.vmem %s1281_s0, %s969_s27  ;;  %s971_s10 = sshll.u32 %s1295_s26, 2  ;;  %397 = vst [vmem:[#allocation2] sm:$0xff] (!%p974_p6), %v1138_v0 }
  0x11   : > { %s1211_s13 = scalar_lea.vmem %s1282_s1, %s971_s10  ;;  %s377_s16 = scalar_lea.vmem %s1284_s3, %s1293_s25 }
  0x12   : > { %396 = sbr.rel (%p974_p6) target bundleno = 25 (0x19), region = 48 }
  0x19 PF: > { %v1082_v1 = vld [vmem:[%s1211_s13 + $0x40] sm:$0xff]   ;;  %v1086_v5 = vld [vmem:[%s1211_s13 + $0x48] sm:$0xff]   ;;  %v1090_v9 = vld [vmem:[%s1211_s13 + $0x50] sm:$0xff]   ;;  %v406_v22 = vlaneseq  ;;  %p1007_p7 = scmp.ne.s32.totalorder %s1128_s21, 1 }
  0x1a   : > { %v1083_v2 = vld [vmem:[%s1211_s13 + $0xc0] sm:$0xff]   ;;  %1013 = vmatprep.subr.bf16.mxu0 %v1082_v1  ;;  %v1087_v6 = vld [vmem:[%s1211_s13 + $0xc8] sm:$0xff]   ;;  %v1091_v10 = vld [vmem:[%s1211_s13 + $0xd0] sm:$0xff]  }
  0x1b   : > { %v1084_v3 = vld [vmem:[%s1211_s13] sm:$0xff]   ;;  %1035 = vmatprep.subr.bf16.mxu1 %v1083_v2  ;;  %v1088_v7 = vld [vmem:[%s1211_s13 + $0x8] sm:$0xff]   ;;  %v1092_v11 = vld [vmem:[%s1211_s13 + $0x10] sm:$0xff]   ;;  %v407_v27 = vshrl.u32 %v406_v22, 7 }
  0x1c   : > { %v1085_v4 = vld [vmem:[%s1211_s13 + $0x80] sm:$0xff]   ;;  %1014 = vmatpush3.bf16.msra.mxu0 %v1084_v3  ;;  %v1089_v8 = vld [vmem:[%s1211_s13 + $0x88] sm:$0xff]   ;;  %v1093_v12 = vld [vmem:[%s1211_s13 + $0x90] sm:$0xff]  }
  0x1d   : > { %1036 = vmatpush3.bf16.msra.mxu1 %v1085_v4  ;;  %1015 = vmatprep.subr.bf16.mxu0 %v1086_v5  ;;  %v1094_v13 = vld [vmem:[%s1211_s13 + $0x58] sm:$0xff]   ;;  %v1098_v17 = vld [vmem:[%s1211_s13 + $0x60] sm:$0xff]   ;;  %v1102_v21 = vld [vmem:[%s1211_s13 + $0x68] sm:$0xff]   ;;  %v412_v32 = vsub.s32 1, %v407_v27  ;;  %v420_v34 = vsub.s32 3, %v407_v27  ;;  %v408_v36 = vsub.s32 0, %v407_v27 }
  0x1e   : > { %1037 = vmatprep.subr.bf16.mxu1 %v1087_v6  ;;  %v1095_v14 = vld [vmem:[%s1211_s13 + $0xd8] sm:$0xff]   ;;  %v1099_v18 = vld [vmem:[%s1211_s13 + $0xe0] sm:$0xff]   ;;  %v1103_v23 = vld [vmem:[%s1211_s13 + $0xe8] sm:$0xff]   ;;  %v416_v38 = vsub.s32 2, %v407_v27 }
  0x1f   : > { %v1096_v15 = vld [vmem:[%s1211_s13 + $0x18] sm:$0xff]   ;;  %v1100_v19 = vld [vmem:[%s1211_s13 + $0x20] sm:$0xff]   ;;  %v1104_v24 = vld [vmem:[%s1211_s13 + $0x28] sm:$0xff]  }
  0x20   : > { %1016 = vmatpush3.bf16.msra.mxu0 %v1088_v7  ;;  %v1097_v16 = vld [vmem:[%s1211_s13 + $0x98] sm:$0xff]   ;;  %v1101_v20 = vld [vmem:[%s1211_s13 + $0xa0] sm:$0xff]   ;;  %v1105_v25 = vld [vmem:[%s1211_s13 + $0xa8] sm:$0xff]  }
  0x21   : > { %1038 = vmatpush3.bf16.msra.mxu1 %v1089_v8  ;;  %1017 = vmatprep.subr.bf16.mxu0 %v1090_v9  ;;  %v1106_v26 = vld [vmem:[%s1211_s13 + $0x70] sm:$0xff]   ;;  %v1110_v31 = vld [vmem:[%s1211_s13 + $0x78] sm:$0xff]   ;;  %v398_v39 = vld [vmem:[%s1206_s9] sm:$0xff] }
  0x22   : > { %1039 = vmatprep.subr.bf16.mxu1 %v1091_v10  ;;  %v1107_v28 = vld [vmem:[%s1211_s13 + $0xf0] sm:$0xff]   ;;  %v1111_v33 = vld [vmem:[%s1211_s13 + $0xf8] sm:$0xff]   ;;  %v404_v40 = vld [vmem:[%s372_s30] sm:$0xf]  ;;  %v400_v42 = vunpack.c.l.bf16 %v398_v39  ;;  %v401_v43 = vunpack.c.h.bf16 %v398_v39 }
  0x23   : > { %v1108_v29 = vld [vmem:[%s1211_s13 + $0x30] sm:$0xff]   ;;  %v1112_v35 = vld [vmem:[%s1211_s13 + $0x38] sm:$0xff]   ;;  %v430_v41 = vld [vmem:[%s377_s16] sm:$0xf]  ;;  %v413_v44 = vrot.slane %v404_v40, %v412_v32  ;;  %v421_v49 = vrot.slane %v404_v40, %v420_v34  ;;  %v409_v52 = vrot.slane %v404_v40, %v408_v36  ;;  %v417_v54 = vrot.slane %v404_v40, %v416_v38 }
  0x24   : > { %1018 = vmatpush3.bf16.msra.mxu0 %v1092_v11  ;;  %v1109_v30 = vld [vmem:[%s1211_s13 + $0xb0] sm:$0xff]   ;;  %v1113_v37 = vld [vmem:[%s1211_s13 + $0xb8] sm:$0xff]   ;;  %v439_v45 = vrot.slane %v430_v41, %v412_v32  ;;  %v399_v46 = vld [vmem:[%s1206_s9 + $0x8] sm:$0xff]  ;;  %v447_v50 = vrot.slane %v430_v41, %v420_v34  ;;  %v435_v53 = vrot.slane %v430_v41, %v408_v36  ;;  %v443_v56 = vrot.slane %v430_v41, %v416_v38 }
  0x25   : > { %1040 = vmatpush3.bf16.msra.mxu1 %v1093_v12  ;;  %1019 = vmatprep.subr.bf16.mxu0 %v1094_v13  ;;  %v402_v47 = vunpack.c.l.bf16 %v399_v46  ;;  %v403_v48 = vunpack.c.h.bf16 %v399_v46  ;;  %v427_v51 = vmul.f32 %v413_v44, %v401_v43  ;;  %v426_v58 = vmul.f32 %v409_v52, %v400_v42  ;;  %v1009_v22 = vld [vmem:[%s1286_s5] ss:$0 sm:$0xff] (!%p1007_p7) }
  0x26   : > { %1041 = vmatprep.subr.bf16.mxu1 %v1095_v14 }
  0x27   : > { %v429_v55 = vmul.f32 %v421_v49, %v403_v48  ;;  %v453_v57 = vadd.f32 %v439_v45, %v427_v51  ;;  %v428_v59 = vmul.f32 %v417_v54, %v402_v47  ;;  %v452_v62 = vadd.f32 %v435_v53, %v426_v58 }
  0x28   : > { %1020 = vmatpush3.bf16.msra.mxu0 %v1096_v15  ;;  %v460_v15 = vld [vmem:[#allocation2] sm:$0xff] }
  0x29   : > { %1042 = vmatpush3.bf16.msra.mxu1 %v1097_v16  ;;  %1021 = vmatprep.subr.bf16.mxu0 %v1098_v17  ;;  %v455_v60 = vadd.f32 %v447_v50, %v429_v55  ;;  %v457_v61 = vmax.f32 %v453_v57, 0.0  ;;  %v454_v63 = vadd.f32 %v443_v56, %v428_v59  ;;  %v456_v2 = vmax.f32 %v452_v62, 0.0 }
  0x2a   : > { %1043 = vmatprep.subr.bf16.mxu1 %v1099_v18 }
  0x2b   : > { %v459_v0 = vmax.f32 %v455_v60, 0.0  ;;  %v462_v1 = vpack.c.bf16 %v457_v61, %v457_v61  ;;  %v458_v3 = vmax.f32 %v454_v63, 0.0  ;;  %v461_v5 = vpack.c.bf16 %v456_v2, %v456_v2 }
  0x2c   : > { %1022 = vmatpush3.bf16.msra.mxu0 %v1100_v19 }
  0x2d   : > { %1044 = vmatpush3.bf16.msra.mxu1 %v1101_v20  ;;  %1023 = vmatprep.subr.bf16.mxu0 %v1102_v21  ;;  %v464_v4 = vpack.c.bf16 %v459_v0, %v459_v0  ;;  %v463_v6 = vpack.c.bf16 %v458_v3, %v458_v3  ;;  %v1008_v21 = vld [vmem:[%s1285_s4] ss:$0 sm:$0xff] (!%p1007_p7) }
  0x2e   : > { %1045 = vmatprep.subr.bf16.mxu1 %v1103_v23  ;;  %753 = vmatprep.mubr.bf16.mxu0 %v462_v1 }
  0x2f   : > { %793 = vmatprep.mubr.bf16.mxu1 %v464_v4 }
  0x30   : > { %1024 = vmatpush3.bf16.msra.mxu0 %v1104_v24 }
  0x31   : > { %1046 = vmatpush3.bf16.msra.mxu1 %v1105_v25  ;;  %1025 = vmatprep.subr.bf16.mxu0 %v1106_v26 }
  0x32   : > { %1047 = vmatprep.subr.bf16.mxu1 %v1107_v28 }
  0x34   : > { %1026 = vmatpush3.bf16.msra.mxu0 %v1108_v29 }
  0x35   : > { %1048 = vmatpush3.bf16.msra.mxu1 %v1109_v30  ;;  %1027 = vmatprep.subr.bf16.mxu0 %v1110_v31 }
  0x36   : > { %1049 = vmatprep.subr.bf16.mxu1 %v1111_v33 }
  0x38   : > { %1028 = vmatpush3.bf16.msra.mxu0 %v1112_v35 }
  0x39   : > { %1050 = vmatpush3.bf16.msra.mxu1 %v1113_v37 }
  0x3b   : > { %754 = vmatmul.mubr.bf16.vlgmr.msra.gmra.mrb[0].mxu0 %v461_v5 }
  0x3c   : > { %794 = vmatmul.mubr.bf16.vlgmr.msra.gmra.mrb[0].mxu1 %v463_v6 }
 0x10e   : > { %v1029_v7 = vpop.f32.mrb[0].mxu0 }
 0x10f   : > { %v1051_v8 = vpop.f32.mrb[0].mxu1  ;;  %v1030_v9 = vpop.f32.mrb[1].mxu0 }
 0x110   : > { %v1052_v10 = vpop.f32.mrb[1].mxu1  ;;  %v1031_v11 = vadd.f32 %v1030_v9, %v1029_v7  ;;  %v1032_v13 = vpop.f32.mrb[2].mxu0 }
 0x111   : > { %v1053_v12 = vadd.f32 %v1052_v10, %v1051_v8  ;;  %v1054_v14 = vpop.f32.mrb[2].mxu1  ;;  %v1033_v16 = vpop.f32.mrb[3].mxu0  ;;  %806 = sbr.rel (%p1007_p7) target bundleno = 296 (0x128), region = 52 }
 0x112   : > { %v1055_v17 = vpop.f32.mrb[3].mxu1 }
 0x113   : > { %v796_v18 = vadd.f32 %v1053_v12, %v1031_v11 }
 0x115   : > { %v801_v19 = vadd.f32 %v796_v18, %v460_v15 }
 0x117   : > { %802 = vst [vmem:[#allocation2] sm:$0xff] %v801_v19 }
 0x11e   : > { %v807_v20 = vld [vmem:[#allocation2] sm:$0xff] }
 0x11f   : > { %v815_v23 = vmul.f32 %v1008_v21, %v807_v20 }
 0x121   : > { %v823_v24 = vadd.f32 %v1009_v22, %v815_v23 }
 0x123   : > { %v824_v25 = vmax.f32 %v823_v24, 0.0 }
 0x125   : > { %v825_v26 = vpack.c.bf16 %v824_v25, %v824_v25 }
 0x127   : > { %826 = vst [vmem:[%s1287_s6] sm:$0xf] %v825_v26 }
 0x128 PF: > { %s16_s23 = sadd.s32 1, %s1136_s23   ;;  %s1288_s21 = smov %s1132_s22 }
 0x129   : > { %p13_p8 = scmp.ge.s32.totalorder %s16_s23, 4   ;;  %s1289_s22 = smov %s1291_s24 }
 0x12b   :  { %15 = sbr.rel (!%p13_p8) target bundleno = 2 (0x2), region = 97 }

// kernel: densenet121_forward.217
= control target key start
LH: loop header
LB: loop body
LE: loop exit
PB: predicated region body
PF: predicated region fallthrough
CT: control target
= control target key end

     0   :  { %s114_s0 = inlined_call_operand.vmem [shape: bf16[4,8,512], index: 0, kind: input, shape index: {}]   ;;  %s115_s1 = inlined_call_operand.vmem [shape: bf16[8,512], index: 1, kind: output, shape index: {}]  }
   0x1   :  { %v8_v0 = vld [vmem:[%s114_s0] sm:$0xff]  ;;  %v10_v1 = vld [vmem:[%s114_s0 + $0x10] sm:$0xff]  ;;  %v9_v8 = vld [vmem:[%s114_s0 + $0x8] sm:$0xff] }
   0x2   :  { %v12_v2 = vld [vmem:[%s114_s0 + $0x20] sm:$0xff]  ;;  %v14_v3 = vld [vmem:[%s114_s0 + $0x30] sm:$0xff]  ;;  %v16_v4 = vunpack.c.l.bf16 %v8_v0  ;;  %v17_v5 = vunpack.c.h.bf16 %v8_v0  ;;  %v20_v6 = vunpack.c.l.bf16 %v10_v1  ;;  %v21_v7 = vunpack.c.h.bf16 %v10_v1  ;;  %v11_v9 = vld [vmem:[%s114_s0 + $0x18] sm:$0xff] }
   0x3   :  { %v24_v10 = vunpack.c.l.bf16 %v12_v2  ;;  %v25_v11 = vunpack.c.h.bf16 %v12_v2  ;;  %v28_v12 = vunpack.c.l.bf16 %v14_v3  ;;  %v29_v13 = vunpack.c.h.bf16 %v14_v3  ;;  %v13_v14 = vld [vmem:[%s114_s0 + $0x28] sm:$0xff]  ;;  %v15_v17 = vld [vmem:[%s114_s0 + $0x38] sm:$0xff] }
   0x4   :  { %v32_v15 = vadd.f32 %v20_v6, %v16_v4  ;;  %v35_v16 = vadd.f32 %v21_v7, %v17_v5  ;;  %v18_v18 = vunpack.c.l.bf16 %v9_v8  ;;  %v19_v19 = vunpack.c.h.bf16 %v9_v8 }
   0x5   :  { %v22_v20 = vunpack.c.l.bf16 %v11_v9  ;;  %v23_v21 = vunpack.c.h.bf16 %v11_v9  ;;  %v26_v22 = vunpack.c.l.bf16 %v13_v14  ;;  %v27_v23 = vunpack.c.h.bf16 %v13_v14 }
   0x6   :  { %v33_v24 = vadd.f32 %v32_v15, %v24_v10  ;;  %v36_v25 = vadd.f32 %v35_v16, %v25_v11  ;;  %v30_v26 = vunpack.c.l.bf16 %v15_v17  ;;  %v31_v27 = vunpack.c.h.bf16 %v15_v17 }
   0x7   :  { %v38_v28 = vadd.f32 %v22_v20, %v18_v18  ;;  %v41_v29 = vadd.f32 %v23_v21, %v19_v19 }
   0x8   :  { %v34_v30 = vadd.f32 %v33_v24, %v28_v12  ;;  %v37_v31 = vadd.f32 %v36_v25, %v29_v13 }
   0x9   :  { %v39_v32 = vadd.f32 %v38_v28, %v26_v22  ;;  %v42_v33 = vadd.f32 %v41_v29, %v27_v23 }
   0xa   :  { %v44_v34 = vmul.f32 0.25, %v34_v30  ;;  %v45_v35 = vmul.f32 0.25, %v37_v31 }
   0xb   :  { %v40_v36 = vadd.f32 %v39_v32, %v30_v26  ;;  %v43_v37 = vadd.f32 %v42_v33, %v31_v27 }
   0xc   :  { %v72_v38 = vpack.c.bf16 %v45_v35, %v44_v34 }
   0xd   :  { %v46_v39 = vmul.f32 0.25, %v40_v36  ;;  %v47_v40 = vmul.f32 0.25, %v43_v37 }
   0xe   :  { %64 = vst [vmem:[%s115_s1] sm:$0xff] %v72_v38 }
   0xf   :  { %v73_v41 = vpack.c.bf16 %v47_v40, %v46_v39 }
  0x11   :  { %65 = vst [vmem:[%s115_s1 + $0x8] sm:$0xff] %v73_v41 }

// kernel: densenet121_forward.216
= control target key start
LH: loop header
LB: loop body
LE: loop exit
PB: predicated region body
PF: predicated region fallthrough
CT: control target
= control target key end

     0   :  { %s1730_s21 = smov 0   ;;  %s1732_s22 = smov 0   ;;  %s2050_s0 = inlined_call_operand.vmem [shape: bf16[8,1024], index: 0, kind: input, shape index: {}]   ;;  %s2051_s1 = inlined_call_operand.vmem [shape: bf16[1024,512], index: 1, kind: input, shape index: {}]   ;;  %s2052_s2 = inlined_call_operand.vmem [shape: f32[1,1024], index: 2, kind: input, shape index: {}]   ;;  %s2053_s3 = inlined_call_operand.vmem [shape: f32[1,1024], index: 3, kind: input, shape index: {}]   ;;  %s2054_s4 = inlined_call_operand.vmem [shape: f32[1,512], index: 4, kind: input, shape index: {}, may-alias: {4,5}]   ;;  %s2055_s5 = inlined_call_operand.vmem [shape: f32[1,512], index: 5, kind: input, shape index: {}, may-alias: {4,5}]   ;;  %s2056_s6 = inlined_call_operand.vmem [shape: bf16[8,512], index: 6, kind: output, shape index: {}]  }
   0x1   :  { %s1734_s23 = smov 0   ;;  %s1736_s24 = smov 0  }
   0x2   :  { %s1738_s25 = smov 0   ;;  %s1740_s26 = smov 0  }
   0x3   :  { %s1742_s27 = smov 0  }
   0x4 LB: > { %s28_s4 = sadd.s32 1, %s1684_s25  ;;  %s31_s5 = sadd.s32 1, %s1688_s26  ;;  %s1692_s27 = sphi %s1742_s27, %s16_s27   ;;  %s1688_s26 = sphi %s1740_s26, %s2062_s26   ;;  %s1684_s25 = sphi %s1738_s25, %s2061_s25   ;;  %s1680_s24 = sphi %s1736_s24, %s2060_s24   ;;  %s1676_s23 = sphi %s1734_s23, %s2059_s23   ;;  %s1672_s22 = sphi %s1732_s22, %s2058_s22   ;;  %s1668_s21 = sphi %s1730_s21, %s2057_s21  }
   0x5   : > { %p29_p0 = scmp.ge.s32.totalorder %s28_s4, 2  ;;  %p79_p1 = scmp.ne.s32.totalorder %s1672_s22, %s1668_s21 }
   0x6   : > { %p80_p2 = scmp.eq.s32.totalorder %s1692_s27, 0  ;;  %s72_s7 = sadd.s32 1, %s1672_s22 }
   0x7   : > { %s2064_s4 = smov (%p29_p0, %s28_s4), 0  ;;  %s2066_s5 = smov (!%p29_p0, %s31_s5), %s1688_s26 }
   0x8   : > { %p81_p3 = por %p80_p2, %p79_p1  ;;  %p33_p4 = scmp.ge.s32.totalorder %s2066_s5, 2 }
   0x9   : > { %s67_s28 = ssub.s32 %s1684_s25, %s2064_s4  ;;  %p1400_p6 = scmp.ge.s32.totalorder %s1692_s27, 4 }
   0xa   : > { %s2068_s5 = smov (%p33_p4, %s2066_s5), 0 }
   0xb   : > { %s68_s29 = ssub.s32 %s1688_s26, %s2068_s5  ;;  %237 = sbr.rel (%p1400_p6) target bundleno = 57 (0x39), region = 16 }
   0xc   : > { %s69_s30 = sor.u32 %s68_s29, %s67_s28 }
   0xd   : > { %p70_p5 = scmp.eq.s32.totalorder %s69_s30, 0 }
   0xf   : > { %s1781_s8 = scalar_select %p70_p5, %s1672_s22, %s72_s7  }
  0x12   : > { %253 = sbr.rel (!%p81_p3) target bundleno = 57 (0x39), region = 24  ;;  %s255_s9 = sand.u32 (%p81_p3), 1, %s1672_s22  }
  0x13   : > { %s1403_s10 = sshll.u32 (%p81_p3), %s1688_s26, 1  ;;  %s1401_s11 = sshll.u32 (%p81_p3), %s255_s9, 9 }
  0x14   : > { %s1483_s12 = sshll.u32 (%p81_p3), %s1684_s25, 8  ;;  %s1795_s18 = scalar_lea.vmem (%p81_p3), [#allocation3], %s1401_s11 }
  0x15   : > { %s261_s13 = sadd.s32 (%p81_p3), %s1483_s12, %s1403_s10 }
  0x16   : > { %s1405_s14 = sshll.u32 (%p81_p3), %s261_s13, 2 }
  0x17   : > { %s1790_s17 = scalar_lea.vmem (%p81_p3), %s2051_s1, %s1405_s14 }
  0x18   : > { %v417_v0 = vld [vmem:[%s1790_s17] sm:$0xff] (%p81_p3)  ;;  %v419_v1 = vld [vmem:[%s1790_s17 + $0x10] sm:$0xff] (%p81_p3) }
  0x19   : > { %v421_v2 = vld [vmem:[%s1790_s17 + $0x20] sm:$0xff]  ;;  %418 = vst [vmem:[%s1795_s18] sm:$0xff] %v417_v0  ;;  %420 = vst [vmem:[%s1795_s18 + $0x8] sm:$0xff] %v419_v1  ;;  %v423_v3 = vld [vmem:[%s1790_s17 + $0x30] sm:$0xff] }
  0x1a   : > { %422 = vst [vmem:[%s1795_s18 + $0x10] sm:$0xff] %v421_v2  ;;  %v425_v4 = vld [vmem:[%s1790_s17 + $0x40] sm:$0xff]  ;;  %v427_v5 = vld [vmem:[%s1790_s17 + $0x50] sm:$0xff]  ;;  %424 = vst [vmem:[%s1795_s18 + $0x18] sm:$0xff] %v423_v3 }
  0x1b   : > { %426 = vst [vmem:[%s1795_s18 + $0x20] sm:$0xff] %v425_v4  ;;  %428 = vst [vmem:[%s1795_s18 + $0x28] sm:$0xff] %v427_v5  ;;  %v429_v6 = vld [vmem:[%s1790_s17 + $0x60] sm:$0xff]  ;;  %v431_v7 = vld [vmem:[%s1790_s17 + $0x70] sm:$0xff] }
  0x1c   : > { %v433_v8 = vld [vmem:[%s1790_s17 + $0x80] sm:$0xff]  ;;  %430 = vst [vmem:[%s1795_s18 + $0x30] sm:$0xff] %v429_v6  ;;  %432 = vst [vmem:[%s1795_s18 + $0x38] sm:$0xff] %v431_v7  ;;  %v435_v9 = vld [vmem:[%s1790_s17 + $0x90] sm:$0xff] }
  0x1d   : > { %434 = vst [vmem:[%s1795_s18 + $0x40] sm:$0xff] %v433_v8  ;;  %v437_v10 = vld [vmem:[%s1790_s17 + $0xa0] sm:$0xff]  ;;  %v439_v11 = vld [vmem:[%s1790_s17 + $0xb0] sm:$0xff]  ;;  %436 = vst [vmem:[%s1795_s18 + $0x48] sm:$0xff] %v435_v9 }
  0x1e   : > { %438 = vst [vmem:[%s1795_s18 + $0x50] sm:$0xff] %v437_v10  ;;  %440 = vst [vmem:[%s1795_s18 + $0x58] sm:$0xff] %v439_v11  ;;  %v441_v12 = vld [vmem:[%s1790_s17 + $0xc0] sm:$0xff]  ;;  %v443_v13 = vld [vmem:[%s1790_s17 + $0xd0] sm:$0xff] }
  0x1f   : > { %v445_v14 = vld [vmem:[%s1790_s17 + $0xe0] sm:$0xff]  ;;  %442 = vst [vmem:[%s1795_s18 + $0x60] sm:$0xff] %v441_v12  ;;  %444 = vst [vmem:[%s1795_s18 + $0x68] sm:$0xff] %v443_v13  ;;  %v447_v15 = vld [vmem:[%s1790_s17 + $0xf0] sm:$0xff] }
  0x20   : > { %446 = vst [vmem:[%s1795_s18 + $0x70] sm:$0xff] %v445_v14  ;;  %v449_v16 = vld [vmem:[%s1790_s17 + $0x100] sm:$0xff]  ;;  %v451_v17 = vld [vmem:[%s1790_s17 + $0x110] sm:$0xff]  ;;  %448 = vst [vmem:[%s1795_s18 + $0x78] sm:$0xff] %v447_v15 }
  0x21   : > { %450 = vst [vmem:[%s1795_s18 + $0x80] sm:$0xff] %v449_v16  ;;  %452 = vst [vmem:[%s1795_s18 + $0x88] sm:$0xff] %v451_v17  ;;  %v453_v18 = vld [vmem:[%s1790_s17 + $0x120] sm:$0xff]  ;;  %v455_v19 = vld [vmem:[%s1790_s17 + $0x130] sm:$0xff] }
  0x22   : > { %v457_v20 = vld [vmem:[%s1790_s17 + $0x140] sm:$0xff]  ;;  %454 = vst [vmem:[%s1795_s18 + $0x90] sm:$0xff] %v453_v18  ;;  %456 = vst [vmem:[%s1795_s18 + $0x98] sm:$0xff] %v455_v19  ;;  %v459_v21 = vld [vmem:[%s1790_s17 + $0x150] sm:$0xff] }
  0x23   : > { %458 = vst [vmem:[%s1795_s18 + $0xa0] sm:$0xff] %v457_v20  ;;  %v461_v22 = vld [vmem:[%s1790_s17 + $0x160] sm:$0xff]  ;;  %v463_v23 = vld [vmem:[%s1790_s17 + $0x170] sm:$0xff]  ;;  %460 = vst [vmem:[%s1795_s18 + $0xa8] sm:$0xff] %v459_v21 }
  0x24   : > { %462 = vst [vmem:[%s1795_s18 + $0xb0] sm:$0xff] %v461_v22  ;;  %464 = vst [vmem:[%s1795_s18 + $0xb8] sm:$0xff] %v463_v23  ;;  %v465_v24 = vld [vmem:[%s1790_s17 + $0x180] sm:$0xff]  ;;  %v467_v25 = vld [vmem:[%s1790_s17 + $0x190] sm:$0xff] }
  0x25   : > { %v469_v26 = vld [vmem:[%s1790_s17 + $0x1a0] sm:$0xff]  ;;  %466 = vst [vmem:[%s1795_s18 + $0xc0] sm:$0xff] %v465_v24  ;;  %468 = vst [vmem:[%s1795_s18 + $0xc8] sm:$0xff] %v467_v25  ;;  %v471_v27 = vld [vmem:[%s1790_s17 + $0x1b0] sm:$0xff] }
  0x26   : > { %470 = vst [vmem:[%s1795_s18 + $0xd0] sm:$0xff] %v469_v26  ;;  %v473_v28 = vld [vmem:[%s1790_s17 + $0x1c0] sm:$0xff]  ;;  %v475_v29 = vld [vmem:[%s1790_s17 + $0x1d0] sm:$0xff]  ;;  %472 = vst [vmem:[%s1795_s18 + $0xd8] sm:$0xff] %v471_v27 }
  0x27   : > { %474 = vst [vmem:[%s1795_s18 + $0xe0] sm:$0xff] %v473_v28  ;;  %476 = vst [vmem:[%s1795_s18 + $0xe8] sm:$0xff] %v475_v29  ;;  %v477_v30 = vld [vmem:[%s1790_s17 + $0x1e0] sm:$0xff]  ;;  %v479_v31 = vld [vmem:[%s1790_s17 + $0x1f0] sm:$0xff] }
  0x28   : > { %v481_v32 = vld [vmem:[%s1790_s17 + $0x200] sm:$0xff]  ;;  %478 = vst [vmem:[%s1795_s18 + $0xf0] sm:$0xff] %v477_v30  ;;  %480 = vst [vmem:[%s1795_s18 + $0xf8] sm:$0xff] %v479_v31  ;;  %v483_v33 = vld [vmem:[%s1790_s17 + $0x210] sm:$0xff] }
  0x29   : > { %482 = vst [vmem:[%s1795_s18 + $0x100] sm:$0xff] %v481_v32  ;;  %v485_v34 = vld [vmem:[%s1790_s17 + $0x220] sm:$0xff]  ;;  %v487_v35 = vld [vmem:[%s1790_s17 + $0x230] sm:$0xff]  ;;  %484 = vst [vmem:[%s1795_s18 + $0x108] sm:$0xff] %v483_v33 }
  0x2a   : > { %486 = vst [vmem:[%s1795_s18 + $0x110] sm:$0xff] %v485_v34  ;;  %488 = vst [vmem:[%s1795_s18 + $0x118] sm:$0xff] %v487_v35  ;;  %v489_v36 = vld [vmem:[%s1790_s17 + $0x240] sm:$0xff]  ;;  %v491_v37 = vld [vmem:[%s1790_s17 + $0x250] sm:$0xff] }
  0x2b   : > { %v493_v38 = vld [vmem:[%s1790_s17 + $0x260] sm:$0xff]  ;;  %490 = vst [vmem:[%s1795_s18 + $0x120] sm:$0xff] %v489_v36  ;;  %492 = vst [vmem:[%s1795_s18 + $0x128] sm:$0xff] %v491_v37  ;;  %v495_v39 = vld [vmem:[%s1790_s17 + $0x270] sm:$0xff] }
  0x2c   : > { %494 = vst [vmem:[%s1795_s18 + $0x130] sm:$0xff] %v493_v38  ;;  %v497_v40 = vld [vmem:[%s1790_s17 + $0x280] sm:$0xff]  ;;  %v499_v41 = vld [vmem:[%s1790_s17 + $0x290] sm:$0xff]  ;;  %496 = vst [vmem:[%s1795_s18 + $0x138] sm:$0xff] %v495_v39 }
  0x2d   : > { %498 = vst [vmem:[%s1795_s18 + $0x140] sm:$0xff] %v497_v40  ;;  %500 = vst [vmem:[%s1795_s18 + $0x148] sm:$0xff] %v499_v41  ;;  %v501_v42 = vld [vmem:[%s1790_s17 + $0x2a0] sm:$0xff]  ;;  %v503_v43 = vld [vmem:[%s1790_s17 + $0x2b0] sm:$0xff] }
  0x2e   : > { %v505_v44 = vld [vmem:[%s1790_s17 + $0x2c0] sm:$0xff]  ;;  %502 = vst [vmem:[%s1795_s18 + $0x150] sm:$0xff] %v501_v42  ;;  %504 = vst [vmem:[%s1795_s18 + $0x158] sm:$0xff] %v503_v43  ;;  %v507_v45 = vld [vmem:[%s1790_s17 + $0x2d0] sm:$0xff] }
  0x2f   : > { %506 = vst [vmem:[%s1795_s18 + $0x160] sm:$0xff] %v505_v44  ;;  %v509_v46 = vld [vmem:[%s1790_s17 + $0x2e0] sm:$0xff]  ;;  %v511_v47 = vld [vmem:[%s1790_s17 + $0x2f0] sm:$0xff]  ;;  %508 = vst [vmem:[%s1795_s18 + $0x168] sm:$0xff] %v507_v45 }
  0x30   : > { %510 = vst [vmem:[%s1795_s18 + $0x170] sm:$0xff] %v509_v46  ;;  %512 = vst [vmem:[%s1795_s18 + $0x178] sm:$0xff] %v511_v47  ;;  %v513_v48 = vld [vmem:[%s1790_s17 + $0x300] sm:$0xff]  ;;  %v515_v49 = vld [vmem:[%s1790_s17 + $0x310] sm:$0xff] }
  0x31   : > { %v517_v50 = vld [vmem:[%s1790_s17 + $0x320] sm:$0xff]  ;;  %514 = vst [vmem:[%s1795_s18 + $0x180] sm:$0xff] %v513_v48  ;;  %516 = vst [vmem:[%s1795_s18 + $0x188] sm:$0xff] %v515_v49  ;;  %v519_v51 = vld [vmem:[%s1790_s17 + $0x330] sm:$0xff] }
  0x32   : > { %518 = vst [vmem:[%s1795_s18 + $0x190] sm:$0xff] %v517_v50  ;;  %v521_v52 = vld [vmem:[%s1790_s17 + $0x340] sm:$0xff]  ;;  %v523_v53 = vld [vmem:[%s1790_s17 + $0x350] sm:$0xff]  ;;  %520 = vst [vmem:[%s1795_s18 + $0x198] sm:$0xff] %v519_v51 }
  0x33   : > { %522 = vst [vmem:[%s1795_s18 + $0x1a0] sm:$0xff] %v521_v52  ;;  %524 = vst [vmem:[%s1795_s18 + $0x1a8] sm:$0xff] %v523_v53  ;;  %v525_v54 = vld [vmem:[%s1790_s17 + $0x360] sm:$0xff]  ;;  %v527_v55 = vld [vmem:[%s1790_s17 + $0x370] sm:$0xff] }
  0x34   : > { %v529_v56 = vld [vmem:[%s1790_s17 + $0x380] sm:$0xff]  ;;  %526 = vst [vmem:[%s1795_s18 + $0x1b0] sm:$0xff] %v525_v54  ;;  %528 = vst [vmem:[%s1795_s18 + $0x1b8] sm:$0xff] %v527_v55  ;;  %v531_v57 = vld [vmem:[%s1790_s17 + $0x390] sm:$0xff] }
  0x35   : > { %530 = vst [vmem:[%s1795_s18 + $0x1c0] sm:$0xff] %v529_v56  ;;  %v533_v58 = vld [vmem:[%s1790_s17 + $0x3a0] sm:$0xff]  ;;  %v535_v59 = vld [vmem:[%s1790_s17 + $0x3b0] sm:$0xff]  ;;  %532 = vst [vmem:[%s1795_s18 + $0x1c8] sm:$0xff] %v531_v57 }
  0x36   : > { %534 = vst [vmem:[%s1795_s18 + $0x1d0] sm:$0xff] %v533_v58  ;;  %536 = vst [vmem:[%s1795_s18 + $0x1d8] sm:$0xff] %v535_v59  ;;  %v537_v60 = vld [vmem:[%s1790_s17 + $0x3c0] sm:$0xff]  ;;  %v539_v61 = vld [vmem:[%s1790_s17 + $0x3d0] sm:$0xff] }
  0x37   : > { %v541_v62 = vld [vmem:[%s1790_s17 + $0x3e0] sm:$0xff]  ;;  %538 = vst [vmem:[%s1795_s18 + $0x1e0] sm:$0xff] %v537_v60  ;;  %540 = vst [vmem:[%s1795_s18 + $0x1e8] sm:$0xff] %v539_v61  ;;  %v543_v63 = vld [vmem:[%s1790_s17 + $0x3f0] sm:$0xff] }
  0x38   : > { %542 = vst [vmem:[%s1795_s18 + $0x1f0] sm:$0xff] %v541_v62  ;;  %544 = vst [vmem:[%s1795_s18 + $0x1f8] sm:$0xff] %v543_v63 }
  0x39 PF: > { %p1406_p7 = scmp.ge.s32.totalorder %s1692_s27, 1  ;;  %p581_p8 = scmp.lt.s32.totalorder %s1692_s27, 5 }
  0x3b   : > { %p582_p9 = pnand %p1406_p7, %p581_p8 }
  0x3c   : > { %s588_s19 = sand.u32 (!%p582_p9), 1, %s1668_s21   ;;  %s1408_s20 = sshll.u32 (!%p582_p9), %s1676_s23, 2 }
  0x3d   : > { %585 = sbr.rel (%p582_p9) target bundleno = 372 (0x174), region = 78  ;;  %s1407_s28 = sshll.u32 (!%p582_p9), %s588_s19, 9 }
  0x3e   : > { %p649_p10 = scmp.lt.s32.totalorder (!%p582_p9), %s1408_s20, 7  ;;  %s1412_s29 = sshll.u32 (!%p582_p9), %s1680_s24, 1 }
  0x3f   : > { %p681_p11 = scmp.lt.s32.totalorder (!%p582_p9), %s1412_s29, 3  ;;  %s1948_s19 = scalar_lea.vmem (!%p582_p9), [#allocation3], %s1407_s28 }
  0x40   : > { %p1414_p12 = scmp.ne.s32.totalorder (!%p582_p9), %s1676_s23, 0 }
  0x44   : > { %s2070_s20 = smov (!%p649_p10, %s1408_s20), 7  ;;  %s2072_s29 = smov (!%p681_p11, %s1412_s29), 3 }
  0x45   : > { %s1409_s30 = sshll.u32 %s2070_s20, 2  ;;  %s661_s10 = scalar_lea.vmem %s2052_s2, %s2070_s20  ;;  %v1694_v0 = vmov (!%p1414_p12), 0.0  }
  0x46   : > { %s1937_s13 = scalar_lea.vmem %s2050_s0, %s1409_s30  ;;  %s666_s24 = scalar_lea.vmem %s2053_s3, %s2070_s20  ;;  %692 = vst [vmem:[#allocation2] sm:$0xff] (!%p1414_p12), %v1694_v0  ;;  %693 = vst [vmem:[#allocation2 + $0x8] sm:$0xff] (!%p1414_p12), %v1694_v0 }
  0x47   : > { %s1413_s15 = sshll.u32 %s2072_s29, 2  ;;  %691 = sbr.rel (%p1414_p12) target bundleno = 78 (0x4e), region = 86 }
  0x48   : > { %s1946_s18 = scalar_lea.vmem %s2056_s6, %s1413_s15 }
  0x4e PF: > { %v1542_v1 = vld [vmem:[%s1948_s19 + $0x4] ss:$8 sps:$4 sm:$0xff]   ;;  %v1546_v3 = vld [vmem:[%s1948_s19] ss:$8 sps:$4 sm:$0xff]   ;;  %v1548_v5 = vld [vmem:[%s1948_s19 + $0x14] ss:$8 sps:$4 sm:$0xff]   ;;  %v702_v38 = vlaneseq }
  0x4f   : > { %v1544_v2 = vld [vmem:[%s1948_s19 + $0x104] ss:$8 sps:$4 sm:$0xff]   ;;  %1146 = vmatprep.subr.bf16.mxu0 %v1542_v1  ;;  %v1547_v4 = vld [vmem:[%s1948_s19 + $0x100] ss:$8 sps:$4 sm:$0xff]   ;;  %v1550_v6 = vld [vmem:[%s1948_s19 + $0x114] ss:$8 sps:$4 sm:$0xff]  }
  0x50   : > { %1187 = vmatprep.subr.bf16.mxu1 %v1544_v2  ;;  %1147 = vmatpush1.bf16.msra.mxu0 %v1546_v3  ;;  %v1552_v7 = vld [vmem:[%s1948_s19 + $0x10] ss:$8 sps:$4 sm:$0xff]   ;;  %v1554_v9 = vld [vmem:[%s1948_s19 + $0x24] ss:$8 sps:$4 sm:$0xff]   ;;  %v1558_v11 = vld [vmem:[%s1948_s19 + $0x20] ss:$8 sps:$4 sm:$0xff]  }
  0x51   : > { %1188 = vmatpush1.bf16.msra.mxu1 %v1547_v4  ;;  %1148 = vmatprep.subr.bf16.mxu0 %v1548_v5  ;;  %v1553_v8 = vld [vmem:[%s1948_s19 + $0x110] ss:$8 sps:$4 sm:$0xff]   ;;  %v1556_v10 = vld [vmem:[%s1948_s19 + $0x124] ss:$8 sps:$4 sm:$0xff]   ;;  %v1559_v12 = vld [vmem:[%s1948_s19 + $0x120] ss:$8 sps:$4 sm:$0xff]  }
  0x52   : > { %1189 = vmatprep.subr.bf16.mxu1 %v1550_v6  ;;  %v1560_v13 = vld [vmem:[%s1948_s19 + $0x34] ss:$8 sps:$4 sm:$0xff]   ;;  %v1564_v15 = vld [vmem:[%s1948_s19 + $0x30] ss:$8 sps:$4 sm:$0xff]   ;;  %v1566_v17 = vld [vmem:[%s1948_s19 + $0x44] ss:$8 sps:$4 sm:$0xff]  }
  0x53   : > { %v1562_v14 = vld [vmem:[%s1948_s19 + $0x134] ss:$8 sps:$4 sm:$0xff]   ;;  %v1565_v16 = vld [vmem:[%s1948_s19 + $0x130] ss:$8 sps:$4 sm:$0xff]   ;;  %v1568_v18 = vld [vmem:[%s1948_s19 + $0x144] ss:$8 sps:$4 sm:$0xff]  }
  0x54   : > { %1149 = vmatpush1.bf16.msra.mxu0 %v1552_v7  ;;  %v1570_v19 = vld [vmem:[%s1948_s19 + $0x40] ss:$8 sps:$4 sm:$0xff]   ;;  %v1572_v21 = vld [vmem:[%s1948_s19 + $0x54] ss:$8 sps:$4 sm:$0xff]   ;;  %v1576_v23 = vld [vmem:[%s1948_s19 + $0x50] ss:$8 sps:$4 sm:$0xff]  }
  0x55   : > { %1190 = vmatpush1.bf16.msra.mxu1 %v1553_v8  ;;  %1150 = vmatprep.subr.bf16.mxu0 %v1554_v9  ;;  %v1571_v20 = vld [vmem:[%s1948_s19 + $0x140] ss:$8 sps:$4 sm:$0xff]   ;;  %v1574_v22 = vld [vmem:[%s1948_s19 + $0x154] ss:$8 sps:$4 sm:$0xff]   ;;  %v1577_v24 = vld [vmem:[%s1948_s19 + $0x150] ss:$8 sps:$4 sm:$0xff]  }
  0x56   : > { %1191 = vmatprep.subr.bf16.mxu1 %v1556_v10  ;;  %v1578_v25 = vld [vmem:[%s1948_s19 + $0x64] ss:$8 sps:$4 sm:$0xff]   ;;  %v1582_v27 = vld [vmem:[%s1948_s19 + $0x60] ss:$8 sps:$4 sm:$0xff]   ;;  %v1584_v29 = vld [vmem:[%s1948_s19 + $0x74] ss:$8 sps:$4 sm:$0xff]  }
  0x57   : > { %v1580_v26 = vld [vmem:[%s1948_s19 + $0x164] ss:$8 sps:$4 sm:$0xff]   ;;  %v1583_v28 = vld [vmem:[%s1948_s19 + $0x160] ss:$8 sps:$4 sm:$0xff]   ;;  %v1586_v30 = vld [vmem:[%s1948_s19 + $0x174] ss:$8 sps:$4 sm:$0xff]  }
  0x58   : > { %1151 = vmatpush1.bf16.msra.mxu0 %v1558_v11  ;;  %v1588_v31 = vld [vmem:[%s1948_s19 + $0x70] ss:$8 sps:$4 sm:$0xff]   ;;  %v1590_v33 = vld [vmem:[%s1948_s19 + $0x84] ss:$8 sps:$4 sm:$0xff]   ;;  %v1594_v35 = vld [vmem:[%s1948_s19 + $0x80] ss:$8 sps:$4 sm:$0xff]  }
  0x59   : > { %1192 = vmatpush1.bf16.msra.mxu1 %v1559_v12  ;;  %1152 = vmatprep.subr.bf16.mxu0 %v1560_v13  ;;  %v1589_v32 = vld [vmem:[%s1948_s19 + $0x170] ss:$8 sps:$4 sm:$0xff]   ;;  %v1592_v34 = vld [vmem:[%s1948_s19 + $0x184] ss:$8 sps:$4 sm:$0xff]   ;;  %v1595_v36 = vld [vmem:[%s1948_s19 + $0x180] ss:$8 sps:$4 sm:$0xff]  }
  0x5a   : > { %1193 = vmatprep.subr.bf16.mxu1 %v1562_v14  ;;  %v1596_v37 = vld [vmem:[%s1948_s19 + $0x94] ss:$8 sps:$4 sm:$0xff]   ;;  %v1600_v40 = vld [vmem:[%s1948_s19 + $0x90] ss:$8 sps:$4 sm:$0xff]   ;;  %v1602_v42 = vld [vmem:[%s1948_s19 + $0xa4] ss:$8 sps:$4 sm:$0xff]  }
  0x5b   : > { %v1598_v39 = vld [vmem:[%s1948_s19 + $0x194] ss:$8 sps:$4 sm:$0xff]   ;;  %v1601_v41 = vld [vmem:[%s1948_s19 + $0x190] ss:$8 sps:$4 sm:$0xff]   ;;  %v703_v43 = vshrl.u32 %v702_v38, 7  ;;  %p1479_p13 = scmp.ne.s32.totalorder %s1676_s23, 1 }
  0x5c   : > { %1153 = vmatpush1.bf16.msra.mxu0 %v1564_v15  ;;  %v1604_v44 = vld [vmem:[%s1948_s19 + $0x1a4] ss:$8 sps:$4 sm:$0xff]   ;;  %v1606_v45 = vld [vmem:[%s1948_s19 + $0xa0] ss:$8 sps:$4 sm:$0xff]   ;;  %v1608_v47 = vld [vmem:[%s1948_s19 + $0xb4] ss:$8 sps:$4 sm:$0xff]  }
  0x5d   : > { %1194 = vmatpush1.bf16.msra.mxu1 %v1565_v16  ;;  %1154 = vmatprep.subr.bf16.mxu0 %v1566_v17  ;;  %v1607_v46 = vld [vmem:[%s1948_s19 + $0x1a0] ss:$8 sps:$4 sm:$0xff]   ;;  %v708_v48 = vsub.s32 1, %v703_v43  ;;  %v1610_v49 = vld [vmem:[%s1948_s19 + $0x1b4] ss:$8 sps:$4 sm:$0xff]   ;;  %v716_v50 = vsub.s32 3, %v703_v43 }
  0x5e   : > { %1195 = vmatprep.subr.bf16.mxu1 %v1568_v18  ;;  %v694_v51 = vld [vmem:[%s1937_s13] sm:$0xff]  ;;  %v704_v52 = vsub.s32 0, %v703_v43  ;;  %v695_v56 = vld [vmem:[%s1937_s13 + $0x8] sm:$0xff]  ;;  %v712_v57 = vsub.s32 2, %v703_v43  ;;  %v1614_v63 = vld [vmem:[%s1948_s19 + $0xc4] ss:$8 sps:$4 sm:$0xff]  }
  0x5f   : > { %v697_v53 = vunpack.c.h.bf16 %v694_v51  ;;  %v700_v54 = vld [vmem:[%s661_s10] sm:$0xf]  ;;  %v699_v62 = vunpack.c.h.bf16 %v695_v56  ;;  %v1616_v0 = vld [vmem:[%s1948_s19 + $0x1c4] ss:$8 sps:$4 sm:$0xff]   ;;  %v696_v3 = vunpack.c.l.bf16 %v694_v51  ;;  %v698_v5 = vunpack.c.l.bf16 %v695_v56  ;;  %v1618_v9 = vld [vmem:[%s1948_s19 + $0xc0] ss:$8 sps:$4 sm:$0xff]  }
  0x60   : > { %1155 = vmatpush1.bf16.msra.mxu0 %v1570_v19  ;;  %v726_v55 = vld [vmem:[%s666_s24] sm:$0xf]  ;;  %v709_v60 = vrot.slane %v700_v54, %v708_v48  ;;  %v717_v1 = vrot.slane %v700_v54, %v716_v50  ;;  %v705_v7 = vrot.slane %v700_v54, %v704_v52  ;;  %v713_v8 = vrot.slane %v700_v54, %v712_v57  ;;  %v1619_v10 = vld [vmem:[%s1948_s19 + $0x1c0] ss:$8 sps:$4 sm:$0xff]   ;;  %v1620_v12 = vld [vmem:[%s1948_s19 + $0xd4] ss:$8 sps:$4 sm:$0xff]  }
  0x61   : > { %1196 = vmatpush1.bf16.msra.mxu1 %v1571_v20  ;;  %1156 = vmatprep.subr.bf16.mxu0 %v1572_v21  ;;  %v1612_v58 = vld [vmem:[%s1948_s19 + $0xb0] ss:$8 sps:$4 sm:$0xff]   ;;  %v735_v61 = vrot.slane %v726_v55, %v708_v48  ;;  %v743_v2 = vrot.slane %v726_v55, %v716_v50  ;;  %v1622_v13 = vld [vmem:[%s1948_s19 + $0x1d4] ss:$8 sps:$4 sm:$0xff]   ;;  %v731_v16 = vrot.slane %v726_v55, %v704_v52 }
  0x62   : > { %1197 = vmatprep.subr.bf16.mxu1 %v1574_v22  ;;  %v1613_v59 = vld [vmem:[%s1948_s19 + $0x1b0] ss:$8 sps:$4 sm:$0xff]   ;;  %v723_v4 = vmul.f32 %v709_v60, %v697_v53  ;;  %v725_v6 = vmul.f32 %v717_v1, %v699_v62  ;;  %v722_v18 = vmul.f32 %v705_v7, %v696_v3  ;;  %v724_v19 = vmul.f32 %v713_v8, %v698_v5 }
  0x63   : > { %v739_v20 = vrot.slane %v726_v55, %v712_v57  ;;  %v1624_v21 = vld [vmem:[%s1948_s19 + $0xd0] ss:$8 sps:$4 sm:$0xff]  }
  0x64   : > { %1157 = vmatpush1.bf16.msra.mxu0 %v1576_v23  ;;  %v749_v11 = vadd.f32 %v735_v61, %v723_v4  ;;  %v751_v14 = vadd.f32 %v743_v2, %v725_v6  ;;  %v1625_v22 = vld [vmem:[%s1948_s19 + $0x1d0] ss:$8 sps:$4 sm:$0xff]  }
  0x65   : > { %1198 = vmatpush1.bf16.msra.mxu1 %v1577_v24  ;;  %1158 = vmatprep.subr.bf16.mxu0 %v1578_v25  ;;  %v1626_v24 = vld [vmem:[%s1948_s19 + $0xe4] ss:$8 sps:$4 sm:$0xff]  }
  0x66   : > { %1199 = vmatprep.subr.bf16.mxu1 %v1580_v26  ;;  %v753_v15 = vmax.f32 %v749_v11, 0.0  ;;  %v755_v17 = vmax.f32 %v751_v14, 0.0  ;;  %v1628_v25 = vld [vmem:[%s1948_s19 + $0x1e4] ss:$8 sps:$4 sm:$0xff]  }
  0x68   : > { %1159 = vmatpush1.bf16.msra.mxu0 %v1582_v27  ;;  %v759_v23 = vpack.c.bf16 %v753_v15, %v753_v15  ;;  %v761_v26 = vpack.c.bf16 %v755_v17, %v755_v17  ;;  %v748_v27 = vadd.f32 %v731_v16, %v722_v18 }
  0x69   : > { %1200 = vmatpush1.bf16.msra.mxu1 %v1583_v28  ;;  %1160 = vmatprep.subr.bf16.mxu0 %v1584_v29  ;;  %v750_v28 = vadd.f32 %v739_v20, %v724_v19  ;;  %v1630_v29 = vld [vmem:[%s1948_s19 + $0xe0] ss:$8 sps:$4 sm:$0xff]  }
  0x6a   : > { %1201 = vmatprep.subr.bf16.mxu1 %v1586_v30  ;;  %1178 = vmatprep.mubr.bf16.mxu0 %v759_v23  ;;  %v1631_v30 = vld [vmem:[%s1948_s19 + $0x1e0] ss:$8 sps:$4 sm:$0xff]  }
  0x6b   : > { %1219 = vmatprep.mubr.bf16.mxu1 %v761_v26 }
  0x6c   : > { %1161 = vmatpush1.bf16.msra.mxu0 %v1588_v31  ;;  %v1632_v31 = vld [vmem:[%s1948_s19 + $0xf4] ss:$8 sps:$4 sm:$0xff]  }
  0x6d   : > { %1202 = vmatpush1.bf16.msra.mxu1 %v1589_v32  ;;  %1162 = vmatprep.subr.bf16.mxu0 %v1590_v33  ;;  %v1634_v32 = vld [vmem:[%s1948_s19 + $0x1f4] ss:$8 sps:$4 sm:$0xff]   ;;  %v752_v33 = vmax.f32 %v748_v27, 0.0 }
  0x6e   : > { %1203 = vmatprep.subr.bf16.mxu1 %v1592_v34  ;;  %v754_v34 = vmax.f32 %v750_v28, 0.0 }
  0x70   : > { %1163 = vmatpush1.bf16.msra.mxu0 %v1594_v35  ;;  %v1636_v35 = vld [vmem:[%s1948_s19 + $0xf0] ss:$8 sps:$4 sm:$0xff]   ;;  %v760_v38 = vpack.c.bf16 %v754_v34, %v754_v34 }
  0x71   : > { %1204 = vmatpush1.bf16.msra.mxu1 %v1595_v36  ;;  %1164 = vmatprep.subr.bf16.mxu0 %v1596_v37  ;;  %v1637_v36 = vld [vmem:[%s1948_s19 + $0x1f0] ss:$8 sps:$4 sm:$0xff]   ;;  %v758_v37 = vpack.c.bf16 %v752_v33, %v752_v33 }
  0x72   : > { %1205 = vmatprep.subr.bf16.mxu1 %v1598_v39 }
  0x74   : > { %1165 = vmatpush1.bf16.msra.mxu0 %v1600_v40  ;;  %v756_v40 = vld [vmem:[#allocation2] sm:$0xff] }
  0x75   : > { %1206 = vmatpush1.bf16.msra.mxu1 %v1601_v41  ;;  %1166 = vmatprep.subr.bf16.mxu0 %v1602_v42 }
  0x76   : > { %1207 = vmatprep.subr.bf16.mxu1 %v1604_v44  ;;  %v757_v44 = vld [vmem:[#allocation2 + $0x8] sm:$0xff] }
  0x78   : > { %1167 = vmatpush1.bf16.msra.mxu0 %v1606_v45 }
  0x79   : > { %1208 = vmatpush1.bf16.msra.mxu1 %v1607_v46  ;;  %1168 = vmatprep.subr.bf16.mxu0 %v1608_v47 }
  0x7a   : > { %1209 = vmatprep.subr.bf16.mxu1 %v1610_v49 }
  0x7c   : > { %1169 = vmatpush1.bf16.msra.mxu0 %v1612_v58 }
  0x7d   : > { %1210 = vmatpush1.bf16.msra.mxu1 %v1613_v59  ;;  %1170 = vmatprep.subr.bf16.mxu0 %v1614_v63 }
  0x7e   : > { %1211 = vmatprep.subr.bf16.mxu1 %v1616_v0 }
  0x80   : > { %1171 = vmatpush1.bf16.msra.mxu0 %v1618_v9 }
  0x81   : > { %1212 = vmatpush1.bf16.msra.mxu1 %v1619_v10  ;;  %1172 = vmatprep.subr.bf16.mxu0 %v1620_v12 }
  0x82   : > { %1213 = vmatprep.subr.bf16.mxu1 %v1622_v13 }
  0x84   : > { %1173 = vmatpush1.bf16.msra.mxu0 %v1624_v21 }
  0x85   : > { %1214 = vmatpush1.bf16.msra.mxu1 %v1625_v22  ;;  %1174 = vmatprep.subr.bf16.mxu0 %v1626_v24 }
  0x86   : > { %1215 = vmatprep.subr.bf16.mxu1 %v1628_v25 }
  0x88   : > { %1175 = vmatpush1.bf16.msra.mxu0 %v1630_v29 }
  0x89   : > { %1216 = vmatpush1.bf16.msra.mxu1 %v1631_v30  ;;  %1176 = vmatprep.subr.bf16.mxu0 %v1632_v31 }
  0x8a   : > { %1217 = vmatprep.subr.bf16.mxu1 %v1634_v32 }
  0x8c   : > { %1177 = vmatpush1.bf16.msra.mxu0 %v1636_v35 }
  0x8d   : > { %1218 = vmatpush1.bf16.msra.mxu1 %v1637_v36 }
  0x8f   : > { %1179 = vmatmul.mubr.bf16.vlgmr.msra.gmra.mrb[0].mxu0 %v758_v37 }
  0x90   : > { %1220 = vmatmul.mubr.bf16.vlgmr.msra.gmra.mrb[0].mxu1 %v760_v38 }
 0x162   : > { %v1180_v39 = vpop.f32.mrb[0].mxu0 }
 0x163   : > { %v1221_v41 = vpop.f32.mrb[0].mxu1  ;;  %v1182_v43 = vpop.f32.mrb[1].mxu0  ;;  %1235 = sbr.rel (%p1479_p13) target bundleno = 372 (0x174), region = 90 }
 0x164   : > { %v1222_v42 = vadd.f32 %v1221_v41, %v1180_v39  ;;  %v1223_v45 = vpop.f32.mrb[1].mxu1  ;;  %v1184_v47 = vpop.f32.mrb[2].mxu0 }
 0x165   : > { %v1224_v46 = vadd.f32 %v1223_v45, %v1182_v43  ;;  %v1225_v48 = vpop.f32.mrb[2].mxu1  ;;  %v1185_v50 = vpop.f32.mrb[3].mxu0 }
 0x166   : > { %v1228_v49 = vadd.f32 %v1222_v42, %v756_v40  ;;  %v1226_v51 = vpop.f32.mrb[3].mxu1 }
 0x167   : > { %v1229_v52 = vadd.f32 %v1224_v46, %v757_v44 }
 0x168   : > { %1230 = vst [vmem:[#allocation2] sm:$0xff] %v1228_v49 }
 0x169   : > { %1231 = vst [vmem:[#allocation2 + $0x8] sm:$0xff] %v1229_v52 }
 0x16f   : > { %v1236_v53 = vld [vmem:[#allocation2] sm:$0xff] }
 0x170   : > { %v1237_v54 = vld [vmem:[#allocation2 + $0x8] sm:$0xff] }
 0x171   : > { %v1484_v55 = vpack.c.bf16 %v1237_v54, %v1236_v53 }
 0x173   : > { %1246 = vst [vmem:[%s1946_s18] sm:$0xff] %v1484_v55 }
 0x174 PF: > { %s16_s27 = sadd.s32 1, %s1692_s27   ;;  %s2057_s21 = smov %s1672_s22 }
 0x175   : > { %p13_p0 = scmp.ge.s32.totalorder %s16_s27, 6   ;;  %s2058_s22 = smov %s1781_s8 }
 0x176   : > { %s2059_s23 = smov %s1684_s25  ;;  %s2060_s24 = smov %s1688_s26 }
 0x177   : > { %s2061_s25 = smov %s2064_s4  ;;  %s2062_s26 = smov %s2068_s5 }
 0x178   :  { %15 = sbr.rel (!%p13_p0) target bundleno = 4 (0x4), region = 140 }

// kernel: densenet121_forward.250
= control target key start
LH: loop header
LB: loop body
LE: loop exit
PB: predicated region body
PF: predicated region fallthrough
CT: control target
= control target key end

     0   :  { %v28_v0 = vlaneseq  ;;  %s230_s0 = inlined_call_operand.vmem [shape: bf16[1,8,1024], index: 0, kind: input, shape index: {}]   ;;  %s231_s1 = inlined_call_operand.vmem [shape: f32[1,1,1024], index: 1, kind: input, shape index: {}]   ;;  %s232_s2 = inlined_call_operand.vmem [shape: f32[1,1,1024], index: 2, kind: input, shape index: {}]   ;;  %s233_s3 = inlined_call_operand.vmem [shape: f32[8,1024], index: 3, kind: output, shape index: {}]  }
   0x1   :  { %v14_v1 = vld [vmem:[%s230_s0] sm:$0xff]  ;;  %v15_v5 = vld [vmem:[%s230_s0 + $0x8] sm:$0xff]  ;;  %v16_v6 = vld [vmem:[%s230_s0 + $0x10] sm:$0xff] }
   0x2   :  { %v18_v2 = vunpack.c.l.bf16 %v14_v1  ;;  %v177_v3 = vshrl.u32 %v28_v0, 7  ;;  %v19_v4 = vunpack.c.h.bf16 %v14_v1  ;;  %v188_v7 = vld [vmem:[%s230_s0 + $0x18] sm:$0xff]  ;;  %v26_v8 = vld [vmem:[%s231_s1] sm:$0xff]  ;;  %v20_v10 = vunpack.c.l.bf16 %v15_v5 }
   0x3   :  { %v76_v9 = vld [vmem:[%s232_s2] sm:$0xff]  ;;  %v21_v11 = vunpack.c.h.bf16 %v15_v5  ;;  %v22_v12 = vunpack.c.l.bf16 %v16_v6  ;;  %v23_v13 = vunpack.c.h.bf16 %v16_v6  ;;  %v24_v20 = vunpack.c.l.bf16 %v188_v7 }
   0x4   :  { %v30_v14 = vsub.s32 0, %v177_v3  ;;  %v34_v15 = vsub.s32 1, %v177_v3  ;;  %v38_v16 = vsub.s32 2, %v177_v3  ;;  %v42_v17 = vsub.s32 3, %v177_v3 }
   0x5   :  { %v46_v18 = vsub.s32 4, %v177_v3  ;;  %v50_v19 = vsub.s32 5, %v177_v3  ;;  %v54_v21 = vsub.s32 6, %v177_v3  ;;  %v25_v55 = vunpack.c.h.bf16 %v188_v7 }
   0x6   :  { %v31_v22 = vrot.slane %v26_v8, %v30_v14  ;;  %v81_v23 = vrot.slane %v76_v9, %v30_v14  ;;  %v35_v24 = vrot.slane %v26_v8, %v34_v15  ;;  %v85_v25 = vrot.slane %v76_v9, %v34_v15 }
   0x7   :  { %v39_v26 = vrot.slane %v26_v8, %v38_v16  ;;  %v89_v27 = vrot.slane %v76_v9, %v38_v16  ;;  %v43_v28 = vrot.slane %v26_v8, %v42_v17  ;;  %v93_v29 = vrot.slane %v76_v9, %v42_v17 }
   0x8   :  { %v68_v30 = vmul.f32 %v31_v22, %v18_v2  ;;  %v69_v31 = vmul.f32 %v35_v24, %v19_v4  ;;  %v47_v32 = vrot.slane %v26_v8, %v46_v18  ;;  %v97_v33 = vrot.slane %v76_v9, %v46_v18 }
   0x9   :  { %v70_v34 = vmul.f32 %v39_v26, %v20_v10  ;;  %v71_v35 = vmul.f32 %v43_v28, %v21_v11  ;;  %v51_v36 = vrot.slane %v26_v8, %v50_v19  ;;  %v101_v37 = vrot.slane %v76_v9, %v50_v19 }
   0xa   :  { %v118_v38 = vadd.f32 %v81_v23, %v68_v30  ;;  %v119_v39 = vadd.f32 %v85_v25, %v69_v31  ;;  %v72_v40 = vmul.f32 %v47_v32, %v22_v12  ;;  %v55_v41 = vrot.slane %v26_v8, %v54_v21 }
   0xb   :  { %v120_v42 = vadd.f32 %v89_v27, %v70_v34  ;;  %v121_v43 = vadd.f32 %v93_v29, %v71_v35  ;;  %v73_v44 = vmul.f32 %v51_v36, %v23_v13  ;;  %v105_v45 = vrot.slane %v76_v9, %v54_v21 }
   0xc   :  { %v126_v46 = vmax.f32 %v118_v38, 0.0  ;;  %v127_v47 = vmax.f32 %v119_v39, 0.0  ;;  %v122_v48 = vadd.f32 %v97_v33, %v72_v40  ;;  %v74_v49 = vmul.f32 %v55_v41, %v24_v20 }
   0xd   :  { %v128_v50 = vmax.f32 %v120_v42, 0.0  ;;  %v129_v51 = vmax.f32 %v121_v43, 0.0  ;;  %v123_v52 = vadd.f32 %v101_v37, %v73_v44  ;;  %v58_v56 = vsub.s32 7, %v177_v3 }
   0xe   :  { %142 = vst [vmem:[%s233_s3] sm:$0xff] %v126_v46  ;;  %143 = vst [vmem:[%s233_s3 + $0x8] sm:$0xff] %v127_v47  ;;  %v130_v53 = vmax.f32 %v122_v48, 0.0  ;;  %v124_v54 = vadd.f32 %v105_v45, %v74_v49 }
   0xf   :  { %144 = vst [vmem:[%s233_s3 + $0x10] sm:$0xff] %v128_v50  ;;  %145 = vst [vmem:[%s233_s3 + $0x18] sm:$0xff] %v129_v51  ;;  %v131_v57 = vmax.f32 %v123_v52, 0.0  ;;  %v59_v59 = vrot.slane %v26_v8, %v58_v56  ;;  %v109_v60 = vrot.slane %v76_v9, %v58_v56 }
  0x10   :  { %146 = vst [vmem:[%s233_s3 + $0x20] sm:$0xff] %v130_v53  ;;  %v132_v58 = vmax.f32 %v124_v54, 0.0 }
  0x11   :  { %147 = vst [vmem:[%s233_s3 + $0x28] sm:$0xff] %v131_v57  ;;  %v75_v61 = vmul.f32 %v59_v59, %v25_v55 }
  0x12   :  { %148 = vst [vmem:[%s233_s3 + $0x30] sm:$0xff] %v132_v58 }
  0x13   :  { %v125_v62 = vadd.f32 %v109_v60, %v75_v61 }
  0x15   :  { %v133_v63 = vmax.f32 %v125_v62, 0.0 }
  0x17   :  { %149 = vst [vmem:[%s233_s3 + $0x38] sm:$0xff] %v133_v63 }

// kernel: densenet121_forward.251
= control target key start
LH: loop header
LB: loop body
LE: loop exit
PB: predicated region body
PF: predicated region fallthrough
CT: control target
= control target key end

     0   :  { %s1129_s21 = smov 0   ;;  %s1131_s22 = smov 0   ;;  %s1212_s0 = inlined_call_operand.vmem [shape: bf16[8,1024], index: 0, kind: input, shape index: {}]   ;;  %s1213_s1 = inlined_call_operand.vmem [shape: bf16[1024,128], index: 1, kind: input, shape index: {}]   ;;  %s1214_s2 = inlined_call_operand.vmem [shape: f32[1,1024], index: 2, kind: input, shape index: {}, may-alias: {2,3}]   ;;  %s1215_s3 = inlined_call_operand.vmem [shape: f32[1,1024], index: 3, kind: input, shape index: {}, may-alias: {2,3}]   ;;  %s1216_s4 = inlined_call_operand.vmem [shape: f32[1,128], index: 4, kind: input, shape index: {}]   ;;  %s1217_s5 = inlined_call_operand.vmem [shape: f32[1,128], index: 5, kind: input, shape index: {}]   ;;  %s1218_s6 = inlined_call_operand.vmem [shape: f32[8,128], index: 6, kind: output, shape index: {}]  }
   0x1   :  { %s1133_s23 = smov 0  }
   0x2 LB: > { %s28_s2 = sadd.s32 1, %s1087_s22  ;;  %p913_p0 = scmp.ge.s32.totalorder %s1091_s23, 1  ;;  %s1091_s23 = sphi %s1133_s23, %s16_s23   ;;  %s1087_s22 = sphi %s1131_s22, %s1220_s22   ;;  %s1083_s21 = sphi %s1129_s21, %s1219_s21  }
   0x3   : > { %p29_p1 = scmp.ge.s32.totalorder %s28_s2, 2  ;;  %p292_p2 = scmp.lt.s32.totalorder %s1091_s23, 3 }
   0x5   : > { %s1222_s2 = smov (%p29_p1, %s28_s2), 0  ;;  %p293_p3 = pnand %p913_p0, %p292_p2 }
   0x6   : > { %s914_s3 = sshll.u32 (!%p293_p3), %s1083_s21, 2  ;;  %s916_s4 = sshll.u32 (!%p293_p3), %s1083_s21, 6 }
   0x7   : > { %296 = sbr.rel (%p293_p3) target bundleno = 317 (0x13d), region = 44  ;;  %p353_p4 = scmp.lt.s32.totalorder (!%p293_p3), %s914_s3, 7 }
   0x8   : > { %p361_p5 = scmp.lt.s32.totalorder (!%p293_p3), %s916_s4, 127  ;;  %p918_p6 = scmp.ne.s32.totalorder (!%p293_p3), %s1083_s21, 0 }
   0xe   : > { %s1224_s3 = smov (!%p353_p4, %s914_s3), 7  ;;  %s1226_s4 = smov (!%p361_p5, %s916_s4), 127 }
   0xf   : > { %s915_s24 = sshll.u32 %s1224_s3, 2  ;;  %s917_s28 = sshll.u32 %s1226_s4, 2  ;;  %v1093_v0 = vmov (!%p918_p6), 0.0  }
  0x10   : > { %s1154_s27 = scalar_lea.vmem %s1212_s0, %s915_s24  ;;  %s1159_s7 = scalar_lea.vmem %s1213_s1, %s917_s28  ;;  %397 = vst [vmem:[#allocation2] sm:$0xff] (!%p918_p6), %v1093_v0 }
  0x11   : > { %396 = sbr.rel (%p918_p6) target bundleno = 24 (0x18), region = 48 }
  0x18 PF: > { %v1029_v1 = vld [vmem:[%s1159_s7 + $0x40] sm:$0xff]   ;;  %v1033_v5 = vld [vmem:[%s1159_s7 + $0x48] sm:$0xff]   ;;  %v1037_v9 = vld [vmem:[%s1159_s7 + $0x50] sm:$0xff]   ;;  %p955_p7 = scmp.ne.s32.totalorder %s1083_s21, 1 }
  0x19   : > { %v1030_v2 = vld [vmem:[%s1159_s7 + $0xc0] sm:$0xff]   ;;  %960 = vmatprep.subr.bf16.mxu0 %v1029_v1  ;;  %v1034_v6 = vld [vmem:[%s1159_s7 + $0xc8] sm:$0xff]   ;;  %v1038_v10 = vld [vmem:[%s1159_s7 + $0xd0] sm:$0xff]  }
  0x1a   : > { %v1031_v3 = vld [vmem:[%s1159_s7] sm:$0xff]   ;;  %982 = vmatprep.subr.bf16.mxu1 %v1030_v2  ;;  %v1035_v7 = vld [vmem:[%s1159_s7 + $0x8] sm:$0xff]   ;;  %v1039_v11 = vld [vmem:[%s1159_s7 + $0x10] sm:$0xff]  }
  0x1b   : > { %v1032_v4 = vld [vmem:[%s1159_s7 + $0x80] sm:$0xff]   ;;  %961 = vmatpush3.bf16.msra.mxu0 %v1031_v3  ;;  %v1036_v8 = vld [vmem:[%s1159_s7 + $0x88] sm:$0xff]   ;;  %v1040_v12 = vld [vmem:[%s1159_s7 + $0x90] sm:$0xff]  }
  0x1c   : > { %983 = vmatpush3.bf16.msra.mxu1 %v1032_v4  ;;  %962 = vmatprep.subr.bf16.mxu0 %v1033_v5  ;;  %v1041_v13 = vld [vmem:[%s1159_s7 + $0x58] sm:$0xff]   ;;  %v1045_v17 = vld [vmem:[%s1159_s7 + $0x60] sm:$0xff]   ;;  %v1049_v21 = vld [vmem:[%s1159_s7 + $0x68] sm:$0xff]  }
  0x1d   : > { %984 = vmatprep.subr.bf16.mxu1 %v1034_v6  ;;  %v1042_v14 = vld [vmem:[%s1159_s7 + $0xd8] sm:$0xff]   ;;  %v1046_v18 = vld [vmem:[%s1159_s7 + $0xe0] sm:$0xff]   ;;  %v1050_v22 = vld [vmem:[%s1159_s7 + $0xe8] sm:$0xff]  }
  0x1e   : > { %v1043_v15 = vld [vmem:[%s1159_s7 + $0x18] sm:$0xff]   ;;  %v1047_v19 = vld [vmem:[%s1159_s7 + $0x20] sm:$0xff]   ;;  %v1051_v23 = vld [vmem:[%s1159_s7 + $0x28] sm:$0xff]  }
  0x1f   : > { %963 = vmatpush3.bf16.msra.mxu0 %v1035_v7  ;;  %v1044_v16 = vld [vmem:[%s1159_s7 + $0x98] sm:$0xff]   ;;  %v1048_v20 = vld [vmem:[%s1159_s7 + $0xa0] sm:$0xff]   ;;  %v1052_v24 = vld [vmem:[%s1159_s7 + $0xa8] sm:$0xff]  }
  0x20   : > { %985 = vmatpush3.bf16.msra.mxu1 %v1036_v8  ;;  %964 = vmatprep.subr.bf16.mxu0 %v1037_v9  ;;  %v1053_v25 = vld [vmem:[%s1159_s7 + $0x70] sm:$0xff]   ;;  %v1057_v29 = vld [vmem:[%s1159_s7 + $0x78] sm:$0xff]   ;;  %v398_v33 = vld [vmem:[%s1154_s27] sm:$0xff] }
  0x21   : > { %986 = vmatprep.subr.bf16.mxu1 %v1038_v10  ;;  %v1054_v26 = vld [vmem:[%s1159_s7 + $0xf0] sm:$0xff]   ;;  %v1058_v30 = vld [vmem:[%s1159_s7 + $0xf8] sm:$0xff]   ;;  %v399_v34 = vld [vmem:[%s1154_s27 + $0x8] sm:$0xff]  ;;  %v919_v35 = vcombine.low %v398_v33, %v398_v33  ;;  %v920_v36 = vcombine.high %v398_v33, %v398_v33 }
  0x22   : > { %v1055_v27 = vld [vmem:[%s1159_s7 + $0x30] sm:$0xff]   ;;  %v1059_v31 = vld [vmem:[%s1159_s7 + $0x38] sm:$0xff]   ;;  %v921_v37 = vcombine.low %v399_v34, %v399_v34  ;;  %v922_v38 = vcombine.high %v399_v34, %v399_v34  ;;  %v400_v47 = vld [vmem:[#allocation2] sm:$0xff] }
  0x23   : > { %965 = vmatpush3.bf16.msra.mxu0 %v1039_v11  ;;  %v1056_v28 = vld [vmem:[%s1159_s7 + $0xb0] sm:$0xff]   ;;  %v1060_v32 = vld [vmem:[%s1159_s7 + $0xb8] sm:$0xff]   ;;  %703 = vmatprep.mubr.bf16.mxu0 %v920_v36  ;;  %v956_v53 = vld [vmem:[%s1217_s5] ss:$0 sm:$0xff] (!%p955_p7) }
  0x24   : > { %987 = vmatpush3.bf16.msra.mxu1 %v1040_v12  ;;  %966 = vmatprep.subr.bf16.mxu0 %v1041_v13 }
  0x25   : > { %988 = vmatprep.subr.bf16.mxu1 %v1042_v14  ;;  %743 = vmatprep.mubr.bf16.mxu1 %v922_v38 }
  0x27   : > { %967 = vmatpush3.bf16.msra.mxu0 %v1043_v15 }
  0x28   : > { %989 = vmatpush3.bf16.msra.mxu1 %v1044_v16  ;;  %968 = vmatprep.subr.bf16.mxu0 %v1045_v17 }
  0x29   : > { %990 = vmatprep.subr.bf16.mxu1 %v1046_v18 }
  0x2b   : > { %969 = vmatpush3.bf16.msra.mxu0 %v1047_v19 }
  0x2c   : > { %991 = vmatpush3.bf16.msra.mxu1 %v1048_v20  ;;  %970 = vmatprep.subr.bf16.mxu0 %v1049_v21 }
  0x2d   : > { %992 = vmatprep.subr.bf16.mxu1 %v1050_v22 }
  0x2f   : > { %971 = vmatpush3.bf16.msra.mxu0 %v1051_v23 }
  0x30   : > { %993 = vmatpush3.bf16.msra.mxu1 %v1052_v24  ;;  %972 = vmatprep.subr.bf16.mxu0 %v1053_v25 }
  0x31   : > { %994 = vmatprep.subr.bf16.mxu1 %v1054_v26 }
  0x33   : > { %973 = vmatpush3.bf16.msra.mxu0 %v1055_v27 }
  0x34   : > { %995 = vmatpush3.bf16.msra.mxu1 %v1056_v28  ;;  %974 = vmatprep.subr.bf16.mxu0 %v1057_v29 }
  0x35   : > { %996 = vmatprep.subr.bf16.mxu1 %v1058_v30 }
  0x37   : > { %975 = vmatpush3.bf16.msra.mxu0 %v1059_v31 }
  0x38   : > { %997 = vmatpush3.bf16.msra.mxu1 %v1060_v32 }
  0x3a   : > { %704 = vmatmul.mubr.bf16.vlgmr.msra.gmra.mrb[0].mxu0 %v919_v35 }
  0x3b   : > { %744 = vmatmul.mubr.bf16.vlgmr.msra.gmra.mrb[0].mxu1 %v921_v37 }
 0x10d   : > { %v976_v39 = vpop.f32.mrb[0].mxu0 }
 0x10e   : > { %v998_v40 = vpop.f32.mrb[0].mxu1  ;;  %v977_v41 = vpop.f32.mrb[1].mxu0 }
 0x10f   : > { %v999_v42 = vpop.f32.mrb[1].mxu1  ;;  %v978_v43 = vadd.f32 %v977_v41, %v976_v39  ;;  %v979_v45 = vpop.f32.mrb[2].mxu0 }
 0x110   : > { %v1000_v44 = vadd.f32 %v999_v42, %v998_v40  ;;  %v1001_v46 = vpop.f32.mrb[2].mxu1  ;;  %v980_v48 = vpop.f32.mrb[3].mxu0  ;;  %756 = sbr.rel (%p955_p7) target bundleno = 317 (0x13d), region = 52 }
 0x111   : > { %v1002_v49 = vpop.f32.mrb[3].mxu1 }
 0x112   : > { %v746_v50 = vadd.f32 %v1000_v44, %v978_v43 }
 0x114   : > { %v751_v51 = vadd.f32 %v746_v50, %v400_v47 }
 0x116   : > { %752 = vst [vmem:[#allocation2] sm:$0xff] %v751_v51 }
 0x11d   : > { %v757_v52 = vld [vmem:[#allocation2] sm:$0xff] }
 0x11e   : > { %v765_v54 = vadd.f32 %v956_v53, %v757_v52 }
 0x120   : > { %v766_v55 = vsub.f32 0.0, %v765_v54 }
 0x122   : > { %v767_v56 = vmul.f32 1.442695, %v766_v55 }
 0x124   : > { %1065 = vpow2.f32 %v767_v56 }
 0x12e   : > { %v1066_v57 = vpop.eup %1065 }
 0x12f   : > { %v769_v58 = vadd.f32 1.0, %v1066_v57 }
 0x131   : > { %1067 = vrcp.f32 %v769_v58 }
 0x13b   : > { %v1068_v59 = vpop.eup %1067 }
 0x13c   : > { %772 = vst [vmem:[%s1218_s6] sm:$0xff] %v1068_v59 }
 0x13d PF: > { %s16_s23 = sadd.s32 1, %s1091_s23   ;;  %s1219_s21 = smov %s1087_s22 }
 0x13e   : > { %p13_p8 = scmp.ge.s32.totalorder %s16_s23, 4   ;;  %s1220_s22 = smov %s1222_s2 }
 0x140   :  { %15 = sbr.rel (!%p13_p8) target bundleno = 2 (0x2), region = 97 }

</bundles_post_ra>
